<compile_context>
chip_gen: v7x
topology: tpu7x:2x2x1
jax: 0.10.0
libtpu: 0.0.40
codegen_flags: <defaults>
</compile_context>

<pallas_src>
import functools

import jax
import jax.numpy as jnp
from jax.experimental import pallas as pl
from jax.experimental.pallas import tpu as pltpu

NEG_SLOPE = 0.1          # LeakyReLU negative_slope
BN_EPS = 1e-5
STRIDES = (1, 2, 1, 1)   # conv strides of the four head convs
VMEM_LIMIT = 48 * 1024 * 1024   # < 64 MiB physical on v7x; plenty on v5e/v6e


def _pick_tile(n, candidates):
    for c in candidates:
        if c <= n and n % c == 0:
            return c
    return n


# ---------------------------------------------------------------------------
# Pallas kernels
# ---------------------------------------------------------------------------
def _conv_bn_lrelu_kernel(x_ref, w_ref, bias_ref, o_ref,
                          *, stride, Ho, Wo, Hs, Cin):
    """Fused 3x3 conv (BN scale pre-folded into weights) + bias + LeakyReLU.

    Grid: (Cout tiles, batch).  The weight block index depends only on the
    Cout tile, so Pallas keeps the weight tile resident across consecutive
    batch steps (weights are streamed from HBM exactly once per conv).  All
    nine taps are accumulated in-kernel in f32 and the tile is written once —
    no grid reduction axis, no accumulator scratch, no init/finalize.

    x_ref:    (1, P*Hs, Ws, Cin)  P = stride**2 polyphase-packed padded input
    w_ref:    (9*Cin, tn)         BN-scale-folded weights, (ky, kx, Cin)-major
    bias_ref: (1, tn)             beta - mean * gamma / sqrt(var + eps)
    o_ref:    (1, Ho*Wo, tn)
    """
    M = Ho * Wo
    tn = w_ref.shape[1]
    acc = jnp.zeros((M, tn), jnp.float32)
    for ky in range(3):                       # static unroll: 9 MXU dots
        for kx in range(3):
            if stride == 1:
                r0, c0 = ky, kx
            else:
                p = (ky % stride) * stride + (kx % stride)   # polyphase plane
                r0 = p * Hs + ky // stride
                c0 = kx // stride
            tap = ky * 3 + kx
            xt = x_ref[0, pl.ds(r0, Ho), pl.ds(c0, Wo), :].reshape(M, Cin)
            acc = acc + jnp.dot(xt, w_ref[pl.ds(tap * Cin, Cin), :],
                                preferred_element_type=jnp.float32)
    y = acc + bias_ref[...]
    y = jnp.maximum(y, NEG_SLOPE * y)         # LeakyReLU(0.1)
    o_ref[0] = y.astype(o_ref.dtype)


def _linear_kernel(x_ref, w_ref, b_ref, o_ref, acc_ref, *, leaky):
    """Tiled Linear (+ optional LeakyReLU); K-reduction over grid axis 1."""
    k = pl.program_id(1)

    @pl.when(k == 0)
    def _init():
        acc_ref[...] = jnp.zeros_like(acc_ref)

    acc_ref[...] += jnp.dot(x_ref[...], w_ref[...],
                            preferred_element_type=jnp.float32)

    @pl.when(k == pl.num_programs(1) - 1)
    def _finalize():
        y = acc_ref[...] + b_ref[...]
        if leaky:
            y = jnp.maximum(y, NEG_SLOPE * y)
        o_ref[...] = y.astype(o_ref.dtype)


# ---------------------------------------------------------------------------
# Wrappers (padding / polyphase pack / weight relayout stay in plain JAX)
# ---------------------------------------------------------------------------
def conv3x3_bn_lrelu(x_nhwc, w_oihw, bn_scale, bn_bias, stride):
    N, H, W, Cin = x_nhwc.shape
    Cout = w_oihw.shape[0]
    Ho = (H + 2 - 3) // stride + 1
    Wo = (W + 2 - 3) // stride + 1
    M = Ho * Wo
    # TODO(synk): at real YOLO spatial sizes (14x14 -> M=196, 7x7 -> M=49), pad
    # M up to a multiple of 8 for sublane-dense stores; test sizes are dense.
    assert M % 8 == 0, "pad M to a multiple of 8 for ragged spatial sizes"

    # zero padding=1, plus (never-read) extra rows/cols so Hp, Wp % stride == 0
    ph = (-(H + 2)) % stride
    pw = (-(W + 2)) % stride
    x_pad = jnp.pad(x_nhwc.astype(jnp.bfloat16),
                    ((0, 0), (1, 1 + ph), (1, 1 + pw), (0, 0)))
    Hp, Wp = H + 2 + ph, W + 2 + pw
    Hs, Ws = Hp // stride, Wp // stride
    # in-kernel slice bounds (stride-2 polyphase) must stay inside the block
    assert Ho + 2 // stride <= Hs and Wo + 2 // stride <= Ws
    if stride == 1:
        x_ph = x_pad
    else:
        # polyphase pack (same total bytes, no im2col blow-up):
        # x_ph[n, (a*stride+b)*Hs + i, j, c] == x_pad[n, stride*i+a, stride*j+b, c]
        x_ph = x_pad.reshape(N, Hs, stride, Ws, stride, Cin)
        x_ph = jnp.transpose(x_ph, (0, 2, 4, 1, 3, 5))
        x_ph = x_ph.reshape(N, stride * stride * Hs, Ws, Cin)

    # torch (Cout, Cin, 3, 3) -> (ky, kx, Cin, Cout); fold BN scale into the
    # weights (per Cout channel) so the kernel epilogue is only bias + LReLU.
    w = jnp.transpose(w_oihw, (2, 3, 1, 0)) * bn_scale
    w = w.reshape(9 * Cin, Cout).astype(jnp.bfloat16)
    bias = bn_bias.reshape(1, Cout).astype(jnp.float32)

    tn = _pick_tile(Cout, (512, 256, 128))    # 512 feeds v6e/v7x MXU at Cout=1024
    P = stride * stride
    grid = (Cout // tn, N)                    # batch innermost -> weight reuse

    kern = functools.partial(_conv_bn_lrelu_kernel, stride=stride,
                             Ho=Ho, Wo=Wo, Hs=Hs, Cin=Cin)
    flops = 2 * N * M * 9 * Cin * Cout
    # weights stream once; activation re-read once per Cout tile
    bytes_accessed = (w.size + x_ph.size * (Cout // tn) + N * M * Cout) * 2 \
        + bias.size * 4

    out = pl.pallas_call(
        kern,
        out_shape=jax.ShapeDtypeStruct((N, M, Cout), jnp.bfloat16),
        grid=grid,
        in_specs=[
            pl.BlockSpec((1, P * Hs, Ws, Cin), lambda j, n: (n, 0, 0, 0)),
            pl.BlockSpec((9 * Cin, tn), lambda j, n: (0, j)),  # j-only -> 1x HBM
            pl.BlockSpec((1, tn), lambda j, n: (0, j)),
        ],
        out_specs=pl.BlockSpec((1, M, tn), lambda j, n: (n, 0, j)),
        compiler_params=pltpu.CompilerParams(
            dimension_semantics=("parallel", "arbitrary"),
            vmem_limit_bytes=VMEM_LIMIT),
        cost_estimate=pl.CostEstimate(flops=flops, transcendentals=0,
                                      bytes_accessed=bytes_accessed),
    )(x_ph, w, bias)
    return out.reshape(N, Ho, Wo, Cout)


def linear(x, w_t, b, *, leaky, out_dtype):
    """x: (N, Fin); w_t: (Fin, Fout) (torch weight already transposed)."""
    Nb, Fin = x.shape
    Fout = w_t.shape[1]
    # Pad Fout to a lane-dense multiple of 128 (avoids masked vst); slice back.
    Fp = ((Fout + 127) // 128) * 128
    if Fp != Fout:
        w_t = jnp.pad(w_t, ((0, 0), (0, Fp - Fout)))
        b = jnp.pad(b, (0, Fp - Fout))
    xb = x.astype(jnp.bfloat16)
    wb = w_t.astype(jnp.bfloat16)
    bb = b.reshape(1, Fp).astype(jnp.float32)

    # Nb is tiny -> the FCs are pure weight streaming: use the biggest tiles
    # that divide evenly so the ~0.35 us/step overhead amortizes over big DMAs.
    # TODO(synk): fp8 (v7x) / int8 (v5e/v6e) weight quantization would ~halve
    # the weight stream but changes numerics vs the PyTorch module; not done.
    tk = _pick_tile(Fin, (2048, 1024, 512, 256, 128))
    tn = _pick_tile(Fp, (2048, 1024, 512, 256, 128))
    grid = (Fp // tn, Fin // tk)
    out_bytes = Nb * Fp * jnp.dtype(out_dtype).itemsize

    out = pl.pallas_call(
        functools.partial(_linear_kernel, leaky=leaky),
        out_shape=jax.ShapeDtypeStruct((Nb, Fp), out_dtype),
        grid=grid,
        in_specs=[
            pl.BlockSpec((Nb, tk), lambda j, k: (0, k)),
            pl.BlockSpec((tk, tn), lambda j, k: (k, j)),
            pl.BlockSpec((1, tn), lambda j, k: (0, j)),
        ],
        out_specs=pl.BlockSpec((Nb, tn), lambda j, k: (0, j)),
        scratch_shapes=[pltpu.VMEM((Nb, tn), jnp.float32)],
        compiler_params=pltpu.CompilerParams(
            dimension_semantics=("parallel", "arbitrary"),
            vmem_limit_bytes=VMEM_LIMIT),
        cost_estimate=pl.CostEstimate(
            flops=2 * Nb * Fin * Fp, transcendentals=0,
            bytes_accessed=(xb.size + wb.size) * 2 + bb.size * 4 + out_bytes),
    )(xb, wb, bb)
    return out[:, :Fout] if Fp != Fout else out


# ---------------------------------------------------------------------------
# Parameters (deterministic, synthetic) and full forward
# ---------------------------------------------------------------------------
def init_params(key, cc, conv_out_hw, hidden, out_dim):
    Hc = Wc = conv_out_hw
    flat_dim = cc * Hc * Wc
    ks = jax.random.split(key, 24)
    p = {}
    idx = 0
    for i in range(4):
        kw, kg, kb, km, kv = ks[idx:idx + 5]
        idx += 5
        w = jax.random.normal(kw, (cc, cc, 3, 3), jnp.float32) * 0.02
        gamma = 1.0 + 0.1 * jax.random.normal(kg, (cc,), jnp.float32)
        beta = 0.1 * jax.random.normal(kb, (cc,), jnp.float32)
        mean = 0.05 * jax.random.normal(km, (cc,), jnp.float32)
        var = jnp.abs(0.2 * jax.random.normal(kv, (cc,), jnp.float32)) + 1.0
        scale = gamma / jnp.sqrt(var + BN_EPS)      # folded eval-mode BN
        bias = beta - mean * scale
        p[f"conv{i}"] = dict(w=w, scale=scale, bias=bias)
    k1, k2, k3, k4 = ks[idx:idx + 4]
    # fc1_w rows are in the PyTorch NCHW-flatten order (c, h, w)
    p["fc1_w"] = jax.random.normal(k1, (flat_dim, hidden), jnp.float32) * 0.02
    p["fc1_b"] = 0.01 * jax.random.normal(k2, (hidden,), jnp.float32)
    p["fc2_w"] = jax.random.normal(k3, (hidden, out_dim), jnp.float32) * 0.02
    p["fc2_b"] = 0.01 * jax.random.normal(k4, (out_dim,), jnp.float32)
    # Fold the NCHW->NHWC flatten permutation into fc1's rows once at init so
    # the forward pass can reshape the NHWC conv output directly (no transpose).
    p["fc1_w_nhwc"] = (p["fc1_w"].reshape(cc, Hc, Wc, hidden)
                       .transpose(1, 2, 0, 3).reshape(flat_dim, hidden))
    return p


@jax.jit
def yolo_forward(x_nchw, params):
    # NCHW (PyTorch) -> NHWC (kernel layout), bf16 intermediates
    x = jnp.transpose(x_nchw, (0, 2, 3, 1)).astype(jnp.bfloat16)
    for i, s in enumerate(STRIDES):
        c = params[f"conv{i}"]
        x = conv3x3_bn_lrelu(x, c["w"], c["scale"], c["bias"], s)
    # NHWC flatten; the NCHW permutation is folded into fc1_w_nhwc's rows.
    n = x.shape[0]
    x = x.reshape(n, -1)
    x = linear(x, params["fc1_w_nhwc"], params["fc1_b"],
               leaky=True, out_dtype=jnp.bfloat16)
    # Dropout(0.5): eval mode -> identity
    x = linear(x, params["fc2_w"], params["fc2_b"],
               leaky=False, out_dtype=jnp.float32)
    return x


@jax.jit
def yolo_reference(x_nchw, params):
    """Pure-JAX reference with identical bf16 casts (correctness check)."""
    x = jnp.transpose(x_nchw, (0, 2, 3, 1)).astype(jnp.bfloat16)
    for i, s in enumerate(STRIDES):
        c = params[f"conv{i}"]
        # same BN-scale-into-weights fold as the kernel wrapper
        w_hwio = (jnp.transpose(c["w"], (2, 3, 1, 0)) * c["scale"]).astype(jnp.bfloat16)
        y = jax.lax.conv_general_dilated(
            x, w_hwio, window_strides=(s, s), padding=((1, 1), (1, 1)),
            dimension_numbers=("NHWC", "HWIO", "NHWC"),
            preferred_element_type=jnp.float32)
        y = y + c["bias"]
        y = jnp.maximum(y, NEG_SLOPE * y)
        x = y.astype(jnp.bfloat16)
    # PyTorch-style NCHW flatten with the original fc1_w row order
    n = x.shape[0]
    x = jnp.transpose(x, (0, 3, 1, 2)).reshape(n, -1)
    h = jnp.dot(x, params["fc1_w"].astype(jnp.bfloat16),
                preferred_element_type=jnp.float32) + params["fc1_b"]
    h = jnp.maximum(h, NEG_SLOPE * h).astype(jnp.bfloat16)
    out = jnp.dot(h, params["fc2_w"].astype(jnp.bfloat16),
                  preferred_element_type=jnp.float32) + params["fc2_b"]
    return out


if __name__ == "__main__":
    S, B, C = 7, 2, 20
    out_dim = S * S * (B * 5 + C)            # 1470
    batch, cc, hw = 2, 128, 16               # scaled-down channels / feature map
    # spatial: 16 -(s1)-> 16 -(s2)-> 8 -(s1)-> 8 -(s1)-> 8
    conv_out_hw = 8
    hidden = 256                              # scaled-down 4096

    key = jax.random.PRNGKey(0)
    kx, kp = jax.random.split(key)
    x = jax.random.normal(kx, (batch, cc, hw, hw), jnp.float32)   # NCHW input
    params = init_params(kp, cc, conv_out_hw, hidden, out_dim)

    out = jax.block_until_ready(yolo_forward(x, params))
    assert out.shape == (batch, out_dim), out.shape
    assert bool(jnp.all(jnp.isfinite(out)))

    ref = jax.block_until_ready(yolo_reference(x, params))
    max_err = float(jnp.max(jnp.abs(out - ref)))
    assert max_err < 2e-2, f"mismatch vs reference: {max_err}"

    print("KERNEL_OK")
</pallas_src>

<mosaic_0001>
module attributes {stable_mosaic.version = 11 : i64} {
  func.func @_conv_bn_lrelu_kernel(%arg0: i32, %arg1: i32, %arg2: memref<1x18x18x128xbf16, #tpu.memory_space<vmem>>, %arg3: memref<1152x128xbf16, #tpu.memory_space<vmem>>, %arg4: memref<1x128xf32, #tpu.memory_space<vmem>>, %arg5: memref<1x256x128xbf16, #tpu.memory_space<vmem>>) attributes {dimension_semantics = [#tpu.dimension_semantics<parallel>, #tpu.dimension_semantics<arbitrary>], iteration_bounds = array<i64: 1, 2>, scalar_prefetch = 0 : i64, scratch_operands = 0 : i64, tpu.core_type = #tpu.core_type<tc>, window_params = [{transform_indices = @transform_0, window_bounds = array<i64: 1, 18, 18, 128>}, {transform_indices = @transform_1, window_bounds = array<i64: 1152, 128>}, {transform_indices = @transform_2, window_bounds = array<i64: 1, 128>}, {transform_indices = @transform_3, window_bounds = array<i64: 1, 256, 128>}]} {
    %cst = arith.constant 0.000000e+00 : f32
    %0 = vector.broadcast %cst : f32 to vector<256x128xf32>
    %c0 = arith.constant 0 : index
    %c0_0 = arith.constant 0 : index
    %c0_1 = arith.constant 0 : index
    %c0_2 = arith.constant 0 : index
    %1 = vector.load %arg2[%c0, %c0_0, %c0_1, %c0_2] : memref<1x18x18x128xbf16, #tpu.memory_space<vmem>>, vector<1x16x16x128xbf16>
    %2 = vector.shape_cast %1 : vector<1x16x16x128xbf16> to vector<16x16x128xbf16>
    %3 = vector.shape_cast %2 : vector<16x16x128xbf16> to vector<256x128xbf16>
    %c0_3 = arith.constant 0 : index
    %c0_4 = arith.constant 0 : index
    %4 = vector.load %arg3[%c0_3, %c0_4] : memref<1152x128xbf16, #tpu.memory_space<vmem>>, vector<128x128xbf16>
    %cst_5 = arith.constant dense<0.000000e+00> : vector<256x128xf32>
    %5 = tpu.matmul %3, %4, %cst_5 {dimension_numbers = #tpu.dot_dimension_numbers<[1], [0], [0], [1], [0, 0, 1, 1], [], []>} : vector<256x128xbf16>, vector<128x128xbf16>, vector<256x128xf32> -> vector<256x128xf32>
    %6 = arith.addf %0, %5 : vector<256x128xf32>
    %c0_6 = arith.constant 0 : index
    %c0_7 = arith.constant 0 : index
    %c1 = arith.constant 1 : index
    %c0_8 = arith.constant 0 : index
    %7 = vector.load %arg2[%c0_6, %c0_7, %c1, %c0_8] : memref<1x18x18x128xbf16, #tpu.memory_space<vmem>>, vector<1x16x16x128xbf16>
    %8 = vector.shape_cast %7 : vector<1x16x16x128xbf16> to vector<16x16x128xbf16>
    %9 = vector.shape_cast %8 : vector<16x16x128xbf16> to vector<256x128xbf16>
    %c128 = arith.constant 128 : index
    %c0_9 = arith.constant 0 : index
    %10 = vector.load %arg3[%c128, %c0_9] : memref<1152x128xbf16, #tpu.memory_space<vmem>>, vector<128x128xbf16>
    %cst_10 = arith.constant dense<0.000000e+00> : vector<256x128xf32>
    %11 = tpu.matmul %9, %10, %cst_10 {dimension_numbers = #tpu.dot_dimension_numbers<[1], [0], [0], [1], [0, 0, 1, 1], [], []>} : vector<256x128xbf16>, vector<128x128xbf16>, vector<256x128xf32> -> vector<256x128xf32>
    %12 = arith.addf %6, %11 : vector<256x128xf32>
    %c0_11 = arith.constant 0 : index
    %c0_12 = arith.constant 0 : index
    %c2 = arith.constant 2 : index
    %c0_13 = arith.constant 0 : index
    %13 = vector.load %arg2[%c0_11, %c0_12, %c2, %c0_13] : memref<1x18x18x128xbf16, #tpu.memory_space<vmem>>, vector<1x16x16x128xbf16>
    %14 = vector.shape_cast %13 : vector<1x16x16x128xbf16> to vector<16x16x128xbf16>
    %15 = vector.shape_cast %14 : vector<16x16x128xbf16> to vector<256x128xbf16>
    %c256 = arith.constant 256 : index
    %c0_14 = arith.constant 0 : index
    %16 = vector.load %arg3[%c256, %c0_14] : memref<1152x128xbf16, #tpu.memory_space<vmem>>, vector<128x128xbf16>
    %cst_15 = arith.constant dense<0.000000e+00> : vector<256x128xf32>
    %17 = tpu.matmul %15, %16, %cst_15 {dimension_numbers = #tpu.dot_dimension_numbers<[1], [0], [0], [1], [0, 0, 1, 1], [], []>} : vector<256x128xbf16>, vector<128x128xbf16>, vector<256x128xf32> -> vector<256x128xf32>
    %18 = arith.addf %12, %17 : vector<256x128xf32>
    %c0_16 = arith.constant 0 : index
    %c1_17 = arith.constant 1 : index
    %c0_18 = arith.constant 0 : index
    %c0_19 = arith.constant 0 : index
    %19 = vector.load %arg2[%c0_16, %c1_17, %c0_18, %c0_19] : memref<1x18x18x128xbf16, #tpu.memory_space<vmem>>, vector<1x16x16x128xbf16>
    %20 = vector.shape_cast %19 : vector<1x16x16x128xbf16> to vector<16x16x128xbf16>
    %21 = vector.shape_cast %20 : vector<16x16x128xbf16> to vector<256x128xbf16>
    %c384 = arith.constant 384 : index
    %c0_20 = arith.constant 0 : index
    %22 = vector.load %arg3[%c384, %c0_20] : memref<1152x128xbf16, #tpu.memory_space<vmem>>, vector<128x128xbf16>
    %cst_21 = arith.constant dense<0.000000e+00> : vector<256x128xf32>
    %23 = tpu.matmul %21, %22, %cst_21 {dimension_numbers = #tpu.dot_dimension_numbers<[1], [0], [0], [1], [0, 0, 1, 1], [], []>} : vector<256x128xbf16>, vector<128x128xbf16>, vector<256x128xf32> -> vector<256x128xf32>
    %24 = arith.addf %18, %23 : vector<256x128xf32>
    %c0_22 = arith.constant 0 : index
    %c1_23 = arith.constant 1 : index
    %c1_24 = arith.constant 1 : index
    %c0_25 = arith.constant 0 : index
    %25 = vector.load %arg2[%c0_22, %c1_23, %c1_24, %c0_25] : memref<1x18x18x128xbf16, #tpu.memory_space<vmem>>, vector<1x16x16x128xbf16>
    %26 = vector.shape_cast %25 : vector<1x16x16x128xbf16> to vector<16x16x128xbf16>
    %27 = vector.shape_cast %26 : vector<16x16x128xbf16> to vector<256x128xbf16>
    %c512 = arith.constant 512 : index
    %c0_26 = arith.constant 0 : index
    %28 = vector.load %arg3[%c512, %c0_26] : memref<1152x128xbf16, #tpu.memory_space<vmem>>, vector<128x128xbf16>
    %cst_27 = arith.constant dense<0.000000e+00> : vector<256x128xf32>
    %29 = tpu.matmul %27, %28, %cst_27 {dimension_numbers = #tpu.dot_dimension_numbers<[1], [0], [0], [1], [0, 0, 1, 1], [], []>} : vector<256x128xbf16>, vector<128x128xbf16>, vector<256x128xf32> -> vector<256x128xf32>
    %30 = arith.addf %24, %29 : vector<256x128xf32>
    %c0_28 = arith.constant 0 : index
    %c1_29 = arith.constant 1 : index
    %c2_30 = arith.constant 2 : index
    %c0_31 = arith.constant 0 : index
    %31 = vector.load %arg2[%c0_28, %c1_29, %c2_30, %c0_31] : memref<1x18x18x128xbf16, #tpu.memory_space<vmem>>, vector<1x16x16x128xbf16>
    %32 = vector.shape_cast %31 : vector<1x16x16x128xbf16> to vector<16x16x128xbf16>
    %33 = vector.shape_cast %32 : vector<16x16x128xbf16> to vector<256x128xbf16>
    %c640 = arith.constant 640 : index
    %c0_32 = arith.constant 0 : index
    %34 = vector.load %arg3[%c640, %c0_32] : memref<1152x128xbf16, #tpu.memory_space<vmem>>, vector<128x128xbf16>
    %cst_33 = arith.constant dense<0.000000e+00> : vector<256x128xf32>
    %35 = tpu.matmul %33, %34, %cst_33 {dimension_numbers = #tpu.dot_dimension_numbers<[1], [0], [0], [1], [0, 0, 1, 1], [], []>} : vector<256x128xbf16>, vector<128x128xbf16>, vector<256x128xf32> -> vector<256x128xf32>
    %36 = arith.addf %30, %35 : vector<256x128xf32>
    %c0_34 = arith.constant 0 : index
    %c2_35 = arith.constant 2 : index
    %c0_36 = arith.constant 0 : index
    %c0_37 = arith.constant 0 : index
    %37 = vector.load %arg2[%c0_34, %c2_35, %c0_36, %c0_37] : memref<1x18x18x128xbf16, #tpu.memory_space<vmem>>, vector<1x16x16x128xbf16>
    %38 = vector.shape_cast %37 : vector<1x16x16x128xbf16> to vector<16x16x128xbf16>
    %39 = vector.shape_cast %38 : vector<16x16x128xbf16> to vector<256x128xbf16>
    %c768 = arith.constant 768 : index
    %c0_38 = arith.constant 0 : index
    %40 = vector.load %arg3[%c768, %c0_38] : memref<1152x128xbf16, #tpu.memory_space<vmem>>, vector<128x128xbf16>
    %cst_39 = arith.constant dense<0.000000e+00> : vector<256x128xf32>
    %41 = tpu.matmul %39, %40, %cst_39 {dimension_numbers = #tpu.dot_dimension_numbers<[1], [0], [0], [1], [0, 0, 1, 1], [], []>} : vector<256x128xbf16>, vector<128x128xbf16>, vector<256x128xf32> -> vector<256x128xf32>
    %42 = arith.addf %36, %41 : vector<256x128xf32>
    %c0_40 = arith.constant 0 : index
    %c2_41 = arith.constant 2 : index
    %c1_42 = arith.constant 1 : index
    %c0_43 = arith.constant 0 : index
    %43 = vector.load %arg2[%c0_40, %c2_41, %c1_42, %c0_43] : memref<1x18x18x128xbf16, #tpu.memory_space<vmem>>, vector<1x16x16x128xbf16>
    %44 = vector.shape_cast %43 : vector<1x16x16x128xbf16> to vector<16x16x128xbf16>
    %45 = vector.shape_cast %44 : vector<16x16x128xbf16> to vector<256x128xbf16>
    %c896 = arith.constant 896 : index
    %c0_44 = arith.constant 0 : index
    %46 = vector.load %arg3[%c896, %c0_44] : memref<1152x128xbf16, #tpu.memory_space<vmem>>, vector<128x128xbf16>
    %cst_45 = arith.constant dense<0.000000e+00> : vector<256x128xf32>
    %47 = tpu.matmul %45, %46, %cst_45 {dimension_numbers = #tpu.dot_dimension_numbers<[1], [0], [0], [1], [0, 0, 1, 1], [], []>} : vector<256x128xbf16>, vector<128x128xbf16>, vector<256x128xf32> -> vector<256x128xf32>
    %48 = arith.addf %42, %47 : vector<256x128xf32>
    %c0_46 = arith.constant 0 : index
    %c2_47 = arith.constant 2 : index
    %c2_48 = arith.constant 2 : index
    %c0_49 = arith.constant 0 : index
    %49 = vector.load %arg2[%c0_46, %c2_47, %c2_48, %c0_49] : memref<1x18x18x128xbf16, #tpu.memory_space<vmem>>, vector<1x16x16x128xbf16>
    %50 = vector.shape_cast %49 : vector<1x16x16x128xbf16> to vector<16x16x128xbf16>
    %51 = vector.shape_cast %50 : vector<16x16x128xbf16> to vector<256x128xbf16>
    %c1024 = arith.constant 1024 : index
    %c0_50 = arith.constant 0 : index
    %52 = vector.load %arg3[%c1024, %c0_50] : memref<1152x128xbf16, #tpu.memory_space<vmem>>, vector<128x128xbf16>
    %cst_51 = arith.constant dense<0.000000e+00> : vector<256x128xf32>
    %53 = tpu.matmul %51, %52, %cst_51 {dimension_numbers = #tpu.dot_dimension_numbers<[1], [0], [0], [1], [0, 0, 1, 1], [], []>} : vector<256x128xbf16>, vector<128x128xbf16>, vector<256x128xf32> -> vector<256x128xf32>
    %54 = arith.addf %48, %53 : vector<256x128xf32>
    %c0_52 = arith.constant 0 : index
    %c0_53 = arith.constant 0 : index
    %55 = vector.load %arg4[%c0_52, %c0_53] : memref<1x128xf32, #tpu.memory_space<vmem>>, vector<1x128xf32>
    %56 = vector.broadcast %55 : vector<1x128xf32> to vector<256x128xf32>
    %57 = arith.addf %54, %56 : vector<256x128xf32>
    %cst_54 = arith.constant 1.000000e-01 : f32
    %58 = vector.broadcast %cst_54 : f32 to vector<256x128xf32>
    %59 = arith.mulf %58, %57 : vector<256x128xf32>
    %60 = arith.maximumf %57, %59 : vector<256x128xf32>
    %61 = arith.truncf %60 : vector<256x128xf32> to vector<256x128xbf16>
    %c0_55 = arith.constant 0 : index
    %c0_56 = arith.constant 0 : index
    %c0_57 = arith.constant 0 : index
    %62 = vector.load %arg5[%c0_55, %c0_56, %c0_57] : memref<1x256x128xbf16, #tpu.memory_space<vmem>>, vector<1x256x128xbf16>
    %63 = vector.shape_cast %62 : vector<1x256x128xbf16> to vector<256x128xbf16>
    %64 = vector.shape_cast %61 : vector<256x128xbf16> to vector<1x256x128xbf16>
    tpu.vector_store %arg5[%c0_55, %c0_56, %c0_57], %64 {strides = array<i32>} : memref<1x256x128xbf16, #tpu.memory_space<vmem>>, vector<1x256x128xbf16>,
    return
  }
  func.func @transform_0(%arg0: i32, %arg1: i32) -> (i32, i32, i32, i32) {
    %c0_i32 = arith.constant 0 : i32
    %c0_i32_0 = arith.constant 0 : i32
    %c0_i32_1 = arith.constant 0 : i32
    %c0_i32_2 = arith.constant 0 : i32
    return %arg1, %c0_i32, %c0_i32_0, %c0_i32_1 : i32, i32, i32, i32
  }
  func.func @transform_1(%arg0: i32, %arg1: i32) -> (i32, i32) {
    %c0_i32 = arith.constant 0 : i32
    %c0_i32_0 = arith.constant 0 : i32
    return %c0_i32, %arg0 : i32, i32
  }
  func.func @transform_2(%arg0: i32, %arg1: i32) -> (i32, i32) {
    %c0_i32 = arith.constant 0 : i32
    %c0_i32_0 = arith.constant 0 : i32
    return %c0_i32, %arg0 : i32, i32
  }
  func.func @transform_3(%arg0: i32, %arg1: i32) -> (i32, i32, i32) {
    %c0_i32 = arith.constant 0 : i32
    %c0_i32_0 = arith.constant 0 : i32
    return %arg1, %c0_i32, %arg0 : i32, i32, i32
  }
}

module attributes {stable_mosaic.version = 11 : i64} {
  func.func @_conv_bn_lrelu_kernel(%arg0: i32, %arg1: i32, %arg2: memref<1x36x9x128xbf16, #tpu.memory_space<vmem>>, %arg3: memref<1152x128xbf16, #tpu.memory_space<vmem>>, %arg4: memref<1x128xf32, #tpu.memory_space<vmem>>, %arg5: memref<1x64x128xbf16, #tpu.memory_space<vmem>>) attributes {dimension_semantics = [#tpu.dimension_semantics<parallel>, #tpu.dimension_semantics<arbitrary>], iteration_bounds = array<i64: 1, 2>, scalar_prefetch = 0 : i64, scratch_operands = 0 : i64, tpu.core_type = #tpu.core_type<tc>, window_params = [{transform_indices = @transform_0, window_bounds = array<i64: 1, 36, 9, 128>}, {transform_indices = @transform_1, window_bounds = array<i64: 1152, 128>}, {transform_indices = @transform_2, window_bounds = array<i64: 1, 128>}, {transform_indices = @transform_3, window_bounds = array<i64: 1, 64, 128>}]} {
    %cst = arith.constant 0.000000e+00 : f32
    %0 = vector.broadcast %cst : f32 to vector<64x128xf32>
    %c0 = arith.constant 0 : index
    %c0_0 = arith.constant 0 : index
    %c0_1 = arith.constant 0 : index
    %c0_2 = arith.constant 0 : index
    %1 = vector.load %arg2[%c0, %c0_0, %c0_1, %c0_2] : memref<1x36x9x128xbf16, #tpu.memory_space<vmem>>, vector<1x8x8x128xbf16>
    %2 = vector.shape_cast %1 : vector<1x8x8x128xbf16> to vector<8x8x128xbf16>
    %3 = vector.shape_cast %2 : vector<8x8x128xbf16> to vector<64x128xbf16>
    %c0_3 = arith.constant 0 : index
    %c0_4 = arith.constant 0 : index
    %4 = vector.load %arg3[%c0_3, %c0_4] : memref<1152x128xbf16, #tpu.memory_space<vmem>>, vector<128x128xbf16>
    %cst_5 = arith.constant dense<0.000000e+00> : vector<64x128xf32>
    %5 = tpu.matmul %3, %4, %cst_5 {dimension_numbers = #tpu.dot_dimension_numbers<[1], [0], [0], [1], [0, 0, 1, 1], [], []>} : vector<64x128xbf16>, vector<128x128xbf16>, vector<64x128xf32> -> vector<64x128xf32>
    %6 = arith.addf %0, %5 : vector<64x128xf32>
    %c0_6 = arith.constant 0 : index
    %c9 = arith.constant 9 : index
    %c0_7 = arith.constant 0 : index
    %c0_8 = arith.constant 0 : index
    %7 = vector.load %arg2[%c0_6, %c9, %c0_7, %c0_8] : memref<1x36x9x128xbf16, #tpu.memory_space<vmem>>, vector<1x8x8x128xbf16>
    %8 = vector.shape_cast %7 : vector<1x8x8x128xbf16> to vector<8x8x128xbf16>
    %9 = vector.shape_cast %8 : vector<8x8x128xbf16> to vector<64x128xbf16>
    %c128 = arith.constant 128 : index
    %c0_9 = arith.constant 0 : index
    %10 = vector.load %arg3[%c128, %c0_9] : memref<1152x128xbf16, #tpu.memory_space<vmem>>, vector<128x128xbf16>
    %cst_10 = arith.constant dense<0.000000e+00> : vector<64x128xf32>
    %11 = tpu.matmul %9, %10, %cst_10 {dimension_numbers = #tpu.dot_dimension_numbers<[1], [0], [0], [1], [0, 0, 1, 1], [], []>} : vector<64x128xbf16>, vector<128x128xbf16>, vector<64x128xf32> -> vector<64x128xf32>
    %12 = arith.addf %6, %11 : vector<64x128xf32>
    %c0_11 = arith.constant 0 : index
    %c0_12 = arith.constant 0 : index
    %c1 = arith.constant 1 : index
    %c0_13 = arith.constant 0 : index
    %13 = vector.load %arg2[%c0_11, %c0_12, %c1, %c0_13] : memref<1x36x9x128xbf16, #tpu.memory_space<vmem>>, vector<1x8x8x128xbf16>
    %14 = vector.shape_cast %13 : vector<1x8x8x128xbf16> to vector<8x8x128xbf16>
    %15 = vector.shape_cast %14 : vector<8x8x128xbf16> to vector<64x128xbf16>
    %c256 = arith.constant 256 : index
    %c0_14 = arith.constant 0 : index
    %16 = vector.load %arg3[%c256, %c0_14] : memref<1152x128xbf16, #tpu.memory_space<vmem>>, vector<128x128xbf16>
    %cst_15 = arith.constant dense<0.000000e+00> : vector<64x128xf32>
    %17 = tpu.matmul %15, %16, %cst_15 {dimension_numbers = #tpu.dot_dimension_numbers<[1], [0], [0], [1], [0, 0, 1, 1], [], []>} : vector<64x128xbf16>, vector<128x128xbf16>, vector<64x128xf32> -> vector<64x128xf32>
    %18 = arith.addf %12, %17 : vector<64x128xf32>
    %c0_16 = arith.constant 0 : index
    %c18 = arith.constant 18 : index
    %c0_17 = arith.constant 0 : index
    %c0_18 = arith.constant 0 : index
    %19 = vector.load %arg2[%c0_16, %c18, %c0_17, %c0_18] : memref<1x36x9x128xbf16, #tpu.memory_space<vmem>>, vector<1x8x8x128xbf16>
    %20 = vector.shape_cast %19 : vector<1x8x8x128xbf16> to vector<8x8x128xbf16>
    %21 = vector.shape_cast %20 : vector<8x8x128xbf16> to vector<64x128xbf16>
    %c384 = arith.constant 384 : index
    %c0_19 = arith.constant 0 : index
    %22 = vector.load %arg3[%c384, %c0_19] : memref<1152x128xbf16, #tpu.memory_space<vmem>>, vector<128x128xbf16>
    %cst_20 = arith.constant dense<0.000000e+00> : vector<64x128xf32>
    %23 = tpu.matmul %21, %22, %cst_20 {dimension_numbers = #tpu.dot_dimension_numbers<[1], [0], [0], [1], [0, 0, 1, 1], [], []>} : vector<64x128xbf16>, vector<128x128xbf16>, vector<64x128xf32> -> vector<64x128xf32>
    %24 = arith.addf %18, %23 : vector<64x128xf32>
    %c0_21 = arith.constant 0 : index
    %c27 = arith.constant 27 : index
    %c0_22 = arith.constant 0 : index
    %c0_23 = arith.constant 0 : index
    %25 = vector.load %arg2[%c0_21, %c27, %c0_22, %c0_23] : memref<1x36x9x128xbf16, #tpu.memory_space<vmem>>, vector<1x8x8x128xbf16>
    %26 = vector.shape_cast %25 : vector<1x8x8x128xbf16> to vector<8x8x128xbf16>
    %27 = vector.shape_cast %26 : vector<8x8x128xbf16> to vector<64x128xbf16>
    %c512 = arith.constant 512 : index
    %c0_24 = arith.constant 0 : index
    %28 = vector.load %arg3[%c512, %c0_24] : memref<1152x128xbf16, #tpu.memory_space<vmem>>, vector<128x128xbf16>
    %cst_25 = arith.constant dense<0.000000e+00> : vector<64x128xf32>
    %29 = tpu.matmul %27, %28, %cst_25 {dimension_numbers = #tpu.dot_dimension_numbers<[1], [0], [0], [1], [0, 0, 1, 1], [], []>} : vector<64x128xbf16>, vector<128x128xbf16>, vector<64x128xf32> -> vector<64x128xf32>
    %30 = arith.addf %24, %29 : vector<64x128xf32>
    %c0_26 = arith.constant 0 : index
    %c18_27 = arith.constant 18 : index
    %c1_28 = arith.constant 1 : index
    %c0_29 = arith.constant 0 : index
    %31 = vector.load %arg2[%c0_26, %c18_27, %c1_28, %c0_29] : memref<1x36x9x128xbf16, #tpu.memory_space<vmem>>, vector<1x8x8x128xbf16>
    %32 = vector.shape_cast %31 : vector<1x8x8x128xbf16> to vector<8x8x128xbf16>
    %33 = vector.shape_cast %32 : vector<8x8x128xbf16> to vector<64x128xbf16>
    %c640 = arith.constant 640 : index
    %c0_30 = arith.constant 0 : index
    %34 = vector.load %arg3[%c640, %c0_30] : memref<1152x128xbf16, #tpu.memory_space<vmem>>, vector<128x128xbf16>
    %cst_31 = arith.constant dense<0.000000e+00> : vector<64x128xf32>
    %35 = tpu.matmul %33, %34, %cst_31 {dimension_numbers = #tpu.dot_dimension_numbers<[1], [0], [0], [1], [0, 0, 1, 1], [], []>} : vector<64x128xbf16>, vector<128x128xbf16>, vector<64x128xf32> -> vector<64x128xf32>
    %36 = arith.addf %30, %35 : vector<64x128xf32>
    %c0_32 = arith.constant 0 : index
    %c1_33 = arith.constant 1 : index
    %c0_34 = arith.constant 0 : index
    %c0_35 = arith.constant 0 : index
    %37 = vector.load %arg2[%c0_32, %c1_33, %c0_34, %c0_35] : memref<1x36x9x128xbf16, #tpu.memory_space<vmem>>, vector<1x8x8x128xbf16>
    %38 = vector.shape_cast %37 : vector<1x8x8x128xbf16> to vector<8x8x128xbf16>
    %39 = vector.shape_cast %38 : vector<8x8x128xbf16> to vector<64x128xbf16>
    %c768 = arith.constant 768 : index
    %c0_36 = arith.constant 0 : index
    %40 = vector.load %arg3[%c768, %c0_36] : memref<1152x128xbf16, #tpu.memory_space<vmem>>, vector<128x128xbf16>
    %cst_37 = arith.constant dense<0.000000e+00> : vector<64x128xf32>
    %41 = tpu.matmul %39, %40, %cst_37 {dimension_numbers = #tpu.dot_dimension_numbers<[1], [0], [0], [1], [0, 0, 1, 1], [], []>} : vector<64x128xbf16>, vector<128x128xbf16>, vector<64x128xf32> -> vector<64x128xf32>
    %42 = arith.addf %36, %41 : vector<64x128xf32>
    %c0_38 = arith.constant 0 : index
    %c10 = arith.constant 10 : index
    %c0_39 = arith.constant 0 : index
    %c0_40 = arith.constant 0 : index
    %43 = vector.load %arg2[%c0_38, %c10, %c0_39, %c0_40] : memref<1x36x9x128xbf16, #tpu.memory_space<vmem>>, vector<1x8x8x128xbf16>
    %44 = vector.shape_cast %43 : vector<1x8x8x128xbf16> to vector<8x8x128xbf16>
    %45 = vector.shape_cast %44 : vector<8x8x128xbf16> to vector<64x128xbf16>
    %c896 = arith.constant 896 : index
    %c0_41 = arith.constant 0 : index
    %46 = vector.load %arg3[%c896, %c0_41] : memref<1152x128xbf16, #tpu.memory_space<vmem>>, vector<128x128xbf16>
    %cst_42 = arith.constant dense<0.000000e+00> : vector<64x128xf32>
    %47 = tpu.matmul %45, %46, %cst_42 {dimension_numbers = #tpu.dot_dimension_numbers<[1], [0], [0], [1], [0, 0, 1, 1], [], []>} : vector<64x128xbf16>, vector<128x128xbf16>, vector<64x128xf32> -> vector<64x128xf32>
    %48 = arith.addf %42, %47 : vector<64x128xf32>
    %c0_43 = arith.constant 0 : index
    %c1_44 = arith.constant 1 : index
    %c1_45 = arith.constant 1 : index
    %c0_46 = arith.constant 0 : index
    %49 = vector.load %arg2[%c0_43, %c1_44, %c1_45, %c0_46] : memref<1x36x9x128xbf16, #tpu.memory_space<vmem>>, vector<1x8x8x128xbf16>
    %50 = vector.shape_cast %49 : vector<1x8x8x128xbf16> to vector<8x8x128xbf16>
    %51 = vector.shape_cast %50 : vector<8x8x128xbf16> to vector<64x128xbf16>
    %c1024 = arith.constant 1024 : index
    %c0_47 = arith.constant 0 : index
    %52 = vector.load %arg3[%c1024, %c0_47] : memref<1152x128xbf16, #tpu.memory_space<vmem>>, vector<128x128xbf16>
    %cst_48 = arith.constant dense<0.000000e+00> : vector<64x128xf32>
    %53 = tpu.matmul %51, %52, %cst_48 {dimension_numbers = #tpu.dot_dimension_numbers<[1], [0], [0], [1], [0, 0, 1, 1], [], []>} : vector<64x128xbf16>, vector<128x128xbf16>, vector<64x128xf32> -> vector<64x128xf32>
    %54 = arith.addf %48, %53 : vector<64x128xf32>
    %c0_49 = arith.constant 0 : index
    %c0_50 = arith.constant 0 : index
    %55 = vector.load %arg4[%c0_49, %c0_50] : memref<1x128xf32, #tpu.memory_space<vmem>>, vector<1x128xf32>
    %56 = vector.broadcast %55 : vector<1x128xf32> to vector<64x128xf32>
    %57 = arith.addf %54, %56 : vector<64x128xf32>
    %cst_51 = arith.constant 1.000000e-01 : f32
    %58 = vector.broadcast %cst_51 : f32 to vector<64x128xf32>
    %59 = arith.mulf %58, %57 : vector<64x128xf32>
    %60 = arith.maximumf %57, %59 : vector<64x128xf32>
    %61 = arith.truncf %60 : vector<64x128xf32> to vector<64x128xbf16>
    %c0_52 = arith.constant 0 : index
    %c0_53 = arith.constant 0 : index
    %c0_54 = arith.constant 0 : index
    %62 = vector.load %arg5[%c0_52, %c0_53, %c0_54] : memref<1x64x128xbf16, #tpu.memory_space<vmem>>, vector<1x64x128xbf16>
    %63 = vector.shape_cast %62 : vector<1x64x128xbf16> to vector<64x128xbf16>
    %64 = vector.shape_cast %61 : vector<64x128xbf16> to vector<1x64x128xbf16>
    tpu.vector_store %arg5[%c0_52, %c0_53, %c0_54], %64 {strides = array<i32>} : memref<1x64x128xbf16, #tpu.memory_space<vmem>>, vector<1x64x128xbf16>,
    return
  }
  func.func @transform_0(%arg0: i32, %arg1: i32) -> (i32, i32, i32, i32) {
    %c0_i32 = arith.constant 0 : i32
    %c0_i32_0 = arith.constant 0 : i32
    %c0_i32_1 = arith.constant 0 : i32
    %c0_i32_2 = arith.constant 0 : i32
    return %arg1, %c0_i32, %c0_i32_0, %c0_i32_1 : i32, i32, i32, i32
  }
  func.func @transform_1(%arg0: i32, %arg1: i32) -> (i32, i32) {
    %c0_i32 = arith.constant 0 : i32
    %c0_i32_0 = arith.constant 0 : i32
    return %c0_i32, %arg0 : i32, i32
  }
  func.func @transform_2(%arg0: i32, %arg1: i32) -> (i32, i32) {
    %c0_i32 = arith.constant 0 : i32
    %c0_i32_0 = arith.constant 0 : i32
    return %c0_i32, %arg0 : i32, i32
  }
  func.func @transform_3(%arg0: i32, %arg1: i32) -> (i32, i32, i32) {
    %c0_i32 = arith.constant 0 : i32
    %c0_i32_0 = arith.constant 0 : i32
    return %arg1, %c0_i32, %arg0 : i32, i32, i32
  }
}

module attributes {stable_mosaic.version = 11 : i64} {
  func.func @_conv_bn_lrelu_kernel(%arg0: i32, %arg1: i32, %arg2: memref<1x10x10x128xbf16, #tpu.memory_space<vmem>>, %arg3: memref<1152x128xbf16, #tpu.memory_space<vmem>>, %arg4: memref<1x128xf32, #tpu.memory_space<vmem>>, %arg5: memref<1x64x128xbf16, #tpu.memory_space<vmem>>) attributes {dimension_semantics = [#tpu.dimension_semantics<parallel>, #tpu.dimension_semantics<arbitrary>], iteration_bounds = array<i64: 1, 2>, scalar_prefetch = 0 : i64, scratch_operands = 0 : i64, tpu.core_type = #tpu.core_type<tc>, window_params = [{transform_indices = @transform_0, window_bounds = array<i64: 1, 10, 10, 128>}, {transform_indices = @transform_1, window_bounds = array<i64: 1152, 128>}, {transform_indices = @transform_2, window_bounds = array<i64: 1, 128>}, {transform_indices = @transform_3, window_bounds = array<i64: 1, 64, 128>}]} {
    %cst = arith.constant 0.000000e+00 : f32
    %0 = vector.broadcast %cst : f32 to vector<64x128xf32>
    %c0 = arith.constant 0 : index
    %c0_0 = arith.constant 0 : index
    %c0_1 = arith.constant 0 : index
    %c0_2 = arith.constant 0 : index
    %1 = vector.load %arg2[%c0, %c0_0, %c0_1, %c0_2] : memref<1x10x10x128xbf16, #tpu.memory_space<vmem>>, vector<1x8x8x128xbf16>
    %2 = vector.shape_cast %1 : vector<1x8x8x128xbf16> to vector<8x8x128xbf16>
    %3 = vector.shape_cast %2 : vector<8x8x128xbf16> to vector<64x128xbf16>
    %c0_3 = arith.constant 0 : index
    %c0_4 = arith.constant 0 : index
    %4 = vector.load %arg3[%c0_3, %c0_4] : memref<1152x128xbf16, #tpu.memory_space<vmem>>, vector<128x128xbf16>
    %cst_5 = arith.constant dense<0.000000e+00> : vector<64x128xf32>
    %5 = tpu.matmul %3, %4, %cst_5 {dimension_numbers = #tpu.dot_dimension_numbers<[1], [0], [0], [1], [0, 0, 1, 1], [], []>} : vector<64x128xbf16>, vector<128x128xbf16>, vector<64x128xf32> -> vector<64x128xf32>
    %6 = arith.addf %0, %5 : vector<64x128xf32>
    %c0_6 = arith.constant 0 : index
    %c0_7 = arith.constant 0 : index
    %c1 = arith.constant 1 : index
    %c0_8 = arith.constant 0 : index
    %7 = vector.load %arg2[%c0_6, %c0_7, %c1, %c0_8] : memref<1x10x10x128xbf16, #tpu.memory_space<vmem>>, vector<1x8x8x128xbf16>
    %8 = vector.shape_cast %7 : vector<1x8x8x128xbf16> to vector<8x8x128xbf16>
    %9 = vector.shape_cast %8 : vector<8x8x128xbf16> to vector<64x128xbf16>
    %c128 = arith.constant 128 : index
    %c0_9 = arith.constant 0 : index
    %10 = vector.load %arg3[%c128, %c0_9] : memref<1152x128xbf16, #tpu.memory_space<vmem>>, vector<128x128xbf16>
    %cst_10 = arith.constant dense<0.000000e+00> : vector<64x128xf32>
    %11 = tpu.matmul %9, %10, %cst_10 {dimension_numbers = #tpu.dot_dimension_numbers<[1], [0], [0], [1], [0, 0, 1, 1], [], []>} : vector<64x128xbf16>, vector<128x128xbf16>, vector<64x128xf32> -> vector<64x128xf32>
    %12 = arith.addf %6, %11 : vector<64x128xf32>
    %c0_11 = arith.constant 0 : index
    %c0_12 = arith.constant 0 : index
    %c2 = arith.constant 2 : index
    %c0_13 = arith.constant 0 : index
    %13 = vector.load %arg2[%c0_11, %c0_12, %c2, %c0_13] : memref<1x10x10x128xbf16, #tpu.memory_space<vmem>>, vector<1x8x8x128xbf16>
    %14 = vector.shape_cast %13 : vector<1x8x8x128xbf16> to vector<8x8x128xbf16>
    %15 = vector.shape_cast %14 : vector<8x8x128xbf16> to vector<64x128xbf16>
    %c256 = arith.constant 256 : index
    %c0_14 = arith.constant 0 : index
    %16 = vector.load %arg3[%c256, %c0_14] : memref<1152x128xbf16, #tpu.memory_space<vmem>>, vector<128x128xbf16>
    %cst_15 = arith.constant dense<0.000000e+00> : vector<64x128xf32>
    %17 = tpu.matmul %15, %16, %cst_15 {dimension_numbers = #tpu.dot_dimension_numbers<[1], [0], [0], [1], [0, 0, 1, 1], [], []>} : vector<64x128xbf16>, vector<128x128xbf16>, vector<64x128xf32> -> vector<64x128xf32>
    %18 = arith.addf %12, %17 : vector<64x128xf32>
    %c0_16 = arith.constant 0 : index
    %c1_17 = arith.constant 1 : index
    %c0_18 = arith.constant 0 : index
    %c0_19 = arith.constant 0 : index
    %19 = vector.load %arg2[%c0_16, %c1_17, %c0_18, %c0_19] : memref<1x10x10x128xbf16, #tpu.memory_space<vmem>>, vector<1x8x8x128xbf16>
    %20 = vector.shape_cast %19 : vector<1x8x8x128xbf16> to vector<8x8x128xbf16>
    %21 = vector.shape_cast %20 : vector<8x8x128xbf16> to vector<64x128xbf16>
    %c384 = arith.constant 384 : index
    %c0_20 = arith.constant 0 : index
    %22 = vector.load %arg3[%c384, %c0_20] : memref<1152x128xbf16, #tpu.memory_space<vmem>>, vector<128x128xbf16>
    %cst_21 = arith.constant dense<0.000000e+00> : vector<64x128xf32>
    %23 = tpu.matmul %21, %22, %cst_21 {dimension_numbers = #tpu.dot_dimension_numbers<[1], [0], [0], [1], [0, 0, 1, 1], [], []>} : vector<64x128xbf16>, vector<128x128xbf16>, vector<64x128xf32> -> vector<64x128xf32>
    %24 = arith.addf %18, %23 : vector<64x128xf32>
    %c0_22 = arith.constant 0 : index
    %c1_23 = arith.constant 1 : index
    %c1_24 = arith.constant 1 : index
    %c0_25 = arith.constant 0 : index
    %25 = vector.load %arg2[%c0_22, %c1_23, %c1_24, %c0_25] : memref<1x10x10x128xbf16, #tpu.memory_space<vmem>>, vector<1x8x8x128xbf16>
    %26 = vector.shape_cast %25 : vector<1x8x8x128xbf16> to vector<8x8x128xbf16>
    %27 = vector.shape_cast %26 : vector<8x8x128xbf16> to vector<64x128xbf16>
    %c512 = arith.constant 512 : index
    %c0_26 = arith.constant 0 : index
    %28 = vector.load %arg3[%c512, %c0_26] : memref<1152x128xbf16, #tpu.memory_space<vmem>>, vector<128x128xbf16>
    %cst_27 = arith.constant dense<0.000000e+00> : vector<64x128xf32>
    %29 = tpu.matmul %27, %28, %cst_27 {dimension_numbers = #tpu.dot_dimension_numbers<[1], [0], [0], [1], [0, 0, 1, 1], [], []>} : vector<64x128xbf16>, vector<128x128xbf16>, vector<64x128xf32> -> vector<64x128xf32>
    %30 = arith.addf %24, %29 : vector<64x128xf32>
    %c0_28 = arith.constant 0 : index
    %c1_29 = arith.constant 1 : index
    %c2_30 = arith.constant 2 : index
    %c0_31 = arith.constant 0 : index
    %31 = vector.load %arg2[%c0_28, %c1_29, %c2_30, %c0_31] : memref<1x10x10x128xbf16, #tpu.memory_space<vmem>>, vector<1x8x8x128xbf16>
    %32 = vector.shape_cast %31 : vector<1x8x8x128xbf16> to vector<8x8x128xbf16>
    %33 = vector.shape_cast %32 : vector<8x8x128xbf16> to vector<64x128xbf16>
    %c640 = arith.constant 640 : index
    %c0_32 = arith.constant 0 : index
    %34 = vector.load %arg3[%c640, %c0_32] : memref<1152x128xbf16, #tpu.memory_space<vmem>>, vector<128x128xbf16>
    %cst_33 = arith.constant dense<0.000000e+00> : vector<64x128xf32>
    %35 = tpu.matmul %33, %34, %cst_33 {dimension_numbers = #tpu.dot_dimension_numbers<[1], [0], [0], [1], [0, 0, 1, 1], [], []>} : vector<64x128xbf16>, vector<128x128xbf16>, vector<64x128xf32> -> vector<64x128xf32>
    %36 = arith.addf %30, %35 : vector<64x128xf32>
    %c0_34 = arith.constant 0 : index
    %c2_35 = arith.constant 2 : index
    %c0_36 = arith.constant 0 : index
    %c0_37 = arith.constant 0 : index
    %37 = vector.load %arg2[%c0_34, %c2_35, %c0_36, %c0_37] : memref<1x10x10x128xbf16, #tpu.memory_space<vmem>>, vector<1x8x8x128xbf16>
    %38 = vector.shape_cast %37 : vector<1x8x8x128xbf16> to vector<8x8x128xbf16>
    %39 = vector.shape_cast %38 : vector<8x8x128xbf16> to vector<64x128xbf16>
    %c768 = arith.constant 768 : index
    %c0_38 = arith.constant 0 : index
    %40 = vector.load %arg3[%c768, %c0_38] : memref<1152x128xbf16, #tpu.memory_space<vmem>>, vector<128x128xbf16>
    %cst_39 = arith.constant dense<0.000000e+00> : vector<64x128xf32>
    %41 = tpu.matmul %39, %40, %cst_39 {dimension_numbers = #tpu.dot_dimension_numbers<[1], [0], [0], [1], [0, 0, 1, 1], [], []>} : vector<64x128xbf16>, vector<128x128xbf16>, vector<64x128xf32> -> vector<64x128xf32>
    %42 = arith.addf %36, %41 : vector<64x128xf32>
    %c0_40 = arith.constant 0 : index
    %c2_41 = arith.constant 2 : index
    %c1_42 = arith.constant 1 : index
    %c0_43 = arith.constant 0 : index
    %43 = vector.load %arg2[%c0_40, %c2_41, %c1_42, %c0_43] : memref<1x10x10x128xbf16, #tpu.memory_space<vmem>>, vector<1x8x8x128xbf16>
    %44 = vector.shape_cast %43 : vector<1x8x8x128xbf16> to vector<8x8x128xbf16>
    %45 = vector.shape_cast %44 : vector<8x8x128xbf16> to vector<64x128xbf16>
    %c896 = arith.constant 896 : index
    %c0_44 = arith.constant 0 : index
    %46 = vector.load %arg3[%c896, %c0_44] : memref<1152x128xbf16, #tpu.memory_space<vmem>>, vector<128x128xbf16>
    %cst_45 = arith.constant dense<0.000000e+00> : vector<64x128xf32>
    %47 = tpu.matmul %45, %46, %cst_45 {dimension_numbers = #tpu.dot_dimension_numbers<[1], [0], [0], [1], [0, 0, 1, 1], [], []>} : vector<64x128xbf16>, vector<128x128xbf16>, vector<64x128xf32> -> vector<64x128xf32>
    %48 = arith.addf %42, %47 : vector<64x128xf32>
    %c0_46 = arith.constant 0 : index
    %c2_47 = arith.constant 2 : index
    %c2_48 = arith.constant 2 : index
    %c0_49 = arith.constant 0 : index
    %49 = vector.load %arg2[%c0_46, %c2_47, %c2_48, %c0_49] : memref<1x10x10x128xbf16, #tpu.memory_space<vmem>>, vector<1x8x8x128xbf16>
    %50 = vector.shape_cast %49 : vector<1x8x8x128xbf16> to vector<8x8x128xbf16>
    %51 = vector.shape_cast %50 : vector<8x8x128xbf16> to vector<64x128xbf16>
    %c1024 = arith.constant 1024 : index
    %c0_50 = arith.constant 0 : index
    %52 = vector.load %arg3[%c1024, %c0_50] : memref<1152x128xbf16, #tpu.memory_space<vmem>>, vector<128x128xbf16>
    %cst_51 = arith.constant dense<0.000000e+00> : vector<64x128xf32>
    %53 = tpu.matmul %51, %52, %cst_51 {dimension_numbers = #tpu.dot_dimension_numbers<[1], [0], [0], [1], [0, 0, 1, 1], [], []>} : vector<64x128xbf16>, vector<128x128xbf16>, vector<64x128xf32> -> vector<64x128xf32>
    %54 = arith.addf %48, %53 : vector<64x128xf32>
    %c0_52 = arith.constant 0 : index
    %c0_53 = arith.constant 0 : index
    %55 = vector.load %arg4[%c0_52, %c0_53] : memref<1x128xf32, #tpu.memory_space<vmem>>, vector<1x128xf32>
    %56 = vector.broadcast %55 : vector<1x128xf32> to vector<64x128xf32>
    %57 = arith.addf %54, %56 : vector<64x128xf32>
    %cst_54 = arith.constant 1.000000e-01 : f32
    %58 = vector.broadcast %cst_54 : f32 to vector<64x128xf32>
    %59 = arith.mulf %58, %57 : vector<64x128xf32>
    %60 = arith.maximumf %57, %59 : vector<64x128xf32>
    %61 = arith.truncf %60 : vector<64x128xf32> to vector<64x128xbf16>
    %c0_55 = arith.constant 0 : index
    %c0_56 = arith.constant 0 : index
    %c0_57 = arith.constant 0 : index
    %62 = vector.load %arg5[%c0_55, %c0_56, %c0_57] : memref<1x64x128xbf16, #tpu.memory_space<vmem>>, vector<1x64x128xbf16>
    %63 = vector.shape_cast %62 : vector<1x64x128xbf16> to vector<64x128xbf16>
    %64 = vector.shape_cast %61 : vector<64x128xbf16> to vector<1x64x128xbf16>
    tpu.vector_store %arg5[%c0_55, %c0_56, %c0_57], %64 {strides = array<i32>} : memref<1x64x128xbf16, #tpu.memory_space<vmem>>, vector<1x64x128xbf16>,
    return
  }
  func.func @transform_0(%arg0: i32, %arg1: i32) -> (i32, i32, i32, i32) {
    %c0_i32 = arith.constant 0 : i32
    %c0_i32_0 = arith.constant 0 : i32
    %c0_i32_1 = arith.constant 0 : i32
    %c0_i32_2 = arith.constant 0 : i32
    return %arg1, %c0_i32, %c0_i32_0, %c0_i32_1 : i32, i32, i32, i32
  }
  func.func @transform_1(%arg0: i32, %arg1: i32) -> (i32, i32) {
    %c0_i32 = arith.constant 0 : i32
    %c0_i32_0 = arith.constant 0 : i32
    return %c0_i32, %arg0 : i32, i32
  }
  func.func @transform_2(%arg0: i32, %arg1: i32) -> (i32, i32) {
    %c0_i32 = arith.constant 0 : i32
    %c0_i32_0 = arith.constant 0 : i32
    return %c0_i32, %arg0 : i32, i32
  }
  func.func @transform_3(%arg0: i32, %arg1: i32) -> (i32, i32, i32) {
    %c0_i32 = arith.constant 0 : i32
    %c0_i32_0 = arith.constant 0 : i32
    return %arg1, %c0_i32, %arg0 : i32, i32, i32
  }
}

module attributes {stable_mosaic.version = 11 : i64} {
  func.func @_linear_kernel(%arg0: i32, %arg1: i32, %arg2: memref<2x2048xbf16, #tpu.memory_space<vmem>>, %arg3: memref<2048x256xbf16, #tpu.memory_space<vmem>>, %arg4: memref<1x256xf32, #tpu.memory_space<vmem>>, %arg5: memref<2x256xbf16, #tpu.memory_space<vmem>>, %arg6: memref<2x256xf32, #tpu.memory_space<vmem>>) attributes {dimension_semantics = [#tpu.dimension_semantics<parallel>, #tpu.dimension_semantics<arbitrary>], iteration_bounds = array<i64: 1, 4>, scalar_prefetch = 0 : i64, scratch_operands = 1 : i64, tpu.core_type = #tpu.core_type<tc>, window_params = [{transform_indices = @transform_0, window_bounds = array<i64: 2, 2048>}, {transform_indices = @transform_1, window_bounds = array<i64: 2048, 256>}, {transform_indices = @transform_2, window_bounds = array<i64: 1, 256>}, {transform_indices = @transform_3, window_bounds = array<i64: 2, 256>}]} {
    %c0_i32 = arith.constant 0 : i32
    %0 = arith.cmpi eq, %arg1, %c0_i32 : i32
    %1 = arith.extui %0 : i1 to i32
    %c0_i32_0 = arith.constant 0 : i32
    %2 = arith.cmpi ne, %1, %c0_i32_0 : i32
    scf.if %2 {
      %cst_9 = arith.constant 0.000000e+00 : f32
      %12 = vector.broadcast %cst_9 : f32 to vector<2x256xf32>
      %c0_10 = arith.constant 0 : index
      %c0_11 = arith.constant 0 : index
      %13 = vector.load %arg6[%c0_10, %c0_11] : memref<2x256xf32, #tpu.memory_space<vmem>>, vector<2x256xf32>
      tpu.vector_store %arg6[%c0_10, %c0_11], %12 {strides = array<i32>} : memref<2x256xf32, #tpu.memory_space<vmem>>, vector<2x256xf32>,
    } else {
    }
    %c0 = arith.constant 0 : index
    %c0_1 = arith.constant 0 : index
    %3 = vector.load %arg6[%c0, %c0_1] : memref<2x256xf32, #tpu.memory_space<vmem>>, vector<2x256xf32>
    %c0_2 = arith.constant 0 : index
    %c0_3 = arith.constant 0 : index
    %4 = vector.load %arg2[%c0_2, %c0_3] : memref<2x2048xbf16, #tpu.memory_space<vmem>>, vector<2x2048xbf16>
    %c0_4 = arith.constant 0 : index
    %c0_5 = arith.constant 0 : index
    %5 = vector.load %arg3[%c0_4, %c0_5] : memref<2048x256xbf16, #tpu.memory_space<vmem>>, vector<2048x256xbf16>
    %cst = arith.constant dense<0.000000e+00> : vector<2x256xf32>
    %6 = tpu.matmul %4, %5, %cst {dimension_numbers = #tpu.dot_dimension_numbers<[1], [0], [0], [1], [0, 0, 1, 1], [], []>} : vector<2x2048xbf16>, vector<2048x256xbf16>, vector<2x256xf32> -> vector<2x256xf32>
    %7 = arith.addf %3, %6 : vector<2x256xf32>
    %c0_6 = arith.constant 0 : index
    %c0_7 = arith.constant 0 : index
    %8 = vector.load %arg6[%c0_6, %c0_7] : memref<2x256xf32, #tpu.memory_space<vmem>>, vector<2x256xf32>
    tpu.vector_store %arg6[%c0_6, %c0_7], %7 {strides = array<i32>} : memref<2x256xf32, #tpu.memory_space<vmem>>, vector<2x256xf32>,
    %c3_i32 = arith.constant 3 : i32
    %9 = arith.cmpi eq, %arg1, %c3_i32 : i32
    %10 = arith.extui %9 : i1 to i32
    %c0_i32_8 = arith.constant 0 : i32
    %11 = arith.cmpi ne, %10, %c0_i32_8 : i32
    scf.if %11 {
      %c0_9 = arith.constant 0 : index
      %c0_10 = arith.constant 0 : index
      %12 = vector.load %arg6[%c0_9, %c0_10] : memref<2x256xf32, #tpu.memory_space<vmem>>, vector<2x256xf32>
      %c0_11 = arith.constant 0 : index
      %c0_12 = arith.constant 0 : index
      %13 = vector.load %arg4[%c0_11, %c0_12] : memref<1x256xf32, #tpu.memory_space<vmem>>, vector<1x256xf32>
      %14 = vector.broadcast %13 : vector<1x256xf32> to vector<2x256xf32>
      %15 = arith.addf %12, %14 : vector<2x256xf32>
      %cst_13 = arith.constant 1.000000e-01 : f32
      %16 = vector.broadcast %cst_13 : f32 to vector<2x256xf32>
      %17 = arith.mulf %16, %15 : vector<2x256xf32>
      %18 = arith.maximumf %15, %17 : vector<2x256xf32>
      %19 = arith.truncf %18 : vector<2x256xf32> to vector<2x256xbf16>
      %c0_14 = arith.constant 0 : index
      %c0_15 = arith.constant 0 : index
      %20 = vector.load %arg5[%c0_14, %c0_15] : memref<2x256xbf16, #tpu.memory_space<vmem>>, vector<2x256xbf16>
      tpu.vector_store %arg5[%c0_14, %c0_15], %19 {strides = array<i32>} : memref<2x256xbf16, #tpu.memory_space<vmem>>, vector<2x256xbf16>,
    } else {
    }
    return
  }
  func.func @transform_0(%arg0: i32, %arg1: i32) -> (i32, i32) {
    %c0_i32 = arith.constant 0 : i32
    %c0_i32_0 = arith.constant 0 : i32
    return %c0_i32, %arg1 : i32, i32
  }
  func.func @transform_1(%arg0: i32, %arg1: i32) -> (i32, i32) {
    %c0_i32 = arith.constant 0 : i32
    return %arg1, %arg0 : i32, i32
  }
  func.func @transform_2(%arg0: i32, %arg1: i32) -> (i32, i32) {
    %c0_i32 = arith.constant 0 : i32
    %c0_i32_0 = arith.constant 0 : i32
    return %c0_i32, %arg0 : i32, i32
  }
  func.func @transform_3(%arg0: i32, %arg1: i32) -> (i32, i32) {
    %c0_i32 = arith.constant 0 : i32
    %c0_i32_0 = arith.constant 0 : i32
    return %c0_i32, %arg0 : i32, i32
  }
}

module attributes {stable_mosaic.version = 11 : i64} {
  func.func @_linear_kernel(%arg0: i32, %arg1: i32, %arg2: memref<2x256xbf16, #tpu.memory_space<vmem>>, %arg3: memref<256x512xbf16, #tpu.memory_space<vmem>>, %arg4: memref<1x512xf32, #tpu.memory_space<vmem>>, %arg5: memref<2x512xf32, #tpu.memory_space<vmem>>, %arg6: memref<2x512xf32, #tpu.memory_space<vmem>>) attributes {dimension_semantics = [#tpu.dimension_semantics<parallel>, #tpu.dimension_semantics<arbitrary>], iteration_bounds = array<i64: 3, 1>, scalar_prefetch = 0 : i64, scratch_operands = 1 : i64, tpu.core_type = #tpu.core_type<tc>, window_params = [{transform_indices = @transform_0, window_bounds = array<i64: 2, 256>}, {transform_indices = @transform_1, window_bounds = array<i64: 256, 512>}, {transform_indices = @transform_2, window_bounds = array<i64: 1, 512>}, {transform_indices = @transform_3, window_bounds = array<i64: 2, 512>}]} {
    %c0_i32 = arith.constant 0 : i32
    %0 = arith.cmpi eq, %arg1, %c0_i32 : i32
    %1 = arith.extui %0 : i1 to i32
    %c0_i32_0 = arith.constant 0 : i32
    %2 = arith.cmpi ne, %1, %c0_i32_0 : i32
    scf.if %2 {
      %cst_10 = arith.constant 0.000000e+00 : f32
      %12 = vector.broadcast %cst_10 : f32 to vector<2x512xf32>
      %c0_11 = arith.constant 0 : index
      %c0_12 = arith.constant 0 : index
      %13 = vector.load %arg6[%c0_11, %c0_12] : memref<2x512xf32, #tpu.memory_space<vmem>>, vector<2x512xf32>
      tpu.vector_store %arg6[%c0_11, %c0_12], %12 {strides = array<i32>} : memref<2x512xf32, #tpu.memory_space<vmem>>, vector<2x512xf32>,
    } else {
    }
    %c0 = arith.constant 0 : index
    %c0_1 = arith.constant 0 : index
    %3 = vector.load %arg6[%c0, %c0_1] : memref<2x512xf32, #tpu.memory_space<vmem>>, vector<2x512xf32>
    %c0_2 = arith.constant 0 : index
    %c0_3 = arith.constant 0 : index
    %4 = vector.load %arg2[%c0_2, %c0_3] : memref<2x256xbf16, #tpu.memory_space<vmem>>, vector<2x256xbf16>
    %c0_4 = arith.constant 0 : index
    %c0_5 = arith.constant 0 : index
    %5 = vector.load %arg3[%c0_4, %c0_5] : memref<256x512xbf16, #tpu.memory_space<vmem>>, vector<256x512xbf16>
    %cst = arith.constant dense<0.000000e+00> : vector<2x512xf32>
    %6 = tpu.matmul %4, %5, %cst {dimension_numbers = #tpu.dot_dimension_numbers<[1], [0], [0], [1], [0, 0, 1, 1], [], []>} : vector<2x256xbf16>, vector<256x512xbf16>, vector<2x512xf32> -> vector<2x512xf32>
    %7 = arith.addf %3, %6 : vector<2x512xf32>
    %c0_6 = arith.constant 0 : index
    %c0_7 = arith.constant 0 : index
    %8 = vector.load %arg6[%c0_6, %c0_7] : memref<2x512xf32, #tpu.memory_space<vmem>>, vector<2x512xf32>
    tpu.vector_store %arg6[%c0_6, %c0_7], %7 {strides = array<i32>} : memref<2x512xf32, #tpu.memory_space<vmem>>, vector<2x512xf32>,
    %c0_i32_8 = arith.constant 0 : i32
    %9 = arith.cmpi eq, %arg1, %c0_i32_8 : i32
    %10 = arith.extui %9 : i1 to i32
    %c0_i32_9 = arith.constant 0 : i32
    %11 = arith.cmpi ne, %10, %c0_i32_9 : i32
    scf.if %11 {
      %c0_10 = arith.constant 0 : index
      %c0_11 = arith.constant 0 : index
      %12 = vector.load %arg6[%c0_10, %c0_11] : memref<2x512xf32, #tpu.memory_space<vmem>>, vector<2x512xf32>
      %c0_12 = arith.constant 0 : index
      %c0_13 = arith.constant 0 : index
      %13 = vector.load %arg4[%c0_12, %c0_13] : memref<1x512xf32, #tpu.memory_space<vmem>>, vector<1x512xf32>
      %14 = vector.broadcast %13 : vector<1x512xf32> to vector<2x512xf32>
      %15 = arith.addf %12, %14 : vector<2x512xf32>
      %c0_14 = arith.constant 0 : index
      %c0_15 = arith.constant 0 : index
      %16 = vector.load %arg5[%c0_14, %c0_15] : memref<2x512xf32, #tpu.memory_space<vmem>>, vector<2x512xf32>
      tpu.vector_store %arg5[%c0_14, %c0_15], %15 {strides = array<i32>} : memref<2x512xf32, #tpu.memory_space<vmem>>, vector<2x512xf32>,
    } else {
    }
    return
  }
  func.func @transform_0(%arg0: i32, %arg1: i32) -> (i32, i32) {
    %c0_i32 = arith.constant 0 : i32
    %c0_i32_0 = arith.constant 0 : i32
    return %c0_i32, %arg1 : i32, i32
  }
  func.func @transform_1(%arg0: i32, %arg1: i32) -> (i32, i32) {
    %c0_i32 = arith.constant 0 : i32
    return %arg1, %arg0 : i32, i32
  }
  func.func @transform_2(%arg0: i32, %arg1: i32) -> (i32, i32) {
    %c0_i32 = arith.constant 0 : i32
    %c0_i32_0 = arith.constant 0 : i32
    return %c0_i32, %arg0 : i32, i32
  }
  func.func @transform_3(%arg0: i32, %arg1: i32) -> (i32, i32) {
    %c0_i32 = arith.constant 0 : i32
    %c0_i32_0 = arith.constant 0 : i32
    return %c0_i32, %arg0 : i32, i32
  }
}

</mosaic_0001>

<bundles_post_ra>
// kernel: yolo_forward.7
= control target key start
LH: loop header
LB: loop body
LE: loop exit
PB: predicated region body
PF: predicated region fallthrough
CT: control target
= control target key end

     0   :  { %s3050_s12 = smov 0   ;;  %s3052_s13 = smov 0   ;;  %s3434_s0 = inlined_call_operand.vmem [shape: bf16[2,36,9,128], index: 0, kind: input, shape index: {}]   ;;  %s3435_s1 = inlined_call_operand.vmem [shape: bf16[1152,128], index: 1, kind: input, shape index: {}]   ;;  %s3436_s2 = inlined_call_operand.vmem [shape: f32[1,128], index: 2, kind: input, shape index: {}]   ;;  %s3437_s3 = inlined_call_operand.vmem [shape: bf16[2,64,128], index: 3, kind: output, shape index: {}]  }
   0x1   :  { %s3054_s14 = smov 0  }
   0x2 LB: > { %s22_s15 = sadd.s32 1, %s3024_s13  ;;  %p2254_p0 = scmp.ge.s32.totalorder %s3028_s14, 1  ;;  %s3028_s14 = sphi %s3054_s14, %s13_s14   ;;  %s3024_s13 = sphi %s3052_s13, %s3441_s13   ;;  %s3020_s12 = sphi %s3050_s12, %s3440_s12  }
   0x3   : > { %p23_p1 = scmp.ge.s32.totalorder %s22_s15, 2  ;;  %p168_p2 = scmp.lt.s32.totalorder %s3028_s14, 3 }
   0x5   : > { %s3443_s15 = smov (%p23_p1, %s22_s15), 0  ;;  %p169_p3 = pnand %p2254_p0, %p168_p2 }
   0x6   : > { %v2910_v0 = vld [vmem:[%s3435_s1 + $0x40] sm:$0xff] (!%p169_p3)   ;;  %p202_p4 = scmp.lt.s32.totalorder (!%p169_p3), %s3020_s12, 1  ;;  %v2912_v2 = vld [vmem:[%s3435_s1 + $0x48] sm:$0xff] (!%p169_p3)   ;;  %v2914_v4 = vld [vmem:[%s3435_s1 + $0x50] sm:$0xff] (!%p169_p3)   ;;  %vm562_vm0 = vsmask.f32 (!%p169_p3), 3328 }
   0x7   : > { %172 = sbr.rel (%p169_p3) target bundleno = 394 (0x18a), region = 32  ;;  %v2911_v1 = vld [vmem:[%s3435_s1 + $0x100] sm:$0xff] (!%p169_p3)   ;;  %2589 = vmatprep.subr.bf16.mxu1 (!%p169_p3), %v2910_v0  ;;  %v2913_v3 = vld [vmem:[%s3435_s1 + $0x108] sm:$0xff] (!%p169_p3)   ;;  %v2915_v5 = vld [vmem:[%s3435_s1 + $0x110] sm:$0xff] (!%p169_p3)   ;;  %vm563_vm1 = vsmask.f32 (!%p169_p3), 7440 }
   0x8   : > { %2685 = vmatprep.subr.bf16.mxu0 (!%p169_p3), %v2911_v1  ;;  %2590 = vmatpush3.bf16.msra.mxu1 (!%p169_p3), %v2910_v0  ;;  %v2916_v6 = vld [vmem:[%s3435_s1 + $0x58] sm:$0xff] (!%p169_p3)   ;;  %v2918_v8 = vld [vmem:[%s3435_s1 + $0x60] sm:$0xff] (!%p169_p3)   ;;  %v2920_v10 = vld [vmem:[%s3435_s1 + $0x68] sm:$0xff] (!%p169_p3)  }
   0x9   : > { %2686 = vmatpush3.bf16.msra.mxu0 (!%p169_p3), %v2911_v1  ;;  %2591 = vmatprep.subr.bf16.mxu1 (!%p169_p3), %v2912_v2  ;;  %v2917_v7 = vld [vmem:[%s3435_s1 + $0x118] sm:$0xff] (!%p169_p3)   ;;  %v2919_v9 = vld [vmem:[%s3435_s1 + $0x120] sm:$0xff] (!%p169_p3)   ;;  %v2921_v12 = vld [vmem:[%s3435_s1 + $0x128] sm:$0xff] (!%p169_p3)  }
   0xa   : > { %2687 = vmatprep.subr.bf16.mxu0 (!%p169_p3), %v2913_v3  ;;  %v2922_v14 = vld [vmem:[%s3435_s1 + $0x70] sm:$0xff] (!%p169_p3)   ;;  %v2924_v16 = vld [vmem:[%s3435_s1 + $0x78] sm:$0xff] (!%p169_p3)   ;;  %v2927_v18 = vld [vmem:[%s3435_s1] sm:$0xff] (!%p169_p3)  }
   0xb   : > { %v2923_v15 = vld [vmem:[%s3435_s1 + $0x130] sm:$0xff] (!%p169_p3)   ;;  %v2925_v17 = vld [vmem:[%s3435_s1 + $0x138] sm:$0xff] (!%p169_p3)   ;;  %v2929_v19 = vld [vmem:[%s3435_s1 + $0x140] sm:$0xff] (!%p169_p3)  }
   0xc   : > { %2592 = vmatpush3.bf16.msra.mxu1 (!%p169_p3), %v2912_v2  ;;  %v2932_v22 = vld [vmem:[%s3435_s1 + $0x8] sm:$0xff] (!%p169_p3)   ;;  %v2934_v26 = vld [vmem:[%s3435_s1 + $0x10] sm:$0xff] (!%p169_p3)   ;;  %v2936_v28 = vld [vmem:[%s3435_s1 + $0x18] sm:$0xff] (!%p169_p3)  }
   0xd   : > { %2688 = vmatpush3.bf16.msra.mxu0 (!%p169_p3), %v2913_v3  ;;  %2593 = vmatprep.subr.bf16.mxu1 (!%p169_p3), %v2914_v4  ;;  %v2933_v23 = vld [vmem:[%s3435_s1 + $0x148] sm:$0xff] (!%p169_p3)   ;;  %v2935_v27 = vld [vmem:[%s3435_s1 + $0x150] sm:$0xff] (!%p169_p3)   ;;  %v2937_v31 = vld [vmem:[%s3435_s1 + $0x158] sm:$0xff] (!%p169_p3)  }
   0xe   : > { %s3445_s12 = smov (!%p202_p4, %s3020_s12), 1  ;;  %2689 = vmatprep.subr.bf16.mxu0 %v2915_v5  ;;  %v2938_v38 = vld [vmem:[%s3435_s1 + $0x20] sm:$0xff]   ;;  %v2940_v47 = vld [vmem:[%s3435_s1 + $0x28] sm:$0xff]   ;;  %vm3175_vm2 = vmor %vm562_vm0, %vm563_vm1 }
   0xf   : > { %s2885_s5 = smul.u32 288, %s3445_s12  ;;  %v2939_v43 = vld [vmem:[%s3435_s1 + $0x160] sm:$0xff]   ;;  %v2941_v50 = vld [vmem:[%s3435_s1 + $0x168] sm:$0xff]   ;;  %v2943_v2 = vld [vmem:[%s3435_s1 + $0x30] sm:$0xff]  }
  0x10   : > { %2594 = vmatpush3.bf16.msra.mxu1 %v2914_v4 }
  0x11   : > { %2690 = vmatpush3.bf16.msra.mxu0 %v2915_v5  ;;  %2595 = vmatprep.subr.bf16.mxu1 %v2916_v6  ;;  %s3104_s16 = scalar_lea.vmem %s3434_s0, %s2885_s5  ;;  %s2449_s5 = sshll.u32 %s3445_s12, 5 }
  0x12   : > { %2691 = vmatprep.subr.bf16.mxu0 %v2917_v7  ;;  %v2926_v11 = vld [vmem:[%s3104_s16 + $0x48] ss:$8 sps:$4 sm:$0xff]   ;;  %v2928_v13 = vld [vmem:[%s3104_s16 + $0xd8] ss:$8 sps:$4 sm:$0xff]   ;;  %v2343_v34 = vld [vmem:[%s3104_s16 + $0x94] sm:$0x1]  ;;  %s221_s8 = scalar_lea.vmem %s3437_s3, %s2449_s5 }
  0x13   : > { %2605 = vmatprep.mubr.bf16.mxu1 %v2926_v11  ;;  %2701 = vmatprep.mubr.bf16.mxu0 %v2928_v13  ;;  %v2930_v20 = vld [vmem:[%s3104_s16 + $0x58] ss:$8 sps:$4 sm:$0xff]   ;;  %v2931_v21 = vld [vmem:[%s3104_s16 + $0xe8] ss:$8 sps:$4 sm:$0xff]   ;;  %v2345_v39 = vld [vmem:[%s3104_s16 + $0x9c] sm:$0x1] }
  0x14   : > { %2596 = vmatpush3.bf16.msra.mxu1 %v2916_v6  ;;  %v2942_v24 = vld [vmem:[%s3104_s16 + $0x68] ss:$8 sps:$4 sm:$0xff]   ;;  %v2944_v25 = vld [vmem:[%s3104_s16 + $0xf8] ss:$8 sps:$4 sm:$0xff]   ;;  %v1196_v40 = vshll.u32 %v2343_v34, 16  ;;  %v1210_v46 = vshll.u32 %v2345_v39, 16 }
  0x15   : > { %2692 = vmatpush3.bf16.msra.mxu0 %v2917_v7  ;;  %2597 = vmatprep.subr.bf16.mxu1 %v2918_v8  ;;  %v2946_v29 = vld [vmem:[%s3104_s16 + $0x78] ss:$8 sps:$4 sm:$0xff]   ;;  %v2947_v30 = vld [vmem:[%s3104_s16 + $0x108] ss:$8 sps:$4 sm:$0xff]   ;;  %v2347_v57 = vld [vmem:[%s3104_s16 + $0xa4] sm:$0x1] }
  0x16   : > { %2693 = vmatprep.subr.bf16.mxu0 %v2919_v9  ;;  %v2950_v32 = vld [vmem:[%s3104_s16] ss:$8 sps:$4 sm:$0xff]   ;;  %v2342_v33 = vld [vmem:[%s3104_s16 + $0x90] sm:$0xf]  ;;  %v2344_v35 = vld [vmem:[%s3104_s16 + $0x98] sm:$0xf] }
  0x17   : > { %v1187_v36 = vshrl.u32 %v2342_v33, 16  ;;  %v1190_v37 = vshll.u32 %v2342_v33, 16  ;;  %v1201_v41 = vshrl.u32 %v2344_v35, 16  ;;  %v1204_v42 = vshll.u32 %v2344_v35, 16  ;;  %v2346_v56 = vld [vmem:[%s3104_s16 + $0xa0] sm:$0xf] }
  0x18   : > { %2598 = vmatpush3.bf16.msra.mxu1 %v2918_v8  ;;  %v1198_v52 = vrot.slane %v1196_v40, 5  ;;  %v1212_v55 = vrot.slane %v1210_v46, 5  ;;  %v2348_v59 = vld [vmem:[%s3104_s16 + $0xa8] sm:$0xf]  ;;  %v2349_v60 = vld [vmem:[%s3104_s16 + $0xac] sm:$0x1] }
  0x19   : > { %2694 = vmatpush3.bf16.msra.mxu0 %v2919_v9  ;;  %2599 = vmatprep.subr.bf16.mxu1 %v2920_v10  ;;  %v1189_v44 = vrot.slane %v1187_v36, 4  ;;  %v1192_v45 = vrot.slane %v1190_v37, 5  ;;  %v1203_v48 = vrot.slane %v1201_v41, 4  ;;  %v1206_v49 = vrot.slane %v1204_v42, 5  ;;  %v2945_v6 = vld [vmem:[%s3435_s1 + $0x170] sm:$0xff]  }
  0x1a   : > { %2695 = vmatprep.subr.bf16.mxu0 %v2921_v12  ;;  %v1215_v61 = vshrl.u32 %v2346_v56, 16  ;;  %v1218_v63 = vshll.u32 %v2346_v56, 16  ;;  %v1224_v0 = vshll.u32 %v2347_v57, 16  ;;  %v1229_v1 = vshrl.u32 %v2348_v59, 16  ;;  %v2964_v37 = vld [vmem:[%s3104_s16 + $0x20] ss:$8 sps:$4 sm:$0xff]  }
  0x1b   : > { %v1193_v51 = vor.u32 %v1192_v45, %v1189_v44  ;;  %v1207_v54 = vor.u32 %v1206_v49, %v1203_v48  ;;  %v1232_v5 = vshll.u32 %v2348_v59, 16  ;;  %v2967_v48 = vld [vmem:[%s3104_s16 + $0x30] ss:$8 sps:$4 sm:$0xff]   ;;  %v2354_v49 = vld [vmem:[%s3104_s16 + $0xc0] sm:$0xf] }
  0x1c   : > { %2600 = vmatpush3.bf16.msra.mxu1 %v2920_v10  ;;  %v1217_v4 = vrot.slane %v1215_v61, 4  ;;  %v1220_v8 = vrot.slane %v1218_v63, 5  ;;  %v1231_v9 = vrot.slane %v1229_v1, 4  ;;  %v1238_v10 = vshll.u32 %v2349_v60, 16  ;;  %v2958_v59 = vld [vmem:[%s3435_s1 + $0x98] sm:$0xff]  }
  0x1d   : > { %2696 = vmatpush3.bf16.msra.mxu0 %v2921_v12  ;;  %2601 = vmatprep.subr.bf16.mxu1 %v2922_v14  ;;  %v1194_v58 = vrot.slane %v1193_v51, 4  ;;  %v1208_v62 = vrot.slane %v1207_v54, 4  ;;  %v1226_v12 = vrot.slane %v1224_v0, 5  ;;  %v1234_v13 = vrot.slane %v1232_v5, 5  ;;  %v2356_v51 = vld [vmem:[%s3104_s16 + $0xc8] sm:$0xf] }
  0x1e   : > { %2697 = vmatprep.subr.bf16.mxu0 %v2923_v15  ;;  %v1271_v56 = vshrl.u32 %v2354_v49, 16  ;;  %v1274_v57 = vshll.u32 %v2354_v49, 16  ;;  %v1285_v61 = vshrl.u32 %v2356_v51, 16 }
  0x1f   : > { %v1199_v3 = vsel %vm3175_vm2, %v1194_v58, %v1198_v52  ;;  %v1213_v7 = vsel %vm3175_vm2, %v1208_v62, %v1212_v55  ;;  %v2957_v52 = vld [vmem:[%s3435_s1 + $0x190] sm:$0xff]   ;;  %v2357_v55 = vld [vmem:[%s3104_s16 + $0xcc] sm:$0x1]  ;;  %v1288_v62 = vshll.u32 %v2356_v51, 16 }
  0x20   : > { %2602 = vmatpush3.bf16.msra.mxu1 %v2922_v14  ;;  %v2358_v11 = vcombine.low %v1199_v3, %v1213_v7  ;;  %v2948_v14 = vld [vmem:[%s3435_s1 + $0x38] sm:$0xff]   ;;  %v1294_v63 = vshll.u32 %v2357_v55, 16  ;;  %v1273_v1 = vrot.slane %v1271_v56, 4 }
  0x21   : > { %2698 = vmatpush3.bf16.msra.mxu0 %v2923_v15  ;;  %2603 = vmatprep.subr.bf16.mxu1 %v2924_v16  ;;  %v1221_v15 = vor.u32 %v1220_v8, %v1217_v4  ;;  %v2959_v4 = vld [vmem:[%s3435_s1 + $0x198] sm:$0xff]   ;;  %v1290_v7 = vrot.slane %v1288_v62, 5 }
  0x22   : > { %2699 = vmatprep.subr.bf16.mxu0 %v2925_v17  ;;  %v1296_v8 = vrot.slane %v1294_v63, 5 }
  0x24   : > { %2604 = vmatpush3.bf16.msra.mxu1 %v2924_v16  ;;  %v1235_v16 = vor.u32 %v1234_v13, %v1231_v9  ;;  %v2960_v13 = vld [vmem:[%s3435_s1 + $0xa0] sm:$0xff]  }
  0x25   : > { %2700 = vmatpush3.bf16.msra.mxu0 %v2925_v17  ;;  %2613 = vmatprep.subr.bf16.mxu1 %v2927_v18  ;;  %v1222_v17 = vrot.slane %v1221_v15, 4 }
  0x26   : > { %2709 = vmatprep.subr.bf16.mxu0 %v2929_v19 }
  0x27   : > { %2606 = vmatmul.mubr.bf16.vlgmr.msra.gmra.mrb[0].mxu1 %v2930_v20  ;;  %v1236_v20 = vrot.slane %v1235_v16, 4  ;;  %v548_v16 = vld [vmem:[%s3104_s16 + $0x8] sm:$0xf] }
  0x28   : > { %2614 = vmatpush3.bf16.msra.mxu1 %v2927_v18  ;;  %2702 = vmatmul.mubr.bf16.vlgmr.msra.gmra.mrb[0].mxu0 %v2931_v21  ;;  %v1240_v18 = vrot.slane %v1238_v10, 5  ;;  %v2951_v21 = vld [vmem:[%s3435_s1 + $0x80] sm:$0xff]  }
  0x29   : > { %2710 = vmatpush3.bf16.msra.mxu0 %v2929_v19  ;;  %2615 = vmatprep.subr.bf16.mxu1 %v2932_v22  ;;  %v2949_v19 = vld [vmem:[%s3435_s1 + $0x178] sm:$0xff]  }
  0x2a   : > { %2711 = vmatprep.subr.bf16.mxu0 %v2933_v23  ;;  %2609 = vmatprep.mubr.bf16.mxu1 %v2942_v24  ;;  %v2952_v24 = vld [vmem:[%s3435_s1 + $0x180] sm:$0xff]  }
  0x2b   : > { %2705 = vmatprep.mubr.bf16.mxu0 %v2944_v25  ;;  %v2953_v25 = vld [vmem:[%s3104_s16 + $0x10] ss:$8 sps:$4 sm:$0xff]  }
  0x2c   : > { %2616 = vmatpush3.bf16.msra.mxu1 %v2932_v22  ;;  %v1227_v22 = vsel %vm3175_vm2, %v1222_v17, %v1226_v12  ;;  %v547_v12 = vld [vmem:[%s3104_s16 + $0x4] sm:$0x1]  ;;  %v549_v17 = vld [vmem:[%s3104_s16 + $0xc] sm:$0x1] }
  0x2d   : > { %2712 = vmatpush3.bf16.msra.mxu0 %v2933_v23  ;;  %2617 = vmatprep.subr.bf16.mxu1 %v2934_v26  ;;  %v1241_v23 = vsel %vm3175_vm2, %v1236_v20, %v1240_v18 }
  0x2e   : > { %2713 = vmatprep.subr.bf16.mxu0 %v2935_v27 }
  0x2f   : > { %2610 = vmatmul.mubr.bf16.gmra.mrb[4].mxu1 %v2946_v29  ;;  %v2955_v29 = vld [vmem:[%s3435_s1 + $0x188] sm:$0xff]  }
  0x30   : > { %2618 = vmatpush3.bf16.msra.mxu1 %v2934_v26  ;;  %2706 = vmatmul.mubr.bf16.gmra.mrb[4].mxu0 %v2947_v30  ;;  %v2954_v26 = vld [vmem:[%s3435_s1 + $0x88] sm:$0xff]   ;;  %v2351_v30 = vld [vmem:[%s3104_s16 + $0xb4] sm:$0x1] }
  0x31   : > { %2714 = vmatpush3.bf16.msra.mxu0 %v2935_v27  ;;  %2619 = vmatprep.subr.bf16.mxu1 %v2936_v28  ;;  %v2350_v27 = vld [vmem:[%s3104_s16 + $0xb0] sm:$0xf]  ;;  %v1252_v35 = vshll.u32 %v2351_v30, 16 }
  0x32   : > { %2715 = vmatprep.subr.bf16.mxu0 %v2937_v31  ;;  %2629 = vmatprep.mubr.bf16.mxu1 %v2950_v32  ;;  %v2353_v32 = vld [vmem:[%s3104_s16 + $0xbc] sm:$0x1]  ;;  %v1243_v33 = vshrl.u32 %v2350_v27, 16  ;;  %v1246_v34 = vshll.u32 %v2350_v27, 16  ;;  %v589_v27 = vshll.u32 %v549_v17, 16 }
  0x33   : > { %2725 = vmatprep.mubr.bf16.mxu0 %v2358_v11  ;;  %v1266_v39 = vshll.u32 %v2353_v32, 16  ;;  %v1254_v44 = vrot.slane %v1252_v35, 5  ;;  %v546_v11 = vld [vmem:[%s3104_s16] sm:$0xf]  ;;  %v2962_v32 = vld [vmem:[%s3435_s1 + $0xa8] sm:$0xff]  }
  0x34   : > { %2620 = vmatpush3.bf16.msra.mxu1 %v2936_v28  ;;  %v2359_v28 = vcombine.low %v1227_v22, %v1241_v23  ;;  %v1245_v40 = vrot.slane %v1243_v33, 4  ;;  %v1248_v41 = vrot.slane %v1246_v34, 5  ;;  %v566_v18 = vshrl.u32 %v546_v11, 16  ;;  %v557_v17 = vld [vmem:[%s3104_s16 + $0x2c] sm:$0x1] }
  0x35   : > { %2716 = vmatpush3.bf16.msra.mxu0 %v2937_v31  ;;  %2621 = vmatprep.subr.bf16.mxu1 %v2938_v38  ;;  %v2352_v31 = vld [vmem:[%s3104_s16 + $0xb8] sm:$0xf]  ;;  %v1268_v46 = vrot.slane %v1266_v39, 5  ;;  %v580_v22 = vshrl.u32 %v548_v16, 16  ;;  %v583_v23 = vshll.u32 %v548_v16, 16 }
  0x36   : > { %2717 = vmatprep.subr.bf16.mxu0 %v2939_v43  ;;  %v1257_v36 = vshrl.u32 %v2352_v31, 16  ;;  %v556_v16 = vld [vmem:[%s3104_s16 + $0x28] sm:$0xf] }
  0x37   : > { %v582_v30 = vrot.slane %v580_v22, 4  ;;  %v636_v22 = vshrl.u32 %v556_v16, 16 }
  0x38   : > { %2622 = vmatpush3.bf16.msra.mxu1 %v2938_v38  ;;  %v1260_v38 = vshll.u32 %v2352_v31, 16  ;;  %v1259_v42 = vrot.slane %v1257_v36, 4  ;;  %v585_v31 = vrot.slane %v583_v23, 5  ;;  %v591_v36 = vrot.slane %v589_v27, 5 }
  0x39   : > { %2718 = vmatpush3.bf16.msra.mxu0 %v2939_v43  ;;  %2623 = vmatprep.subr.bf16.mxu1 %v2940_v47  ;;  %v2956_v43 = vld [vmem:[%s3435_s1 + $0x90] sm:$0xff]   ;;  %v639_v23 = vshll.u32 %v556_v16, 16  ;;  %v2411_v16 = vld [vmem:[%s3104_s16 + $0xc] sm:$0x1] }
  0x3a   : > { %2719 = vmatprep.subr.bf16.mxu0 %v2941_v50  ;;  %v1262_v45 = vrot.slane %v1260_v38, 5  ;;  %v2963_v38 = vld [vmem:[%s3435_s1 + $0x1a8] sm:$0xff]  }
  0x3c   : > { %2624 = vmatpush3.bf16.msra.mxu1 %v2940_v47  ;;  %v1249_v47 = vor.u32 %v1248_v41, %v1245_v40  ;;  %v1263_v54 = vor.u32 %v1262_v45, %v1259_v42  ;;  %v586_v40 = vor.u32 %v585_v31, %v582_v30  ;;  %v550_v41 = vld [vmem:[%s3104_s16 + $0x10] sm:$0xf]  ;;  %v641_v31 = vrot.slane %v639_v23, 5 }
  0x3d   : > { %2720 = vmatpush3.bf16.msra.mxu0 %v2941_v50  ;;  %2625 = vmatprep.subr.bf16.mxu1 %v2943_v2  ;;  %v2355_v50 = vld [vmem:[%s3104_s16 + $0xc4] sm:$0x1]  ;;  %v594_v45 = vshrl.u32 %v550_v41, 16  ;;  %v558_v30 = vld [vmem:[%s3104_s16 + $0x30] sm:$0xf] }
  0x3e   : > { %2721 = vmatprep.subr.bf16.mxu0 %v2945_v6  ;;  %v1280_v58 = vshll.u32 %v2355_v50, 16  ;;  %v1250_v60 = vrot.slane %v1249_v47, 4  ;;  %v1264_v0 = vrot.slane %v1263_v54, 4  ;;  %v553_v47 = vld [vmem:[%s3104_s16 + $0x1c] sm:$0x1] }
  0x40   : > { %2626 = vmatpush3.bf16.msra.mxu1 %v2943_v2  ;;  %v1276_v2 = vrot.slane %v1274_v57, 5  ;;  %v1282_v3 = vrot.slane %v1280_v58, 5  ;;  %v1255_v5 = vsel %vm3175_vm2, %v1250_v60, %v1254_v44  ;;  %v1269_v9 = vsel %vm3175_vm2, %v1264_v0, %v1268_v46  ;;  %v552_v44 = vld [vmem:[%s3104_s16 + $0x18] sm:$0xf]  ;;  %v2966_v60 = vld [vmem:[%s3435_s1 + $0x1b0] sm:$0xff]  }
  0x41   : > { %2722 = vmatpush3.bf16.msra.mxu0 %v2945_v6  ;;  %2627 = vmatprep.subr.bf16.mxu1 %v2948_v14  ;;  %v1287_v6 = vrot.slane %v1285_v61, 4  ;;  %v587_v46 = vrot.slane %v586_v40, 4  ;;  %v608_v50 = vshrl.u32 %v552_v44, 16  ;;  %v611_v54 = vshll.u32 %v552_v44, 16 }
  0x42   : > { %2723 = vmatprep.subr.bf16.mxu0 %v2949_v19  ;;  %v1277_v10 = vor.u32 %v1276_v2, %v1273_v1  ;;  %v617_v58 = vshll.u32 %v553_v47, 16 }
  0x43   : > { %v1291_v15 = vor.u32 %v1290_v7, %v1287_v6  ;;  %v592_v55 = vsel %vm3175_vm2, %v587_v46, %v591_v36  ;;  %v610_v57 = vrot.slane %v608_v50, 4  ;;  %v613_v63 = vrot.slane %v611_v54, 5  ;;  %v2969_v6 = vld [vmem:[%s3435_s1 + $0x1b8] sm:$0xff]   ;;  %v2970_v7 = vld [vmem:[%s3435_s1 + $0xc0] sm:$0xff]  }
  0x44   : > { %2628 = vmatpush3.bf16.msra.mxu1 %v2948_v14  ;;  %v2360_v14 = vcombine.low %v1255_v5, %v1269_v9  ;;  %v1278_v20 = vrot.slane %v1277_v10, 4  ;;  %v2972_v10 = vld [vmem:[%s3435_s1 + $0x1c0] sm:$0xff]   ;;  %v2978_v50 = vld [vmem:[%s3435_s1 + $0xd8] sm:$0xff]  }
  0x45   : > { %2724 = vmatpush3.bf16.msra.mxu0 %v2949_v19  ;;  %2637 = vmatprep.subr.bf16.mxu1 %v2951_v21  ;;  %v569_v19 = vshll.u32 %v546_v11, 16  ;;  %v614_v1 = vor.u32 %v613_v63, %v610_v57  ;;  %v2973_v11 = vld [vmem:[%s3104_s16 + $0x18] ss:$8 sps:$4 sm:$0xff]  }
  0x46   : > { %2733 = vmatprep.subr.bf16.mxu0 %v2952_v24 }
  0x47   : > { %2630 = vmatmul.mubr.bf16.vlgmr.msra.gmra.mrb[0].mxu1 %v2953_v25  ;;  %v568_v25 = vrot.slane %v566_v18, 4  ;;  %v615_v5 = vrot.slane %v614_v1, 4  ;;  %v2975_v18 = vld [vmem:[%s3435_s1 + $0x1c8] sm:$0xff]   ;;  %v2980_v1 = vld [vmem:[%s3435_s1 + $0xe0] sm:$0xff]  }
  0x48   : > { %2638 = vmatpush3.bf16.msra.mxu1 %v2951_v21  ;;  %2726 = vmatmul.mubr.bf16.vlgmr.msra.gmra.mrb[0].mxu0 %v2359_v28  ;;  %v575_v21 = vshll.u32 %v547_v12, 16  ;;  %v2961_v28 = vld [vmem:[%s3435_s1 + $0x1a0] sm:$0xff]  }
  0x49   : > { %2734 = vmatpush3.bf16.msra.mxu0 %v2952_v24  ;;  %2639 = vmatprep.subr.bf16.mxu1 %v2954_v26  ;;  %v1292_v24 = vrot.slane %v1291_v15, 4  ;;  %v554_v12 = vld [vmem:[%s3104_s16 + $0x20] sm:$0xf]  ;;  %v555_v15 = vld [vmem:[%s3104_s16 + $0x24] sm:$0x1] }
  0x4a   : > { %2735 = vmatprep.subr.bf16.mxu0 %v2955_v29  ;;  %2633 = vmatprep.mubr.bf16.mxu1 %v2964_v37  ;;  %v577_v35 = vrot.slane %v575_v21, 5  ;;  %v2971_v37 = vld [vmem:[%s3104_s16 + $0x8] ss:$8 sps:$4 sm:$0xff]   ;;  %v631_v21 = vshll.u32 %v555_v15, 16 }
  0x4b   : > { %2729 = vmatprep.mubr.bf16.mxu0 %v2360_v14  ;;  %v1297_v33 = vsel %vm3175_vm2, %v1292_v24, %v1296_v8  ;;  %v2974_v14 = vld [vmem:[%s3435_s1 + $0xc8] sm:$0xff]   ;;  %v645_v24 = vshll.u32 %v557_v17, 16  ;;  %v2412_v17 = vld [vmem:[%s3104_s16 + $0x10] sm:$0xf] }
  0x4c   : > { %2640 = vmatpush3.bf16.msra.mxu1 %v2954_v26  ;;  %v571_v26 = vrot.slane %v569_v19, 5  ;;  %v622_v19 = vshrl.u32 %v554_v12, 16  ;;  %v2410_v15 = vld [vmem:[%s3104_s16 + $0x8] sm:$0xf]  ;;  %v1825_v23 = vshll.u32 %v2412_v17, 16 }
  0x4d   : > { %2736 = vmatpush3.bf16.msra.mxu0 %v2955_v29  ;;  %2641 = vmatprep.subr.bf16.mxu1 %v2956_v43  ;;  %v1283_v29 = vsel %vm3175_vm2, %v1278_v20, %v1282_v3  ;;  %v619_v3 = vrot.slane %v617_v58, 5  ;;  %v625_v20 = vshll.u32 %v554_v12, 16  ;;  %v2986_v58 = vld [vmem:[%s3104_s16 + $0x38] ss:$8 sps:$4 sm:$0xff]  }
  0x4e   : > { %2737 = vmatprep.subr.bf16.mxu0 %v2957_v52  ;;  %v572_v34 = vor.u32 %v571_v26, %v568_v25  ;;  %v2361_v39 = vcombine.low %v1283_v29, %v1297_v33  ;;  %v2984_v25 = vld [vmem:[%s3104_s16 + $0x28] ss:$8 sps:$4 sm:$0xff]   ;;  %v624_v26 = vrot.slane %v622_v19, 4  ;;  %v638_v29 = vrot.slane %v636_v22, 4  ;;  %v559_v33 = vld [vmem:[%s3104_s16 + $0x34] sm:$0x1] }
  0x4f   : > { %2634 = vmatmul.mubr.bf16.gmra.mrb[4].mxu1 %v2967_v48  ;;  %v597_v48 = vshll.u32 %v550_v41, 16  ;;  %v620_v9 = vsel %vm3175_vm2, %v615_v5, %v619_v3  ;;  %v627_v27 = vrot.slane %v625_v20, 5  ;;  %v659_v40 = vshll.u32 %v559_v33, 16  ;;  %v2977_v41 = vld [vmem:[%s3435_s1 + $0x1d0] sm:$0xff]   ;;  %v2981_v5 = vld [vmem:[%s3435_s1 + $0x1e0] sm:$0xff]   ;;  %v2988_v12 = vld [vmem:[%s3435_s1 + $0xf8] sm:$0xff]  }
  0x50   : > { %2642 = vmatpush3.bf16.msra.mxu1 %v2956_v43  ;;  %v573_v42 = vrot.slane %v572_v34, 4  ;;  %v551_v43 = vld [vmem:[%s3104_s16 + $0x14] sm:$0x1]  ;;  %2730 = vmatmul.mubr.bf16.gmra.mrb[4].mxu0 %v2361_v39  ;;  %v560_v34 = vld [vmem:[%s3104_s16 + $0x38] sm:$0xf]  ;;  %v653_v39 = vshll.u32 %v558_v30, 16 }
  0x51   : > { %2738 = vmatpush3.bf16.msra.mxu0 %v2957_v52  ;;  %2643 = vmatprep.subr.bf16.mxu1 %v2958_v59  ;;  %v603_v49 = vshll.u32 %v551_v43, 16  ;;  %v596_v52 = vrot.slane %v594_v45, 4  ;;  %v599_v56 = vrot.slane %v597_v48, 5  ;;  %v628_v36 = vor.u32 %v627_v27, %v624_v26  ;;  %v2421_v33 = vld [vmem:[%s3104_s16 + $0x34] sm:$0x1] }
  0x52   : > { %2739 = vmatprep.subr.bf16.mxu0 %v2959_v4  ;;  %v578_v51 = vsel %vm3175_vm2, %v573_v42, %v577_v35  ;;  %2749 = vmatprep.mubr.bf16.mxu0 %v2971_v37  ;;  %v2976_v35 = vld [vmem:[%s3435_s1 + $0xd0] sm:$0xff]   ;;  %v561_v37 = vld [vmem:[%s3104_s16 + $0x3c] sm:$0x1]  ;;  %v642_v42 = vor.u32 %v641_v31, %v638_v29  ;;  %v664_v43 = vshrl.u32 %v560_v34, 16  ;;  %v667_v44 = vshll.u32 %v560_v34, 16 }
  0x53   : > { %v2290_v61 = vcombine.low %v578_v51, %v592_v55  ;;  %v605_v62 = vrot.slane %v603_v49, 5  ;;  %v600_v0 = vor.u32 %v599_v56, %v596_v52  ;;  %v673_v45 = vshll.u32 %v561_v37, 16  ;;  %v2420_v29 = vld [vmem:[%s3104_s16 + $0x30] sm:$0xf]  ;;  %v2993_v34 = vld [vmem:[%s3104_s16 + $0x60] ss:$8 sps:$4 sm:$0xff]  }
  0x54   : > { %2644 = vmatpush3.bf16.msra.mxu1 %v2958_v59  ;;  %v2965_v59 = vld [vmem:[%s3435_s1 + $0xb0] sm:$0xff]   ;;  %v629_v46 = vrot.slane %v628_v36, 4  ;;  %v655_v48 = vrot.slane %v653_v39, 5  ;;  %v661_v49 = vrot.slane %v659_v40, 5  ;;  %v643_v51 = vrot.slane %v642_v42, 4  ;;  %v2995_v39 = vld [vmem:[%s3435_s1 + $0x208] sm:$0xff]  }
  0x55   : > { %2740 = vmatpush3.bf16.msra.mxu0 %v2959_v4  ;;  %2645 = vmatprep.subr.bf16.mxu1 %v2960_v13  ;;  %v601_v2 = vrot.slane %v600_v0, 4  ;;  %v2968_v4 = vld [vmem:[%s3435_s1 + $0xb8] sm:$0xff]   ;;  %v666_v52 = vrot.slane %v664_v43, 4  ;;  %v669_v54 = vrot.slane %v667_v44, 5  ;;  %v675_v55 = vrot.slane %v673_v45, 5 }
  0x56   : > { %2741 = vmatprep.subr.bf16.mxu0 %v2961_v28  ;;  %2653 = vmatprep.mubr.bf16.mxu1 %v2290_v61  ;;  %v2979_v61 = vld [vmem:[%s3435_s1 + $0x1d8] sm:$0xff]   ;;  %v1808_v19 = vshrl.u32 %v2410_v15, 16  ;;  %v1811_v20 = vshll.u32 %v2410_v15, 16  ;;  %v1822_v22 = vshrl.u32 %v2412_v17, 16  ;;  %v1881_v42 = vshll.u32 %v2420_v29, 16  ;;  %v3002_v15 = vld [vmem:[%s3435_s1 + $0x220] sm:$0xff]  }
  0x57   : > { %v606_v8 = vsel %vm3175_vm2, %v601_v2, %v605_v62  ;;  %v1887_v43 = vshll.u32 %v2421_v33, 16  ;;  %v2996_v44 = vld [vmem:[%s3104_s16 + $0xb0] ss:$8 sps:$4 sm:$0xff]  }
  0x58   : > { %2646 = vmatpush3.bf16.msra.mxu1 %v2960_v13  ;;  %v2291_v13 = vcombine.low %v606_v8, %v620_v9  ;;  %v2982_v8 = vld [vmem:[%s3435_s1 + $0xe8] sm:$0xff]   ;;  %v1810_v26 = vrot.slane %v1808_v19, 4  ;;  %v1813_v27 = vrot.slane %v1811_v20, 5  ;;  %v1824_v31 = vrot.slane %v1822_v22, 4 }
  0x59   : > { %2742 = vmatpush3.bf16.msra.mxu0 %v2961_v28  ;;  %2647 = vmatprep.subr.bf16.mxu1 %v2962_v32  ;;  %v633_v28 = vrot.slane %v631_v21, 5  ;;  %v2983_v9 = vld [vmem:[%s3435_s1 + $0x1e8] sm:$0xff]   ;;  %v1817_v21 = vshll.u32 %v2411_v16, 16 }
  0x5a   : > { %2743 = vmatprep.subr.bf16.mxu0 %v2963_v38  ;;  %v3003_v20 = vld [vmem:[%s3435_s1 + $0x228] sm:$0xff]  }
  0x5b   : > { %v634_v56 = vsel %vm3175_vm2, %v629_v46, %v633_v28  ;;  %v2419_v28 = vld [vmem:[%s3104_s16 + $0x2c] sm:$0x1]  ;;  %v1819_v45 = vrot.slane %v1817_v21, 5  ;;  %v2423_v21 = vld [vmem:[%s3104_s16 + $0x3c] sm:$0x1] }
  0x5c   : > { %2648 = vmatpush3.bf16.msra.mxu1 %v2962_v32  ;;  %v647_v32 = vrot.slane %v645_v24, 5 }
  0x5d   : > { %2744 = vmatpush3.bf16.msra.mxu0 %v2963_v38  ;;  %2649 = vmatprep.subr.bf16.mxu1 %v2965_v59  ;;  %v650_v38 = vshrl.u32 %v558_v30, 16  ;;  %v2992_v30 = vld [vmem:[%s3104_s16 + $0xa0] ss:$8 sps:$4 sm:$0xff]  }
  0x5e   : > { %2745 = vmatprep.subr.bf16.mxu0 %v2966_v60 }
  0x5f   : > { %v652_v47 = vrot.slane %v650_v38, 4  ;;  %v1873_v38 = vshll.u32 %v2419_v28, 16 }
  0x60   : > { %2650 = vmatpush3.bf16.msra.mxu1 %v2965_v59  ;;  %v648_v59 = vsel %vm3175_vm2, %v643_v51, %v647_v32  ;;  %v1827_v32 = vrot.slane %v1825_v23, 5 }
  0x61   : > { %2746 = vmatpush3.bf16.msra.mxu0 %v2966_v60  ;;  %2651 = vmatprep.subr.bf16.mxu1 %v2968_v4  ;;  %v656_v57 = vor.u32 %v655_v48, %v652_v47  ;;  %v670_v60 = vor.u32 %v669_v54, %v666_v52  ;;  %v2292_v62 = vcombine.low %v634_v56, %v648_v59  ;;  %v1883_v54 = vrot.slane %v1881_v42, 5 }
  0x62   : > { %2747 = vmatprep.subr.bf16.mxu0 %v2969_v6  ;;  %v1828_v40 = vor.u32 %v1827_v32, %v1824_v31  ;;  %v1875_v56 = vrot.slane %v1873_v38, 5  ;;  %v1889_v59 = vrot.slane %v1887_v43, 5  ;;  %v2415_v31 = vld [vmem:[%s3104_s16 + $0x1c] sm:$0x1]  ;;  %v2417_v32 = vld [vmem:[%s3104_s16 + $0x24] sm:$0x1] }
  0x63   : > { %v657_v63 = vrot.slane %v656_v57, 4  ;;  %v671_v0 = vrot.slane %v670_v60, 4  ;;  %v3000_v57 = vld [vmem:[%s3435_s1 + $0x210] sm:$0xff]  }
  0x64   : > { %2652 = vmatpush3.bf16.msra.mxu1 %v2968_v4  ;;  %v2991_v4 = vld [vmem:[%s3104_s16 + $0x50] ss:$8 sps:$4 sm:$0xff]   ;;  %v1829_v51 = vrot.slane %v1828_v40, 4 }
  0x65   : > { %2748 = vmatpush3.bf16.msra.mxu0 %v2969_v6  ;;  %2661 = vmatprep.subr.bf16.mxu1 %v2970_v7  ;;  %v662_v2 = vsel %vm3175_vm2, %v657_v63, %v661_v49  ;;  %v676_v3 = vsel %vm3175_vm2, %v671_v0, %v675_v55  ;;  %v2997_v49 = vld [vmem:[%s3104_s16 + $0x70] ss:$8 sps:$4 sm:$0xff]  }
  0x66   : > { %2757 = vmatprep.subr.bf16.mxu0 %v2972_v10  ;;  %v2293_v6 = vcombine.low %v662_v2, %v676_v3  ;;  %v3001_v3 = vld [vmem:[%s3435_s1 + $0x218] sm:$0xff]  }
  0x67   : > { %2654 = vmatmul.mubr.bf16.vlgmr.msra.gmra.mrb[0].mxu1 %v2291_v13  ;;  %v2989_v13 = vld [vmem:[%s3435_s1 + $0x1f8] sm:$0xff]  }
  0x68   : > { %2662 = vmatpush3.bf16.msra.mxu1 %v2970_v7  ;;  %2750 = vmatmul.mubr.bf16.vlgmr.msra.gmra.mrb[0].mxu0 %v2973_v11  ;;  %v2990_v7 = vld [vmem:[%s3104_s16 + $0x90] ss:$8 sps:$4 sm:$0xff]  }
  0x69   : > { %2758 = vmatpush3.bf16.msra.mxu0 %v2972_v10  ;;  %2663 = vmatprep.subr.bf16.mxu1 %v2974_v14  ;;  %v2985_v10 = vld [vmem:[%s3435_s1 + $0xf0] sm:$0xff]  }
  0x6a   : > { %2759 = vmatprep.subr.bf16.mxu0 %v2975_v18  ;;  %2753 = vmatprep.mubr.bf16.mxu0 %v2984_v25  ;;  %v2987_v11 = vld [vmem:[%s3435_s1 + $0x1f0] sm:$0xff]   ;;  %v2418_v25 = vld [vmem:[%s3104_s16 + $0x28] sm:$0xf] }
  0x6b   : > { %2657 = vmatprep.mubr.bf16.mxu1 %v2292_v62  ;;  %v1864_v36 = vshrl.u32 %v2418_v25, 16  ;;  %v1867_v37 = vshll.u32 %v2418_v25, 16 }
  0x6c   : > { %2664 = vmatpush3.bf16.msra.mxu1 %v2974_v14  ;;  %v2994_v14 = vld [vmem:[%s3435_s1 + $0x200] sm:$0xff]  }
  0x6d   : > { %2760 = vmatpush3.bf16.msra.mxu0 %v2975_v18  ;;  %2665 = vmatprep.subr.bf16.mxu1 %v2976_v35  ;;  %v2413_v18 = vld [vmem:[%s3104_s16 + $0x14] sm:$0x1]  ;;  %v1866_v47 = vrot.slane %v1864_v36, 4  ;;  %v1869_v48 = vrot.slane %v1867_v37, 5 }
  0x6e   : > { %2761 = vmatprep.subr.bf16.mxu0 %v2977_v41  ;;  %v1831_v24 = vshll.u32 %v2413_v18, 16  ;;  %v3004_v37 = vld [vmem:[%s3435_s1 + $0x230] sm:$0xff]  }
  0x6f   : > { %2658 = vmatmul.mubr.bf16.gmra.mrb[4].mxu1 %v2293_v6  ;;  %v1870_v55 = vor.u32 %v1869_v48, %v1866_v47  ;;  %v2424_v6 = vld [vmem:[%s3104_s16 + $0x40] sm:$0xf] }
  0x70   : > { %2666 = vmatpush3.bf16.msra.mxu1 %v2976_v35  ;;  %2754 = vmatmul.mubr.bf16.gmra.mrb[4].mxu0 %v2986_v58  ;;  %v1814_v35 = vor.u32 %v1813_v27, %v1810_v26  ;;  %v1833_v46 = vrot.slane %v1831_v24, 5 }
  0x71   : > { %2762 = vmatpush3.bf16.msra.mxu0 %v2977_v41  ;;  %2667 = vmatprep.subr.bf16.mxu1 %v2978_v50  ;;  %v1878_v41 = vshrl.u32 %v2420_v29, 16  ;;  %v1871_v60 = vrot.slane %v1870_v55, 4 }
  0x72   : > { %2763 = vmatprep.subr.bf16.mxu0 %v2979_v61  ;;  %2773 = vmatprep.mubr.bf16.mxu0 %v2991_v4  ;;  %v1834_v63 = vsel %vm3175_vm2, %v1829_v51, %v1833_v46  ;;  %v3005_v46 = vld [vmem:[%s3435_s1 + $0x238] sm:$0xff]  }
  0x73   : > { %2677 = vmatprep.mubr.bf16.mxu1 %v2990_v7  ;;  %v1880_v52 = vrot.slane %v1878_v41, 4  ;;  %v1876_v2 = vsel %vm3175_vm2, %v1871_v60, %v1875_v56  ;;  %v1859_v41 = vshll.u32 %v2417_v32, 16 }
  0x74   : > { %2668 = vmatpush3.bf16.msra.mxu1 %v2978_v50  ;;  %v1815_v50 = vrot.slane %v1814_v35, 4 }
  0x75   : > { %2764 = vmatpush3.bf16.msra.mxu0 %v2979_v61  ;;  %2669 = vmatprep.subr.bf16.mxu1 %v2980_v1  ;;  %v1884_v58 = vor.u32 %v1883_v54, %v1880_v52  ;;  %v2998_v61 = vld [vmem:[%s3104_s16 + $0xc0] ss:$8 sps:$4 sm:$0xff]  }
  0x76   : > { %2765 = vmatprep.subr.bf16.mxu0 %v2981_v5  ;;  %v1820_v62 = vsel %vm3175_vm2, %v1815_v50, %v1819_v45  ;;  %v1861_v50 = vrot.slane %v1859_v41, 5 }
  0x77   : > { %v1885_v0 = vrot.slane %v1884_v58, 4  ;;  %v2426_v7 = vcombine.low %v1820_v62, %v1834_v63 }
  0x78   : > { %2670 = vmatpush3.bf16.msra.mxu1 %v2980_v1  ;;  %v2999_v1 = vld [vmem:[%s3104_s16 + $0x80] ss:$8 sps:$4 sm:$0xff]  }
  0x79   : > { %2766 = vmatpush3.bf16.msra.mxu0 %v2981_v5  ;;  %2671 = vmatprep.subr.bf16.mxu1 %v2982_v8  ;;  %v1890_v4 = vsel %vm3175_vm2, %v1885_v0, %v1889_v59  ;;  %v2422_v5 = vld [vmem:[%s3104_s16 + $0x38] sm:$0xf] }
  0x7a   : > { %2767 = vmatprep.subr.bf16.mxu0 %v2983_v9 }
  0x7c   : > { %2672 = vmatpush3.bf16.msra.mxu1 %v2982_v8  ;;  %v2414_v8 = vld [vmem:[%s3104_s16 + $0x18] sm:$0xf] }
  0x7d   : > { %2768 = vmatpush3.bf16.msra.mxu0 %v2983_v9  ;;  %2673 = vmatprep.subr.bf16.mxu1 %v2985_v10  ;;  %v2416_v9 = vld [vmem:[%s3104_s16 + $0x20] sm:$0xf]  ;;  %v1836_v16 = vshrl.u32 %v2414_v8, 16  ;;  %v1839_v17 = vshll.u32 %v2414_v8, 16 }
  0x7e   : > { %2769 = vmatprep.subr.bf16.mxu0 %v2987_v11  ;;  %v1850_v18 = vshrl.u32 %v2416_v9, 16  ;;  %v1853_v19 = vshll.u32 %v2416_v9, 16  ;;  %v2438_v9 = vld [vmem:[%s3436_s2] ss:$0 sm:$0xff] }
  0x7f   : > { %v1838_v26 = vrot.slane %v1836_v16, 4  ;;  %v1841_v27 = vrot.slane %v1839_v17, 5 }
  0x80   : > { %2674 = vmatpush3.bf16.msra.mxu1 %v2985_v10  ;;  %v2428_v10 = vcombine.low %v1876_v2, %v1890_v4  ;;  %v1852_v28 = vrot.slane %v1850_v18, 4  ;;  %v1855_v29 = vrot.slane %v1853_v19, 5 }
  0x81   : > { %2770 = vmatpush3.bf16.msra.mxu0 %v2987_v11  ;;  %2675 = vmatprep.subr.bf16.mxu1 %v2988_v12  ;;  %v1892_v11 = vshrl.u32 %v2422_v5, 16  ;;  %v1842_v38 = vor.u32 %v1841_v27, %v1838_v26 }
  0x82   : > { %2771 = vmatprep.subr.bf16.mxu0 %v2989_v13  ;;  %v1856_v40 = vor.u32 %v1855_v29, %v1852_v28 }
  0x83   : > { %v1894_v22 = vrot.slane %v1892_v11, 4  ;;  %v1843_v47 = vrot.slane %v1842_v38, 4 }
  0x84   : > { %2676 = vmatpush3.bf16.msra.mxu1 %v2988_v12  ;;  %v1895_v12 = vshll.u32 %v2422_v5, 16 }
  0x85   : > { %2772 = vmatpush3.bf16.msra.mxu0 %v2989_v13  ;;  %2805 = vmatprep.subr.bf16.mxu1 %v2994_v14  ;;  %v1906_v13 = vshrl.u32 %v2424_v6, 16 }
  0x86   : > { %2781 = vmatprep.subr.bf16.mxu0 %v2994_v14  ;;  %v1897_v23 = vrot.slane %v1895_v12, 5 }
  0x87   : > { %2678 = vmatmul.mubr.bf16.vlgmr.msra.gmra.mrb[0].mxu1 %v2992_v30  ;;  %v1908_v24 = vrot.slane %v1906_v13, 4  ;;  %v2425_v30 = vld [vmem:[%s3104_s16 + $0x44] sm:$0x1] }
  0x88   : > { %2774 = vmatmul.mubr.bf16.vlgmr.msra.gmra.mrb[0].mxu0 %v2993_v34  ;;  %2813 = vmatpush3.bf16.msra.mxu1 %v2994_v14  ;;  %v1898_v33 = vor.u32 %v1897_v23, %v1894_v22  ;;  %v1901_v34 = vshll.u32 %v2423_v21, 16  ;;  %v1915_v36 = vshll.u32 %v2425_v30, 16 }
  0x89   : > { %2782 = vmatpush3.bf16.msra.mxu0 %v2994_v14  ;;  %2806 = vmatprep.subr.bf16.mxu1 %v2995_v39  ;;  %v1909_v14 = vshll.u32 %v2424_v6, 16 }
  0x8a   : > { %2783 = vmatprep.subr.bf16.mxu0 %v2995_v39  ;;  %2681 = vmatprep.mubr.bf16.mxu1 %v2996_v44  ;;  %v1899_v42 = vrot.slane %v1898_v33, 4  ;;  %v1903_v43 = vrot.slane %v1901_v34, 5  ;;  %v1917_v45 = vrot.slane %v1915_v36, 5 }
  0x8b   : > { %2777 = vmatprep.mubr.bf16.mxu0 %v2997_v49  ;;  %v1911_v25 = vrot.slane %v1909_v14, 5  ;;  %v1857_v49 = vrot.slane %v1856_v40, 4 }
  0x8c   : > { %2814 = vmatpush3.bf16.msra.mxu1 %v2995_v39  ;;  %v1904_v51 = vsel %vm3175_vm2, %v1899_v42, %v1903_v43 }
  0x8d   : > { %2784 = vmatpush3.bf16.msra.mxu0 %v2995_v39  ;;  %2807 = vmatprep.subr.bf16.mxu1 %v3000_v57  ;;  %v1912_v35 = vor.u32 %v1911_v25, %v1908_v24  ;;  %v1845_v39 = vshll.u32 %v2415_v31, 16  ;;  %v1862_v55 = vsel %vm3175_vm2, %v1857_v49, %v1861_v50 }
  0x8e   : > { %2785 = vmatprep.subr.bf16.mxu0 %v3000_v57 }
  0x8f   : > { %2682 = vmatmul.mubr.bf16.gmra.mrb[4].mxu1 %v2998_v61  ;;  %v1913_v44 = vrot.slane %v1912_v35, 4  ;;  %v1847_v48 = vrot.slane %v1845_v39, 5 }
  0x90   : > { %2778 = vmatmul.mubr.bf16.gmra.mrb[4].mxu0 %v2999_v1  ;;  %2815 = vmatpush3.bf16.msra.mxu1 %v3000_v57 }
  0x91   : > { %2786 = vmatpush3.bf16.msra.mxu0 %v3000_v57  ;;  %2808 = vmatprep.subr.bf16.mxu1 %v3001_v3  ;;  %v1918_v52 = vsel %vm3175_vm2, %v1913_v44, %v1917_v45  ;;  %v1848_v54 = vsel %vm3175_vm2, %v1843_v47, %v1847_v48 }
  0x92   : > { %2787 = vmatprep.subr.bf16.mxu0 %v3001_v3  ;;  %2797 = vmatprep.mubr.bf16.mxu0 %v2426_v7  ;;  %v2429_v56 = vcombine.low %v1904_v51, %v1918_v52  ;;  %v2427_v57 = vcombine.low %v1848_v54, %v1862_v55 }
  0x93   : > { %2801 = vmatprep.mubr.bf16.mxu1 %v2428_v10 }
  0x94   : > { %2816 = vmatpush3.bf16.msra.mxu1 %v3001_v3 }
  0x95   : > { %2788 = vmatpush3.bf16.msra.mxu0 %v3001_v3  ;;  %2809 = vmatprep.subr.bf16.mxu1 %v3002_v15 }
  0x96   : > { %2789 = vmatprep.subr.bf16.mxu0 %v3002_v15 }
  0x98   : > { %2817 = vmatpush3.bf16.msra.mxu1 %v3002_v15 }
  0x99   : > { %2790 = vmatpush3.bf16.msra.mxu0 %v3002_v15  ;;  %2810 = vmatprep.subr.bf16.mxu1 %v3003_v20 }
  0x9a   : > { %2791 = vmatprep.subr.bf16.mxu0 %v3003_v20 }
  0x9c   : > { %2818 = vmatpush3.bf16.msra.mxu1 %v3003_v20 }
  0x9d   : > { %2792 = vmatpush3.bf16.msra.mxu0 %v3003_v20  ;;  %2811 = vmatprep.subr.bf16.mxu1 %v3004_v37 }
  0x9e   : > { %2793 = vmatprep.subr.bf16.mxu0 %v3004_v37 }
  0xa0   : > { %2819 = vmatpush3.bf16.msra.mxu1 %v3004_v37 }
  0xa1   : > { %2794 = vmatpush3.bf16.msra.mxu0 %v3004_v37  ;;  %2812 = vmatprep.subr.bf16.mxu1 %v3005_v46 }
  0xa2   : > { %2795 = vmatprep.subr.bf16.mxu0 %v3005_v46 }
  0xa4   : > { %2820 = vmatpush3.bf16.msra.mxu1 %v3005_v46 }
  0xa5   : > { %2796 = vmatpush3.bf16.msra.mxu0 %v3005_v46 }
  0xa7   : > { %2802 = vmatmul.mubr.bf16.vlgmr.msra.gmra.mrb[8].mxu1 %v2429_v56 }
  0xa8   : > { %2798 = vmatmul.mubr.bf16.vlgmr.msra.gmra.mrb[0].mxu0 %v2427_v57 }
 0x15a   : > { %v2679_v58 = vpop.f32.mrb[0].mxu1 }
 0x15b   : > { %v961_v59 = vpop.f32.mrb[1].mxu1 }
 0x15c   : > { %v2680_v60 = vpop.f32.mrb[2].mxu1 }
 0x15d   : > { %v964_v61 = vpop.f32.mrb[3].mxu1 }
 0x162   : > { %v2683_v62 = vpop.f32.mrb[4].mxu1 }
 0x163   : > { %v2779_v63 = vpop.f32.mrb[4].mxu0  ;;  %v977_v0 = vpop.f32.mrb[5].mxu1 }
 0x164   : > { %v2825_v1 = vadd.f32 %v2779_v63, %v2683_v62  ;;  %v1768_v2 = vpop.f32.mrb[5].mxu0  ;;  %v2684_v3 = vpop.f32.mrb[6].mxu1 }
 0x165   : > { %v2827_v4 = vadd.f32 %v1768_v2, %v977_v0  ;;  %v2780_v53 = vpop.f32.mrb[6].mxu0  ;;  %v980_v5 = vpop.f32.mrb[7].mxu1 }
 0x166   : > { %v2829_v6 = vadd.f32 %v2780_v53, %v2684_v3  ;;  %v1771_v7 = vpop.f32.mrb[7].mxu0 }
 0x167   : > { %v2831_v8 = vadd.f32 %v1771_v7, %v980_v5 }
 0x17a   : > { %v2803_v10 = vpop.f32.mrb[8].mxu1 }
 0x17b   : > { %v2799_v11 = vpop.f32.mrb[0].mxu0  ;;  %v2826_v12 = vadd.f32 %v2825_v1, %v2803_v10  ;;  %v2049_v13 = vpop.f32.mrb[9].mxu1 }
 0x17c   : > { %v2821_v14 = vadd.f32 %v2799_v11, %v2679_v58  ;;  %v2033_v15 = vpop.f32.mrb[1].mxu0  ;;  %v2828_v16 = vadd.f32 %v2827_v4, %v2049_v13  ;;  %v2804_v17 = vpop.f32.mrb[10].mxu1 }
 0x17d   : > { %v2085_v18 = vadd.f32 %v2826_v12, %v2438_v9  ;;  %v2822_v19 = vadd.f32 %v2033_v15, %v961_v59  ;;  %v2800_v20 = vpop.f32.mrb[2].mxu0  ;;  %v2830_v21 = vadd.f32 %v2829_v6, %v2804_v17  ;;  %v2052_v22 = vpop.f32.mrb[11].mxu1 }
 0x17e   : > { %v2081_v23 = vadd.f32 %v2821_v14, %v2438_v9  ;;  %v2083_v24 = vadd.f32 %v2828_v16, %v2438_v9  ;;  %v2823_v25 = vadd.f32 %v2800_v20, %v2680_v60  ;;  %v2036_v26 = vpop.f32.mrb[3].mxu0  ;;  %v2832_v27 = vadd.f32 %v2831_v8, %v2052_v22 }
 0x17f   : > { %v2093_v28 = vmul.f32 0.1, %v2085_v18  ;;  %v2079_v29 = vadd.f32 %v2822_v19, %v2438_v9  ;;  %v2086_v30 = vadd.f32 %v2830_v21, %v2438_v9  ;;  %v2824_v31 = vadd.f32 %v2036_v26, %v964_v61 }
 0x180   : > { %v2089_v32 = vmul.f32 0.1, %v2081_v23  ;;  %v2091_v33 = vmul.f32 0.1, %v2083_v24  ;;  %v2082_v34 = vadd.f32 %v2823_v25, %v2438_v9  ;;  %v2084_v35 = vadd.f32 %v2832_v27, %v2438_v9 }
 0x181   : > { %v2087_v36 = vmul.f32 0.1, %v2079_v29  ;;  %v2094_v37 = vmul.f32 0.1, %v2086_v30  ;;  %v2080_v38 = vadd.f32 %v2824_v31, %v2438_v9  ;;  %v2101_v41 = vmax.f32 %v2085_v18, %v2093_v28 }
 0x182   : > { %v2090_v39 = vmul.f32 0.1, %v2082_v34  ;;  %v2092_v40 = vmul.f32 0.1, %v2084_v35  ;;  %v2097_v44 = vmax.f32 %v2081_v23, %v2089_v32  ;;  %v2099_v45 = vmax.f32 %v2083_v24, %v2091_v33 }
 0x183   : > { %v2102_v42 = vmax.f32 %v2086_v30, %v2094_v37  ;;  %v2088_v43 = vmul.f32 0.1, %v2080_v38  ;;  %v2095_v48 = vmax.f32 %v2079_v29, %v2087_v36 }
 0x184   : > { %v2098_v46 = vmax.f32 %v2082_v34, %v2090_v39  ;;  %v2100_v47 = vmax.f32 %v2084_v35, %v2092_v40 }
 0x185   : > { %v2476_v49 = vpack.c.bf16 %v2102_v42, %v2101_v41  ;;  %v2096_v50 = vmax.f32 %v2080_v38, %v2088_v43 }
 0x186   : > { %v2466_v51 = vpack.c.bf16 %v2098_v46, %v2097_v44  ;;  %v2471_v52 = vpack.c.bf16 %v2100_v47, %v2099_v45 }
 0x187   : > { %2480 = vst [vmem:[%s221_s8 + $0x18] sm:$0xff] %v2476_v49   ;;  %v2461_v54 = vpack.c.bf16 %v2096_v50, %v2095_v48 }
 0x188   : > { %2478 = vst [vmem:[%s221_s8 + $0x8] sm:$0xff] %v2466_v51   ;;  %2479 = vst [vmem:[%s221_s8 + $0x10] sm:$0xff] %v2471_v52  }
 0x189   : > { %2462 = vst [vmem:[%s221_s8] sm:$0xff] %v2461_v54  }
 0x18a PF: > { %s13_s14 = sadd.s32 1, %s3028_s14   ;;  %s3440_s12 = smov %s3024_s13 }
 0x18b   : > { %p10_p5 = scmp.ge.s32.totalorder %s13_s14, 4   ;;  %s3441_s13 = smov %s3443_s15 }
 0x18d   :  { %12 = sbr.rel (!%p10_p5) target bundleno = 2 (0x2), region = 73 }

// kernel: yolo_forward.8
= control target key start
LH: loop header
LB: loop body
LE: loop exit
PB: predicated region body
PF: predicated region fallthrough
CT: control target
= control target key end

     0   :  { %s3166_s12 = smov 0   ;;  %s3168_s13 = smov 0   ;;  %s3754_s0 = inlined_call_operand.vmem [shape: bf16[2,10,10,128], index: 0, kind: input, shape index: {}]   ;;  %s3755_s1 = inlined_call_operand.vmem [shape: bf16[1152,128], index: 1, kind: input, shape index: {}]   ;;  %s3756_s2 = inlined_call_operand.vmem [shape: f32[1,128], index: 2, kind: input, shape index: {}]   ;;  %s3757_s3 = inlined_call_operand.vmem [shape: bf16[2,64,128], index: 3, kind: output, shape index: {}]  }
   0x1   :  { %s3170_s14 = smov 0  }
   0x2 LB: > { %s22_s15 = sadd.s32 1, %s3140_s13  ;;  %p2366_p0 = scmp.ge.s32.totalorder %s3144_s14, 1  ;;  %s3144_s14 = sphi %s3170_s14, %s13_s14   ;;  %s3140_s13 = sphi %s3168_s13, %s3763_s13   ;;  %s3136_s12 = sphi %s3166_s12, %s3762_s12  }
   0x3   : > { %p23_p1 = scmp.ge.s32.totalorder %s22_s15, 2  ;;  %p168_p2 = scmp.lt.s32.totalorder %s3144_s14, 3 }
   0x5   : > { %s3765_s15 = smov (%p23_p1, %s22_s15), 0  ;;  %p169_p3 = pnand %p2366_p0, %p168_p2 }
   0x6   : > { %v3038_v0 = vld [vmem:[%s3755_s1 + $0x40] sm:$0xff] (!%p169_p3)   ;;  %p202_p4 = scmp.lt.s32.totalorder (!%p169_p3), %s3136_s12, 1  ;;  %v3040_v2 = vld [vmem:[%s3755_s1 + $0x48] sm:$0xff] (!%p169_p3)   ;;  %v3042_v4 = vld [vmem:[%s3755_s1 + $0x50] sm:$0xff] (!%p169_p3)   ;;  %vm255_vm0 = vsmask.f32 (!%p169_p3), 3328 }
   0x7   : > { %172 = sbr.rel (%p169_p3) target bundleno = 399 (0x18f), region = 32  ;;  %v3039_v1 = vld [vmem:[%s3755_s1 + $0x100] sm:$0xff] (!%p169_p3)   ;;  %2717 = vmatprep.subr.bf16.mxu1 (!%p169_p3), %v3038_v0  ;;  %v3041_v3 = vld [vmem:[%s3755_s1 + $0x108] sm:$0xff] (!%p169_p3)   ;;  %v3043_v5 = vld [vmem:[%s3755_s1 + $0x110] sm:$0xff] (!%p169_p3)   ;;  %vm256_vm1 = vsmask.f32 (!%p169_p3), 7440 }
   0x8   : > { %2813 = vmatprep.subr.bf16.mxu0 (!%p169_p3), %v3039_v1  ;;  %2718 = vmatpush3.bf16.msra.mxu1 (!%p169_p3), %v3038_v0  ;;  %v3044_v6 = vld [vmem:[%s3755_s1 + $0x58] sm:$0xff] (!%p169_p3)   ;;  %v3046_v8 = vld [vmem:[%s3755_s1 + $0x60] sm:$0xff] (!%p169_p3)   ;;  %v3048_v10 = vld [vmem:[%s3755_s1 + $0x68] sm:$0xff] (!%p169_p3)   ;;  %vm676_vm3 = vcmask (!%p169_p3), 1042432   ;;  %vm677_vm4 = vcmask (!%p169_p3), 1046532  }
   0x9   : > { %2814 = vmatpush3.bf16.msra.mxu0 (!%p169_p3), %v3039_v1  ;;  %2719 = vmatprep.subr.bf16.mxu1 (!%p169_p3), %v3040_v2  ;;  %v3045_v7 = vld [vmem:[%s3755_s1 + $0x118] sm:$0xff] (!%p169_p3)   ;;  %v3047_v9 = vld [vmem:[%s3755_s1 + $0x120] sm:$0xff] (!%p169_p3)   ;;  %v3049_v14 = vld [vmem:[%s3755_s1 + $0x128] sm:$0xff] (!%p169_p3)  }
   0xa   : > { %2815 = vmatprep.subr.bf16.mxu0 (!%p169_p3), %v3041_v3  ;;  %v3050_v22 = vld [vmem:[%s3755_s1 + $0x70] sm:$0xff] (!%p169_p3)   ;;  %v3052_v37 = vld [vmem:[%s3755_s1 + $0x78] sm:$0xff] (!%p169_p3)   ;;  %vm3265_vm2 = vmor (!%p169_p3), %vm255_vm0, %vm256_vm1 }
   0xb   : > { %v3051_v23 = vld [vmem:[%s3755_s1 + $0x130] sm:$0xff] (!%p169_p3)   ;;  %v3053_v47 = vld [vmem:[%s3755_s1 + $0x138] sm:$0xff] (!%p169_p3)   ;;  %v3054_v63 = vld [vmem:[%s3755_s1] sm:$0xff] (!%p169_p3)  }
   0xc   : > { %2720 = vmatpush3.bf16.msra.mxu1 (!%p169_p3), %v3040_v2  ;;  %v3297_v1 = vld [vmem:[%s3755_s1 + $0x140] sm:$0xff] (!%p169_p3)   ;;  %vm3439_vm5 = vmor (!%p169_p3), %vm676_vm3, %vm677_vm4 }
   0xd   : > { %2816 = vmatpush3.bf16.msra.mxu0 (!%p169_p3), %v3041_v3  ;;  %2721 = vmatprep.subr.bf16.mxu1 (!%p169_p3), %v3042_v4  ;;  %v3118_v38 = vld [vmem:[%s3755_s1 + $0x220] sm:$0xff] (!%p169_p3)  }
   0xe   : > { %s3767_s12 = smov (!%p202_p4, %s3136_s12), 1  ;;  %2817 = vmatprep.subr.bf16.mxu0 %v3043_v5 }
   0xf   : > { %s3013_s5 = smul.u32 80, %s3767_s12 }
  0x10   : > { %2722 = vmatpush3.bf16.msra.mxu1 %v3042_v4 }
  0x11   : > { %2818 = vmatpush3.bf16.msra.mxu0 %v3043_v5  ;;  %2723 = vmatprep.subr.bf16.mxu1 %v3044_v6  ;;  %s3220_s16 = scalar_lea.vmem %s3754_s0, %s3013_s5  ;;  %s2577_s5 = sshll.u32 %s3767_s12, 5 }
  0x12   : > { %2819 = vmatprep.subr.bf16.mxu0 %v3045_v7  ;;  %v3226_v11 = vld [vmem:[%s3220_s16] sm:$0xf]  ;;  %v3229_v12 = vld [vmem:[%s3220_s16 + $0x8] sm:$0xf]  ;;  %v3232_v13 = vld [vmem:[%s3220_s16 + $0x4] sm:$0x1]  ;;  %s221_s8 = scalar_lea.vmem %s3757_s3, %s2577_s5 }
  0x13   : > { %v3238_v15 = vld [vmem:[%s3220_s16 + $0xc] sm:$0x1]  ;;  %v259_v16 = vshrl.u32 %v3226_v11, 16  ;;  %v262_v17 = vshll.u32 %v3226_v11, 16  ;;  %v268_v18 = vshll.u32 %v3232_v13, 16  ;;  %v273_v19 = vshrl.u32 %v3229_v12, 16 }
  0x14   : > { %2724 = vmatpush3.bf16.msra.mxu1 %v3044_v6  ;;  %v276_v20 = vshll.u32 %v3229_v12, 16  ;;  %v282_v21 = vshll.u32 %v3238_v15, 16  ;;  %v2434_v30 = vld [vmem:[%s3220_s16 + $0x8] sm:$0xf]  ;;  %v3254_v31 = vld [vmem:[%s3220_s16 + $0xc] sm:$0x1] }
  0x15   : > { %2820 = vmatpush3.bf16.msra.mxu0 %v3045_v7  ;;  %2725 = vmatprep.subr.bf16.mxu1 %v3046_v8  ;;  %v261_v24 = vrot.slane %v259_v16, 4  ;;  %v264_v25 = vrot.slane %v262_v17, 5  ;;  %v270_v26 = vrot.slane %v268_v18, 5  ;;  %v275_v27 = vrot.slane %v273_v19, 4  ;;  %v2436_v33 = vld [vmem:[%s3220_s16 + $0x10] sm:$0xf] }
  0x16   : > { %2821 = vmatprep.subr.bf16.mxu0 %v3047_v9  ;;  %v278_v28 = vrot.slane %v276_v20, 5  ;;  %v284_v29 = vrot.slane %v282_v21, 5  ;;  %v3258_v34 = vld [vmem:[%s3220_s16 + $0x14] sm:$0x1]  ;;  %v1051_v35 = vshrl.u32 %v2434_v30, 16  ;;  %v1054_v36 = vshll.u32 %v2434_v30, 16 }
  0x17   : > { %v265_v32 = vor.u32 %v264_v25, %v261_v24  ;;  %v1060_v40 = vshll.u32 %v3254_v31, 16  ;;  %v1065_v41 = vshrl.u32 %v2436_v33, 16  ;;  %v1068_v42 = vshll.u32 %v2436_v33, 16  ;;  %v3275_v51 = vld [vmem:[%s3220_s16 + $0x10] sm:$0xf] }
  0x18   : > { %2726 = vmatpush3.bf16.msra.mxu1 %v3046_v8  ;;  %v279_v39 = vor.u32 %v278_v28, %v275_v27  ;;  %v1053_v44 = vrot.slane %v1051_v35, 4  ;;  %v1056_v45 = vrot.slane %v1054_v36, 5  ;;  %v1074_v46 = vshll.u32 %v3258_v34, 16  ;;  %v3280_v55 = vld [vmem:[%s3220_s16 + $0x18] sm:$0xf] }
  0x19   : > { %2822 = vmatpush3.bf16.msra.mxu0 %v3047_v9  ;;  %2727 = vmatprep.subr.bf16.mxu1 %v3048_v10  ;;  %v266_v43 = vrot.slane %v265_v32, 4  ;;  %v1067_v49 = vrot.slane %v1065_v41, 4  ;;  %v1070_v50 = vrot.slane %v1068_v42, 5  ;;  %v1062_v54 = vrot.slane %v1060_v40, 5  ;;  %v3283_v56 = vld [vmem:[%s3220_s16 + $0x14] sm:$0x1] }
  0x1a   : > { %2823 = vmatprep.subr.bf16.mxu0 %v3049_v14  ;;  %v280_v48 = vrot.slane %v279_v39, 4  ;;  %v1057_v53 = vor.u32 %v1056_v45, %v1053_v44  ;;  %v1076_v59 = vrot.slane %v1074_v46, 5  ;;  %v3288_v60 = vld [vmem:[%s3220_s16 + $0x1c] sm:$0x1]  ;;  %v287_v61 = vshrl.u32 %v3275_v51, 16 }
  0x1b   : > { %v271_v52 = vsel %vm3265_vm2, %v266_v43, %v270_v26  ;;  %v1071_v58 = vor.u32 %v1070_v50, %v1067_v49  ;;  %v290_v2 = vshll.u32 %v3275_v51, 16  ;;  %v296_v3 = vshll.u32 %v3283_v56, 16  ;;  %v2438_v8 = vld [vmem:[%s3220_s16 + $0x18] sm:$0xf]  ;;  %v3308_v16 = vld [vmem:[%s3220_s16 + $0x1c] sm:$0x1] }
  0x1c   : > { %2728 = vmatpush3.bf16.msra.mxu1 %v3048_v10  ;;  %v285_v57 = vsel %vm3265_vm2, %v280_v48, %v284_v29  ;;  %v1058_v0 = vrot.slane %v1057_v53, 4  ;;  %v289_v5 = vrot.slane %v287_v61, 4  ;;  %v301_v6 = vshrl.u32 %v3280_v55, 16  ;;  %v2440_v17 = vld [vmem:[%s3220_s16 + $0x20] sm:$0xf]  ;;  %v3056_v43 = vld [vmem:[%s3755_s1 + $0x8] sm:$0xff]  }
  0x1d   : > { %2824 = vmatpush3.bf16.msra.mxu0 %v3049_v14  ;;  %2729 = vmatprep.subr.bf16.mxu1 %v3050_v22  ;;  %v2370_v62 = vcombine.low %v271_v52, %v285_v57  ;;  %v1072_v4 = vrot.slane %v1071_v58, 4  ;;  %v304_v7 = vshll.u32 %v3280_v55, 16  ;;  %v292_v10 = vrot.slane %v290_v2, 5  ;;  %v3314_v21 = vld [vmem:[%s3220_s16 + $0x24] sm:$0x1] }
  0x1e   : > { %2825 = vmatprep.subr.bf16.mxu0 %v3051_v23  ;;  %v1063_v9 = vsel %vm3265_vm2, %v1058_v0, %v1062_v54  ;;  %v310_v14 = vshll.u32 %v3288_v60, 16  ;;  %v303_v19 = vrot.slane %v301_v6, 4  ;;  %v298_v24 = vrot.slane %v296_v3, 5  ;;  %v3057_v54 = vld [vmem:[%s3755_s1 + $0x148] sm:$0xff]   ;;  %v3344_v0 = vld [vmem:[%s3220_s16 + $0x24] sm:$0x1] }
  0x1f   : > { %2733 = vmatprep.mubr.bf16.mxu1 %v2370_v62  ;;  %v1077_v18 = vsel %vm3265_vm2, %v1072_v4, %v1076_v59  ;;  %v306_v20 = vrot.slane %v304_v7, 5  ;;  %v1079_v27 = vshrl.u32 %v2438_v8, 16  ;;  %v1082_v28 = vshll.u32 %v2438_v8, 16  ;;  %v3058_v59 = vld [vmem:[%s3755_s1 + $0x10] sm:$0xff]   ;;  %v3338_v62 = vld [vmem:[%s3220_s16 + $0x20] sm:$0xf] }
  0x20   : > { %2730 = vmatpush3.bf16.msra.mxu1 %v3050_v22  ;;  %v2450_v22 = vcombine.low %v1063_v9, %v1077_v18  ;;  %v312_v25 = vrot.slane %v310_v14, 5  ;;  %v1088_v29 = vshll.u32 %v3308_v16, 16  ;;  %v1093_v32 = vshrl.u32 %v2440_v17, 16  ;;  %v3347_v2 = vld [vmem:[%s3220_s16 + $0x2c] sm:$0x1]  ;;  %v3059_v9 = vld [vmem:[%s3755_s1 + $0x150] sm:$0xff]  }
  0x21   : > { %2826 = vmatpush3.bf16.msra.mxu0 %v3051_v23  ;;  %2731 = vmatprep.subr.bf16.mxu1 %v3052_v37  ;;  %v293_v23 = vor.u32 %v292_v10, %v289_v5  ;;  %v307_v26 = vor.u32 %v306_v20, %v303_v19  ;;  %v1096_v33 = vshll.u32 %v2440_v17, 16  ;;  %v1102_v35 = vshll.u32 %v3314_v21, 16  ;;  %v3060_v10 = vld [vmem:[%s3755_s1 + $0x18] sm:$0xff]  }
  0x22   : > { %2827 = vmatprep.subr.bf16.mxu0 %v3053_v47  ;;  %2829 = vmatprep.mubr.bf16.mxu0 %v2450_v22  ;;  %v1084_v39 = vrot.slane %v1082_v28, 5  ;;  %v1095_v41 = vrot.slane %v1093_v32, 4  ;;  %v1090_v46 = vrot.slane %v1088_v29, 5  ;;  %v1341_v57 = vrot.slane %v3254_v31, 5  ;;  %v3061_v29 = vld [vmem:[%s3755_s1 + $0x158] sm:$0xff]  }
  0x23   : > { %v294_v30 = vrot.slane %v293_v23, 4  ;;  %v308_v36 = vrot.slane %v307_v26, 4  ;;  %v1098_v42 = vrot.slane %v1096_v33, 5  ;;  %v315_v3 = vshrl.u32 %v3338_v62, 16  ;;  %v2442_v23 = vld [vmem:[%s3220_s16 + $0x28] sm:$0xf] }
  0x24   : > { %2732 = vmatpush3.bf16.msra.mxu1 %v3052_v37  ;;  %v1081_v37 = vrot.slane %v1079_v27, 4  ;;  %v318_v4 = vshll.u32 %v3338_v62, 16  ;;  %v324_v5 = vshll.u32 %v3344_v0, 16  ;;  %v338_v8 = vshll.u32 %v3347_v2, 16  ;;  %v3368_v26 = vld [vmem:[%s3220_s16 + $0x34] sm:$0x1] }
  0x25   : > { %2828 = vmatpush3.bf16.msra.mxu0 %v3053_v47  ;;  %2741 = vmatprep.subr.bf16.mxu1 %v3054_v63  ;;  %v299_v40 = vsel %vm3265_vm2, %v294_v30, %v298_v24  ;;  %v313_v44 = vsel %vm3265_vm2, %v308_v36, %v312_v25  ;;  %v1104_v47 = vrot.slane %v1102_v35, 5  ;;  %v1099_v49 = vor.u32 %v1098_v42, %v1095_v41  ;;  %v3364_v24 = vld [vmem:[%s3220_s16 + $0x2c] sm:$0x1]  ;;  %v2444_v25 = vld [vmem:[%s3220_s16 + $0x30] sm:$0xf]  ;;  %v3062_v30 = vld [vmem:[%s3755_s1 + $0x20] sm:$0xff]  }
  0x26   : > { %2837 = vmatprep.subr.bf16.mxu0 %v3297_v1  ;;  %v1085_v45 = vor.u32 %v1084_v39, %v1081_v37  ;;  %v2371_v48 = vcombine.low %v299_v40, %v313_v44  ;;  %v317_v14 = vrot.slane %v315_v3, 4  ;;  %v320_v17 = vrot.slane %v318_v4, 5 }
  0x27   : > { %v1100_v52 = vrot.slane %v1099_v49, 4  ;;  %v326_v18 = vrot.slane %v324_v5, 5  ;;  %v340_v22 = vrot.slane %v338_v8, 5  ;;  %v1107_v27 = vshrl.u32 %v2442_v23, 16  ;;  %v2446_v5 = vld [vmem:[%s3220_s16 + $0x38] sm:$0xf] }
  0x28   : > { %v1086_v50 = vrot.slane %v1085_v45, 4  ;;  %2734 = vmatmul.mubr.bf16.vlgmr.msra.gmra.mrb[0].mxu1 %v2371_v48  ;;  %v1110_v28 = vshll.u32 %v2442_v23, 16  ;;  %v1116_v33 = vshll.u32 %v3364_v24, 16  ;;  %v1121_v35 = vshrl.u32 %v2444_v25, 16 }
  0x29   : > { %2742 = vmatpush3.bf16.msra.mxu1 %v3054_v63  ;;  %v1105_v58 = vsel %vm3265_vm2, %v1100_v52, %v1104_v47  ;;  %v3341_v63 = vld [vmem:[%s3220_s16 + $0x28] sm:$0xf]  ;;  %v1124_v36 = vshll.u32 %v2444_v25, 16  ;;  %v1109_v39 = vrot.slane %v1107_v27, 4  ;;  %v1130_v41 = vshll.u32 %v3368_v26, 16 }
  0x2a   : > { %v1091_v53 = vsel %vm3265_vm2, %v1086_v50, %v1090_v46  ;;  %2743 = vmatprep.subr.bf16.mxu1 %v3056_v43  ;;  %v329_v6 = vshrl.u32 %v3341_v63, 16  ;;  %v332_v7 = vshll.u32 %v3341_v63, 16  ;;  %v1112_v40 = vrot.slane %v1110_v28, 5  ;;  %v3379_v46 = vld [vmem:[%s3220_s16 + $0x30] sm:$0xf] }
  0x2b   : > { %v2451_v61 = vcombine.low %v1091_v53, %v1105_v58  ;;  %v1123_v44 = vrot.slane %v1121_v35, 4  ;;  %v1126_v45 = vrot.slane %v1124_v36, 5  ;;  %v1132_v49 = vrot.slane %v1130_v41, 5  ;;  %v3384_v50 = vld [vmem:[%s3220_s16 + $0x38] sm:$0xf] }
  0x2c   : > { %v331_v19 = vrot.slane %v329_v6, 4  ;;  %v334_v20 = vrot.slane %v332_v7, 5  ;;  %v1113_v48 = vor.u32 %v1112_v40, %v1109_v39  ;;  %v3387_v52 = vld [vmem:[%s3220_s16 + $0x34] sm:$0x1]  ;;  %v343_v53 = vshrl.u32 %v3379_v46, 16  ;;  %v3064_v6 = vld [vmem:[%s3755_s1 + $0x28] sm:$0xff]  }
  0x2d   : > { %2830 = vmatmul.mubr.bf16.vlgmr.msra.gmra.mrb[0].mxu0 %v2451_v61  ;;  %2744 = vmatpush3.bf16.msra.mxu1 %v3056_v43  ;;  %v1118_v43 = vrot.slane %v1116_v33, 5  ;;  %v3396_v61 = vld [vmem:[%s3220_s16 + $0x3c] sm:$0x1]  ;;  %v346_v3 = vshll.u32 %v3379_v46, 16  ;;  %v352_v4 = vshll.u32 %v3387_v52, 16  ;;  %v1135_v28 = vshrl.u32 %v2446_v5, 16 }
  0x2e   : > { %2838 = vmatpush3.bf16.msra.mxu0 %v3297_v1  ;;  %2745 = vmatprep.subr.bf16.mxu1 %v3058_v59  ;;  %v321_v1 = vor.u32 %v320_v17, %v317_v14  ;;  %v335_v32 = vor.u32 %v334_v20, %v331_v19  ;;  %v1114_v8 = vrot.slane %v1113_v48, 4  ;;  %v357_v14 = vshrl.u32 %v3384_v50, 16  ;;  %v3406_v17 = vld [vmem:[%s3220_s16 + $0x3c] sm:$0x1]  ;;  %v3414_v27 = vld [vmem:[%s3220_s16 + $0x44] sm:$0x1] }
  0x2f   : > { %2839 = vmatprep.subr.bf16.mxu0 %v3057_v54  ;;  %v348_v19 = vrot.slane %v346_v3, 5  ;;  %v354_v20 = vrot.slane %v352_v4, 5  ;;  %v366_v25 = vshll.u32 %v3396_v61, 16  ;;  %v1138_v36 = vshll.u32 %v2446_v5, 16 }
  0x30   : > { %v322_v37 = vrot.slane %v321_v1, 4  ;;  %v336_v42 = vrot.slane %v335_v32, 4  ;;  %v1119_v23 = vsel %vm3265_vm2, %v1114_v8, %v1118_v43  ;;  %v359_v1 = vrot.slane %v357_v14, 4 }
  0x31   : > { %2746 = vmatpush3.bf16.msra.mxu1 %v3058_v59  ;;  %v1127_v59 = vor.u32 %v1126_v45, %v1123_v44  ;;  %v368_v40 = vrot.slane %v366_v25, 5  ;;  %v1137_v41 = vrot.slane %v1135_v28, 4  ;;  %v1140_v45 = vrot.slane %v1138_v36, 5  ;;  %v2464_v25 = vld [vmem:[%s3220_s16 + $0x18] sm:$0xe] }
  0x32   : > { %2840 = vmatpush3.bf16.msra.mxu0 %v3057_v54  ;;  %2747 = vmatprep.subr.bf16.mxu1 %v3060_v10  ;;  %v327_v47 = vsel %vm3265_vm2, %v322_v37, %v326_v18  ;;  %v3063_v54 = vld [vmem:[%s3755_s1 + $0x160] sm:$0xff]   ;;  %v341_v58 = vsel %vm3265_vm2, %v336_v42, %v340_v22  ;;  %v360_v22 = vshll.u32 %v3384_v50, 16  ;;  %v3066_v37 = vld [vmem:[%s3755_s1 + $0x30] sm:$0xff]   ;;  %v1144_v42 = vshll.u32 %v3406_v17, 16  ;;  %v3069_v28 = vld [vmem:[%s3755_s1 + $0x178] sm:$0xff]  }
  0x33   : > { %2841 = vmatprep.subr.bf16.mxu0 %v3059_v9  ;;  %v2372_v7 = vcombine.low %v327_v47, %v341_v58  ;;  %v1128_v18 = vrot.slane %v1127_v59, 4  ;;  %v1345_v47 = vrot.slane %v3258_v34, 5  ;;  %v1349_v48 = vrot.slane %v3308_v16, 5  ;;  %v3067_v58 = vld [vmem:[%s3755_s1 + $0x170] sm:$0xff]  }
  0x34   : > { %v362_v35 = vrot.slane %v360_v22, 5  ;;  %v1141_v4 = vor.u32 %v1140_v45, %v1137_v41  ;;  %v1146_v34 = vrot.slane %v1144_v42, 5  ;;  %v1353_v22 = vrot.slane %v3314_v21, 5  ;;  %v3072_v41 = vld [vmem:[%s3755_s1 + $0x180] sm:$0xff]  }
  0x35   : > { %2748 = vmatpush3.bf16.msra.mxu1 %v3060_v10  ;;  %v345_v10 = vrot.slane %v343_v53, 4  ;;  %2737 = vmatprep.mubr.bf16.mxu1 %v2372_v7  ;;  %v1133_v32 = vsel %vm3265_vm2, %v1128_v18, %v1132_v49  ;;  %v1158_v53 = vshll.u32 %v3414_v27, 16  ;;  %v2462_v7 = vld [vmem:[%s3220_s16 + $0x8] sm:$0xe]  ;;  %v2472_v36 = vrot.slane %v2464_v25, 9 }
  0x36   : > { %2842 = vmatpush3.bf16.msra.mxu0 %v3059_v9  ;;  %2749 = vmatprep.subr.bf16.mxu1 %v3062_v30  ;;  %v2448_v9 = vld [vmem:[%s3220_s16 + $0x40] sm:$0xf]  ;;  %v2452_v39 = vcombine.low %v1119_v23, %v1133_v32  ;;  %v363_v44 = vor.u32 %v362_v35, %v359_v1  ;;  %v2470_v14 = vrot.slane %v2462_v7, 9  ;;  %v1142_v18 = vrot.slane %v1141_v4, 4 }
  0x37   : > { %2843 = vmatprep.subr.bf16.mxu0 %v3061_v29  ;;  %v349_v33 = vor.u32 %v348_v19, %v345_v10  ;;  %v1152_v49 = vshll.u32 %v2448_v9, 16  ;;  %v2463_v10 = vld [vmem:[%s3220_s16 + $0x10] sm:$0xe]  ;;  %v2382_v19 = vcombine.low %v3226_v11, %v3229_v12  ;;  %v1160_v1 = vrot.slane %v1158_v53, 5  ;;  %v2465_v12 = vld [vmem:[%s3220_s16 + $0x20] sm:$0xe] }
  0x38   : > { %2833 = vmatprep.mubr.bf16.mxu0 %v2452_v39  ;;  %v364_v3 = vrot.slane %v363_v44, 4  ;;  %v1342_v32 = vsel %vm3439_vm5, %v2470_v14, %v1341_v57  ;;  %v1147_v21 = vsel %vm3265_vm2, %v1142_v18, %v1146_v34  ;;  %v3071_v35 = vld [vmem:[%s3755_s1 + $0x80] sm:$0xff]   ;;  %v1350_v42 = vsel %vm3439_vm5, %v2472_v36, %v1349_v48  ;;  %v3076_v44 = vld [vmem:[%s3755_s1 + $0x90] sm:$0xff]  }
  0x39   : > { %2750 = vmatpush3.bf16.msra.mxu1 %v3062_v30  ;;  %v3065_v30 = vld [vmem:[%s3755_s1 + $0x168] sm:$0xff]   ;;  %v350_v43 = vrot.slane %v349_v33, 4  ;;  %v1154_v16 = vrot.slane %v1152_v49, 5  ;;  %v1357_v45 = vrot.slane %v3364_v24, 5  ;;  %v1365_v53 = vrot.slane %v3406_v17, 5  ;;  %v3080_v18 = vld [vmem:[%s3755_s1 + $0xa0] sm:$0xff]  }
  0x3a   : > { %2844 = vmatpush3.bf16.msra.mxu0 %v3061_v29  ;;  %2751 = vmatprep.subr.bf16.mxu1 %v3064_v6  ;;  %v1149_v29 = vshrl.u32 %v2448_v9, 16  ;;  %v1369_v24 = vrot.slane %v3414_v27, 5  ;;  %v685_v34 = vrot.slane %v3238_v15, 5  ;;  %v689_v17 = vrot.slane %v3283_v56, 5  ;;  %v653_v15 = vld [vmem:[%s3220_s16 + $0x8] sm:$0xe] }
  0x3b   : > { %2845 = vmatprep.subr.bf16.mxu0 %v3063_v54  ;;  %v355_v59 = vsel %vm3265_vm2, %v350_v43, %v354_v20  ;;  %v2471_v20 = vrot.slane %v2463_v10, 9  ;;  %v3074_v43 = vld [vmem:[%s3755_s1 + $0x88] sm:$0xff]   ;;  %v3077_v10 = vld [vmem:[%s3755_s1 + $0x190] sm:$0xff]   ;;  %v2395_v14 = vrot.slane %v653_v15, 9  ;;  %v697_v36 = vrot.slane %v3344_v0, 5  ;;  %v3090_v0 = vld [vmem:[%s3755_s1 + $0xc0] sm:$0xff]  }
  0x3c   : > { %v1151_v5 = vrot.slane %v1149_v29, 4  ;;  %v1361_v29 = vrot.slane %v3368_v26, 5  ;;  %v2385_v26 = vcombine.low %v3379_v46, %v3384_v50  ;;  %v3078_v46 = vld [vmem:[%s3755_s1 + $0x98] sm:$0xff]   ;;  %v3095_v15 = vld [vmem:[%s3755_s1 + $0x1c8] sm:$0xff]  }
  0x3d   : > { %2752 = vmatpush3.bf16.msra.mxu1 %v3064_v6  ;;  %v3068_v6 = vld [vmem:[%s3755_s1 + $0x38] sm:$0xff]   ;;  %v1346_v11 = vsel %vm3439_vm5, %v2471_v20, %v1345_v47 }
  0x3e   : > { %2846 = vmatpush3.bf16.msra.mxu0 %v3063_v54  ;;  %2753 = vmatprep.subr.bf16.mxu1 %v3066_v37  ;;  %v369_v54 = vsel %vm3265_vm2, %v364_v3, %v368_v40  ;;  %v1155_v23 = vor.u32 %v1154_v16, %v1151_v5  ;;  %v2478_v57 = vcombine.low %v1342_v32, %v1346_v11  ;;  %v652_v16 = vld [vmem:[%s3220_s16] sm:$0xe]  ;;  %v3079_v20 = vld [vmem:[%s3755_s1 + $0x198] sm:$0xff]  }
  0x3f   : > { %2847 = vmatprep.subr.bf16.mxu0 %v3065_v30  ;;  %v2373_v9 = vcombine.low %v355_v59, %v369_v54  ;;  %v2383_v40 = vcombine.low %v3275_v51, %v3280_v55  ;;  %v2384_v51 = vcombine.low %v3338_v62, %v3341_v63  ;;  %v681_v55 = vrot.slane %v3232_v13, 5  ;;  %v3075_v62 = vld [vmem:[%s3755_s1 + $0x188] sm:$0xff]   ;;  %v2467_v63 = vld [vmem:[%s3220_s16 + $0x30] sm:$0xe]  ;;  %v2469_v59 = vld [vmem:[%s3220_s16 + $0x40] sm:$0xe] }
  0x40   : > { %v1156_v33 = vrot.slane %v1155_v23, 4  ;;  %v2466_v13 = vld [vmem:[%s3220_s16 + $0x28] sm:$0xe]  ;;  %v2475_v49 = vrot.slane %v2467_v63, 9  ;;  %v2477_v7 = vrot.slane %v2469_v59, 9  ;;  %v2394_v56 = vrot.slane %v652_v16, 9 }
  0x41   : > { %2754 = vmatpush3.bf16.msra.mxu1 %v3066_v37  ;;  %v2473_v37 = vrot.slane %v2465_v12, 9  ;;  %v2474_v48 = vrot.slane %v2466_v13, 9  ;;  %v693_v54 = vrot.slane %v3288_v60, 5  ;;  %v654_v23 = vld [vmem:[%s3220_s16 + $0x10] sm:$0xe] }
  0x42   : > { %2848 = vmatpush3.bf16.msra.mxu0 %v3065_v30  ;;  %2738 = vmatmul.mubr.bf16.gmra.mrb[4].mxu1 %v2373_v9  ;;  %v1161_v31 = vsel %vm3265_vm2, %v1156_v33, %v1160_v1  ;;  %v1362_v4 = vsel %vm3439_vm5, %v2475_v49, %v1361_v29  ;;  %v686_v9 = vsel %vm3439_vm5, %v2395_v14, %v685_v34  ;;  %v655_v60 = vld [vmem:[%s3220_s16 + $0x18] sm:$0xe]  ;;  %v2396_v25 = vrot.slane %v654_v23, 9  ;;  %v3082_v33 = vld [vmem:[%s3755_s1 + $0xa8] sm:$0xff]  }
  0x43   : > { %2849 = vmatprep.subr.bf16.mxu0 %v3067_v58  ;;  %2755 = vmatprep.subr.bf16.mxu1 %v3068_v6  ;;  %v2453_v39 = vcombine.low %v1147_v21, %v1161_v31  ;;  %v1354_v30 = vsel %vm3439_vm5, %v2473_v37, %v1353_v22  ;;  %v1358_v3 = vsel %vm3439_vm5, %v2474_v48, %v1357_v45  ;;  %v3091_v32 = vld [vmem:[%s3220_s16 + $0x10] ss:$8 sps:$4 sm:$0xff]   ;;  %v705_v29 = vrot.slane %v3387_v52, 5  ;;  %v3094_v49 = vld [vmem:[%s3755_s1 + $0xc8] sm:$0xff]  }
  0x44   : > { %2757 = vmatprep.mubr.bf16.mxu1 %v2382_v19  ;;  %v2479_v47 = vcombine.low %v1350_v42, %v1354_v30  ;;  %v2480_v27 = vcombine.low %v1358_v3, %v1362_v4  ;;  %v682_v19 = vsel %vm3439_vm5, %v2394_v56, %v681_v55  ;;  %v690_v11 = vsel %vm3439_vm5, %v2396_v25, %v689_v17  ;;  %v3085_v31 = vld [vmem:[%s3755_s1 + $0xb0] sm:$0xff]   ;;  %v3088_v37 = vld [vmem:[%s3755_s1 + $0xb8] sm:$0xff]   ;;  %v2516_v25 = vld [vmem:[%s3220_s16 + $0x28] sm:$0xf] }
  0x45   : > { %2756 = vmatpush3.bf16.msra.mxu1 %v3068_v6  ;;  %2834 = vmatmul.mubr.bf16.gmra.mrb[4].mxu0 %v2453_v39  ;;  %v1370_v6 = vsel %vm3439_vm5, %v2477_v7, %v1369_v24  ;;  %v2402_v1 = vcombine.low %v682_v19, %v686_v9  ;;  %v656_v39 = vld [vmem:[%s3220_s16 + $0x20] sm:$0xe]  ;;  %v3089_v45 = vld [vmem:[%s3755_s1 + $0x1b8] sm:$0xff]   ;;  %v3578_v24 = vld [vmem:[%s3220_s16 + $0x14] sm:$0x1] }
  0x46   : > { %2850 = vmatpush3.bf16.msra.mxu0 %v3067_v58  ;;  %2765 = vmatprep.subr.bf16.mxu1 %v3071_v35  ;;  %v2468_v58 = vld [vmem:[%s3220_s16 + $0x38] sm:$0xe]  ;;  %v2398_v42 = vrot.slane %v656_v39, 9  ;;  %v1720_v59 = vshll.u32 %v3578_v24, 16  ;;  %v3093_v7 = vld [vmem:[%s3220_s16 + $0x20] ss:$8 sps:$4 sm:$0xff]  }
  0x47   : > { %2851 = vmatprep.subr.bf16.mxu0 %v3069_v28  ;;  %2853 = vmatprep.mubr.bf16.mxu0 %v2478_v57  ;;  %v2476_v5 = vrot.slane %v2468_v58, 9  ;;  %v3083_v57 = vld [vmem:[%s3755_s1 + $0x1a8] sm:$0xff]   ;;  %v2512_v52 = vld [vmem:[%s3220_s16 + $0x18] sm:$0xf]  ;;  %v3097_v9 = vld [vmem:[%s3755_s1 + $0x1d0] sm:$0xff]  }
  0x48   : > { %v1725_v3 = vshrl.u32 %v2512_v52, 16  ;;  %v1728_v4 = vshll.u32 %v2512_v52, 16  ;;  %v3104_v56 = vld [vmem:[%s3220_s16 + $0x30] ss:$8 sps:$4 sm:$0xff]   ;;  %v3103_v52 = vld [vmem:[%s3755_s1 + $0x1e8] sm:$0xff]  }
  0x49   : > { %v1366_v50 = vsel %vm3439_vm5, %v2476_v5, %v1365_v53  ;;  %v2510_v53 = vld [vmem:[%s3220_s16 + $0x10] sm:$0xf]  ;;  %v3098_v23 = vld [vmem:[%s3755_s1 + $0xd8] sm:$0xff]  }
  0x4a   : > { %2852 = vmatpush3.bf16.msra.mxu0 %v3069_v28  ;;  %2758 = vmatmul.mubr.bf16.vlgmr.msra.gmra.mrb[0].mxu1 %v2383_v40  ;;  %v2481_v22 = vcombine.low %v1366_v50, %v1370_v6  ;;  %v2397_v28 = vrot.slane %v655_v60, 9  ;;  %v657_v40 = vld [vmem:[%s3220_s16 + $0x28] sm:$0xe]  ;;  %v1714_v58 = vshll.u32 %v2510_v53, 16  ;;  %v1727_v50 = vrot.slane %v1725_v3, 4 }
  0x4b   : > { %2861 = vmatprep.subr.bf16.mxu0 %v3072_v41  ;;  %2766 = vmatpush3.bf16.msra.mxu1 %v3071_v35  ;;  %v3081_v35 = vld [vmem:[%s3755_s1 + $0x1a0] sm:$0xff]   ;;  %v2399_v30 = vrot.slane %v657_v40, 9  ;;  %v1730_v6 = vrot.slane %v1728_v4, 5 }
  0x4c   : > { %2767 = vmatprep.subr.bf16.mxu1 %v3074_v43  ;;  %2761 = vmatprep.mubr.bf16.mxu1 %v2384_v51  ;;  %v694_v12 = vsel %vm3439_vm5, %v2397_v28, %v693_v54  ;;  %v658_v51 = vld [vmem:[%s3220_s16 + $0x30] sm:$0xe]  ;;  %v1716_v16 = vrot.slane %v1714_v58, 5  ;;  %v1722_v54 = vrot.slane %v1720_v59, 5 }
  0x4d   : > { %2854 = vmatmul.mubr.bf16.vlgmr.msra.gmra.mrb[0].mxu0 %v2479_v47  ;;  %v2403_v21 = vcombine.low %v690_v11, %v694_v12  ;;  %v709_v47 = vrot.slane %v3396_v61, 5  ;;  %v2400_v63 = vrot.slane %v658_v51, 9  ;;  %v3582_v61 = vld [vmem:[%s3220_s16 + $0x1c] sm:$0x1]  ;;  %v3106_v11 = vld [vmem:[%s3220_s16 + $0x40] ss:$8 sps:$4 sm:$0xff]  }
  0x4e   : > { %2862 = vmatpush3.bf16.msra.mxu0 %v3072_v41  ;;  %2857 = vmatprep.mubr.bf16.mxu0 %v2480_v27  ;;  %v701_v41 = vrot.slane %v3347_v2, 5  ;;  %v698_v2 = vsel %vm3439_vm5, %v2398_v42, %v697_v36  ;;  %v1734_v5 = vshll.u32 %v3582_v61, 16  ;;  %v2518_v12 = vld [vmem:[%s3220_s16 + $0x30] sm:$0xf]  ;;  %v1756_v36 = vshll.u32 %v2516_v25, 16 }
  0x4f   : > { %2768 = vmatpush3.bf16.msra.mxu1 %v3074_v43  ;;  %2863 = vmatprep.subr.bf16.mxu0 %v3075_v62  ;;  %v3086_v43 = vld [vmem:[%s3755_s1 + $0x1b0] sm:$0xff]   ;;  %v706_v34 = vsel %vm3439_vm5, %v2400_v63, %v705_v29  ;;  %v1767_v40 = vshrl.u32 %v2518_v12, 16  ;;  %v3627_v51 = vld [vmem:[%s3220_s16 + $0x24] sm:$0x1] }
  0x50   : > { %2769 = vmatprep.subr.bf16.mxu1 %v3076_v44  ;;  %v702_v55 = vsel %vm3439_vm5, %v2399_v30, %v701_v41  ;;  %v1736_v19 = vrot.slane %v1734_v5, 5  ;;  %v1770_v41 = vshll.u32 %v2518_v12, 16  ;;  %v1758_v29 = vrot.slane %v1756_v36, 5  ;;  %v2524_v5 = vld [vmem:[%s3220_s16 + $0x48] sm:$0xf]  ;;  %v3109_v12 = vld [vmem:[%s3755_s1 + $0x1f8] sm:$0xff]  }
  0x51   : > { %v2404_v13 = vcombine.low %v698_v2, %v702_v55  ;;  %v3630_v2 = vld [vmem:[%s3220_s16 + $0x2c] sm:$0x1]  ;;  %v1748_v58 = vshll.u32 %v3627_v51, 16 }
  0x52   : > { %2762 = vmatmul.mubr.bf16.gmra.mrb[4].mxu1 %v2385_v26  ;;  %2864 = vmatpush3.bf16.msra.mxu0 %v3075_v62  ;;  %v3092_v62 = vld [vmem:[%s3755_s1 + $0x1c0] sm:$0xff]   ;;  %v1711_v26 = vshrl.u32 %v2510_v53, 16  ;;  %v1772_v63 = vrot.slane %v1770_v41, 5  ;;  %v1762_v59 = vshll.u32 %v3630_v2, 16 }
  0x53   : > { %2770 = vmatpush3.bf16.msra.mxu1 %v3076_v44  ;;  %2865 = vmatprep.subr.bf16.mxu0 %v3077_v10  ;;  %v659_v44 = vld [vmem:[%s3220_s16 + $0x38] sm:$0xe]  ;;  %v2522_v53 = vld [vmem:[%s3220_s16 + $0x40] sm:$0xf] }
  0x54   : > { %2771 = vmatprep.subr.bf16.mxu1 %v3078_v46  ;;  %2781 = vmatprep.mubr.bf16.mxu1 %v2402_v1  ;;  %v2401_v48 = vrot.slane %v659_v44, 9  ;;  %v1713_v27 = vrot.slane %v1711_v26, 4  ;;  %v2514_v1 = vld [vmem:[%s3220_s16 + $0x20] sm:$0xf]  ;;  %v3105_v26 = vld [vmem:[%s3755_s1 + $0xf0] sm:$0xff]  }
  0x55   : > { %2858 = vmatmul.mubr.bf16.gmra.mrb[4].mxu0 %v2481_v22 }
  0x56   : > { %2866 = vmatpush3.bf16.msra.mxu0 %v3077_v10  ;;  %2877 = vmatprep.mubr.bf16.mxu0 %v3091_v32  ;;  %v710_v17 = vsel %vm3439_vm5, %v2401_v48, %v709_v47  ;;  %v1717_v10 = vor.u32 %v1716_v16, %v1713_v27  ;;  %v3633_v47 = vld [vmem:[%s3220_s16 + $0x34] sm:$0x1]  ;;  %v1798_v27 = vshll.u32 %v2522_v53, 16 }
  0x57   : > { %2772 = vmatpush3.bf16.msra.mxu1 %v3078_v46  ;;  %2867 = vmatprep.subr.bf16.mxu0 %v3079_v20  ;;  %v3096_v46 = vld [vmem:[%s3755_s1 + $0xd0] sm:$0xff]   ;;  %v2405_v14 = vcombine.low %v706_v34, %v710_v17  ;;  %v1776_v3 = vshll.u32 %v3633_v47, 16  ;;  %v1795_v17 = vshrl.u32 %v2522_v53, 16  ;;  %v2539_v53 = vld [vmem:[%s3220_s16 + $0x18] sm:$0xe] }
  0x58   : > { %2773 = vmatprep.subr.bf16.mxu1 %v3080_v18  ;;  %v1718_v22 = vrot.slane %v1717_v10, 4 }
  0x5a   : > { %2868 = vmatpush3.bf16.msra.mxu0 %v3079_v20  ;;  %v3110_v20 = vld [vmem:[%s3220_s16 + $0x8] ss:$8 sps:$4 sm:$0xff]   ;;  %v1723_v28 = vsel %vm3265_vm2, %v1718_v22, %v1722_v54 }
  0x5b   : > { %2774 = vmatpush3.bf16.msra.mxu1 %v3080_v18  ;;  %2869 = vmatprep.subr.bf16.mxu0 %v3081_v35  ;;  %v1731_v18 = vor.u32 %v1730_v6, %v1727_v50  ;;  %v1809_v50 = vshrl.u32 %v2524_v5, 16  ;;  %v1812_v6 = vshll.u32 %v2524_v5, 16  ;;  %v2547_v5 = vrot.slane %v2539_v53, 9 }
  0x5c   : > { %2775 = vmatprep.subr.bf16.mxu1 %v3082_v33 }
  0x5d   : > { %v1732_v60 = vrot.slane %v1731_v18, 4  ;;  %v1764_v18 = vrot.slane %v1762_v59, 5  ;;  %v3115_v59 = vld [vmem:[%s3220_s16 + $0x38] ss:$8 sps:$4 sm:$0xff]  }
  0x5e   : > { %2870 = vmatpush3.bf16.msra.mxu0 %v3081_v35  ;;  %v1739_v35 = vshrl.u32 %v2514_v1, 16 }
  0x5f   : > { %2776 = vmatpush3.bf16.msra.mxu1 %v3082_v33  ;;  %2871 = vmatprep.subr.bf16.mxu0 %v3083_v57  ;;  %v1737_v32 = vsel %vm3265_vm2, %v1732_v60, %v1736_v19  ;;  %v3100_v33 = vld [vmem:[%s3755_s1 + $0xe0] sm:$0xff]   ;;  %v3660_v60 = vld [vmem:[%s3220_s16 + $0x4c] sm:$0x1] }
  0x60   : > { %2777 = vmatprep.subr.bf16.mxu1 %v3085_v31  ;;  %v2526_v39 = vcombine.low %v1723_v28, %v1737_v32  ;;  %v1741_v55 = vrot.slane %v1739_v35, 4  ;;  %v1811_v28 = vrot.slane %v1809_v50, 4  ;;  %v1814_v32 = vrot.slane %v1812_v6, 5  ;;  %v3111_v35 = vld [vmem:[%s3220_s16 + $0x18] ss:$8 sps:$4 sm:$0xff]   ;;  %v3119_v6 = vld [vmem:[%s3755_s1 + $0x228] sm:$0xff]  }
  0x62   : > { %2872 = vmatpush3.bf16.msra.mxu0 %v3083_v57  ;;  %v1753_v57 = vshrl.u32 %v2516_v25, 16  ;;  %v1800_v25 = vrot.slane %v1798_v27, 5 }
  0x63   : > { %2778 = vmatpush3.bf16.msra.mxu1 %v3085_v31  ;;  %2873 = vmatprep.subr.bf16.mxu0 %v3086_v43  ;;  %v1742_v31 = vshll.u32 %v2514_v1, 16  ;;  %v1797_v1 = vrot.slane %v1795_v17, 4 }
  0x64   : > { %2779 = vmatprep.subr.bf16.mxu1 %v3088_v37 }
  0x65   : > { %v1744_v44 = vrot.slane %v1742_v31, 5 }
  0x66   : > { %2874 = vmatpush3.bf16.msra.mxu0 %v3086_v43  ;;  %v3101_v43 = vld [vmem:[%s3755_s1 + $0x1e0] sm:$0xff]  }
  0x67   : > { %2780 = vmatpush3.bf16.msra.mxu1 %v3088_v37  ;;  %2875 = vmatprep.subr.bf16.mxu0 %v3089_v45  ;;  %v3099_v37 = vld [vmem:[%s3755_s1 + $0x1d8] sm:$0xff]  }
  0x68   : > { %2789 = vmatprep.subr.bf16.mxu1 %v3090_v0 }
  0x6a   : > { %2782 = vmatmul.mubr.bf16.vlgmr.msra.gmra.mrb[0].mxu1 %v2403_v21  ;;  %2876 = vmatpush3.bf16.msra.mxu0 %v3089_v45  ;;  %v2520_v21 = vld [vmem:[%s3220_s16 + $0x38] sm:$0xf]  ;;  %v1755_v45 = vrot.slane %v1753_v57, 4 }
  0x6b   : > { %2790 = vmatpush3.bf16.msra.mxu1 %v3090_v0  ;;  %2785 = vmatprep.mubr.bf16.mxu1 %v2404_v13  ;;  %v1781_v42 = vshrl.u32 %v2520_v21, 16  ;;  %v1784_v30 = vshll.u32 %v2520_v21, 16  ;;  %v3102_v0 = vld [vmem:[%s3755_s1 + $0xe8] sm:$0xff]   ;;  %v1769_v13 = vrot.slane %v1767_v40, 4  ;;  %v2542_v21 = vld [vmem:[%s3220_s16 + $0x30] sm:$0xe] }
  0x6c   : > { %2791 = vmatprep.subr.bf16.mxu1 %v3094_v49  ;;  %2885 = vmatprep.subr.bf16.mxu0 %v3092_v62  ;;  %v1759_v34 = vor.u32 %v1758_v29, %v1755_v45 }
  0x6d   : > { %2878 = vmatmul.mubr.bf16.vlgmr.msra.gmra.mrb[0].mxu0 %v3093_v7  ;;  %v1783_v48 = vrot.slane %v1781_v42, 4  ;;  %v1745_v7 = vor.u32 %v1744_v44, %v1741_v55  ;;  %v1773_v16 = vor.u32 %v1772_v63, %v1769_v13  ;;  %v1801_v42 = vor.u32 %v1800_v25, %v1797_v1 }
  0x6e   : > { %2886 = vmatpush3.bf16.msra.mxu0 %v3092_v62  ;;  %2881 = vmatprep.mubr.bf16.mxu0 %v3104_v56  ;;  %v3636_v62 = vld [vmem:[%s3220_s16 + $0x3c] sm:$0x1]  ;;  %v3107_v56 = vld [vmem:[%s3755_s1 + $0x1f0] sm:$0xff]   ;;  %v1760_v54 = vrot.slane %v1759_v34, 4  ;;  %v2017_v55 = vrot.slane %v3633_v47, 5  ;;  %v2009_v25 = vrot.slane %v3627_v51, 5 }
  0x6f   : > { %2792 = vmatpush3.bf16.msra.mxu1 %v3094_v49  ;;  %2887 = vmatprep.subr.bf16.mxu0 %v3095_v15  ;;  %v1786_v49 = vrot.slane %v1784_v30, 5  ;;  %v1790_v4 = vshll.u32 %v3636_v62, 16  ;;  %v1746_v10 = vrot.slane %v1745_v7, 4  ;;  %v1774_v19 = vrot.slane %v1773_v16, 4  ;;  %v3117_v16 = vld [vmem:[%s3755_s1 + $0x218] sm:$0xff]  }
  0x70   : > { %2793 = vmatprep.subr.bf16.mxu1 %v3096_v46  ;;  %v1765_v57 = vsel %vm3265_vm2, %v1760_v54, %v1764_v18  ;;  %v1815_v30 = vor.u32 %v1814_v32, %v1811_v28  ;;  %v2021_v45 = vrot.slane %v3636_v62, 5  ;;  %v2005_v7 = vrot.slane %v3582_v61, 5 }
  0x71   : > { %v2029_v54 = vrot.slane %v3660_v60, 5  ;;  %v2013_v32 = vrot.slane %v3630_v2, 5 }
  0x72   : > { %2786 = vmatmul.mubr.bf16.gmra.mrb[4].mxu1 %v2405_v14  ;;  %2888 = vmatpush3.bf16.msra.mxu0 %v3095_v15  ;;  %v3108_v15 = vld [vmem:[%s3755_s1 + $0xf8] sm:$0xff]   ;;  %v1750_v14 = vrot.slane %v1748_v58, 5  ;;  %v3116_v58 = vld [vmem:[%s3755_s1 + $0x210] sm:$0xff]   ;;  %v2006_v61 = vsel %vm3439_vm5, %v2547_v5, %v2005_v7 }
  0x73   : > { %2794 = vmatpush3.bf16.msra.mxu1 %v3096_v46  ;;  %2805 = vmatprep.mubr.bf16.mxu1 %v3110_v20  ;;  %v1787_v46 = vor.u32 %v1786_v49, %v1783_v48  ;;  %v1778_v20 = vrot.slane %v1776_v3, 5  ;;  %v2538_v49 = vld [vmem:[%s3220_s16 + $0x10] sm:$0xe] }
  0x74   : > { %2795 = vmatprep.subr.bf16.mxu1 %v3098_v23  ;;  %2889 = vmatprep.subr.bf16.mxu0 %v3097_v9  ;;  %v1751_v31 = vsel %vm3265_vm2, %v1746_v10, %v1750_v14  ;;  %v2546_v3 = vrot.slane %v2538_v49, 9  ;;  %v2545_v10 = vld [vmem:[%s3220_s16 + $0x48] sm:$0xe] }
  0x75   : > { %2882 = vmatmul.mubr.bf16.gmra.mrb[4].mxu0 %v3106_v11  ;;  %v1788_v22 = vrot.slane %v1787_v46, 4  ;;  %v3112_v11 = vld [vmem:[%s3755_s1 + $0x200] sm:$0xff]   ;;  %v1779_v40 = vsel %vm3265_vm2, %v1774_v19, %v1778_v20  ;;  %v2527_v29 = vcombine.low %v1751_v31, %v1765_v57  ;;  %v2553_v19 = vrot.slane %v2545_v10, 9  ;;  %v3121_v20 = vld [vmem:[%s3755_s1 + $0x238] sm:$0xff]  }
  0x76   : > { %2890 = vmatpush3.bf16.msra.mxu0 %v3097_v9  ;;  %2901 = vmatprep.mubr.bf16.mxu0 %v2526_v39  ;;  %v1792_v9 = vrot.slane %v1790_v4, 5  ;;  %v3114_v39 = vld [vmem:[%s3220_s16 + $0x28] ss:$8 sps:$4 sm:$0xff]   ;;  %v2001_v4 = vrot.slane %v3578_v24, 5 }
  0x77   : > { %2796 = vmatpush3.bf16.msra.mxu1 %v3098_v23  ;;  %2891 = vmatprep.subr.bf16.mxu0 %v3099_v37  ;;  %v3657_v23 = vld [vmem:[%s3220_s16 + $0x44] sm:$0x1] }
  0x78   : > { %2797 = vmatprep.subr.bf16.mxu1 %v3100_v33  ;;  %v1804_v36 = vshll.u32 %v3657_v23, 16  ;;  %v1793_v41 = vsel %vm3265_vm2, %v1788_v22, %v1792_v9  ;;  %v2002_v24 = vsel %vm3439_vm5, %v2546_v3, %v2001_v4  ;;  %v2025_v14 = vrot.slane %v3657_v23, 5  ;;  %v2540_v22 = vld [vmem:[%s3220_s16 + $0x20] sm:$0xe]  ;;  %v2541_v9 = vld [vmem:[%s3220_s16 + $0x28] sm:$0xe] }
  0x79   : > { %v2528_v13 = vcombine.low %v1779_v40, %v1793_v41  ;;  %v2554_v50 = vcombine.low %v2002_v24, %v2006_v61  ;;  %v2030_v23 = vsel %vm3439_vm5, %v2553_v19, %v2029_v54  ;;  %v2549_v28 = vrot.slane %v2541_v9, 9 }
  0x7a   : > { %2892 = vmatpush3.bf16.msra.mxu0 %v3099_v37  ;;  %v1818_v37 = vshll.u32 %v3660_v60, 16  ;;  %v1806_v63 = vrot.slane %v1804_v36, 5  ;;  %v2548_v60 = vrot.slane %v2540_v22, 9 }
  0x7b   : > { %2798 = vmatpush3.bf16.msra.mxu1 %v3100_v33  ;;  %2893 = vmatprep.subr.bf16.mxu0 %v3101_v43  ;;  %v2543_v33 = vld [vmem:[%s3220_s16 + $0x38] sm:$0xe] }
  0x7c   : > { %2799 = vmatprep.subr.bf16.mxu1 %v3102_v0  ;;  %v2551_v44 = vrot.slane %v2543_v33, 9  ;;  %v1820_v48 = vrot.slane %v1818_v37, 5 }
  0x7e   : > { %2894 = vmatpush3.bf16.msra.mxu0 %v3101_v43  ;;  %v3113_v43 = vld [vmem:[%s3755_s1 + $0x208] sm:$0xff]   ;;  %v2022_v62 = vsel %vm3439_vm5, %v2551_v44, %v2021_v45  ;;  %v2566_v44 = vld [vmem:[%s3756_s2] ss:$0 sm:$0xff] }
  0x7f   : > { %2800 = vmatpush3.bf16.msra.mxu1 %v3102_v0  ;;  %2895 = vmatprep.subr.bf16.mxu0 %v3103_v52  ;;  %v2550_v0 = vrot.slane %v2542_v21, 9  ;;  %v2014_v21 = vsel %vm3439_vm5, %v2549_v28, %v2013_v32 }
  0x80   : > { %2801 = vmatprep.subr.bf16.mxu1 %v3105_v26 }
  0x81   : > { %v2018_v47 = vsel %vm3439_vm5, %v2550_v0, %v2017_v55 }
  0x82   : > { %2896 = vmatpush3.bf16.msra.mxu0 %v3103_v52  ;;  %v1802_v52 = vrot.slane %v1801_v42, 4  ;;  %v2556_v34 = vcombine.low %v2018_v47, %v2022_v62 }
  0x83   : > { %2802 = vmatpush3.bf16.msra.mxu1 %v3105_v26  ;;  %2897 = vmatprep.subr.bf16.mxu0 %v3107_v56  ;;  %v1816_v26 = vrot.slane %v1815_v30, 4 }
  0x84   : > { %2803 = vmatprep.subr.bf16.mxu1 %v3108_v15  ;;  %v1807_v17 = vsel %vm3265_vm2, %v1802_v52, %v1806_v63 }
  0x85   : > { %v1821_v27 = vsel %vm3265_vm2, %v1816_v26, %v1820_v48 }
  0x86   : > { %2898 = vmatpush3.bf16.msra.mxu0 %v3107_v56  ;;  %v2529_v46 = vcombine.low %v1807_v17, %v1821_v27  ;;  %v2544_v56 = vld [vmem:[%s3220_s16 + $0x40] sm:$0xe] }
  0x87   : > { %2804 = vmatpush3.bf16.msra.mxu1 %v3108_v15  ;;  %2899 = vmatprep.subr.bf16.mxu0 %v3109_v12  ;;  %v3120_v15 = vld [vmem:[%s3755_s1 + $0x230] sm:$0xff]   ;;  %v2552_v18 = vrot.slane %v2544_v56, 9 }
  0x88   : > { %2933 = vmatprep.subr.bf16.mxu1 %v3112_v11 }
  0x89   : > { %v2026_v1 = vsel %vm3439_vm5, %v2552_v18, %v2025_v14 }
  0x8a   : > { %2806 = vmatmul.mubr.bf16.vlgmr.msra.gmra.mrb[0].mxu1 %v3111_v35  ;;  %2900 = vmatpush3.bf16.msra.mxu0 %v3109_v12  ;;  %v2010_v12 = vsel %vm3439_vm5, %v2548_v60, %v2009_v25 }
  0x8b   : > { %2941 = vmatpush3.bf16.msra.mxu1 %v3112_v11  ;;  %2809 = vmatprep.mubr.bf16.mxu1 %v3114_v39  ;;  %v2555_v33 = vcombine.low %v2010_v12, %v2014_v21 }
  0x8c   : > { %2934 = vmatprep.subr.bf16.mxu1 %v3113_v43  ;;  %2909 = vmatprep.subr.bf16.mxu0 %v3112_v11 }
  0x8d   : > { %2902 = vmatmul.mubr.bf16.vlgmr.msra.gmra.mrb[0].mxu0 %v2527_v29 }
  0x8e   : > { %2910 = vmatpush3.bf16.msra.mxu0 %v3112_v11  ;;  %2905 = vmatprep.mubr.bf16.mxu0 %v2528_v13  ;;  %v2557_v11 = vcombine.low %v2026_v1, %v2030_v23 }
  0x8f   : > { %2942 = vmatpush3.bf16.msra.mxu1 %v3113_v43  ;;  %2911 = vmatprep.subr.bf16.mxu0 %v3113_v43 }
  0x90   : > { %2935 = vmatprep.subr.bf16.mxu1 %v3116_v58 }
  0x92   : > { %2810 = vmatmul.mubr.bf16.gmra.mrb[4].mxu1 %v3115_v59  ;;  %2912 = vmatpush3.bf16.msra.mxu0 %v3113_v43 }
  0x93   : > { %2943 = vmatpush3.bf16.msra.mxu1 %v3116_v58  ;;  %2929 = vmatprep.mubr.bf16.mxu1 %v2556_v34 }
  0x94   : > { %2936 = vmatprep.subr.bf16.mxu1 %v3117_v16  ;;  %2913 = vmatprep.subr.bf16.mxu0 %v3116_v58 }
  0x95   : > { %2906 = vmatmul.mubr.bf16.gmra.mrb[4].mxu0 %v2529_v46 }
  0x96   : > { %2914 = vmatpush3.bf16.msra.mxu0 %v3116_v58  ;;  %2925 = vmatprep.mubr.bf16.mxu0 %v2554_v50 }
  0x97   : > { %2944 = vmatpush3.bf16.msra.mxu1 %v3117_v16  ;;  %2915 = vmatprep.subr.bf16.mxu0 %v3117_v16 }
  0x98   : > { %2937 = vmatprep.subr.bf16.mxu1 %v3118_v38 }
  0x9a   : > { %2916 = vmatpush3.bf16.msra.mxu0 %v3117_v16 }
  0x9b   : > { %2945 = vmatpush3.bf16.msra.mxu1 %v3118_v38  ;;  %2917 = vmatprep.subr.bf16.mxu0 %v3118_v38 }
  0x9c   : > { %2938 = vmatprep.subr.bf16.mxu1 %v3119_v6 }
  0x9e   : > { %2918 = vmatpush3.bf16.msra.mxu0 %v3118_v38 }
  0x9f   : > { %2946 = vmatpush3.bf16.msra.mxu1 %v3119_v6  ;;  %2919 = vmatprep.subr.bf16.mxu0 %v3119_v6 }
  0xa0   : > { %2939 = vmatprep.subr.bf16.mxu1 %v3120_v15 }
  0xa2   : > { %2920 = vmatpush3.bf16.msra.mxu0 %v3119_v6 }
  0xa3   : > { %2947 = vmatpush3.bf16.msra.mxu1 %v3120_v15  ;;  %2921 = vmatprep.subr.bf16.mxu0 %v3120_v15 }
  0xa4   : > { %2940 = vmatprep.subr.bf16.mxu1 %v3121_v20 }
  0xa6   : > { %2922 = vmatpush3.bf16.msra.mxu0 %v3120_v15 }
  0xa7   : > { %2948 = vmatpush3.bf16.msra.mxu1 %v3121_v20  ;;  %2923 = vmatprep.subr.bf16.mxu0 %v3121_v20 }
  0xaa   : > { %2930 = vmatmul.mubr.bf16.vlgmr.msra.gmra.mrb[8].mxu1 %v2557_v11  ;;  %2924 = vmatpush3.bf16.msra.mxu0 %v3121_v20 }
  0xad   : > { %2926 = vmatmul.mubr.bf16.vlgmr.msra.gmra.mrb[0].mxu0 %v2555_v33 }
 0x15d   : > { %v2807_v35 = vpop.f32.mrb[0].mxu1 }
 0x15e   : > { %v995_v51 = vpop.f32.mrb[1].mxu1 }
 0x15f   : > { %v2808_v31 = vpop.f32.mrb[2].mxu1 }
 0x160   : > { %v998_v57 = vpop.f32.mrb[3].mxu1 }
 0x165   : > { %v2811_v2 = vpop.f32.mrb[4].mxu1 }
 0x166   : > { %v1011_v36 = vpop.f32.mrb[5].mxu1 }
 0x167   : > { %v2812_v37 = vpop.f32.mrb[6].mxu1 }
 0x168   : > { %v1014_v39 = vpop.f32.mrb[7].mxu1  ;;  %v2907_v40 = vpop.f32.mrb[4].mxu0 }
 0x169   : > { %v2953_v41 = vadd.f32 %v2907_v40, %v2811_v2  ;;  %v1952_v42 = vpop.f32.mrb[5].mxu0 }
 0x16a   : > { %v2955_v30 = vadd.f32 %v1952_v42, %v1011_v36  ;;  %v2908_v43 = vpop.f32.mrb[6].mxu0 }
 0x16b   : > { %v2957_v8 = vadd.f32 %v2908_v43, %v2812_v37  ;;  %v1955_v0 = vpop.f32.mrb[7].mxu0 }
 0x16c   : > { %v2959_v55 = vadd.f32 %v1955_v0, %v1014_v39 }
 0x17d   : > { %v2931_v45 = vpop.f32.mrb[8].mxu1 }
 0x17e   : > { %v2954_v29 = vadd.f32 %v2953_v41, %v2931_v45  ;;  %v2161_v13 = vpop.f32.mrb[9].mxu1 }
 0x17f   : > { %v2956_v63 = vadd.f32 %v2955_v30, %v2161_v13  ;;  %v2932_v48 = vpop.f32.mrb[10].mxu1 }
 0x180   : > { %v2197_v49 = vadd.f32 %v2954_v29, %v2566_v44  ;;  %v2958_v53 = vadd.f32 %v2957_v8, %v2932_v48  ;;  %v2164_v52 = vpop.f32.mrb[11].mxu1  ;;  %v2927_v62 = vpop.f32.mrb[0].mxu0 }
 0x181   : > { %v2195_v26 = vadd.f32 %v2956_v63, %v2566_v44  ;;  %v2960_v47 = vadd.f32 %v2959_v55, %v2164_v52  ;;  %v2949_v3 = vadd.f32 %v2927_v62, %v2807_v35  ;;  %v2145_v4 = vpop.f32.mrb[1].mxu0 }
 0x182   : > { %v2205_v58 = vmul.f32 0.1, %v2197_v49  ;;  %v2198_v59 = vadd.f32 %v2958_v53, %v2566_v44  ;;  %v2950_v34 = vadd.f32 %v2145_v4, %v995_v51  ;;  %v2928_v17 = vpop.f32.mrb[2].mxu0 }
 0x183   : > { %v2203_v5 = vmul.f32 0.1, %v2195_v26  ;;  %v2196_v7 = vadd.f32 %v2960_v47, %v2566_v44  ;;  %v2193_v16 = vadd.f32 %v2949_v3, %v2566_v44  ;;  %v2951_v24 = vadd.f32 %v2928_v17, %v2808_v31  ;;  %v2148_v61 = vpop.f32.mrb[3].mxu0 }
 0x184   : > { %v2206_v27 = vmul.f32 0.1, %v2198_v59  ;;  %v2213_v38 = vmax.f32 %v2197_v49, %v2205_v58  ;;  %v2191_v50 = vadd.f32 %v2950_v34, %v2566_v44  ;;  %v2952_v15 = vadd.f32 %v2148_v61, %v998_v57 }
 0x185   : > { %v2204_v46 = vmul.f32 0.1, %v2196_v7  ;;  %v2201_v56 = vmul.f32 0.1, %v2193_v16  ;;  %v2211_v10 = vmax.f32 %v2195_v26, %v2203_v5  ;;  %v2194_v14 = vadd.f32 %v2951_v24, %v2566_v44 }
 0x186   : > { %v2214_v6 = vmax.f32 %v2198_v59, %v2206_v27  ;;  %v2199_v18 = vmul.f32 0.1, %v2191_v50  ;;  %v2192_v20 = vadd.f32 %v2952_v15, %v2566_v44 }
 0x187   : > { %v2212_v54 = vmax.f32 %v2196_v7, %v2204_v46  ;;  %v2202_v22 = vmul.f32 0.1, %v2194_v14  ;;  %v2209_v23 = vmax.f32 %v2193_v16, %v2201_v56 }
 0x188   : > { %v2604_v19 = vpack.c.bf16 %v2214_v6, %v2213_v38  ;;  %v2200_v1 = vmul.f32 0.1, %v2192_v20  ;;  %v2207_v25 = vmax.f32 %v2191_v50, %v2199_v18 }
 0x189   : > { %v2599_v9 = vpack.c.bf16 %v2212_v54, %v2211_v10  ;;  %v2210_v60 = vmax.f32 %v2194_v14, %v2202_v22 }
 0x18a   : > { %2608 = vst [vmem:[%s221_s8 + $0x18] sm:$0xff] %v2604_v19   ;;  %v2208_v28 = vmax.f32 %v2192_v20, %v2200_v1 }
 0x18b   : > { %2607 = vst [vmem:[%s221_s8 + $0x10] sm:$0xff] %v2599_v9   ;;  %v2594_v32 = vpack.c.bf16 %v2210_v60, %v2209_v23 }
 0x18c   : > { %v2589_v11 = vpack.c.bf16 %v2208_v28, %v2207_v25 }
 0x18d   : > { %2606 = vst [vmem:[%s221_s8 + $0x8] sm:$0xff] %v2594_v32  }
 0x18e   : > { %2590 = vst [vmem:[%s221_s8] sm:$0xff] %v2589_v11  }
 0x18f PF: > { %s13_s14 = sadd.s32 1, %s3144_s14   ;;  %s3762_s12 = smov %s3140_s13 }
 0x190   : > { %p10_p5 = scmp.ge.s32.totalorder %s13_s14, 4   ;;  %s3763_s13 = smov %s3765_s15 }
 0x192   :  { %12 = sbr.rel (!%p10_p5) target bundleno = 2 (0x2), region = 70 }

// kernel: yolo_forward.6
= control target key start
LH: loop header
LB: loop body
LE: loop exit
PB: predicated region body
PF: predicated region fallthrough
CT: control target
= control target key end

     0   :  { %8 = vsyncpa [#allocation3], 0  ;;  %s7253_s12 = smov 0   ;;  %s7255_s13 = smov 0   ;;  %s9192_s0 = inlined_call_operand.vmem [shape: bf16[2,18,18,128], index: 0, kind: input, shape index: {}]   ;;  %s9193_s1 = inlined_call_operand.vmem [shape: bf16[1152,128], index: 1, kind: input, shape index: {}]   ;;  %s9194_s2 = inlined_call_operand.hbm [shape: f32[1,128], index: 2, kind: input, shape index: {}]   ;;  %s9195_s3 = inlined_call_operand.vmem [shape: bf16[2,256,128], index: 3, kind: output, shape index: {}]  }
   0x1   :  { %s7257_s14 = smov 0  }
   0x2 LB: > { %s5400_s15 = sadd.s32 4294967295, %s7230_s14   ;;  %s23_s16 = sadd.s32 1, %s7226_s13  ;;  %s7230_s14 = sphi %s7257_s14, %s14_s14   ;;  %s7226_s13 = sphi %s7255_s13, %s9263_s13   ;;  %s7222_s12 = sphi %s7253_s12, %s9262_s12  }
   0x3   : > { %p24_p0 = scmp.ge.s32.totalorder %s23_s16, 2  ;;  %p5402_p1 = scmp.ge.s32.totalorder %s7230_s14, 1 }
   0x4   : > { %p137_p2 = scmp.lt.s32.totalorder %s7230_s14, 3  ;;  %p7278_p4 = scmp.eq.s32.totalorder %s5400_s15, 0 }
   0x5   : > { %s9265_s16 = smov (%p24_p0, %s23_s16), 0  ;;  %s7232_s19 = smov [#allocation2]  }
   0x6   : > { %p7274_p3 = pnand %p5402_p1, %p137_p2  ;;  %s159_s20 = sshll.u32 %s7232_s19, 4  ;;  %s160_s20 = int_to_ptr.vmem [resolvable:$true] %s159_s20 }
   0x7   : > { %s9210_s18 = scalar_select %p7278_p4, 1, 0 }
   0x8   : > { %s9209_s17 = scalar_select %p7274_p3, 1, 0 }
   0x9   : > { %p6955_p5 = pneg %p7274_p3  ;;  %s7176_s24 = scalar_lea.hbm %s9194_s2, 16 }
   0xa   : > { %p7177_p7 = scmp.ne.s32.totalorder %s9194_s2, %s7176_s24  ;;  %p7183_p11 = scmp.lt.u32.totalorder %s7176_s24, %s9194_s2 }
   0xb   : > { %p7286_p6 = pnand %p7278_p4, %p6955_p5 }
   0xd   : > { %p7178_p8 = pneg %p7286_p6 }
   0xf   : > { %p7179_p9 = pnand %p7178_p8, %p7177_p7 }
  0x11   : > { %p7180_p10 = pneg %p7179_p9 }
  0x13   : > { %p7185_p12 = pnand %p7183_p11, %p7180_p10 }
  0x15   : > { %7188 = shalt.err (!%p7185_p12)
}
  0x16   : > { %s7189_s29 = scalar_lea.vmem %s160_s20, 16  ;;  %s7196_s30 = scalar_lea.vmem %s160_s20, 32 }
  0x17   : > { %p7190_p13 = scmp.ne.s32.totalorder %s160_s20, %s7189_s29  ;;  %p7197_p2 = scmp.lt.s32.totalorder %s160_s20, %s160_s20 }
  0x18   : > { %p7198_p5 = scmp.lt.s32.totalorder %s7196_s30, %s7189_s29 }
  0x19   : > { %p7192_p0 = pnand %p7190_p13, %p7178_p8 }
  0x1a   : > { %p7199_p4 = por %p7198_p5, %p7197_p2 }
  0x1b   : > { %p7193_p1 = pneg %p7192_p0 }
  0x1d   : > { %p7200_p3 = pnand %p7199_p4, %p7193_p1 }
  0x1f   : > { %7203 = shalt.err (!%p7200_p3)
}
  0x20   : > { %6958 = dma.hbm_to_vmem [thread:$0]  (!%p7286_p6), %s9194_s2, 16, %s160_s20, [#allocation3]  }
  0x21   : > { %p9212_p7 = scmp.ne.s32.totalorder %s9209_s17, 0 }
  0x23   : > { %180 = sbr.rel (%p9212_p7) target bundleno = 622 (0x26e), region = 32 }
  0x2a   : > { %p9213_p9 = scmp.ne.s32.totalorder %s9210_s18, 0 }
  0x2c   : > { %7217 = dma.done.wait (%p9213_p9), [#allocation3], 16  }
  0x2d   : > { %7219 = vsyncadd (%p9213_p9), [#allocation3], 4294967280  ;;  %v6986_v0 = vld [vmem:[%s9193_s1 + $0x40] sm:$0xff]   ;;  %p211_p3 = scmp.lt.s32.totalorder %s7222_s12, 1  ;;  %v6988_v2 = vld [vmem:[%s9193_s1 + $0x48] sm:$0xff]   ;;  %vm1322_vm3 = vcmask 1042432  }
  0x2e   : > { %v6987_v1 = vld [vmem:[%s9193_s1 + $0x100] sm:$0xff]   ;;  %6246 = vmatprep.subr.bf16.mxu1 %v6986_v0  ;;  %v6989_v3 = vld [vmem:[%s9193_s1 + $0x108] sm:$0xff]   ;;  %v6990_v4 = vld [vmem:[%s9193_s1 + $0x50] sm:$0xff]   ;;  %vm293_vm0 = vsmask.f32 3328  ;;  %vm1323_vm4 = vcmask 1046532  }
  0x2f   : > { %6438 = vmatprep.subr.bf16.mxu0 %v6987_v1  ;;  %6247 = vmatpush3.bf16.msra.mxu1 %v6986_v0  ;;  %v6991_v5 = vld [vmem:[%s9193_s1 + $0x110] sm:$0xff]   ;;  %s9267_s12 = smov (!%p211_p3, %s7222_s12), 1  ;;  %v6992_v6 = vld [vmem:[%s9193_s1 + $0x58] sm:$0xff]   ;;  %vm294_vm1 = vsmask.f32 7440  ;;  %v6994_v8 = vld [vmem:[%s9193_s1 + $0x60] sm:$0xff]  }
  0x30   : > { %6439 = vmatpush3.bf16.msra.mxu0 %v6987_v1  ;;  %6248 = vmatprep.subr.bf16.mxu1 %v6988_v2  ;;  %v6993_v7 = vld [vmem:[%s9193_s1 + $0x118] sm:$0xff]   ;;  %s6950_s26 = smul.u32 216, %s9267_s12  ;;  %v6995_v9 = vld [vmem:[%s9193_s1 + $0x120] sm:$0xff]   ;;  %v6996_v10 = vld [vmem:[%s9193_s1 + $0x68] sm:$0xff]  }
  0x31   : > { %6440 = vmatprep.subr.bf16.mxu0 %v6989_v3  ;;  %v6997_v11 = vld [vmem:[%s9193_s1 + $0x128] sm:$0xff]   ;;  %v6998_v23 = vld [vmem:[%s9193_s1 + $0x70] sm:$0xff]   ;;  %vm7381_vm2 = vmor %vm293_vm0, %vm294_vm1 }
  0x32   : > { %s7350_s6 = scalar_lea.vmem %s9192_s0, %s6950_s26  ;;  %v6999_v24 = vld [vmem:[%s9193_s1 + $0x130] sm:$0xff]   ;;  %v7000_v47 = vld [vmem:[%s9193_s1 + $0x78] sm:$0xff]   ;;  %vm7628_vm5 = vmor %vm1322_vm3, %vm1323_vm4 }
  0x33   : > { %6249 = vmatpush3.bf16.msra.mxu1 %v6988_v2  ;;  %v229_v12 = vld [vmem:[%s7350_s6] sm:$0xf]  ;;  %v230_v13 = vld [vmem:[%s7350_s6 + $0x4] sm:$0xf]  ;;  %v277_v14 = vld [vmem:[%s7350_s6 + $0x8] sm:$0x1] }
  0x34   : > { %6441 = vmatpush3.bf16.msra.mxu0 %v6989_v3  ;;  %6250 = vmatprep.subr.bf16.mxu1 %v6990_v4  ;;  %v297_v15 = vshrl.u32 %v229_v12, 16  ;;  %v300_v16 = vshll.u32 %v229_v12, 16  ;;  %v306_v17 = vshll.u32 %v230_v13, 16  ;;  %v310_v18 = vshrl.u32 %v230_v13, 16  ;;  %v5555_v19 = vld [vmem:[%s7350_s6 + $0xc] sm:$0xf] }
  0x35   : > { %6442 = vmatprep.subr.bf16.mxu0 %v6991_v5  ;;  %v316_v20 = vshll.u32 %v277_v14, 16  ;;  %v7363_v21 = vld [vmem:[%s7350_s6 + $0x10] sm:$0xf]  ;;  %v7366_v22 = vld [vmem:[%s7350_s6 + $0x14] sm:$0x1]  ;;  %v2193_v30 = vshrl.u32 %v5555_v19, 16 }
  0x36   : > { %v299_v25 = vrot.slane %v297_v15, 4  ;;  %v302_v26 = vrot.slane %v300_v16, 5  ;;  %v308_v27 = vrot.slane %v306_v17, 5  ;;  %v312_v28 = vrot.slane %v310_v18, 4  ;;  %v231_v33 = vld [vmem:[%s7350_s6 + $0xc] sm:$0xf] }
  0x37   : > { %6251 = vmatpush3.bf16.msra.mxu1 %v6990_v4  ;;  %v318_v29 = vrot.slane %v316_v20, 5  ;;  %v2196_v31 = vshll.u32 %v5555_v19, 16  ;;  %v2202_v32 = vshll.u32 %v7363_v21, 16  ;;  %v2206_v36 = vshrl.u32 %v7363_v21, 16  ;;  %v232_v38 = vld [vmem:[%s7350_s6 + $0x10] sm:$0xf] }
  0x38   : > { %6443 = vmatpush3.bf16.msra.mxu0 %v6991_v5  ;;  %6252 = vmatprep.subr.bf16.mxu1 %v6992_v6  ;;  %v303_v34 = vor.u32 %v302_v26, %v299_v25  ;;  %v313_v35 = vor.u32 %v312_v28, %v308_v27  ;;  %v2212_v37 = vshll.u32 %v7366_v22, 16  ;;  %v2195_v40 = vrot.slane %v2193_v30, 4  ;;  %v278_v49 = vld [vmem:[%s7350_s6 + $0x14] sm:$0x1]  ;;  %v7001_v53 = vld [vmem:[%s9193_s1 + $0x138] sm:$0xff]   ;;  %v7002_v12 = vld [vmem:[%s9193_s1] sm:$0xff]  }
  0x39   : > { %6444 = vmatprep.subr.bf16.mxu0 %v6993_v7  ;;  %v2198_v41 = vrot.slane %v2196_v31, 5  ;;  %v2204_v42 = vrot.slane %v2202_v32, 5  ;;  %v2208_v45 = vrot.slane %v2206_v36, 4  ;;  %v321_v50 = vshrl.u32 %v231_v33, 16  ;;  %v5558_v58 = vld [vmem:[%s7350_s6 + $0x18] sm:$0xf] }
  0x3a   : > { %v304_v43 = vrot.slane %v303_v34, 4  ;;  %v314_v44 = vrot.slane %v313_v35, 4  ;;  %v2214_v46 = vrot.slane %v2212_v37, 5  ;;  %v324_v51 = vshll.u32 %v231_v33, 16  ;;  %v7398_v59 = vld [vmem:[%s7350_s6 + $0x1c] sm:$0xf] }
  0x3b   : > { %6253 = vmatpush3.bf16.msra.mxu1 %v6992_v6  ;;  %v2199_v48 = vor.u32 %v2198_v41, %v2195_v40  ;;  %v330_v52 = vshll.u32 %v232_v38, 16  ;;  %v2209_v56 = vor.u32 %v2208_v45, %v2204_v42  ;;  %v334_v57 = vshrl.u32 %v232_v38, 16  ;;  %v7401_v0 = vld [vmem:[%s7350_s6 + $0x20] sm:$0x1]  ;;  %v233_v25 = vld [vmem:[%s7350_s6 + $0x18] sm:$0xf] }
  0x3c   : > { %6445 = vmatpush3.bf16.msra.mxu0 %v6993_v7  ;;  %6254 = vmatprep.subr.bf16.mxu1 %v6994_v8  ;;  %v309_v54 = vsel %vm7381_vm2, %v304_v43, %v308_v27  ;;  %v319_v55 = vsel %vm7381_vm2, %v314_v44, %v318_v29  ;;  %v323_v62 = vrot.slane %v321_v50, 4  ;;  %v326_v63 = vrot.slane %v324_v51, 5  ;;  %v7414_v14 = vld [vmem:[%s9193_s1 + $0x140] sm:$0xff]   ;;  %v234_v30 = vld [vmem:[%s7350_s6 + $0x1c] sm:$0xf]  ;;  %v7005_v43 = vld [vmem:[%s9193_s1 + $0x8] sm:$0xff]  }
  0x3d   : > { %6446 = vmatprep.subr.bf16.mxu0 %v6995_v9  ;;  %v5411_v60 = vcombine.low %v309_v54, %v319_v55  ;;  %v2200_v61 = vrot.slane %v2199_v48, 4  ;;  %v2210_v1 = vrot.slane %v2209_v56, 4  ;;  %v332_v2 = vrot.slane %v330_v52, 5  ;;  %v279_v35 = vld [vmem:[%s7350_s6 + $0x20] sm:$0x1] }
  0x3e   : > { %v336_v3 = vrot.slane %v334_v57, 4  ;;  %v340_v4 = vshll.u32 %v278_v49, 16  ;;  %v2966_v6 = vrot.slane %v7366_v22, 5  ;;  %v327_v7 = vor.u32 %v326_v63, %v323_v62  ;;  %v5561_v36 = vld [vmem:[%s7350_s6 + $0x24] sm:$0xf]  ;;  %v7008_v63 = vld [vmem:[%s9193_s1 + $0x10] sm:$0xff]  }
  0x3f   : > { %6255 = vmatpush3.bf16.msra.mxu1 %v6994_v8  ;;  %v2205_v5 = vsel %vm7381_vm2, %v2200_v61, %v2204_v42  ;;  %v2217_v8 = vshrl.u32 %v5558_v58, 16  ;;  %6262 = vmatprep.mubr.bf16.mxu1 %v5411_v60  ;;  %v2220_v13 = vshll.u32 %v5558_v58, 16  ;;  %v2226_v18 = vshll.u32 %v7398_v59, 16  ;;  %v7435_v42 = vld [vmem:[%s7350_s6 + $0x28] sm:$0xf] }
  0x40   : > { %6447 = vmatpush3.bf16.msra.mxu0 %v6995_v9  ;;  %6256 = vmatprep.subr.bf16.mxu1 %v6996_v10  ;;  %v2215_v9 = vsel %vm7381_vm2, %v2210_v1, %v2214_v46  ;;  %v328_v16 = vrot.slane %v327_v7, 4  ;;  %v2970_v28 = vrot.slane %v7398_v59, 5  ;;  %v2973_v29 = vrot.slane %v7401_v0, 5  ;;  %v7441_v48 = vld [vmem:[%s7350_s6 + $0x2c] sm:$0x1] }
  0x41   : > { %6448 = vmatprep.subr.bf16.mxu0 %v6997_v11  ;;  %v5603_v15 = vcombine.low %v2205_v5, %v2215_v9  ;;  %v2219_v17 = vrot.slane %v2217_v8, 4  ;;  %v2222_v20 = vrot.slane %v2220_v13, 5  ;;  %v2228_v27 = vrot.slane %v2226_v18, 5  ;;  %v235_v62 = vld [vmem:[%s7350_s6 + $0x24] sm:$0xf] }
  0x42   : > { %v333_v26 = vsel %vm7381_vm2, %v328_v16, %v332_v2  ;;  %v7432_v38 = vrot.slane %v2970_v28, 4  ;;  %v345_v40 = vshrl.u32 %v233_v25, 16  ;;  %v348_v41 = vshll.u32 %v233_v25, 16  ;;  %v236_v7 = vld [vmem:[%s7350_s6 + $0x28] sm:$0xf] }
  0x43   : > { %6257 = vmatpush3.bf16.msra.mxu1 %v6996_v10  ;;  %v337_v10 = vor.u32 %v336_v3, %v332_v2  ;;  %6454 = vmatprep.mubr.bf16.mxu0 %v5603_v15  ;;  %v2223_v32 = vor.u32 %v2222_v20, %v2219_v17  ;;  %v354_v46 = vshll.u32 %v234_v30, 16  ;;  %v364_v51 = vshll.u32 %v279_v35, 16  ;;  %v7004_v2 = vld [vmem:[%s9193_s1 + $0x148] sm:$0xff]   ;;  %v5564_v13 = vld [vmem:[%s7350_s6 + $0x30] sm:$0xf]  ;;  %v7011_v15 = vld [vmem:[%s9193_s1 + $0x18] sm:$0xff]  }
  0x44   : > { %6449 = vmatpush3.bf16.msra.mxu0 %v6997_v11  ;;  %6258 = vmatprep.subr.bf16.mxu1 %v6998_v23  ;;  %v342_v11 = vrot.slane %v340_v4, 5  ;;  %v347_v49 = vrot.slane %v345_v40, 4  ;;  %v350_v50 = vrot.slane %v348_v41, 5  ;;  %v2241_v52 = vshrl.u32 %v5561_v36, 16 }
  0x45   : > { %6450 = vmatprep.subr.bf16.mxu0 %v6999_v24  ;;  %v338_v19 = vrot.slane %v337_v10, 4  ;;  %v2224_v44 = vrot.slane %v2223_v32, 4  ;;  %v356_v55 = vrot.slane %v354_v46, 5  ;;  %v366_v58 = vrot.slane %v364_v51, 5  ;;  %v7014_v51 = vld [vmem:[%s9193_s1 + $0x20] sm:$0xff]  }
  0x46   : > { %v351_v57 = vor.u32 %v350_v50, %v347_v49  ;;  %v2243_v60 = vrot.slane %v2241_v52, 4  ;;  %v2244_v61 = vshll.u32 %v5561_v36, 16  ;;  %v2250_v4 = vshll.u32 %v7435_v42, 16  ;;  %v7469_v36 = vld [vmem:[%s7350_s6 + $0x34] sm:$0xf] }
  0x47   : > { %6259 = vmatpush3.bf16.msra.mxu1 %v6998_v23  ;;  %v2230_v23 = vshrl.u32 %v7398_v59, 16  ;;  %v343_v31 = vsel %vm7381_vm2, %v338_v19, %v342_v11  ;;  %v2254_v5 = vshrl.u32 %v7435_v42, 16  ;;  %v2260_v11 = vshll.u32 %v7441_v48, 16  ;;  %v237_v50 = vld [vmem:[%s7350_s6 + $0x30] sm:$0xf] }
  0x48   : > { %6451 = vmatpush3.bf16.msra.mxu0 %v6999_v24  ;;  %6260 = vmatprep.subr.bf16.mxu1 %v7000_v47  ;;  %v2236_v24 = vshll.u32 %v7401_v0, 16  ;;  %v5412_v37 = vcombine.low %v333_v26, %v343_v31  ;;  %v352_v9 = vrot.slane %v351_v57, 4  ;;  %v2246_v10 = vrot.slane %v2244_v61, 5  ;;  %v7017_v0 = vld [vmem:[%s9193_s1 + $0x188] sm:$0xff]  }
  0x49   : > { %6452 = vmatprep.subr.bf16.mxu0 %v7001_v53  ;;  %v2232_v33 = vrot.slane %v2230_v23, 4  ;;  %v2252_v17 = vrot.slane %v2250_v4, 5  ;;  %v2256_v18 = vrot.slane %v2254_v5, 4  ;;  %v369_v19 = vshrl.u32 %v235_v62, 16 }
  0x4a   : > { %v2238_v34 = vrot.slane %v2236_v24, 5  ;;  %v357_v20 = vsel %vm7381_vm2, %v352_v9, %v356_v55  ;;  %v2247_v23 = vor.u32 %v2246_v10, %v2243_v60  ;;  %v2262_v24 = vrot.slane %v2260_v11, 5  ;;  %v5567_v10 = vld [vmem:[%s7350_s6 + $0x3c] sm:$0xf]  ;;  %v7009_v11 = vld [vmem:[%s9193_s1 + $0x160] sm:$0xff]  }
  0x4b   : > { %6261 = vmatpush3.bf16.msra.mxu1 %v7000_v47  ;;  %v2233_v45 = vor.u32 %v2232_v33, %v2228_v27  ;;  %v358_v47 = vshrl.u32 %v234_v30, 16  ;;  %v372_v25 = vshll.u32 %v235_v62, 16  ;;  %v371_v30 = vrot.slane %v369_v19, 4  ;;  %v238_v62 = vld [vmem:[%s7350_s6 + $0x34] sm:$0xf] }
  0x4c   : > { %6453 = vmatpush3.bf16.msra.mxu0 %v7001_v53  ;;  %6294 = vmatprep.subr.bf16.mxu1 %v7002_v12  ;;  %v2229_v53 = vsel %vm7381_vm2, %v2224_v44, %v2228_v27  ;;  %v2257_v27 = vor.u32 %v2256_v18, %v2252_v17  ;;  %v378_v31 = vshll.u32 %v236_v7, 16  ;;  %v2248_v33 = vrot.slane %v2247_v23, 4 }
  0x4d   : > { %6486 = vmatprep.subr.bf16.mxu0 %v7414_v14  ;;  %v2234_v54 = vrot.slane %v2233_v45, 4  ;;  %v360_v56 = vrot.slane %v358_v47, 4  ;;  %v382_v35 = vshrl.u32 %v236_v7, 16  ;;  %v2265_v44 = vshrl.u32 %v5564_v13, 16 }
  0x4e   : > { %6263 = vmatmul.mubr.bf16.vlgmr.msra.gmra.mrb[0].mxu1 %v5412_v37  ;;  %v7006_v37 = vld [vmem:[%s9193_s1 + $0x150] sm:$0xff]   ;;  %v2258_v40 = vrot.slane %v2257_v27, 4  ;;  %v2253_v45 = vsel %vm7381_vm2, %v2248_v33, %v2252_v17  ;;  %v2268_v49 = vshll.u32 %v5564_v13, 16  ;;  %v393_v4 = vshrl.u32 %v237_v50, 16 }
  0x4f   : > { %6295 = vmatpush3.bf16.msra.mxu1 %v7002_v12  ;;  %v2239_v1 = vsel %vm7381_vm2, %v2234_v54, %v2238_v34  ;;  %v361_v3 = vor.u32 %v360_v56, %v356_v55  ;;  %v280_v12 = vld [vmem:[%s7350_s6 + $0x2c] sm:$0x1]  ;;  %v374_v34 = vrot.slane %v372_v25, 5  ;;  %v384_v47 = vrot.slane %v382_v35, 4  ;;  %v7007_v56 = vld [vmem:[%s9193_s1 + $0x158] sm:$0xff]  }
  0x50   : > { %6296 = vmatprep.subr.bf16.mxu1 %v7005_v43  ;;  %v5604_v8 = vcombine.low %v2229_v53, %v2239_v1  ;;  %v388_v41 = vshll.u32 %v280_v12, 16  ;;  %v2263_v52 = vsel %vm7381_vm2, %v2258_v40, %v2262_v24  ;;  %v2267_v54 = vrot.slane %v2265_v44, 4  ;;  %v7505_v24 = vld [vmem:[%s7350_s6 + $0x44] sm:$0x1]  ;;  %v7016_v25 = vld [vmem:[%s9193_s1 + $0x28] sm:$0xff]  }
  0x51   : > { %v362_v16 = vrot.slane %v361_v3, 4  ;;  %v375_v46 = vor.u32 %v374_v34, %v371_v30  ;;  %v2274_v55 = vshll.u32 %v7469_v36, 16  ;;  %v5605_v57 = vcombine.low %v2253_v45, %v2263_v52 }
  0x52   : > { %6455 = vmatmul.mubr.bf16.vlgmr.msra.gmra.mrb[0].mxu0 %v5604_v8  ;;  %v390_v53 = vrot.slane %v388_v41, 5  ;;  %v2270_v61 = vrot.slane %v2268_v49, 5  ;;  %v396_v9 = vshll.u32 %v237_v50, 16  ;;  %v402_v17 = vshll.u32 %v238_v62, 16  ;;  %v239_v49 = vld [vmem:[%s7350_s6 + $0x3c] sm:$0xf] }
  0x53   : > { %6297 = vmatpush3.bf16.msra.mxu1 %v7005_v43  ;;  %6487 = vmatpush3.bf16.msra.mxu0 %v7414_v14  ;;  %v367_v26 = vsel %vm7381_vm2, %v362_v16, %v366_v58  ;;  %v380_v14 = vrot.slane %v378_v31, 5  ;;  %v7475_v43 = vld [vmem:[%s7350_s6 + $0x38] sm:$0x1]  ;;  %v376_v58 = vrot.slane %v375_v46, 4  ;;  %v2276_v1 = vrot.slane %v2274_v55, 5  ;;  %v7010_v50 = vld [vmem:[%s9193_s1 + $0x168] sm:$0xff]  }
  0x54   : > { %6298 = vmatprep.subr.bf16.mxu1 %v7008_v63  ;;  %6488 = vmatprep.subr.bf16.mxu0 %v7004_v2  ;;  %v5413_v32 = vcombine.low %v357_v20, %v367_v26  ;;  %v2284_v3 = vshll.u32 %v7475_v43, 16  ;;  %v2271_v8 = vor.u32 %v2270_v61, %v2267_v54  ;;  %v395_v16 = vrot.slane %v393_v4, 4  ;;  %v240_v55 = vld [vmem:[%s7350_s6 + $0x40] sm:$0xf] }
  0x55   : > { %v385_v60 = vor.u32 %v384_v47, %v380_v14  ;;  %6458 = vmatprep.mubr.bf16.mxu0 %v5605_v57  ;;  %v381_v5 = vsel %vm7381_vm2, %v376_v58, %v380_v14  ;;  %v398_v20 = vrot.slane %v396_v9, 5  ;;  %v406_v23 = vshrl.u32 %v238_v62, 16  ;;  %v5570_v9 = vld [vmem:[%s7350_s6 + $0x48] sm:$0xf] }
  0x56   : > { %6266 = vmatprep.mubr.bf16.mxu1 %v5413_v32  ;;  %v2286_v13 = vrot.slane %v2284_v3, 5  ;;  %v2272_v19 = vrot.slane %v2271_v8, 4  ;;  %v404_v30 = vrot.slane %v402_v17, 5  ;;  %v2289_v35 = vshrl.u32 %v5567_v10, 16 }
  0x57   : > { %6299 = vmatpush3.bf16.msra.mxu1 %v7008_v63  ;;  %6489 = vmatpush3.bf16.msra.mxu0 %v7004_v2  ;;  %v281_v63 = vld [vmem:[%s7350_s6 + $0x38] sm:$0x1]  ;;  %v2278_v2 = vshrl.u32 %v7469_v36, 16  ;;  %v386_v7 = vrot.slane %v385_v60, 4  ;;  %v399_v33 = vor.u32 %v398_v20, %v395_v16  ;;  %v408_v34 = vrot.slane %v406_v23, 4 }
  0x58   : > { %6300 = vmatprep.subr.bf16.mxu1 %v7011_v15  ;;  %6490 = vmatprep.subr.bf16.mxu0 %v7006_v37  ;;  %v412_v31 = vshll.u32 %v281_v63, 16  ;;  %v2277_v32 = vsel %vm7381_vm2, %v2272_v19, %v2276_v1  ;;  %v2292_v14 = vshll.u32 %v5567_v10, 16  ;;  %v2291_v46 = vrot.slane %v2289_v35, 4  ;;  %v7012_v10 = vld [vmem:[%s9193_s1 + $0x170] sm:$0xff]  }
  0x59   : > { %v2280_v12 = vrot.slane %v2278_v2, 4  ;;  %v391_v18 = vsel %vm7381_vm2, %v386_v7, %v390_v53  ;;  %v400_v44 = vrot.slane %v399_v33, 4  ;;  %v409_v45 = vor.u32 %v408_v34, %v404_v30 }
  0x5a   : > { %v5414_v26 = vcombine.low %v381_v5, %v391_v18  ;;  %v414_v40 = vrot.slane %v412_v31, 5  ;;  %v2294_v52 = vrot.slane %v2292_v14, 5  ;;  %v2308_v54 = vshll.u32 %v7505_v24, 16  ;;  %v7020_v18 = vld [vmem:[%s9193_s1 + $0x38] sm:$0xff]   ;;  %v7546_v31 = vld [vmem:[%s7350_s6 + $0x50] sm:$0x1] }
  0x5b   : > { %6301 = vmatpush3.bf16.msra.mxu1 %v7011_v15  ;;  %6491 = vmatpush3.bf16.msra.mxu0 %v7006_v37  ;;  %v7500_v15 = vld [vmem:[%s7350_s6 + $0x40] sm:$0xf]  ;;  %v2281_v27 = vor.u32 %v2280_v12, %v2276_v1  ;;  %v405_v58 = vsel %vm7381_vm2, %v400_v44, %v404_v30  ;;  %v410_v60 = vrot.slane %v409_v45, 4  ;;  %v282_v1 = vld [vmem:[%s7350_s6 + $0x44] sm:$0x1]  ;;  %v417_v2 = vshrl.u32 %v239_v49, 16 }
  0x5c   : > { %6302 = vmatprep.subr.bf16.mxu1 %v7014_v51  ;;  %6492 = vmatprep.subr.bf16.mxu0 %v7007_v56  ;;  %v2298_v41 = vshll.u32 %v7500_v15, 16  ;;  %v2302_v47 = vshrl.u32 %v7500_v15, 16  ;;  %v2295_v62 = vor.u32 %v2294_v52, %v2291_v46  ;;  %v2310_v63 = vrot.slane %v2308_v54, 5  ;;  %v241_v14 = vld [vmem:[%s7350_s6 + $0x48] sm:$0xf]  ;;  %v7559_v54 = vld [vmem:[%s9193_s1 + $0x180] sm:$0xff]  }
  0x5d   : > { %6267 = vmatmul.mubr.bf16.gmra.mrb[4].mxu1 %v5414_v26  ;;  %v2282_v37 = vrot.slane %v2281_v27, 4  ;;  %v420_v3 = vshll.u32 %v239_v49, 16  ;;  %v415_v4 = vsel %vm7381_vm2, %v410_v60, %v414_v40  ;;  %v426_v7 = vshll.u32 %v240_v55, 16  ;;  %v7013_v26 = vld [vmem:[%s9193_s1 + $0x178] sm:$0xff]   ;;  %v283_v49 = vld [vmem:[%s7350_s6 + $0x50] sm:$0x1] }
  0x5e   : > { %v2300_v53 = vrot.slane %v2298_v41, 5  ;;  %v2304_v61 = vrot.slane %v2302_v47, 4  ;;  %v430_v8 = vshrl.u32 %v240_v55, 16  ;;  %v5415_v12 = vcombine.low %v405_v58, %v415_v4  ;;  %v242_v41 = vld [vmem:[%s7350_s6 + $0x4c] sm:$0xf] }
  0x5f   : > { %6303 = vmatpush3.bf16.msra.mxu1 %v7014_v51  ;;  %6493 = vmatpush3.bf16.msra.mxu0 %v7007_v56  ;;  %v2287_v51 = vsel %vm7381_vm2, %v2282_v37, %v2286_v13  ;;  %v7018_v56 = vld [vmem:[%s9193_s1 + $0x30] sm:$0xff]   ;;  %v2296_v13 = vrot.slane %v2295_v62, 4  ;;  %v419_v16 = vrot.slane %v417_v2, 4  ;;  %v422_v17 = vrot.slane %v420_v3, 5  ;;  %v7569_v2 = vld [vmem:[%s9193_s1 + $0x80] sm:$0xff]  }
  0x60   : > { %6304 = vmatprep.subr.bf16.mxu1 %v7016_v25  ;;  %6494 = vmatprep.subr.bf16.mxu0 %v7009_v11  ;;  %v5606_v57 = vcombine.low %v2277_v32, %v2287_v51  ;;  %v2305_v5 = vor.u32 %v2304_v61, %v2300_v53  ;;  %v428_v20 = vrot.slane %v426_v7, 5  ;;  %v432_v23 = vrot.slane %v430_v8, 4  ;;  %v7572_v8 = vld [vmem:[%s7350_s6 + $0x58] sm:$0xf] }
  0x61   : > { %6270 = vmatprep.mubr.bf16.mxu1 %v5415_v12  ;;  %v2301_v27 = vsel %vm7381_vm2, %v2296_v13, %v2300_v53  ;;  %v423_v30 = vor.u32 %v422_v17, %v419_v16  ;;  %v2313_v32 = vshrl.u32 %v5570_v9, 16  ;;  %v2316_v33 = vshll.u32 %v5570_v9, 16 }
  0x62   : > { %6459 = vmatmul.mubr.bf16.gmra.mrb[4].mxu0 %v5606_v57  ;;  %v2306_v19 = vrot.slane %v2305_v5, 4  ;;  %v433_v35 = vor.u32 %v432_v23, %v428_v20  ;;  %v2332_v53 = vshll.u32 %v7546_v31, 16  ;;  %v441_v57 = vshrl.u32 %v241_v14, 16 }
  0x63   : > { %6305 = vmatpush3.bf16.msra.mxu1 %v7016_v25  ;;  %6495 = vmatpush3.bf16.msra.mxu0 %v7009_v11  ;;  %v7535_v11 = vld [vmem:[%s7350_s6 + $0x4c] sm:$0xf]  ;;  %v436_v25 = vshll.u32 %v282_v1, 16  ;;  %v424_v45 = vrot.slane %v423_v30, 4  ;;  %v2315_v46 = vrot.slane %v2313_v32, 4  ;;  %v2318_v47 = vrot.slane %v2316_v33, 5 }
  0x64   : > { %6306 = vmatprep.subr.bf16.mxu1 %v7018_v56  ;;  %6496 = vmatprep.subr.bf16.mxu0 %v7010_v50  ;;  %v2311_v34 = vsel %vm7381_vm2, %v2306_v19, %v2310_v63  ;;  %v2322_v40 = vshll.u32 %v7535_v11, 16  ;;  %v434_v51 = vrot.slane %v433_v35, 4  ;;  %v2326_v52 = vshrl.u32 %v7535_v11, 16  ;;  %v5573_v1 = vld [vmem:[%s7350_s6 + $0x54] sm:$0xf] }
  0x65   : > { %v438_v37 = vrot.slane %v436_v25, 5  ;;  %v5607_v44 = vcombine.low %v2301_v27, %v2311_v34  ;;  %v429_v55 = vsel %vm7381_vm2, %v424_v45, %v428_v20  ;;  %v444_v58 = vshll.u32 %v241_v14, 16  ;;  %v243_v32 = vld [vmem:[%s7350_s6 + $0x54] sm:$0xf] }
  0x66   : > { %v2328_v61 = vrot.slane %v2326_v52, 4  ;;  %v2334_v62 = vrot.slane %v2332_v53, 5  ;;  %v450_v63 = vshll.u32 %v242_v41, 16  ;;  %v443_v5 = vrot.slane %v441_v57, 4 }
  0x67   : > { %6307 = vmatpush3.bf16.msra.mxu1 %v7018_v56  ;;  %6497 = vmatpush3.bf16.msra.mxu0 %v7010_v50  ;;  %v2324_v50 = vrot.slane %v2322_v40, 5  ;;  %v2319_v56 = vor.u32 %v2318_v47, %v2315_v46  ;;  %v439_v60 = vsel %vm7381_vm2, %v434_v51, %v438_v37  ;;  %v446_v7 = vrot.slane %v444_v58, 5  ;;  %v244_v40 = vld [vmem:[%s7350_s6 + $0x58] sm:$0xf]  ;;  %v284_v51 = vld [vmem:[%s7350_s6 + $0x5c] sm:$0x1] }
  0x68   : > { %6498 = vmatprep.subr.bf16.mxu0 %v7012_v10  ;;  %6308 = vmatprep.subr.bf16.mxu1 %v7020_v18  ;;  %v5416_v3 = vcombine.low %v429_v55, %v439_v60  ;;  %v454_v12 = vshrl.u32 %v242_v41, 16  ;;  %v460_v13 = vshll.u32 %v283_v49, 16  ;;  %v2337_v19 = vshrl.u32 %v5573_v1, 16 }
  0x69   : > { %6462 = vmatprep.mubr.bf16.mxu0 %v5607_v44  ;;  %v2320_v4 = vrot.slane %v2319_v56, 4  ;;  %v2329_v9 = vor.u32 %v2328_v61, %v2324_v50  ;;  %v447_v17 = vor.u32 %v446_v7, %v443_v5  ;;  %v2340_v20 = vshll.u32 %v5573_v1, 16  ;;  %v5576_v61 = vld [vmem:[%s7350_s6 + $0x60] sm:$0xf] }
  0x6a   : > { %6271 = vmatmul.mubr.bf16.gmra.mrb[8].mxu1 %v5416_v3  ;;  %v456_v25 = vrot.slane %v454_v12, 4  ;;  %v462_v27 = vrot.slane %v460_v13, 5  ;;  %v2346_v30 = vshll.u32 %v7572_v8, 16  ;;  %v2339_v34 = vrot.slane %v2337_v19, 4 }
  0x6b   : > { %6309 = vmatpush3.bf16.msra.mxu1 %v7020_v18  ;;  %6499 = vmatpush3.bf16.msra.mxu0 %v7012_v10  ;;  %v452_v10 = vrot.slane %v450_v63, 5  ;;  %v2325_v16 = vsel %vm7381_vm2, %v2320_v4, %v2324_v50  ;;  %v7578_v18 = vld [vmem:[%s7350_s6 + $0x5c] sm:$0x1]  ;;  %v2330_v23 = vrot.slane %v2329_v9, 4  ;;  %v448_v33 = vrot.slane %v447_v17, 4 }
  0x6c   : > { %6500 = vmatprep.subr.bf16.mxu0 %v7013_v26  ;;  %6342 = vmatprep.subr.bf16.mxu1 %v7569_v2  ;;  %v2342_v35 = vrot.slane %v2340_v20, 5  ;;  %v2350_v37 = vshrl.u32 %v7572_v8, 16  ;;  %v2356_v44 = vshll.u32 %v7578_v18, 16  ;;  %v465_v53 = vshrl.u32 %v243_v32, 16  ;;  %v7595_v4 = vld [vmem:[%s7350_s6 + $0x64] sm:$0xf] }
  0x6d   : > { %v2335_v14 = vsel %vm7381_vm2, %v2330_v23, %v2334_v62  ;;  %v457_v41 = vor.u32 %v456_v25, %v452_v10  ;;  %v453_v46 = vsel %vm7381_vm2, %v448_v33, %v452_v10  ;;  %v468_v55 = vshll.u32 %v243_v32, 16  ;;  %v7600_v17 = vld [vmem:[%s7350_s6 + $0x68] sm:$0x1] }
  0x6e   : > { %v5608_v45 = vcombine.low %v2325_v16, %v2335_v14  ;;  %v2343_v47 = vor.u32 %v2342_v35, %v2339_v34  ;;  %v2352_v49 = vrot.slane %v2350_v37, 4  ;;  %v2358_v52 = vrot.slane %v2356_v44, 5  ;;  %v7610_v37 = vld [vmem:[%s7350_s6 + $0x64] sm:$0xf]  ;;  %v285_v44 = vld [vmem:[%s7350_s6 + $0x68] sm:$0x1] }
  0x6f   : > { %6501 = vmatpush3.bf16.msra.mxu0 %v7013_v26  ;;  %v2348_v26 = vrot.slane %v2346_v30, 5  ;;  %v458_v50 = vrot.slane %v457_v41, 4  ;;  %v474_v58 = vshll.u32 %v244_v40, 16  ;;  %v478_v60 = vshrl.u32 %v244_v40, 16  ;;  %v7607_v30 = vld [vmem:[%s7350_s6 + $0x60] sm:$0xf] }
  0x70   : > { %6534 = vmatprep.subr.bf16.mxu0 %v7559_v54  ;;  %6463 = vmatmul.mubr.bf16.gmra.mrb[8].mxu0 %v5608_v45  ;;  %v2344_v56 = vrot.slane %v2343_v47, 4  ;;  %v467_v63 = vrot.slane %v465_v53, 4  ;;  %v470_v1 = vrot.slane %v468_v55, 5  ;;  %v484_v3 = vshll.u32 %v284_v51, 16  ;;  %v5627_v51 = vld [vmem:[%s7350_s6 + $0xc] sm:$0xe] }
  0x71   : > { %v2353_v57 = vor.u32 %v2352_v49, %v2348_v26  ;;  %v463_v62 = vsel %vm7381_vm2, %v458_v50, %v462_v27  ;;  %v476_v10 = vrot.slane %v474_v58, 5  ;;  %v480_v13 = vrot.slane %v478_v60, 4 }
  0x72   : > { %v5417_v5 = vcombine.low %v453_v46, %v463_v62  ;;  %v2349_v7 = vsel %vm7381_vm2, %v2344_v56, %v2348_v26  ;;  %v471_v12 = vor.u32 %v470_v1, %v467_v63  ;;  %v486_v16 = vrot.slane %v484_v3, 5 }
  0x73   : > { %v2354_v9 = vrot.slane %v2353_v57, 4  ;;  %v2361_v19 = vshrl.u32 %v5576_v61, 16  ;;  %v2364_v23 = vshll.u32 %v5576_v61, 16  ;;  %v2370_v25 = vshll.u32 %v7595_v4, 16  ;;  %v7624_v61 = vld [vmem:[%s7350_s6 + $0x6c] sm:$0xf] }
  0x74   : > { %6274 = vmatprep.mubr.bf16.mxu1 %v5417_v5  ;;  %v2374_v27 = vshrl.u32 %v7595_v4, 16  ;;  %v472_v33 = vrot.slane %v471_v12, 4  ;;  %v481_v34 = vor.u32 %v480_v13, %v476_v10  ;;  %v2380_v26 = vshll.u32 %v7600_v17, 16 }
  0x75   : > { %v2359_v20 = vsel %vm7381_vm2, %v2354_v9, %v2358_v52  ;;  %v2363_v35 = vrot.slane %v2361_v19, 4  ;;  %v2366_v40 = vrot.slane %v2364_v23, 5  ;;  %v2372_v14 = vrot.slane %v2370_v25, 5 }
  0x76   : > { %v5609_v32 = vcombine.low %v2349_v7, %v2359_v20  ;;  %v2376_v41 = vrot.slane %v2374_v27, 4  ;;  %v477_v45 = vsel %vm7381_vm2, %v472_v33, %v476_v10  ;;  %v482_v46 = vrot.slane %v481_v34, 4  ;;  %v7638_v20 = vld [vmem:[%s7350_s6 + $0x70] sm:$0xf]  ;;  %v286_v34 = vld [vmem:[%s7350_s6 + $0x74] sm:$0x1] }
  0x77   : > { %v489_v47 = vshrl.u32 %v7607_v30, 16  ;;  %v492_v49 = vshll.u32 %v7607_v30, 16  ;;  %v2367_v50 = vor.u32 %v2366_v40, %v2363_v35  ;;  %v2382_v53 = vrot.slane %v2380_v26, 5  ;;  %v5628_v35 = vld [vmem:[%s7350_s6 + $0x18] sm:$0xe] }
  0x78   : > { %6466 = vmatprep.mubr.bf16.mxu0 %v5609_v32  ;;  %v2377_v52 = vor.u32 %v2376_v41, %v2372_v14  ;;  %v498_v55 = vshll.u32 %v7610_v37, 16  ;;  %v487_v56 = vsel %vm7381_vm2, %v482_v46, %v486_v16  ;;  %v502_v60 = vshrl.u32 %v7610_v37, 16  ;;  %v5588_v10 = vld [vmem:[%s7350_s6 + $0x90] sm:$0xf] }
  0x79   : > { %v491_v57 = vrot.slane %v489_v47, 4  ;;  %v494_v58 = vrot.slane %v492_v49, 5  ;;  %v5418_v62 = vcombine.low %v477_v45, %v487_v56  ;;  %v2368_v63 = vrot.slane %v2367_v50, 4 }
  0x7a   : > { %v2378_v1 = vrot.slane %v2377_v52, 4  ;;  %v500_v3 = vrot.slane %v498_v55, 5  ;;  %v504_v7 = vrot.slane %v502_v60, 4  ;;  %v508_v9 = vshll.u32 %v285_v44, 16  ;;  %v7647_v44 = vld [vmem:[%s7350_s6 + $0x78] sm:$0xf] }
  0x7b   : > { %v495_v5 = vor.u32 %v494_v58, %v491_v57  ;;  %v5643_v12 = vrot.slane %v5627_v51, 9  ;;  %6275 = vmatmul.mubr.bf16.gmra.mrb[12].mxu1 %v5418_v62  ;;  %v2373_v13 = vsel %vm7381_vm2, %v2368_v63, %v2372_v14  ;;  %v2963_v19 = vrot.slane %v7363_v21, 5 }
  0x7c   : > { %v2383_v16 = vsel %vm7381_vm2, %v2378_v1, %v2382_v53  ;;  %v513_v23 = vshrl.u32 %v7624_v61, 16  ;;  %v505_v32 = vor.u32 %v504_v7, %v500_v3  ;;  %v510_v33 = vrot.slane %v508_v9, 5  ;;  %v7658_v53 = vld [vmem:[%s7350_s6 + $0x7c] sm:$0xf]  ;;  %v5629_v9 = vld [vmem:[%s7350_s6 + $0x24] sm:$0xe] }
  0x7d   : > { %v5610_v25 = vcombine.low %v2373_v13, %v2383_v16  ;;  %v496_v27 = vrot.slane %v495_v5, 4  ;;  %v2964_v40 = vsel %vm7628_vm5, %v5643_v12, %v2963_v19  ;;  %v2965_v14 = vrot.slane %v2963_v19, 4 }
  0x7e   : > { %v515_v41 = vrot.slane %v513_v23, 4  ;;  %v516_v26 = vshll.u32 %v7624_v61, 16  ;;  %v506_v45 = vrot.slane %v505_v32, 4  ;;  %v522_v46 = vshll.u32 %v7638_v20, 16  ;;  %v7681_v23 = vld [vmem:[%s7350_s6 + $0x84] sm:$0xf] }
  0x7f   : > { %6467 = vmatmul.mubr.bf16.gmra.mrb[12].mxu0 %v5610_v25  ;;  %v501_v21 = vsel %vm7381_vm2, %v496_v27, %v500_v3  ;;  %v526_v47 = vshrl.u32 %v7638_v20, 16  ;;  %v2967_v49 = vsel %vm7628_vm5, %v2965_v14, %v2966_v6  ;;  %v532_v50 = vshll.u32 %v286_v34, 16  ;;  %v287_v6 = vld [vmem:[%s7350_s6 + $0x80] sm:$0x1]  ;;  %v7686_v34 = vld [vmem:[%s7350_s6 + $0x88] sm:$0xf] }
  0x80   : > { %v518_v51 = vrot.slane %v516_v26, 5  ;;  %v5644_v52 = vrot.slane %v5628_v35, 9  ;;  %v511_v55 = vsel %vm7381_vm2, %v506_v45, %v510_v33  ;;  %v5659_v56 = vcombine.low %v2964_v40, %v2967_v49 }
  0x81   : > { %v524_v57 = vrot.slane %v522_v46, 5  ;;  %v528_v58 = vrot.slane %v526_v47, 4  ;;  %v5419_v60 = vcombine.low %v501_v21, %v511_v55  ;;  %v534_v63 = vrot.slane %v532_v50, 5  ;;  %v288_v46 = vld [vmem:[%s7350_s6 + $0x8c] sm:$0x1] }
  0x82   : > { %v519_v62 = vor.u32 %v518_v51, %v515_v41  ;;  %v2971_v22 = vsel %vm7628_vm5, %v5644_v52, %v2970_v28  ;;  %6502 = vmatprep.mubr.bf16.mxu0 %v5659_v56  ;;  %v2974_v3 = vsel %vm7628_vm5, %v7432_v38, %v2973_v29  ;;  %v537_v5 = vshrl.u32 %v7647_v44, 16 }
  0x83   : > { %v529_v1 = vor.u32 %v528_v58, %v524_v57  ;;  %v540_v7 = vshll.u32 %v7647_v44, 16  ;;  %6278 = vmatprep.mubr.bf16.mxu1 %v5419_v60  ;;  %v5660_v12 = vcombine.low %v2971_v22, %v2974_v3  ;;  %v546_v28 = vshll.u32 %v7658_v53, 16  ;;  %v7709_v22 = vld [vmem:[%s7350_s6 + $0x90] sm:$0xf] }
  0x84   : > { %v520_v59 = vrot.slane %v519_v62, 4  ;;  %v550_v13 = vshrl.u32 %v7658_v53, 16  ;;  %v539_v19 = vrot.slane %v537_v5, 4  ;;  %v556_v38 = vshll.u32 %v287_v6, 16  ;;  %v7712_v6 = vld [vmem:[%s7350_s6 + $0x94] sm:$0xf] }
  0x85   : > { %v530_v16 = vrot.slane %v529_v1, 4  ;;  %v542_v29 = vrot.slane %v540_v7, 5  ;;  %v548_v27 = vrot.slane %v546_v28, 5  ;;  %v5645_v33 = vrot.slane %v5629_v9, 9 }
  0x86   : > { %v525_v25 = vsel %vm7381_vm2, %v520_v59, %v524_v57  ;;  %v552_v32 = vrot.slane %v550_v13, 4  ;;  %v558_v14 = vrot.slane %v556_v38, 5  ;;  %v2977_v41 = vrot.slane %v7435_v42, 5  ;;  %v7019_v42 = vld [vmem:[%s9193_s1 + $0x190] sm:$0xff]   ;;  %v289_v13 = vld [vmem:[%s7350_s6 + $0x98] sm:$0x1] }
  0x87   : > { %v535_v35 = vsel %vm7381_vm2, %v530_v16, %v534_v63  ;;  %6503 = vmatmul.mubr.bf16.vlgmr.msra.gmra.mrb[0].mxu0 %v5660_v12  ;;  %v543_v40 = vor.u32 %v542_v29, %v539_v19  ;;  %v2980_v45 = vrot.slane %v7441_v48, 5  ;;  %v561_v47 = vshrl.u32 %v7681_v23, 16  ;;  %v5630_v57 = vld [vmem:[%s7350_s6 + $0x30] sm:$0xe]  ;;  %v7021_v16 = vld [vmem:[%s9193_s1 + $0x198] sm:$0xff]  }
  0x88   : > { %v5420_v26 = vcombine.low %v525_v25, %v535_v35  ;;  %6535 = vmatpush3.bf16.msra.mxu0 %v7559_v54  ;;  %v553_v21 = vor.u32 %v552_v32, %v548_v27  ;;  %v2978_v51 = vsel %vm7628_vm5, %v5645_v33, %v2977_v41  ;;  %v2979_v50 = vrot.slane %v2977_v41, 4 }
  0x89   : > { %v544_v49 = vrot.slane %v543_v40, 4  ;;  %v564_v52 = vshll.u32 %v7681_v23, 16  ;;  %6536 = vmatprep.subr.bf16.mxu0 %v7017_v0  ;;  %v563_v48 = vrot.slane %v561_v47, 4  ;;  %v570_v55 = vshll.u32 %v7686_v34, 16 }
  0x8a   : > { %6279 = vmatmul.mubr.bf16.gmra.mrb[16].mxu1 %v5420_v26  ;;  %v554_v54 = vrot.slane %v553_v21, 4  ;;  %v574_v56 = vshrl.u32 %v7686_v34, 16  ;;  %v2981_v60 = vsel %vm7628_vm5, %v2979_v50, %v2980_v45  ;;  %v580_v63 = vshll.u32 %v288_v46, 16  ;;  %v7732_v46 = vld [vmem:[%s7350_s6 + $0x9c] sm:$0xf] }
  0x8b   : > { %v549_v58 = vsel %vm7381_vm2, %v544_v49, %v548_v27  ;;  %v566_v62 = vrot.slane %v564_v52, 5  ;;  %v5661_v3 = vcombine.low %v2978_v51, %v2981_v60  ;;  %v572_v5 = vrot.slane %v570_v55, 5  ;;  %v7739_v52 = vld [vmem:[%s7350_s6 + $0xa0] sm:$0xf] }
  0x8c   : > { %v559_v1 = vsel %vm7381_vm2, %v554_v54, %v558_v14  ;;  %v576_v7 = vrot.slane %v574_v56, 4  ;;  %6537 = vmatpush3.bf16.msra.mxu0 %v7017_v0  ;;  %v582_v12 = vrot.slane %v580_v63, 5  ;;  %v5646_v28 = vrot.slane %v5630_v57, 9  ;;  %v5631_v0 = vld [vmem:[%s7350_s6 + $0x3c] sm:$0xe]  ;;  %v7029_v57 = vld [vmem:[%s9193_s1 + $0x1a8] sm:$0xff]  }
  0x8d   : > { %v5421_v9 = vcombine.low %v549_v58, %v559_v1  ;;  %v567_v59 = vor.u32 %v566_v62, %v563_v48  ;;  %6538 = vmatprep.subr.bf16.mxu0 %v7019_v42  ;;  %6506 = vmatprep.mubr.bf16.mxu0 %v5661_v3  ;;  %v2984_v29 = vrot.slane %v7469_v36, 5  ;;  %v2987_v38 = vrot.slane %v7475_v43, 5  ;;  %v290_v63 = vld [vmem:[%s7350_s6 + $0xa4] sm:$0x1] }
  0x8e   : > { %v577_v19 = vor.u32 %v576_v7, %v572_v5  ;;  %v585_v25 = vshrl.u32 %v7709_v22, 16  ;;  %v588_v32 = vshll.u32 %v7709_v22, 16  ;;  %v594_v33 = vshll.u32 %v7712_v6, 16 }
  0x8f   : > { %6282 = vmatprep.mubr.bf16.mxu1 %v5421_v9  ;;  %v568_v27 = vrot.slane %v567_v59, 4  ;;  %v598_v35 = vshrl.u32 %v7712_v6, 16  ;;  %v2985_v14 = vsel %vm7628_vm5, %v5646_v28, %v2984_v29  ;;  %v2986_v36 = vrot.slane %v2984_v29, 4  ;;  %v5632_v59 = vld [vmem:[%s7350_s6 + $0x48] sm:$0xe] }
  0x90   : > { %v578_v40 = vrot.slane %v577_v19, 4  ;;  %v587_v41 = vrot.slane %v585_v25, 4  ;;  %6539 = vmatpush3.bf16.msra.mxu0 %v7019_v42  ;;  %v590_v26 = vrot.slane %v588_v32, 5  ;;  %v596_v21 = vrot.slane %v594_v33, 5  ;;  %v7025_v42 = vld [vmem:[%s9193_s1 + $0x1a0] sm:$0xff]  }
  0x91   : > { %v573_v43 = vsel %vm7381_vm2, %v568_v27, %v572_v5  ;;  %v600_v45 = vrot.slane %v598_v35, 4  ;;  %6540 = vmatprep.subr.bf16.mxu0 %v7021_v16  ;;  %v2988_v49 = vsel %vm7628_vm5, %v2986_v36, %v2987_v38  ;;  %v604_v51 = vshll.u32 %v289_v13, 16  ;;  %v7762_v38 = vld [vmem:[%s7350_s6 + $0xa8] sm:$0xf]  ;;  %v7767_v33 = vld [vmem:[%s7350_s6 + $0xac] sm:$0xf] }
  0x92   : > { %v583_v47 = vsel %vm7381_vm2, %v578_v40, %v582_v12  ;;  %v5647_v50 = vrot.slane %v5631_v0, 9  ;;  %v5662_v48 = vcombine.low %v2985_v14, %v2988_v49  ;;  %v591_v55 = vor.u32 %v590_v26, %v587_v41  ;;  %v7033_v35 = vld [vmem:[%s9193_s1 + $0x1b0] sm:$0xff]  }
  0x93   : > { %v5422_v54 = vcombine.low %v573_v43, %v583_v47  ;;  %v601_v56 = vor.u32 %v600_v45, %v596_v21  ;;  %v606_v58 = vrot.slane %v604_v51, 5  ;;  %v2991_v60 = vrot.slane %v7500_v15, 5  ;;  %v291_v45 = vld [vmem:[%s7350_s6 + $0xb0] sm:$0x1] }
  0x94   : > { %v2994_v62 = vrot.slane %v7505_v24, 5  ;;  %v609_v1 = vshrl.u32 %v7732_v46, 16  ;;  %6541 = vmatpush3.bf16.msra.mxu0 %v7021_v16  ;;  %v592_v3 = vrot.slane %v591_v55, 4  ;;  %v612_v7 = vshll.u32 %v7732_v46, 16 }
  0x95   : > { %6283 = vmatmul.mubr.bf16.gmra.mrb[20].mxu1 %v5422_v54  ;;  %6507 = vmatmul.mubr.bf16.gmra.mrb[4].mxu0 %v5662_v48  ;;  %v602_v5 = vrot.slane %v601_v56, 4  ;;  %v618_v9 = vshll.u32 %v7739_v52, 16  ;;  %v2992_v15 = vsel %vm7628_vm5, %v5647_v50, %v2991_v60  ;;  %v2993_v12 = vrot.slane %v2991_v60, 4  ;;  %v5633_v54 = vld [vmem:[%s7350_s6 + $0x54] sm:$0xe] }
  0x96   : > { %v611_v24 = vrot.slane %v609_v1, 4  ;;  %v622_v28 = vshrl.u32 %v7739_v52, 16  ;;  %6542 = vmatprep.subr.bf16.mxu0 %v7025_v42  ;;  %v597_v13 = vsel %vm7381_vm2, %v592_v3, %v596_v21  ;;  %v614_v19 = vrot.slane %v612_v7, 5 }
  0x97   : > { %v607_v16 = vsel %vm7381_vm2, %v602_v5, %v606_v58  ;;  %v620_v29 = vrot.slane %v618_v9, 5  ;;  %v2995_v0 = vsel %vm7628_vm5, %v2993_v12, %v2994_v62  ;;  %v628_v32 = vshll.u32 %v290_v63, 16  ;;  %v7792_v9 = vld [vmem:[%s7350_s6 + $0xb8] sm:$0xf] }
  0x98   : > { %v5423_v25 = vcombine.low %v597_v13, %v607_v16  ;;  %v624_v27 = vrot.slane %v622_v28, 4  ;;  %6543 = vmatpush3.bf16.msra.mxu0 %v7025_v42  ;;  %v5663_v40 = vcombine.low %v2992_v15, %v2995_v0  ;;  %v615_v14 = vor.u32 %v614_v19, %v611_v24  ;;  %v292_v28 = vld [vmem:[%s7350_s6 + $0xbc] sm:$0x1] }
  0x99   : > { %v5648_v36 = vrot.slane %v5632_v59, 9  ;;  %v2998_v41 = vrot.slane %v7535_v11, 5  ;;  %6544 = vmatprep.subr.bf16.mxu0 %v7029_v57  ;;  %v630_v26 = vrot.slane %v628_v32, 5  ;;  %v3001_v21 = vrot.slane %v7546_v31, 5  ;;  %v7783_v31 = vld [vmem:[%s7350_s6 + $0xb4] sm:$0xf] }
  0x9a   : > { %6286 = vmatprep.mubr.bf16.mxu1 %v5423_v25  ;;  %v625_v43 = vor.u32 %v624_v27, %v620_v29  ;;  %v633_v47 = vshrl.u32 %v7762_v38, 16  ;;  %6510 = vmatprep.mubr.bf16.mxu0 %v5663_v40  ;;  %v616_v49 = vrot.slane %v615_v14, 4  ;;  %v636_v42 = vshll.u32 %v7762_v38, 16  ;;  %v5634_v40 = vld [vmem:[%s7350_s6 + $0x60] sm:$0xe] }
  0x9b   : > { %v2999_v51 = vsel %vm7628_vm5, %v5648_v36, %v2998_v41  ;;  %v3000_v50 = vrot.slane %v2998_v41, 4  ;;  %v642_v55 = vshll.u32 %v7767_v33, 16  ;;  %v646_v56 = vshrl.u32 %v7767_v33, 16 }
  0x9c   : > { %v626_v11 = vrot.slane %v625_v43, 4  ;;  %v635_v48 = vrot.slane %v633_v47, 4  ;;  %6545 = vmatpush3.bf16.msra.mxu0 %v7029_v57  ;;  %v621_v58 = vsel %vm7381_vm2, %v616_v49, %v620_v29  ;;  %v638_v62 = vrot.slane %v636_v42, 5  ;;  %v7037_v57 = vld [vmem:[%s9193_s1 + $0x1b8] sm:$0xff]   ;;  %v5581_v43 = vld [vmem:[%s7350_s6 + $0x74] sm:$0x1] }
  0x9d   : > { %v3002_v60 = vsel %vm7628_vm5, %v3000_v50, %v3001_v21  ;;  %v652_v63 = vshll.u32 %v291_v45, 16  ;;  %6546 = vmatprep.subr.bf16.mxu0 %v7033_v35  ;;  %v644_v5 = vrot.slane %v642_v55, 5  ;;  %v648_v7 = vrot.slane %v646_v56, 4  ;;  %v5635_v49 = vld [vmem:[%s7350_s6 + $0x6c] sm:$0xe] }
  0x9e   : > { %v631_v1 = vsel %vm7381_vm2, %v626_v11, %v630_v26  ;;  %v5664_v3 = vcombine.low %v2999_v51, %v3002_v60  ;;  %v639_v15 = vor.u32 %v638_v62, %v635_v48  ;;  %v5649_v24 = vrot.slane %v5633_v54, 9  ;;  %v7812_v26 = vld [vmem:[%s9193_s1 + $0x1c0] sm:$0xff]  }
  0x9f   : > { %v5424_v59 = vcombine.low %v621_v58, %v631_v1  ;;  %v654_v12 = vrot.slane %v652_v63, 5  ;;  %v649_v13 = vor.u32 %v648_v7, %v644_v5  ;;  %v3005_v16 = vrot.slane %v7572_v8, 5  ;;  %v5636_v1 = vld [vmem:[%s7350_s6 + $0x78] sm:$0xe] }
  0xa0   : > { %6511 = vmatmul.mubr.bf16.gmra.mrb[8].mxu0 %v5664_v3  ;;  %v3008_v19 = vrot.slane %v7578_v18, 5  ;;  %v657_v29 = vshrl.u32 %v7783_v31, 16  ;;  %v640_v25 = vrot.slane %v639_v15, 4  ;;  %v660_v0 = vshll.u32 %v7783_v31, 16  ;;  %v5580_v18 = vld [vmem:[%s7350_s6 + $0x70] sm:$0xf] }
  0xa1   : > { %6287 = vmatmul.mubr.bf16.gmra.mrb[24].mxu1 %v5424_v59  ;;  %v666_v27 = vshll.u32 %v7792_v9, 16  ;;  %v670_v32 = vshrl.u32 %v7792_v9, 16  ;;  %6547 = vmatpush3.bf16.msra.mxu0 %v7033_v35  ;;  %v650_v14 = vrot.slane %v649_v13, 4  ;;  %v3006_v36 = vsel %vm7628_vm5, %v5649_v24, %v3005_v16  ;;  %v7829_v15 = vld [vmem:[%s7350_s6 + $0x80] sm:$0x1] }
  0xa2   : > { %v3007_v8 = vrot.slane %v3005_v16, 4  ;;  %v659_v41 = vrot.slane %v657_v29, 4  ;;  %6548 = vmatprep.subr.bf16.mxu0 %v7037_v57  ;;  %v645_v21 = vsel %vm7381_vm2, %v640_v25, %v644_v5  ;;  %v662_v45 = vrot.slane %v660_v0, 5  ;;  %v7835_v24 = vld [vmem:[%s7350_s6 + $0x4] sm:$0xf] }
  0xa3   : > { %v668_v47 = vrot.slane %v666_v27, 5  ;;  %v672_v35 = vrot.slane %v670_v32, 4  ;;  %v655_v51 = vsel %vm7381_vm2, %v650_v14, %v654_v12  ;;  %v676_v42 = vshll.u32 %v292_v28, 16  ;;  %v7106_v12 = vld [vmem:[%s7350_s6] sm:$0xf] }
  0xa4   : > { %v3009_v50 = vsel %vm7628_vm5, %v3007_v8, %v3008_v19  ;;  %v5650_v54 = vrot.slane %v5634_v40, 9  ;;  %v5425_v11 = vcombine.low %v645_v21, %v655_v51  ;;  %v663_v55 = vor.u32 %v662_v45, %v659_v41  ;;  %v5586_v13 = vld [vmem:[%s7350_s6 + $0x88] sm:$0xf]  ;;  %v5587_v0 = vld [vmem:[%s7350_s6 + $0x8c] sm:$0x1] }
  0xa5   : > { %v5665_v48 = vcombine.low %v3006_v36, %v3009_v50  ;;  %v673_v56 = vor.u32 %v672_v35, %v668_v47  ;;  %6549 = vmatpush3.bf16.msra.mxu0 %v7037_v57  ;;  %v678_v58 = vrot.slane %v676_v42, 5  ;;  %v3012_v60 = vrot.slane %v7595_v4, 5  ;;  %v7826_v57 = vld [vmem:[%s7350_s6 + $0x7c] sm:$0xf]  ;;  %v5637_v40 = vld [vmem:[%s7350_s6 + $0x84] sm:$0xe] }
  0xa6   : > { %v3015_v62 = vrot.slane %v7600_v17, 5  ;;  %v5651_v63 = vrot.slane %v5635_v49, 9  ;;  %6582 = vmatprep.subr.bf16.mxu0 %v7812_v26  ;;  %6290 = vmatprep.mubr.bf16.mxu1 %v5425_v11  ;;  %v664_v3 = vrot.slane %v663_v55, 4  ;;  %v3019_v7 = vrot.slane %v5580_v18, 5  ;;  %v5589_v41 = vld [vmem:[%s7350_s6 + $0x94] sm:$0xf] }
  0xa7   : > { %6514 = vmatprep.mubr.bf16.mxu0 %v5665_v48  ;;  %v674_v5 = vrot.slane %v673_v56, 4  ;;  %v3022_v59 = vrot.slane %v5581_v43, 5  ;;  %v3013_v4 = vsel %vm7628_vm5, %v5650_v54, %v3012_v60  ;;  %v3014_v17 = vrot.slane %v3012_v60, 4  ;;  %v5590_v45 = vld [vmem:[%s7350_s6 + $0x98] sm:$0x1] }
  0xa8   : > { %v5435_v28 = vcombine.low %v7106_v12, %v7835_v24  ;;  %v669_v16 = vsel %vm7381_vm2, %v664_v3, %v668_v47  ;;  %v3020_v29 = vsel %vm7628_vm5, %v5651_v63, %v3019_v7  ;;  %v3021_v25 = vrot.slane %v3019_v7, 4  ;;  %v5638_v47 = vld [vmem:[%s7350_s6 + $0x90] sm:$0xe]  ;;  %v5592_v51 = vld [vmem:[%s7350_s6 + $0xa0] sm:$0xf] }
  0xa9   : > { %v679_v19 = vsel %vm7381_vm2, %v674_v5, %v678_v58  ;;  %v3016_v32 = vsel %vm7628_vm5, %v3014_v17, %v3015_v62  ;;  %v5652_v8 = vrot.slane %v5636_v1, 9  ;;  %v3026_v43 = vrot.slane %v7826_v57, 5  ;;  %v5593_v11 = vld [vmem:[%s7350_s6 + $0xa4] sm:$0x1]  ;;  %v5639_v48 = vld [vmem:[%s7350_s6 + $0x9c] sm:$0xe] }
  0xaa   : > { %v5426_v27 = vcombine.low %v669_v16, %v679_v19  ;;  %v5666_v14 = vcombine.low %v3013_v4, %v3016_v32  ;;  %v3023_v36 = vsel %vm7628_vm5, %v3021_v25, %v3022_v59  ;;  %v3029_v21 = vrot.slane %v7829_v15, 5  ;;  %v7108_v58 = vld [vmem:[%s7350_s6 + $0xc] sm:$0xf]  ;;  %v7865_v60 = vld [vmem:[%s7350_s6 + $0x10] sm:$0xf] }
  0xab   : > { %v5667_v18 = vcombine.low %v3020_v29, %v3023_v36  ;;  %v5653_v35 = vrot.slane %v5637_v40, 9  ;;  %v3033_v49 = vrot.slane %v5586_v13, 5  ;;  %v3027_v50 = vsel %vm7628_vm5, %v5652_v8, %v3026_v43  ;;  %v5595_v3 = vld [vmem:[%s7350_s6 + $0xac] sm:$0xf]  ;;  %v7110_v12 = vld [vmem:[%s7350_s6 + $0x18] sm:$0xf] }
  0xac   : > { %6291 = vmatmul.mubr.bf16.gmra.mrb[28].mxu1 %v5426_v27  ;;  %6515 = vmatmul.mubr.bf16.gmra.mrb[12].mxu0 %v5666_v14  ;;  %v3028_v42 = vrot.slane %v3026_v43, 4  ;;  %v3036_v54 = vrot.slane %v5587_v0, 5  ;;  %v5436_v62 = vcombine.low %v7108_v58, %v7865_v60  ;;  %v3040_v1 = vrot.slane %v5589_v41, 5  ;;  %v7028_v59 = vld [vmem:[%s9193_s1 + $0x88] sm:$0xff]   ;;  %v5598_v32 = vld [vmem:[%s7350_s6 + $0xb8] sm:$0xf] }
  0xad   : > { %6310 = vmatprep.mubr.bf16.mxu1 %v5435_v28  ;;  %6518 = vmatprep.mubr.bf16.mxu0 %v5667_v18  ;;  %v3034_v55 = vsel %vm7628_vm5, %v5653_v35, %v3033_v49  ;;  %v3035_v56 = vrot.slane %v3033_v49, 4  ;;  %v5654_v4 = vrot.slane %v5638_v47, 9  ;;  %v3043_v17 = vrot.slane %v5590_v45, 5  ;;  %v7878_v28 = vld [vmem:[%s7350_s6 + $0x1c] sm:$0xf]  ;;  %v7032_v18 = vld [vmem:[%s9193_s1 + $0x90] sm:$0xff]  }
  0xae   : > { %v3030_v63 = vsel %vm7628_vm5, %v3028_v42, %v3029_v21  ;;  %v5437_v13 = vcombine.low %v7110_v12, %v7878_v28  ;;  %v3042_v19 = vrot.slane %v3040_v1, 4  ;;  %v3047_v29 = vrot.slane %v5592_v51, 5  ;;  %v5640_v27 = vld [vmem:[%s7350_s6 + $0xa8] sm:$0xe]  ;;  %v5596_v14 = vld [vmem:[%s7350_s6 + $0xb0] sm:$0x1] }
  0xaf   : > { %v5668_v5 = vcombine.low %v3027_v50, %v3030_v63  ;;  %v3037_v7 = vsel %vm7628_vm5, %v3035_v56, %v3036_v54  ;;  %v5655_v25 = vrot.slane %v5639_v48, 9  ;;  %v3050_v0 = vrot.slane %v5593_v11, 5  ;;  %v5641_v43 = vld [vmem:[%s7350_s6 + $0xb4] sm:$0xe]  ;;  %v5599_v47 = vld [vmem:[%s7350_s6 + $0xbc] sm:$0x1] }
  0xb0   : > { %v5669_v16 = vcombine.low %v3034_v55, %v3037_v7  ;;  %v3049_v40 = vrot.slane %v3047_v29, 4  ;;  %v3054_v36 = vrot.slane %v5595_v3, 5  ;;  %v3041_v8 = vsel %vm7628_vm5, %v5654_v4, %v3040_v1  ;;  %v7112_v35 = vld [vmem:[%s7350_s6 + $0x24] sm:$0xf]  ;;  %v7900_v49 = vld [vmem:[%s7350_s6 + $0x28] sm:$0xf] }
  0xb1   : > { %v3044_v41 = vsel %vm7628_vm5, %v3042_v19, %v3043_v17  ;;  %v3061_v21 = vrot.slane %v5598_v32, 5  ;;  %v5438_v51 = vcombine.low %v7112_v35, %v7900_v49  ;;  %v7114_v50 = vld [vmem:[%s7350_s6 + $0x30] sm:$0xf]  ;;  %v7905_v42 = vld [vmem:[%s7350_s6 + $0x34] sm:$0xf]  ;;  %v5656_v11 = vrot.slane %v5640_v27, 9 }
  0xb2   : > { %v3051_v45 = vsel %vm7628_vm5, %v3049_v40, %v3050_v0  ;;  %v5439_v54 = vcombine.low %v7114_v50, %v7905_v42  ;;  %v5670_v48 = vcombine.low %v3041_v8, %v3044_v41  ;;  %v3056_v55 = vrot.slane %v3054_v36, 4  ;;  %v5601_v63 = vld [vmem:[%s7350_s6 + $0xc4] sm:$0xf]  ;;  %v5642_v4 = vld [vmem:[%s7350_s6 + $0xc0] sm:$0xe] }
  0xb3   : > { %v3057_v56 = vrot.slane %v5596_v14, 5  ;;  %v5657_v58 = vrot.slane %v5641_v43, 9  ;;  %v3063_v3 = vrot.slane %v3061_v21, 4  ;;  %v3055_v7 = vsel %vm7628_vm5, %v5656_v11, %v3054_v36  ;;  %v7041_v19 = vld [vmem:[%s9193_s1 + $0xa0] sm:$0xff]   ;;  %v7118_v32 = vld [vmem:[%s7350_s6 + $0x48] sm:$0xf] }
  0xb4   : > { %6311 = vmatmul.mubr.bf16.vlgmr.msra.gmra.mrb[0].mxu1 %v5436_v62  ;;  %6519 = vmatmul.mubr.bf16.gmra.mrb[16].mxu0 %v5668_v5  ;;  %v7036_v62 = vld [vmem:[%s9193_s1 + $0x98] sm:$0xff]   ;;  %v3064_v5 = vrot.slane %v5599_v47, 5  ;;  %v3068_v17 = vrot.slane %v5601_v63, 5  ;;  %v7932_v40 = vld [vmem:[%s7350_s6 + $0x4c] sm:$0xf]  ;;  %v5658_v36 = vrot.slane %v5642_v4, 9 }
  0xb5   : > { %6343 = vmatpush3.bf16.msra.mxu1 %v7569_v2  ;;  %6314 = vmatprep.mubr.bf16.mxu1 %v5437_v13  ;;  %v3048_v2 = vsel %vm7628_vm5, %v5655_v25, %v3047_v29  ;;  %v3062_v12 = vsel %vm7628_vm5, %v5657_v58, %v3061_v21  ;;  %v7116_v29 = vld [vmem:[%s7350_s6 + $0x3c] sm:$0xf]  ;;  %v7927_v25 = vld [vmem:[%s7350_s6 + $0x40] sm:$0xf]  ;;  %v5441_v14 = vcombine.low %v7118_v32, %v7932_v40  ;;  %v7047_v43 = vld [vmem:[%s9193_s1 + $0xa8] sm:$0xff]   ;;  %v1327_v58 = vrot.slane %v7835_v24, 5 }
  0xb6   : > { %6522 = vmatprep.mubr.bf16.mxu0 %v5669_v16  ;;  %6344 = vmatprep.subr.bf16.mxu1 %v7028_v59  ;;  %v5671_v1 = vcombine.low %v3048_v2, %v3051_v45  ;;  %v3065_v13 = vsel %vm7628_vm5, %v3063_v3, %v3064_v5  ;;  %v5602_v16 = vld [vmem:[%s7350_s6 + $0xc8] sm:$0x1]  ;;  %v5440_v0 = vcombine.low %v7116_v29, %v7927_v25  ;;  %v3070_v41 = vrot.slane %v3068_v17, 4  ;;  %v7053_v45 = vld [vmem:[%s9193_s1 + $0xb0] sm:$0xff]   ;;  %v7947_v35 = vld [vmem:[%s7350_s6 + $0x58] sm:$0xf] }
  0xb7   : > { %v5673_v8 = vcombine.low %v3062_v12, %v3065_v13  ;;  %v3069_v21 = vsel %vm7628_vm5, %v5658_v36, %v3068_v17  ;;  %v7120_v47 = vld [vmem:[%s7350_s6 + $0x54] sm:$0xf]  ;;  %v7039_v11 = vld [vmem:[%s7350_s6 + $0x18] sm:$0xff]   ;;  %v7122_v63 = vld [vmem:[%s7350_s6 + $0x8] sm:$0x1]  ;;  %v1341_v4 = vrot.slane %v7878_v28, 5  ;;  %v5445_v29 = vcombine.low %v7647_v44, %v7658_v53 }
  0xb8   : > { %v1275_v3 = vld [vmem:[%s7350_s6 + $0xc] sm:$0xe]  ;;  %v7967_v5 = vld [vmem:[%s9193_s1 + $0xc0] sm:$0xff]   ;;  %v1348_v17 = vrot.slane %v7900_v49, 5  ;;  %v1329_v12 = vrot.slane %v1327_v58, 4  ;;  %v1355_v44 = vrot.slane %v7905_v42, 5  ;;  %v5447_v42 = vcombine.low %v7709_v22, %v7712_v6 }
  0xb9   : > { %6345 = vmatpush3.bf16.msra.mxu1 %v7028_v59  ;;  %v3058_v59 = vsel %vm7628_vm5, %v3056_v55, %v3057_v56  ;;  %v2422_v55 = vshrl.u32 %v7826_v57, 16  ;;  %v7059_v56 = vld [vmem:[%s9193_s1 + $0xb8] sm:$0xff]   ;;  %v1277_v13 = vld [vmem:[%s7350_s6 + $0x24] sm:$0xe]  ;;  %v7124_v28 = vld [vmem:[%s7350_s6 + $0x20] sm:$0x1] }
  0xba   : > { %6346 = vmatprep.subr.bf16.mxu1 %v7032_v18  ;;  %v5672_v27 = vcombine.low %v3055_v7, %v3058_v59  ;;  %v1276_v59 = vld [vmem:[%s7350_s6 + $0x18] sm:$0xe]  ;;  %v1344_v49 = vrot.slane %v7124_v28, 5  ;;  %v7125_v36 = vld [vmem:[%s7350_s6 + $0x2c] sm:$0x1] }
  0xbb   : > { %v7971_v7 = vrot.slane %v2422_v55, 4  ;;  %v7054_v53 = vld [vmem:[%s7350_s6 + $0x54] sm:$0xff]  }
  0xbc   : > { %6315 = vmatmul.mubr.bf16.gmra.mrb[4].mxu1 %v5438_v51  ;;  %6523 = vmatmul.mubr.bf16.gmra.mrb[20].mxu0 %v5670_v48  ;;  %v5442_v51 = vcombine.low %v7120_v47, %v7947_v35  ;;  %v2418_v48 = vshll.u32 %v7826_v57, 16  ;;  %v1334_v57 = vrot.slane %v7865_v60, 5  ;;  %v5448_v47 = vcombine.low %v7732_v46, %v7739_v52 }
  0xbd   : > { %6318 = vmatprep.mubr.bf16.mxu1 %v5439_v54  ;;  %6526 = vmatprep.mubr.bf16.mxu0 %v5671_v1  ;;  %v5443_v54 = vcombine.low %v7607_v30, %v7610_v37  ;;  %v1330_v1 = vrot.slane %v7122_v63, 5  ;;  %v7123_v30 = vld [vmem:[%s7350_s6 + $0x14] sm:$0x1]  ;;  %v9220_v46 = vcombine.low %v7762_v38, %v7767_v33 }
  0xbe   : > { %6347 = vmatpush3.bf16.msra.mxu1 %v7032_v18  ;;  %v3071_v18 = vrot.slane %v5602_v16, 5  ;;  %v1337_v37 = vrot.slane %v7123_v30, 5  ;;  %v7969_v24 = vrot.slane %v2418_v48, 5  ;;  %v2428_v16 = vshll.u32 %v7829_v15, 16  ;;  %v7049_v15 = vld [vmem:[%s9193_s1 + $0x1c8] sm:$0xff]  }
  0xbf   : > { %6348 = vmatprep.subr.bf16.mxu1 %v7036_v62  ;;  %v1336_v32 = vrot.slane %v1334_v57, 4  ;;  %v1357_v30 = vrot.slane %v1355_v44, 4 }
  0xc0   : > { %v3072_v2 = vsel %vm7628_vm5, %v3070_v41, %v3071_v18  ;;  %9218 = vst [vmem:[#allocation5_spill] sm:$0xff] %v7969_v24  ;;  %v7045_v41 = vld [vmem:[%s7350_s6 + $0x30] sm:$0xff]   ;;  %v1343_v18 = vrot.slane %v1341_v4, 4 }
  0xc1   : > { %v5674_v50 = vcombine.low %v3069_v21, %v3072_v2  ;;  %v8000_v2 = vsel %vm7628_vm5, %v1329_v12, %v1330_v1  ;;  %v8032_v48 = vsel %vm7628_vm5, %v1336_v32, %v1337_v37  ;;  %v1369_v37 = vrot.slane %v7932_v40, 5  ;;  %v7127_v12 = vld [vmem:[%s7350_s6 + $0x44] sm:$0x1] }
  0xc2   : > { %6349 = vmatpush3.bf16.msra.mxu1 %v7036_v62  ;;  %v1274_v62 = vld [vmem:[%s7350_s6] sm:$0xe]  ;;  %v8036_v55 = vsel %vm7628_vm5, %v1343_v18, %v1344_v49  ;;  %v1281_v49 = vld [vmem:[%s7350_s6 + $0x54] sm:$0xe] }
  0xc3   : > { %6350 = vmatprep.subr.bf16.mxu1 %v7041_v19  ;;  %v5459_v60 = vrot.slane %v1274_v62, 9  ;;  %v7048_v62 = vld [vmem:[%s7350_s6 + $0x3c] sm:$0xff]  }
  0xc4   : > { %6319 = vmatmul.mubr.bf16.gmra.mrb[8].mxu1 %v5440_v0  ;;  %6527 = vmatmul.mubr.bf16.gmra.mrb[24].mxu0 %v5672_v27  ;;  %v5460_v0 = vrot.slane %v1275_v3, 9  ;;  %v7042_v27 = vld [vmem:[%s7350_s6 + $0x24] sm:$0xff]   ;;  %v5740_v3 = vld [vmem:[%s7350_s6 + $0x1c] sm:$0xf] }
  0xc5   : > { %6322 = vmatprep.mubr.bf16.mxu1 %v5441_v14  ;;  %6530 = vmatprep.mubr.bf16.mxu0 %v5673_v8  ;;  %v5461_v14 = vrot.slane %v1276_v59, 9  ;;  %v1351_v8 = vrot.slane %v7125_v36, 5  ;;  %v7996_v21 = vsel %vm7628_vm5, %v5459_v60, %v1327_v58  ;;  %v5739_v58 = vld [vmem:[%s7350_s6 + $0x18] sm:$0xf]  ;;  %v3838_v36 = vshll.u32 %v5740_v3, 16 }
  0xc6   : > { %6351 = vmatpush3.bf16.msra.mxu1 %v7041_v19  ;;  %v5444_v19 = vcombine.low %v7624_v61, %v7638_v20  ;;  %v5462_v61 = vrot.slane %v1277_v13, 9  ;;  %v1350_v20 = vrot.slane %v1348_v17, 4  ;;  %v8017_v22 = vsel %vm7628_vm5, %v5460_v0, %v1334_v57  ;;  %v7126_v57 = vld [vmem:[%s7350_s6 + $0x38] sm:$0x1] }
  0xc7   : > { %6352 = vmatprep.subr.bf16.mxu1 %v7047_v43  ;;  %v8021_v6 = vsel %vm7628_vm5, %v5461_v14, %v1341_v4  ;;  %v1358_v59 = vrot.slane %v7126_v57, 5  ;;  %v1365_v13 = vrot.slane %v7127_v12, 5  ;;  %v3832_v32 = vshll.u32 %v5739_v58, 16  ;;  %v5743_v57 = vld [vmem:[%s7350_s6 + $0x28] sm:$0xf] }
  0xc8   : > { %v8045_v63 = vsel %vm7628_vm5, %v5462_v61, %v1348_v17  ;;  %v8049_v1 = vsel %vm7628_vm5, %v1350_v20, %v1351_v8  ;;  %v7061_v17 = vld [vmem:[%s9193_s1 + $0x1d8] sm:$0xff]   ;;  %v3842_v8 = vshrl.u32 %v5740_v3, 16  ;;  %v1376_v61 = vrot.slane %v7947_v35, 5  ;;  %v5742_v20 = vld [vmem:[%s7350_s6 + $0x24] sm:$0xf] }
  0xc9   : > { %v5466_v35 = vrot.slane %v1281_v49, 9  ;;  %v3853_v28 = vshrl.u32 %v5742_v20, 16 }
  0xca   : > { %6353 = vmatpush3.bf16.msra.mxu1 %v7047_v43  ;;  %v5446_v43 = vcombine.low %v7681_v23, %v7686_v34  ;;  %v1362_v34 = vrot.slane %v7927_v25, 5  ;;  %v7055_v25 = vld [vmem:[%s9193_s1 + $0x1d0] sm:$0xff]  }
  0xcb   : > { %6354 = vmatprep.subr.bf16.mxu1 %v7053_v45 }
  0xcc   : > { %6323 = vmatmul.mubr.bf16.gmra.mrb[12].mxu1 %v5442_v51  ;;  %6531 = vmatmul.mubr.bf16.gmra.mrb[28].mxu0 %v5674_v50  ;;  %v8011_v51 = vrot.slane %v2428_v16, 5  ;;  %v1364_v60 = vrot.slane %v1362_v34, 4  ;;  %v7051_v16 = vld [vmem:[%s7350_s6 + $0x48] sm:$0xff]  }
  0xcd   : > { %6326 = vmatprep.mubr.bf16.mxu1 %v5443_v54  ;;  %6550 = vmatprep.mubr.bf16.mxu0 %v7039_v11  ;;  %v1279_v54 = vld [vmem:[%s7350_s6 + $0x3c] sm:$0xe] }
  0xce   : > { %6355 = vmatpush3.bf16.msra.mxu1 %v7053_v45  ;;  %v1278_v45 = vld [vmem:[%s7350_s6 + $0x30] sm:$0xe]  ;;  %9219 = vst [vmem:[#allocation6_spill] sm:$0xff] %v8011_v51  ;;  %v5464_v4 = vrot.slane %v1279_v54, 9  ;;  %v8336_v51 = vld [vmem:[%s7350_s6 + $0x64] sm:$0xf] }
  0xcf   : > { %6356 = vmatprep.subr.bf16.mxu1 %v7059_v56 }
  0xd0   : > { %v8085_v54 = vsel %vm7628_vm5, %v5464_v4, %v1362_v34  ;;  %v8093_v34 = vrot.slane %v3838_v36, 5  ;;  %v3844_v4 = vrot.slane %v3842_v8, 4  ;;  %v7133_v8 = vld [vmem:[%s7350_s6 + $0x74] sm:$0x1] }
  0xd1   : > { %v1393_v14 = vrot.slane %v7133_v8, 5  ;;  %v7077_v8 = vld [vmem:[%s9193_s1 + $0x1f8] sm:$0xff]  }
  0xd2   : > { %6357 = vmatpush3.bf16.msra.mxu1 %v7059_v56  ;;  %v5463_v56 = vrot.slane %v1278_v45, 9  ;;  %v8081_v45 = vsel %vm7628_vm5, %v1357_v30, %v1358_v59  ;;  %v3834_v30 = vrot.slane %v3832_v32, 5  ;;  %v7131_v59 = vld [vmem:[%s7350_s6 + $0x70] sm:$0xf] }
  0xd3   : > { %6390 = vmatprep.subr.bf16.mxu1 %v7967_v5 }
  0xd4   : > { %6327 = vmatmul.mubr.bf16.gmra.mrb[16].mxu1 %v5444_v19  ;;  %6551 = vmatmul.mubr.bf16.vlgmr.msra.gmra.mrb[0].mxu0 %v7042_v27  ;;  %v3829_v27 = vshrl.u32 %v5739_v58, 16  ;;  %v8073_v18 = vsel %vm7628_vm5, %v5463_v56, %v1355_v44  ;;  %v1282_v56 = vld [vmem:[%s7350_s6 + $0x60] sm:$0xe]  ;;  %v7130_v58 = vld [vmem:[%s7350_s6 + $0x64] sm:$0xf] }
  0xd5   : > { %6330 = vmatprep.mubr.bf16.mxu1 %v5445_v29  ;;  %6583 = vmatpush3.bf16.msra.mxu0 %v7812_v26  ;;  %v8039_v26 = vld [vmem:[%s7350_s6 + $0x48] sm:$0xe]  ;;  %v8061_v29 = vld [vmem:[%s7350_s6 + $0x50] sm:$0x1]  ;;  %v1383_v3 = vrot.slane %v7130_v58, 5  ;;  %v3856_v58 = vshll.u32 %v5742_v20, 16  ;;  %v8104_v20 = vsel %vm7628_vm5, %v1364_v60, %v1365_v13  ;;  %v3845_v60 = vor.u32 %v3844_v4, %v8093_v34 }
  0xd6   : > { %6554 = vmatprep.mubr.bf16.mxu0 %v7045_v41  ;;  %6584 = vmatprep.subr.bf16.mxu0 %v7049_v15  ;;  %v5465_v19 = vrot.slane %v8039_v26, 9  ;;  %v1372_v0 = vrot.slane %v8061_v29, 5  ;;  %v7129_v26 = vld [vmem:[%s7350_s6 + $0x5c] sm:$0x1]  ;;  %v3831_v12 = vrot.slane %v3829_v27, 4  ;;  %v1390_v41 = vrot.slane %v7131_v59, 5 }
  0xd7   : > { %v1379_v44 = vrot.slane %v7129_v26, 5  ;;  %v1283_v26 = vld [vmem:[%s7350_s6 + $0x6c] sm:$0xe]  ;;  %v7132_v27 = vld [vmem:[%s7350_s6 + $0x68] sm:$0x1]  ;;  %v5467_v49 = vrot.slane %v1282_v56, 9 }
  0xd8   : > { %v1386_v32 = vrot.slane %v7132_v27, 5  ;;  %v1385_v36 = vrot.slane %v1383_v3, 4  ;;  %v8110_v11 = vsel %vm7628_vm5, %v5465_v19, %v1369_v37  ;;  %v5468_v50 = vrot.slane %v1283_v26, 9  ;;  %v5745_v27 = vld [vmem:[%s7350_s6 + $0x30] sm:$0xf]  ;;  %v7069_v56 = vld [vmem:[%s9193_s1 + $0x1e8] sm:$0xff]  }
  0xd9   : > { %6585 = vmatpush3.bf16.msra.mxu0 %v7049_v15  ;;  %v1371_v15 = vrot.slane %v1369_v37, 4  ;;  %v1392_v23 = vrot.slane %v1390_v41, 4  ;;  %v3855_v13 = vrot.slane %v3853_v28, 4  ;;  %v3858_v40 = vrot.slane %v3856_v58, 5  ;;  %v7060_v58 = vld [vmem:[%s7350_s6 + $0x6c] sm:$0xff]  }
  0xda   : > { %6586 = vmatprep.subr.bf16.mxu0 %v7055_v25  ;;  %v8126_v19 = vsel %vm7628_vm5, %v5466_v35, %v1376_v61  ;;  %v8139_v29 = vsel %vm7628_vm5, %v1385_v36, %v1386_v32  ;;  %v3880_v35 = vshll.u32 %v5745_v27, 16  ;;  %v8148_v52 = vsel %vm7628_vm5, %v5467_v49, %v1383_v3  ;;  %v1284_v3 = vld [vmem:[%s7350_s6 + $0x78] sm:$0xe]  ;;  %v8314_v32 = vld [vmem:[%s7350_s6 + $0x5c] sm:$0x1] }
  0xdb   : > { %v8122_v37 = vsel %vm7628_vm5, %v1371_v15, %v1372_v0  ;;  %v5744_v0 = vld [vmem:[%s7350_s6 + $0x2c] sm:$0x1]  ;;  %v5746_v15 = vld [vmem:[%s7350_s6 + $0x34] sm:$0xf]  ;;  %v8162_v38 = vrot.slane %v3845_v60, 4  ;;  %v3859_v33 = vor.u32 %v3858_v40, %v3855_v13  ;;  %v7062_v49 = vld [vmem:[%s7350_s6 + $0x78] sm:$0xff]  }
  0xdc   : > { %6331 = vmatmul.mubr.bf16.gmra.mrb[20].mxu1 %v5446_v43  ;;  %6555 = vmatmul.mubr.bf16.gmra.mrb[4].mxu0 %v7048_v62  ;;  %v5741_v43 = vld [vmem:[%s7350_s6 + $0x20] sm:$0x1]  ;;  %v1378_v62 = vrot.slane %v1376_v61, 4  ;;  %v3877_v61 = vshrl.u32 %v5745_v27, 16  ;;  %v5469_v27 = vrot.slane %v1284_v3, 9 }
  0xdd   : > { %6334 = vmatprep.mubr.bf16.mxu1 %v5447_v42  ;;  %6558 = vmatprep.mubr.bf16.mxu0 %v7051_v16  ;;  %v7065_v42 = vld [vmem:[%s9193_s1 + $0x1e0] sm:$0xff]   ;;  %v3862_v16 = vshll.u32 %v5743_v57, 16  ;;  %v3848_v59 = vshll.u32 %v5741_v43, 16  ;;  %v3835_v43 = vor.u32 %v3834_v30, %v3831_v12  ;;  %v8158_v12 = vsel %vm7628_vm5, %v1392_v23, %v1393_v14  ;;  %v7134_v30 = vld [vmem:[%s7350_s6 + $0x7c] sm:$0xf] }
  0xde   : > { %6587 = vmatpush3.bf16.msra.mxu0 %v7055_v25  ;;  %v3866_v25 = vshrl.u32 %v5743_v57, 16  ;;  %v7057_v57 = vld [vmem:[%s7350_s6 + $0x60] sm:$0xff]   ;;  %v8135_v28 = vsel %vm7628_vm5, %v1378_v62, %v1379_v44  ;;  %v8154_v44 = vsel %vm7628_vm5, %v5468_v50, %v1390_v41  ;;  %v1397_v4 = vrot.slane %v7134_v30, 5  ;;  %v7073_v50 = vld [vmem:[%s9193_s1 + $0x1f0] sm:$0xff]   ;;  %v5747_v60 = vld [vmem:[%s7350_s6 + $0x38] sm:$0x1] }
  0xdf   : > { %6588 = vmatprep.subr.bf16.mxu0 %v7061_v17  ;;  %v3872_v14 = vshll.u32 %v5744_v0, 16  ;;  %v3886_v41 = vshll.u32 %v5746_v15, 16 }
  0xe0   : > { %v3868_v26 = vrot.slane %v3866_v25, 4  ;;  %v3882_v25 = vrot.slane %v3880_v35, 5  ;;  %v1399_v0 = vrot.slane %v1397_v4, 4 }
  0xe1   : > { %v8191_v3 = vrot.slane %v3886_v41, 5 }
  0xe2   : > { %6589 = vmatpush3.bf16.msra.mxu0 %v7061_v17  ;;  %v8128_v17 = vrot.slane %v3862_v16, 5  ;;  %v3879_v16 = vrot.slane %v3877_v61, 4  ;;  %v5749_v61 = vld [vmem:[%s7350_s6 + $0x40] sm:$0xf] }
  0xe3   : > { %6590 = vmatprep.subr.bf16.mxu0 %v7065_v42  ;;  %v3910_v13 = vshll.u32 %v5749_v61, 16 }
  0xe4   : > { %6335 = vmatmul.mubr.bf16.gmra.mrb[24].mxu1 %v5448_v47  ;;  %6559 = vmatmul.mubr.bf16.gmra.mrb[8].mxu0 %v7054_v53  ;;  %v8150_v47 = vrot.slane %v3848_v59, 5  ;;  %v8160_v53 = vrot.slane %v3835_v43, 4  ;;  %v3869_v23 = vor.u32 %v3868_v26, %v8128_v17  ;;  %v3860_v26 = vrot.slane %v3859_v33, 4  ;;  %v7140_v59 = vld [vmem:[%s7350_s6 + $0x98] sm:$0x1] }
  0xe5   : > { %6338 = vmatprep.mubr.bf16.mxu1 %v9220_v46  ;;  %6562 = vmatprep.mubr.bf16.mxu0 %v7057_v57  ;;  %v7135_v57 = vld [vmem:[%s7350_s6 + $0x80] sm:$0x1]  ;;  %v3874_v46 = vrot.slane %v3872_v14, 5  ;;  %v7136_v14 = vld [vmem:[%s7350_s6 + $0x88] sm:$0xf]  ;;  %v1414_v36 = vrot.slane %v7140_v59, 5 }
  0xe6   : > { %6591 = vmatpush3.bf16.msra.mxu0 %v7065_v42  ;;  %v3890_v42 = vshrl.u32 %v5746_v15, 16  ;;  %v1400_v43 = vrot.slane %v7135_v57, 5  ;;  %v5748_v15 = vld [vmem:[%s7350_s6 + $0x3c] sm:$0xf]  ;;  %v3870_v35 = vrot.slane %v3869_v23, 4  ;;  %v3841_v33 = vsel %vm7381_vm2, %v8160_v53, %v8093_v34 }
  0xe7   : > { %6592 = vmatprep.subr.bf16.mxu0 %v7069_v56  ;;  %v1285_v57 = vld [vmem:[%s7350_s6 + $0x84] sm:$0xe]  ;;  %v3851_v40 = vsel %vm7381_vm2, %v8162_v38, %v8150_v47  ;;  %v3883_v23 = vor.u32 %v3882_v25, %v3879_v16  ;;  %v1404_v41 = vrot.slane %v7136_v14, 5  ;;  %v3914_v34 = vshrl.u32 %v5749_v61, 16 }
  0xe8   : > { %v3892_v30 = vrot.slane %v3890_v42, 4  ;;  %v5751_v42 = vld [vmem:[%s7350_s6 + $0x48] sm:$0xf]  ;;  %v3865_v47 = vsel %vm7381_vm2, %v3860_v26, %v8128_v17  ;;  %v8215_v53 = vsel %vm7628_vm5, %v5469_v27, %v1397_v4  ;;  %v5470_v16 = vrot.slane %v1285_v57, 9  ;;  %v7137_v4 = vld [vmem:[%s7350_s6 + $0x8c] sm:$0x1] }
  0xe9   : > { %v7064_v38 = vld [vmem:[%s7350_s6 + $0x84] sm:$0xff]   ;;  %v1407_v25 = vrot.slane %v7137_v4, 5  ;;  %v7066_v27 = vld [vmem:[%s7350_s6 + $0x90] sm:$0xff]   ;;  %v3916_v14 = vrot.slane %v3914_v34, 4 }
  0xea   : > { %6593 = vmatpush3.bf16.msra.mxu0 %v7069_v56  ;;  %v9221_v56 = vcombine.low %v7783_v31, %v7792_v9  ;;  %v9222_v31 = vcombine.low %v7996_v21, %v8000_v2  ;;  %v3901_v9 = vshrl.u32 %v5748_v15, 16  ;;  %v8219_v21 = vsel %vm7628_vm5, %v1399_v0, %v1400_v43  ;;  %v5750_v26 = vld [vmem:[%s7350_s6 + $0x44] sm:$0x1] }
  0xeb   : > { %6594 = vmatprep.subr.bf16.mxu0 %v7073_v50  ;;  %v3896_v2 = vshll.u32 %v5747_v60, 16  ;;  %v3893_v17 = vor.u32 %v3892_v30, %v8191_v3  ;;  %v8235_v43 = vrot.slane %v3883_v23, 4  ;;  %v1406_v60 = vrot.slane %v1404_v41, 4 }
  0xec   : > { %6339 = vmatmul.mubr.bf16.gmra.mrb[28].mxu1 %v9221_v56  ;;  %6563 = vmatmul.mubr.bf16.gmra.mrb[12].mxu0 %v7060_v58  ;;  %v3904_v56 = vshll.u32 %v5748_v15, 16  ;;  %v3875_v58 = vsel %vm7381_vm2, %v3870_v35, %v3874_v46  ;;  %v3925_v0 = vshrl.u32 %v5751_v42, 16  ;;  %v3928_v15 = vshll.u32 %v5751_v42, 16  ;;  %v7067_v42 = vld [vmem:[%s9193_s1 + $0xc8] sm:$0xff]  }
  0xed   : > { %6358 = vmatprep.mubr.bf16.mxu1 %v9222_v31  ;;  %6566 = vmatprep.mubr.bf16.mxu0 %v7062_v49  ;;  %v8232_v49 = vld [vmem:[%s7350_s6 + $0x4c] sm:$0xf]  ;;  %v3903_v61 = vrot.slane %v3901_v9, 4  ;;  %v8238_v46 = vrot.slane %v3910_v13, 5  ;;  %v8240_v30 = vcombine.low %v3841_v33, %v3851_v40  ;;  %v1286_v31 = vld [vmem:[%s7350_s6 + $0x90] sm:$0xe]  ;;  %v8250_v9 = vcombine.low %v3865_v47, %v3875_v58 }
  0xee   : > { %6595 = vmatpush3.bf16.msra.mxu0 %v7073_v50  ;;  %v8227_v50 = vld [vmem:[%s9193_s1 + $0x200] sm:$0xff]   ;;  %v3906_v35 = vrot.slane %v3904_v56, 5  ;;  %v3934_v23 = vshll.u32 %v8232_v49, 16  ;;  %v3938_v4 = vshrl.u32 %v8232_v49, 16  ;;  %v8255_v13 = vrot.slane %v3896_v2, 5 }
  0xef   : > { %6596 = vmatprep.subr.bf16.mxu0 %v7077_v8  ;;  %v3920_v40 = vshll.u32 %v5750_v26, 16  ;;  %v5754_v33 = vld [vmem:[%s7350_s6 + $0x54] sm:$0xf]  ;;  %v9223_v56 = vcombine.low %v8017_v22, %v8032_v48  ;;  %v8267_v47 = vsel %vm7628_vm5, %v5470_v16, %v1404_v41  ;;  %v3927_v58 = vrot.slane %v3925_v0, 4  ;;  %v8270_v2 = vld [vmem:[%s7350_s6 + $0x58] sm:$0xf] }
  0xf0   : > { %v9224_v26 = vor.u32 %v7971_v7, %v7969_v24  ;;  %v7071_v22 = vld [vmem:[%s9193_s1 + $0xd0] sm:$0xff]   ;;  %v8283_v48 = vsel %vm7628_vm5, %v1406_v60, %v1407_v25  ;;  %v3907_v41 = vor.u32 %v3906_v35, %v3903_v61  ;;  %v3917_v16 = vor.u32 %v3916_v14, %v8238_v46  ;;  %v7141_v24 = vld [vmem:[%s7350_s6 + $0xa4] sm:$0x1] }
  0xf1   : > { %v8287_v7 = vld [vmem:[%s7350_s6 + $0x50] sm:$0x1]  ;;  %v3940_v0 = vrot.slane %v3938_v4, 4  ;;  %v3952_v25 = vshll.u32 %v5754_v33, 16  ;;  %v5471_v60 = vrot.slane %v1286_v31, 9  ;;  %v3958_v14 = vshll.u32 %v8270_v2, 16 }
  0xf2   : > { %6597 = vmatpush3.bf16.msra.mxu0 %v7077_v8  ;;  %v8253_v8 = vrot.slane %v3893_v17, 4  ;;  %v3930_v17 = vrot.slane %v3928_v15, 5  ;;  %v8275_v57 = vrot.slane %v9224_v26, 4  ;;  %v3949_v15 = vshrl.u32 %v5754_v33, 16  ;;  %v7138_v61 = vld [vmem:[%s7350_s6 + $0x94] sm:$0xf] }
  0xf3   : > { %6630 = vmatprep.subr.bf16.mxu0 %v8227_v50  ;;  %v1411_v35 = vrot.slane %v7138_v61, 5  ;;  %v1287_v31 = vld [vmem:[%s7350_s6 + $0x9c] sm:$0xe]  ;;  %v7139_v33 = vld [vmem:[%s7350_s6 + $0xa0] sm:$0xf]  ;;  %v8309_v61 = vrot.slane %v3917_v16, 4 }
  0xf4   : > { %6359 = vmatmul.mubr.bf16.vlgmr.msra.gmra.mrb[0].mxu1 %v9223_v56  ;;  %9225 = vst [vmem:[#allocation7_spill] sm:$0xff] %v8275_v57  ;;  %6567 = vmatmul.mubr.bf16.gmra.mrb[16].mxu0 %v7064_v38  ;;  %v9226_v38 = vcombine.low %v8021_v6, %v8036_v55  ;;  %v3962_v56 = vshrl.u32 %v8270_v2, 16  ;;  %v7068_v6 = vld [vmem:[%s7350_s6 + $0x9c] sm:$0xff]   ;;  %v7070_v55 = vld [vmem:[%s7350_s6 + $0xa8] sm:$0xff]   ;;  %v3931_v4 = vor.u32 %v3930_v17, %v3927_v58  ;;  %v1418_v26 = vrot.slane %v7139_v33, 5 }
  0xf5   : > { %6391 = vmatpush3.bf16.msra.mxu1 %v7967_v5  ;;  %6570 = vmatprep.mubr.bf16.mxu0 %v7066_v27  ;;  %v8292_v5 = vrot.slane %v3934_v23, 5  ;;  %v8303_v23 = vrot.slane %v3920_v40, 5  ;;  %v3944_v34 = vshll.u32 %v8287_v7, 16  ;;  %v3951_v17 = vrot.slane %v3949_v15, 4  ;;  %v7075_v16 = vld [vmem:[%s9193_s1 + $0xd8] sm:$0xff]  }
  0xf6   : > { %6362 = vmatprep.mubr.bf16.mxu1 %v9226_v38  ;;  %6392 = vmatprep.subr.bf16.mxu1 %v7067_v42  ;;  %v8307_v38 = vrot.slane %v3907_v41, 4  ;;  %v5757_v41 = vld [vmem:[%s7350_s6 + $0x60] sm:$0xf]  ;;  %v8325_v59 = vsel %vm7628_vm5, %v5471_v60, %v1411_v35  ;;  %v1413_v33 = vrot.slane %v1411_v35, 4  ;;  %v8327_v27 = vrot.slane %v3958_v14, 5 }
  0xf7   : > { %v3941_v58 = vor.u32 %v3940_v0, %v8292_v5  ;;  %v3964_v62 = vrot.slane %v3962_v56, 4  ;;  %v9227_v40 = vcombine.low %v8045_v63, %v8049_v1  ;;  %v8332_v0 = vrot.slane %v3931_v4, 4  ;;  %v7078_v35 = vld [vmem:[%s9193_s1 + $0xe0] sm:$0xff]   ;;  %v1288_v14 = vld [vmem:[%s7350_s6 + $0xa8] sm:$0xe] }
  0xf8   : > { %v5472_v15 = vrot.slane %v1287_v31, 9  ;;  %v1421_v57 = vrot.slane %v7141_v24, 5  ;;  %v9228_v60 = vcombine.low %v8073_v18, %v8081_v45  ;;  %v3913_v63 = vsel %vm7381_vm2, %v8307_v38, %v8238_v46  ;;  %v5760_v31 = vld [vmem:[%s7350_s6 + $0x6c] sm:$0xf] }
  0xf9   : > { %6393 = vmatpush3.bf16.msra.mxu1 %v7067_v42  ;;  %v3954_v42 = vrot.slane %v3952_v25, 5  ;;  %v1420_v25 = vrot.slane %v1418_v26, 4  ;;  %v3946_v1 = vrot.slane %v3944_v34, 5  ;;  %v3973_v24 = vshrl.u32 %v5757_v41, 16 }
  0xfa   : > { %6394 = vmatprep.subr.bf16.mxu1 %v7071_v22  ;;  %v3976_v56 = vshll.u32 %v5757_v41, 16  ;;  %v3923_v18 = vsel %vm7381_vm2, %v8309_v61, %v8303_v23  ;;  %v3942_v45 = vrot.slane %v3941_v58, 4  ;;  %v3968_v4 = vshll.u32 %v8314_v32, 16  ;;  %v7072_v58 = vld [vmem:[%s7350_s6 + $0xb4] sm:$0xff]  }
  0xfb   : > { %v8357_v46 = vsel %vm7628_vm5, %v1413_v33, %v1414_v36  ;;  %v3965_v34 = vor.u32 %v3964_v62, %v8327_v27  ;;  %v3937_v23 = vsel %vm7381_vm2, %v8332_v0, %v8292_v5  ;;  %v8368_v38 = vsel %vm7628_vm5, %v5472_v15, %v1418_v26  ;;  %v7142_v36 = vld [vmem:[%s7350_s6 + $0xac] sm:$0xf]  ;;  %v8376_v62 = vld [vmem:[%s7350_s6 + $0x68] sm:$0x1]  ;;  %v7074_v5 = vld [vmem:[%s7350_s6 + $0xc0] sm:$0xff]  }
  0xfc   : > { %6363 = vmatmul.mubr.bf16.gmra.mrb[4].mxu1 %v9227_v40  ;;  %6571 = vmatmul.mubr.bf16.gmra.mrb[20].mxu0 %v7068_v6  ;;  %v3955_v6 = vor.u32 %v3954_v42, %v3951_v17  ;;  %v8372_v61 = vsel %vm7628_vm5, %v1420_v25, %v1421_v57  ;;  %v1425_v40 = vrot.slane %v7142_v36, 5  ;;  %9229 = vst [vmem:[#allocation8_spill] sm:$0xff] %v8376_v62  ;;  %v3975_v17 = vrot.slane %v3973_v24, 4  ;;  %v7080_v26 = vld [vmem:[%s9193_s1 + $0xe8] sm:$0xff]   ;;  %v8398_v36 = vld [vmem:[%s7350_s6 + $0x70] sm:$0xf] }
  0xfd   : > { %6366 = vmatprep.mubr.bf16.mxu1 %v9228_v60  ;;  %6574 = vmatprep.mubr.bf16.mxu0 %v7070_v55  ;;  %v3986_v55 = vshrl.u32 %v8336_v51, 16  ;;  %v3978_v42 = vrot.slane %v3976_v56, 5  ;;  %v3997_v41 = vshrl.u32 %v5760_v31, 16  ;;  %v4000_v33 = vshll.u32 %v5760_v31, 16  ;;  %v8395_v31 = vld [vmem:[%s7350_s6 + $0xb4] sm:$0xe] }
  0xfe   : > { %6395 = vmatpush3.bf16.msra.mxu1 %v7071_v22  ;;  %v3982_v22 = vshll.u32 %v8336_v51, 16  ;;  %v3947_v57 = vsel %vm7381_vm2, %v3942_v45, %v3946_v1  ;;  %v8385_v0 = vrot.slane %v3955_v6, 4  ;;  %v8387_v15 = vrot.slane %v3968_v4, 5  ;;  %9230 = vst [vmem:[#allocation9_spill] sm:$0xff] %v8398_v36 }
  0xff   : > { %6396 = vmatprep.subr.bf16.mxu1 %v7075_v16  ;;  %v5473_v25 = vrot.slane %v1288_v14, 9  ;;  %v8389_v60 = vrot.slane %v3965_v34, 4  ;;  %v3992_v56 = vshll.u32 %v8376_v62, 16  ;;  %v9231_v1 = vcombine.low %v8085_v54, %v8104_v20  ;;  %v8421_v20 = vld [vmem:[%s7350_s6 + $0x74] sm:$0x1] }
 0x100   : > { %v8391_v24 = vrot.slane %v3982_v22, 5  ;;  %v9232_v14 = vsel %vm7381_vm2, %v8253_v8, %v8255_v13  ;;  %v9233_v45 = vsel %vm7381_vm2, %v8235_v43, %v8191_v3  ;;  %v8415_v4 = vcombine.low %v3913_v63, %v3923_v18  ;;  %v7143_v22 = vld [vmem:[%s7350_s6 + $0xb0] sm:$0x1]  ;;  %9234 = vst [vmem:[#allocation10_spill] sm:$0xff] %v8421_v20  ;;  %v5763_v18 = vld [vmem:[%s7350_s6 + $0x78] sm:$0xf] }
 0x101   : > { %v8413_v6 = vcombine.low %v9233_v45, %v9232_v14  ;;  %v1428_v54 = vrot.slane %v7143_v22, 5  ;;  %v9235_v8 = vcombine.low %v8110_v11, %v8122_v37  ;;  %v1427_v3 = vrot.slane %v1425_v40, 4  ;;  %v8439_v37 = vld [vmem:[%s7350_s6 + $0xb8] sm:$0xf]  ;;  %v8463_v14 = vld [vmem:[%s7350_s6 + $0xbc] sm:$0x1] }
 0x102   : > { %6397 = vmatpush3.bf16.msra.mxu1 %v7075_v16  ;;  %v3988_v16 = vrot.slane %v3986_v55, 4  ;;  %v3979_v43 = vor.u32 %v3978_v42, %v3975_v17  ;;  %v3999_v13 = vrot.slane %v3997_v41, 4  ;;  %v4002_v63 = vrot.slane %v4000_v33, 5  ;;  %v8428_v55 = vld [vmem:[%s7350_s6 + $0x7c] sm:$0xf]  ;;  %v7076_v41 = vld [vmem:[%s7350_s6 + $0xcc] sm:$0xff]  }
 0x103   : > { %6398 = vmatprep.subr.bf16.mxu1 %v7078_v35  ;;  %9236 = vst [vmem:[#allocation11_spill] sm:$0xff] %v8428_v55  ;;  %v8436_v11 = vsel %vm7628_vm5, %v5473_v25, %v1425_v40  ;;  %v9201_v17 = vrot.slane %v8439_v37, 5  ;;  %v5766_v42 = vld [vmem:[%s7350_s6 + $0x84] sm:$0xf]  ;;  %v3971_v40 = vsel %vm7381_vm2, %v8389_v60, %v8387_v15  ;;  %v5474_v25 = vrot.slane %v8395_v31, 9 }
 0x104   : > { %6367 = vmatmul.mubr.bf16.gmra.mrb[8].mxu1 %v9231_v1  ;;  %6575 = vmatmul.mubr.bf16.gmra.mrb[24].mxu0 %v7072_v58  ;;  %v8430_v1 = vcombine.low %v3937_v23, %v3947_v57  ;;  %v3961_v23 = vsel %vm7381_vm2, %v8385_v0, %v8327_v27  ;;  %v3989_v33 = vor.u32 %v3988_v16, %v8391_v24  ;;  %v8459_v57 = vld [vmem:[%s7350_s6 + $0x88] sm:$0xf]  ;;  %v4006_v27 = vshll.u32 %v8398_v36, 16  ;;  %v7084_v16 = vld [vmem:[%s9193_s1 + $0xf8] sm:$0xff]   ;;  %v5769_v22 = vld [vmem:[%s7350_s6 + $0x90] sm:$0xf] }
 0x105   : > { %6370 = vmatprep.mubr.bf16.mxu1 %v9235_v8  ;;  %6578 = vmatprep.mubr.bf16.mxu0 %v7074_v5  ;;  %v8456_v5 = vrot.slane %v3992_v56, 5  ;;  %9237 = vst [vmem:[#allocation12_spill] sm:$0xff] %v8459_v57  ;;  %v4010_v0 = vshrl.u32 %v8398_v36, 16  ;;  %v8470_v15 = vsel %vm7628_vm5, %v1427_v3, %v1428_v54  ;;  %v8472_v60 = vrot.slane %v3979_v43, 4  ;;  %v8483_v54 = vld [vmem:[%s7350_s6 + $0x94] sm:$0xf] }
 0x106   : > { %6399 = vmatpush3.bf16.msra.mxu1 %v7078_v35  ;;  %v7082_v35 = vld [vmem:[%s9193_s1 + $0xf0] sm:$0xff]   ;;  %v4003_v56 = vor.u32 %v4002_v63, %v3999_v13  ;;  %v4016_v31 = vshll.u32 %v8421_v20, 16  ;;  %v1434_v8 = vrot.slane %v9201_v17, 4  ;;  %v4021_v58 = vshrl.u32 %v5763_v18, 16  ;;  %9238 = vst [vmem:[#allocation13_spill] sm:$0xff] %v8483_v54 }
 0x107   : > { %6400 = vmatprep.subr.bf16.mxu1 %v7080_v26  ;;  %v4024_v34 = vshll.u32 %v5763_v18, 16  ;;  %v4030_v45 = vshll.u32 %v8428_v55, 16  ;;  %v8485_v3 = vrot.slane %v3989_v33, 4  ;;  %v4034_v43 = vshrl.u32 %v8428_v55, 16 }
 0x108   : > { %v4045_v13 = vshrl.u32 %v5766_v42, 16  ;;  %v4048_v63 = vshll.u32 %v5766_v42, 16  ;;  %v8491_v20 = vrot.slane %v4006_v27, 5  ;;  %v4012_v17 = vrot.slane %v4010_v0, 4 }
 0x109   : > { %v4054_v18 = vshll.u32 %v8459_v57, 16  ;;  %v4058_v36 = vshrl.u32 %v8459_v57, 16  ;;  %v9240_v33 = vcombine.low %v8148_v52, %v8139_v29  ;;  %v8498_v55 = vrot.slane %v4003_v56, 4  ;;  %v5772_v52 = vld [vmem:[%s7350_s6 + $0x9c] sm:$0xf] }
 0x10a   : > { %6401 = vmatpush3.bf16.msra.mxu1 %v7080_v26  ;;  %v9239_v26 = vcombine.low %v8126_v19, %v8135_v28  ;;  %v8500_v42 = vrot.slane %v4016_v31, 5  ;;  %v8503_v19 = vld [vmem:[%s7350_s6 + $0x80] sm:$0x1]  ;;  %v4069_v28 = vshrl.u32 %v5769_v22, 16  ;;  %v4072_v27 = vshll.u32 %v5769_v22, 16 }
 0x10b   : > { %6402 = vmatprep.subr.bf16.mxu1 %v7082_v35  ;;  %v4023_v0 = vrot.slane %v4021_v58, 4  ;;  %v4078_v29 = vshll.u32 %v8483_v54, 16  ;;  %v4036_v56 = vrot.slane %v4034_v43, 4  ;;  %v4047_v31 = vrot.slane %v4045_v13, 4  ;;  %v8515_v22 = vld [vmem:[%s7350_s6 + $0xa0] sm:$0xf] }
 0x10c   : > { %6371 = vmatmul.mubr.bf16.gmra.mrb[12].mxu1 %v9239_v26  ;;  %6579 = vmatmul.mubr.bf16.gmra.mrb[28].mxu0 %v7076_v41  ;;  %v4026_v26 = vrot.slane %v4024_v34, 5  ;;  %v8506_v41 = vrot.slane %v4030_v45, 5  ;;  %v4050_v57 = vrot.slane %v4048_v63, 5  ;;  %v4082_v62 = vshrl.u32 %v8483_v54, 16  ;;  %9241 = vst [vmem:[#allocation14_spill] sm:$0xff] %v8515_v22 }
 0x10d   : > { %6374 = vmatprep.mubr.bf16.mxu1 %v9240_v33  ;;  %6598 = vmatprep.mubr.bf16.mxu0 %v8240_v30  ;;  %v8511_v33 = vld [vmem:[%s7350_s6 + $0x8c] sm:$0x1]  ;;  %v8517_v30 = vcombine.low %v3961_v23, %v3971_v40  ;;  %v4013_v34 = vor.u32 %v4012_v17, %v8491_v20  ;;  %v8520_v58 = vrot.slane %v4054_v18, 5  ;;  %v9242_v43 = vrot.slane %v8439_v37, 5  ;;  %v8537_v40 = vld [vmem:[%s7350_s6 + $0x98] sm:$0x1] }
 0x10e   : > { %6403 = vmatpush3.bf16.msra.mxu1 %v7082_v35  ;;  %v4060_v35 = vrot.slane %v4058_v36, 4  ;;  %v4071_v63 = vrot.slane %v4069_v28, 4  ;;  %v4074_v54 = vrot.slane %v4072_v27, 5  ;;  %v7081_v17 = vld [vmem:[%s9193_s1 + $0x208] sm:$0xff]   ;;  %v4027_v23 = vor.u32 %v4026_v26, %v4023_v0 }
 0x10f   : > { %6404 = vmatprep.subr.bf16.mxu1 %v7084_v16  ;;  %v8530_v13 = vsel %vm7628_vm5, %v5474_v25, %v9242_v43  ;;  %v4040_v36 = vshll.u32 %v8503_v19, 16  ;;  %v8539_v18 = vrot.slane %v4078_v29, 5  ;;  %v4093_v37 = vshrl.u32 %v5772_v52, 16  ;;  %v8544_v25 = vld [vmem:[%s9193_s1 + $0x100] sm:$0xff]  }
 0x110   : > { %9243 = vst [vmem:[#allocation15_spill] sm:$0xff] %v8544_v25  ;;  %v4084_v28 = vrot.slane %v4082_v62, 4  ;;  %v4096_v27 = vshll.u32 %v5772_v52, 16  ;;  %v4106_v0 = vshrl.u32 %v8515_v22, 16  ;;  %v9244_v26 = vcombine.low %v8154_v44, %v8158_v12 }
 0x111   : > { %v9245_v29 = vrot.slane %v8463_v14, 5  ;;  %v8558_v45 = vrot.slane %v4013_v34, 4  ;;  %v4037_v62 = vor.u32 %v4036_v56, %v8506_v41  ;;  %v4064_v52 = vshll.u32 %v8511_v33, 16 }
 0x112   : > { %6405 = vmatpush3.bf16.msra.mxu1 %v7084_v16  ;;  %v4102_v16 = vshll.u32 %v8515_v22, 16  ;;  %v9246_v44 = vcombine.low %v8215_v53, %v8219_v21  ;;  %v4051_v12 = vor.u32 %v4050_v57, %v4047_v31  ;;  %v4061_v14 = vor.u32 %v4060_v35, %v8520_v58  ;;  %v8579_v22 = vld [vmem:[%s7350_s6 + $0xac] sm:$0xf]  ;;  %v7083_v53 = vld [vmem:[%s9193_s1 + $0x210] sm:$0xff]  }
 0x113   : > { %6678 = vmatprep.subr.bf16.mxu1 %v8544_v25  ;;  %v8556_v43 = vsel %vm7628_vm5, %v1434_v8, %v9245_v29  ;;  %v8563_v25 = vld [vmem:[%s7350_s6 + $0xa4] sm:$0x1]  ;;  %v4075_v8 = vor.u32 %v4074_v54, %v4071_v63  ;;  %v8573_v56 = vrot.slane %v4027_v23, 4  ;;  %v8575_v34 = vrot.slane %v4040_v36, 5 }
 0x114   : > { %6375 = vmatmul.mubr.bf16.gmra.mrb[16].mxu1 %v9244_v26  ;;  %6599 = vmatmul.mubr.bf16.vlgmr.msra.gmra.mrb[0].mxu0 %v8250_v9  ;;  %v5775_v26 = vld [vmem:[%s7350_s6 + $0xa8] sm:$0xf]  ;;  %v4088_v29 = vshll.u32 %v8537_v40, 16  ;;  %v4095_v9 = vrot.slane %v4093_v37, 4  ;;  %v4085_v21 = vor.u32 %v4084_v28, %v8539_v18  ;;  %v4098_v57 = vrot.slane %v4096_v27, 5 }
 0x115   : > { %6378 = vmatprep.mubr.bf16.mxu1 %v9246_v44  ;;  %6631 = vmatpush3.bf16.msra.mxu0 %v8227_v50  ;;  %v8585_v50 = vrot.slane %v4102_v16, 5  ;;  %v4038_v54 = vrot.slane %v4037_v62, 4  ;;  %v4066_v31 = vrot.slane %v4064_v52, 5  ;;  %v4117_v35 = vshrl.u32 %v5775_v26, 16  ;;  %v7085_v62 = vld [vmem:[%s9193_s1 + $0x218] sm:$0xff]  }
 0x116   : > { %6602 = vmatprep.mubr.bf16.mxu0 %v8413_v6  ;;  %6632 = vmatprep.subr.bf16.mxu0 %v7081_v17  ;;  %v4108_v6 = vrot.slane %v4106_v0, 4  ;;  %v4120_v63 = vshll.u32 %v5775_v26, 16  ;;  %v4052_v23 = vrot.slane %v4051_v12, 4  ;;  %v4062_v36 = vrot.slane %v4061_v14, 4  ;;  %v8614_v14 = vld [vmem:[%s7350_s6 + $0xb0] sm:$0x1] }
 0x117   : > { %v4076_v37 = vrot.slane %v4075_v8, 4  ;;  %v4112_v44 = vshll.u32 %v8563_v25, 16  ;;  %v3995_v28 = vsel %vm7381_vm2, %v8485_v3, %v8456_v5  ;;  %v4009_v27 = vsel %vm7381_vm2, %v8498_v55, %v8491_v20 }
 0x118   : > { %v4126_v16 = vshll.u32 %v8579_v22, 16  ;;  %v4130_v0 = vshrl.u32 %v8579_v22, 16  ;;  %v4090_v52 = vrot.slane %v4088_v29, 5  ;;  %v4099_v12 = vor.u32 %v4098_v57, %v4095_v9 }
 0x119   : > { %6633 = vmatpush3.bf16.msra.mxu0 %v7081_v17  ;;  %v4086_v17 = vrot.slane %v4085_v21, 4  ;;  %v4109_v5 = vor.u32 %v4108_v6, %v8585_v50  ;;  %v9247_v3 = vcombine.low %v8267_v47, %v8283_v48  ;;  %v4019_v20 = vsel %vm7381_vm2, %v8558_v45, %v8500_v42  ;;  %v5778_v45 = vld [vmem:[%s7350_s6 + $0xb4] sm:$0xf] }
 0x11a   : > { %6634 = vmatprep.subr.bf16.mxu0 %v7083_v53  ;;  %v4033_v55 = vsel %vm7381_vm2, %v8573_v56, %v8506_v41  ;;  %v4119_v8 = vrot.slane %v4117_v35, 4  ;;  %v4122_v26 = vrot.slane %v4120_v63, 5  ;;  %v9248_v47 = vcombine.low %v8325_v59, %v8357_v46  ;;  %v8630_v56 = vld [vmem:[%s7350_s6 + $0xb8] sm:$0xf] }
 0x11b   : > { %v4043_v48 = vsel %vm7381_vm2, %v4038_v54, %v8575_v34  ;;  %v4057_v42 = vsel %vm7381_vm2, %v4052_v23, %v8520_v58  ;;  %v4067_v41 = vsel %vm7381_vm2, %v4062_v36, %v4066_v31  ;;  %v4081_v59 = vsel %vm7381_vm2, %v4076_v37, %v8539_v18  ;;  %v7088_v58 = vld [vmem:[%s9193_s1 + $0x220] sm:$0xff]   ;;  %v5815_v36 = vld [vmem:[%s7350_s6 + $0x48] sm:$0xe] }
 0x11c   : > { %6379 = vmatmul.mubr.bf16.gmra.mrb[20].mxu1 %v9247_v3  ;;  %6603 = vmatmul.mubr.bf16.gmra.mrb[4].mxu0 %v8415_v4  ;;  %v8636_v46 = vrot.slane %v4112_v44, 5  ;;  %v8638_v4 = vrot.slane %v4126_v16, 5  ;;  %v4132_v34 = vrot.slane %v4130_v0, 4  ;;  %v4091_v29 = vsel %vm7381_vm2, %v4086_v17, %v4090_v52  ;;  %v8685_v0 = vld [vmem:[%s7350_s6 + $0xbc] sm:$0x1] }
 0x11d   : > { %6382 = vmatprep.mubr.bf16.mxu1 %v9248_v47  ;;  %6606 = vmatprep.mubr.bf16.mxu0 %v8430_v1  ;;  %v8645_v1 = vrot.slane %v4099_v12, 4  ;;  %v8647_v9 = vrot.slane %v4109_v5, 4  ;;  %v4136_v18 = vshll.u32 %v8614_v14, 16  ;;  %v4123_v21 = vor.u32 %v4122_v26, %v4119_v8  ;;  %v5817_v3 = vld [vmem:[%s7350_s6 + $0x60] sm:$0xe] }
 0x11e   : > { %6635 = vmatpush3.bf16.msra.mxu0 %v7083_v53  ;;  %v5489_v53 = vcombine.low %v8436_v11, %v8470_v15  ;;  %v4141_v57 = vshrl.u32 %v5778_v45, 16  ;;  %v4144_v6 = vshll.u32 %v5778_v45, 16  ;;  %v9249_v54 = vsel %vm7381_vm2, %v8472_v60, %v8391_v24  ;;  %v5816_v60 = vld [vmem:[%s7350_s6 + $0x54] sm:$0xe] }
 0x11f   : > { %6636 = vmatprep.subr.bf16.mxu0 %v7085_v62  ;;  %v5793_v31 = vcombine.low %v9249_v54, %v3995_v28  ;;  %v5490_v35 = vcombine.low %v8530_v13, %v8556_v43  ;;  %v8659_v63 = vcombine.low %v4009_v27, %v4019_v20  ;;  %v4150_v23 = vshll.u32 %v8630_v56, 16  ;;  %v7091_v27 = vld [vmem:[%s9193_s1 + $0x228] sm:$0xff]  }
 0x120   : > { %v8663_v11 = vcombine.low %v4033_v55, %v4043_v48  ;;  %v8665_v15 = vcombine.low %v4057_v42, %v4067_v41  ;;  %v8667_v37 = vcombine.low %v4081_v59, %v4091_v29  ;;  %v4133_v24 = vor.u32 %v4132_v34, %v8638_v4  ;;  %v5818_v48 = vld [vmem:[%s7350_s6 + $0x6c] sm:$0xe]  ;;  %v5781_v29 = vld [vmem:[%s7350_s6 + $0xc0] sm:$0xf] }
 0x121   : > { %v4105_v44 = vsel %vm7381_vm2, %v8645_v1, %v8585_v50  ;;  %v4115_v28 = vsel %vm7381_vm2, %v8647_v9, %v8636_v46  ;;  %v8682_v16 = vrot.slane %v4136_v18, 5  ;;  %v9250_v17 = vcombine.low %v8368_v38, %v8372_v61  ;;  %v9251_v46 = vld [vmem:[#allocation8_spill] sm:$0xff]  ;;  %v9252_v18 = vld [vmem:[#allocation9_spill] sm:$0xff] }
 0x122   : > { %6637 = vmatpush3.bf16.msra.mxu0 %v7085_v62  ;;  %v4154_v62 = vshrl.u32 %v8630_v56, 16  ;;  %v8691_v50 = vrot.slane %v4123_v21, 4  ;;  %v8693_v52 = vrot.slane %v4141_v57, 4  ;;  %v8695_v12 = vrot.slane %v4144_v6, 5  ;;  %v9253_v21 = vld [vmem:[#allocation10_spill] sm:$0xff] }
 0x123   : > { %6638 = vmatprep.subr.bf16.mxu0 %v7088_v58  ;;  %v5831_v5 = vrot.slane %v5815_v36, 9  ;;  %v8699_v20 = vrot.slane %v4150_v23, 5  ;;  %v4627_v55 = vrot.slane %v8232_v49, 5  ;;  %v4630_v8 = vrot.slane %v8287_v7, 5  ;;  %v7094_v49 = vld [vmem:[%s9193_s1 + $0x230] sm:$0xff]  }
 0x124   : > { %6383 = vmatmul.mubr.bf16.gmra.mrb[24].mxu1 %v9250_v17  ;;  %6607 = vmatmul.mubr.bf16.gmra.mrb[8].mxu0 %v8517_v30  ;;  %v5832_v38 = vrot.slane %v5816_v60, 9  ;;  %v8703_v61 = vrot.slane %v4133_v24, 4  ;;  %v4160_v26 = vshll.u32 %v8685_v0, 16  ;;  %v4634_v47 = vrot.slane %v8270_v2, 5  ;;  %v8745_v36 = vld [vmem:[%s7350_s6 + $0xc4] sm:$0xf] }
 0x125   : > { %6386 = vmatprep.mubr.bf16.mxu1 %v5489_v53  ;;  %6610 = vmatprep.mubr.bf16.mxu0 %v5793_v31  ;;  %v4637_v30 = vrot.slane %v8314_v32, 5  ;;  %v8709_v42 = vrot.slane %v4154_v62, 4  ;;  %v8716_v7 = vsel %vm7628_vm5, %v5831_v5, %v4627_v55  ;;  %v4629_v41 = vrot.slane %v4627_v55, 4  ;;  %v7097_v24 = vld [vmem:[%s9193_s1 + $0x238] sm:$0xff]  }
 0x126   : > { %6639 = vmatpush3.bf16.msra.mxu0 %v7088_v58  ;;  %v5833_v45 = vrot.slane %v5817_v3, 9  ;;  %v8720_v59 = vsel %vm7628_vm5, %v5832_v38, %v4634_v47  ;;  %v4636_v2 = vrot.slane %v4634_v47, 4  ;;  %v4641_v32 = vrot.slane %v8336_v51, 5  ;;  %v7086_v58 = vld [vmem:[%s7350_s6 + $0xc] sm:$0xff]   ;;  %v5819_v3 = vld [vmem:[%s7350_s6 + $0x78] sm:$0xe] }
 0x127   : > { %6640 = vmatprep.subr.bf16.mxu0 %v7091_v27  ;;  %v4644_v34 = vrot.slane %v9251_v46, 5  ;;  %v8728_v1 = vsel %vm7628_vm5, %v4629_v41, %v4630_v8  ;;  %v5834_v9 = vrot.slane %v5818_v48, 9  ;;  %v4648_v53 = vrot.slane %v9252_v18, 5  ;;  %v5820_v8 = vld [vmem:[%s7350_s6 + $0x84] sm:$0xe]  ;;  %v9256_v46 = vld [vmem:[#allocation7_spill] sm:$0xff] }
 0x128   : > { %v4651_v57 = vrot.slane %v9253_v21, 5  ;;  %v5847_v6 = vcombine.low %v8716_v7, %v8728_v1  ;;  %v8736_v51 = vsel %vm7628_vm5, %v4636_v2, %v4637_v30  ;;  %v8740_v54 = vsel %vm7628_vm5, %v5833_v45, %v4641_v32  ;;  %v5784_v41 = vld [vmem:[%s7350_s6 + $0xcc] sm:$0xf]  ;;  %v8810_v18 = vld [vmem:[%s7350_s6 + $0xd0] sm:$0xf] }
 0x129   : > { %v4643_v31 = vrot.slane %v4641_v32, 4  ;;  %v8742_v23 = vcombine.low %v4105_v44, %v4115_v28  ;;  %v5848_v60 = vcombine.low %v8720_v59, %v8736_v51  ;;  %v4650_v62 = vrot.slane %v4648_v53, 4  ;;  %v9255_v32 = vld [vmem:[#allocation6_spill] sm:$0xff] }
 0x12a   : > { %6641 = vmatpush3.bf16.msra.mxu0 %v7091_v27  ;;  %v8754_v27 = vsel %vm7628_vm5, %v5834_v9, %v4648_v53  ;;  %v4129_v44 = vsel %vm7381_vm2, %v8691_v50, %v8638_v4  ;;  %v4165_v28 = vshrl.u32 %v5781_v29, 16  ;;  %v4168_v17 = vshll.u32 %v5781_v29, 16  ;;  %v5582_v50 = vld [vmem:[%s7350_s6 + $0x78] sm:$0xf]  ;;  %v7089_v29 = vld [vmem:[%s7350_s6 + $0x24] sm:$0xff]  }
 0x12b   : > { %6642 = vmatprep.subr.bf16.mxu0 %v7094_v49  ;;  %v8765_v5 = vsel %vm7628_vm5, %v4643_v31, %v4644_v34  ;;  %v4147_v13 = vor.u32 %v8695_v12, %v8693_v52  ;;  %v8771_v43 = vrot.slane %v4160_v26, 5  ;;  %v4157_v52 = vor.u32 %v8709_v42, %v8699_v20  ;;  %v9254_v26 = vld [vmem:[#allocation11_spill] sm:$0xff] }
 0x12c   : > { %6387 = vmatmul.mubr.bf16.gmra.mrb[28].mxu1 %v5490_v35  ;;  %6611 = vmatmul.mubr.bf16.gmra.mrb[12].mxu0 %v8659_v63  ;;  %v5849_v4 = vcombine.low %v8740_v54, %v8765_v5  ;;  %v8777_v35 = vsel %vm7628_vm5, %v4650_v62, %v4651_v57  ;;  %v4139_v63 = vsel %vm7381_vm2, %v8703_v61, %v8682_v16  ;;  %v4174_v12 = vshll.u32 %v8745_v36, 16  ;;  %v7087_v61 = vld [vmem:[%s7350_s6 + $0x18] sm:$0xff]   ;;  %v8813_v57 = vld [vmem:[%s7350_s6 + $0xc8] sm:$0x1] }
 0x12d   : > { %6406 = vmatprep.mubr.bf16.mxu1 %v7086_v58  ;;  %6614 = vmatprep.mubr.bf16.mxu0 %v8663_v11  ;;  %v5850_v55 = vcombine.low %v8754_v27, %v8777_v35  ;;  %v4178_v38 = vshrl.u32 %v8745_v36, 16  ;;  %v5835_v11 = vrot.slane %v5819_v3, 9  ;;  %v4655_v47 = vrot.slane %v9254_v26, 5  ;;  %v7168_v54 = vld [vmem:[%s7350_s6 + $0x98] sm:$0x1] }
 0x12e   : > { %6643 = vmatpush3.bf16.msra.mxu0 %v7094_v49  ;;  %v4658_v16 = vrot.slane %v8503_v19, 5  ;;  %v4167_v30 = vrot.slane %v4165_v28, 4  ;;  %v4170_v48 = vrot.slane %v4168_v17, 5  ;;  %v2409_v42 = vshrl.u32 %v5582_v50, 16  ;;  %v9257_v28 = vld [vmem:[#allocation12_spill] sm:$0xff] }
 0x12f   : > { %6644 = vmatprep.subr.bf16.mxu0 %v7097_v24  ;;  %v2412_v49 = vshll.u32 %v5582_v50, 16  ;;  %v8798_v45 = vsel %vm7628_vm5, %v5835_v11, %v4655_v47  ;;  %v4657_v2 = vrot.slane %v4655_v47, 4  ;;  %v2431_v34 = vsel %vm7381_vm2, %v9256_v46, %v9255_v32  ;;  %v9260_v46 = vld [vmem:[#allocation5_spill] sm:$0xff] }
 0x130   : > { %v5836_v58 = vrot.slane %v5820_v8, 9  ;;  %v8805_v19 = vcombine.low %v4129_v44, %v4139_v63  ;;  %v8807_v9 = vrot.slane %v4174_v12, 5  ;;  %v2411_v53 = vrot.slane %v2409_v42, 4  ;;  %v5821_v12 = vld [vmem:[%s7350_s6 + $0x90] sm:$0xe] }
 0x131   : > { %v2414_v21 = vrot.slane %v2412_v49, 5  ;;  %v4180_v31 = vrot.slane %v4178_v38, 4  ;;  %v8817_v62 = vsel %vm7628_vm5, %v4657_v2, %v4658_v16  ;;  %v4662_v17 = vrot.slane %v9257_v28, 5  ;;  %v9258_v8 = vld [vmem:[#allocation15_spill] sm:$0xff] }
 0x132   : > { %6645 = vmatpush3.bf16.msra.mxu0 %v7097_v24  ;;  %v4665_v44 = vrot.slane %v8511_v33, 5  ;;  %v4171_v3 = vor.u32 %v4170_v48, %v4167_v30  ;;  %v4189_v50 = vshrl.u32 %v5784_v41, 16  ;;  %v5851_v63 = vcombine.low %v8798_v45, %v8817_v62  ;;  %v7147_v30 = vld [vmem:[%s9193_s1 + $0x108] sm:$0xff]  }
 0x133   : > { %v2415_v24 = vor.u32 %v2414_v21, %v2411_v53  ;;  %v4192_v38 = vshll.u32 %v5784_v41, 16  ;;  %v4198_v11 = vshll.u32 %v8810_v18, 16  ;;  %v8829_v26 = vsel %vm7628_vm5, %v5836_v58, %v4662_v17  ;;  %v7090_v41 = vld [vmem:[%s7350_s6 + $0x30] sm:$0xff]   ;;  %v7092_v53 = vld [vmem:[%s7350_s6 + $0x3c] sm:$0xff]  }
 0x134   : > { %6407 = vmatmul.mubr.bf16.vlgmr.msra.gmra.mrb[0].mxu1 %v7087_v61  ;;  %6615 = vmatmul.mubr.bf16.gmra.mrb[16].mxu0 %v8665_v15  ;;  %v4664_v33 = vrot.slane %v4662_v17, 4  ;;  %v4148_v47 = vrot.slane %v4147_v13, 4  ;;  %v4184_v16 = vshll.u32 %v8813_v57, 16  ;;  %v4202_v15 = vshrl.u32 %v8810_v18, 16 }
 0x135   : > { %6686 = vmatpush3.bf16.msra.mxu1 %v9258_v8  ;;  %6410 = vmatprep.mubr.bf16.mxu1 %v7089_v29  ;;  %v2416_v61 = vrot.slane %v2415_v24, 4  ;;  %v4181_v48 = vor.u32 %v4180_v31, %v8807_v9  ;;  %v5837_v49 = vrot.slane %v5821_v12, 9  ;;  %v4158_v2 = vrot.slane %v4157_v52, 4  ;;  %v7148_v52 = vld [vmem:[%s9193_s1 + $0x110] sm:$0xff]  }
 0x136   : > { %6618 = vmatprep.mubr.bf16.mxu0 %v8667_v37  ;;  %6679 = vmatprep.subr.bf16.mxu1 %v7147_v30  ;;  %v8840_v42 = vsel %vm7628_vm5, %v4664_v33, %v4665_v44  ;;  %v9259_v37 = vld [vmem:[#allocation13_spill] sm:$0xff]  ;;  %v4172_v32 = vrot.slane %v4171_v3, 4  ;;  %v4191_v21 = vrot.slane %v4189_v50, 4  ;;  %v4194_v31 = vrot.slane %v4192_v38, 5  ;;  %v8863_v38 = vld [vmem:[%s7350_s6 + $0xd4] sm:$0x1] }
 0x137   : > { %v4669_v13 = vrot.slane %v9259_v37, 5  ;;  %v2421_v58 = vsel %vm7381_vm2, %v2416_v61, %v9260_v46  ;;  %v5852_v29 = vcombine.low %v8829_v26, %v8840_v42  ;;  %v8850_v28 = vrot.slane %v4198_v11, 5  ;;  %v5811_v61 = vld [vmem:[%s7350_s6 + $0x18] sm:$0xe] }
 0x138   : > { %v8852_v17 = vcombine.low %v2421_v58, %v2431_v34  ;;  %v4204_v44 = vrot.slane %v4202_v15, 4  ;;  %v4672_v12 = vrot.slane %v8537_v40, 5  ;;  %v4182_v8 = vrot.slane %v4181_v48, 4  ;;  %v5822_v34 = vld [vmem:[%s7350_s6 + $0x9c] sm:$0xe] }
 0x139   : > { %6687 = vmatpush3.bf16.msra.mxu1 %v7147_v30  ;;  %v8859_v3 = vsel %vm7628_vm5, %v5837_v49, %v4669_v13  ;;  %v4671_v24 = vrot.slane %v4669_v13, 4  ;;  %v4186_v50 = vrot.slane %v4184_v16, 5  ;;  %v4153_v11 = vsel %vm7381_vm2, %v4148_v47, %v8699_v20  ;;  %v7150_v48 = vld [vmem:[%s7350_s6 + $0x1c] sm:$0xf]  ;;  %v9261_v49 = vld [vmem:[#allocation14_spill] sm:$0xff] }
 0x13a   : > { %6680 = vmatprep.subr.bf16.mxu1 %v7148_v52  ;;  %v4163_v40 = vsel %vm7381_vm2, %v4158_v2, %v8771_v43  ;;  %v4177_v16 = vsel %vm7381_vm2, %v4172_v32, %v8807_v9  ;;  %v4195_v47 = vor.u32 %v4194_v31, %v4191_v21  ;;  %v4208_v15 = vshll.u32 %v8863_v38, 16  ;;  %v7149_v9 = vld [vmem:[%s9193_s1 + $0x118] sm:$0xff]  }
 0x13b   : > { %v8871_v33 = vsel %vm7628_vm5, %v4671_v24, %v4672_v12  ;;  %v5838_v30 = vrot.slane %v5822_v34, 9  ;;  %v4187_v43 = vsel %vm7381_vm2, %v4182_v8, %v4186_v50  ;;  %v4676_v37 = vrot.slane %v9261_v49, 5  ;;  %v7095_v32 = vld [vmem:[%s7350_s6 + $0x54] sm:$0xff]   ;;  %v5823_v24 = vld [vmem:[%s7350_s6 + $0xa8] sm:$0xe] }
 0x13c   : > { %6411 = vmatmul.mubr.bf16.gmra.mrb[4].mxu1 %v7090_v41  ;;  %6619 = vmatmul.mubr.bf16.gmra.mrb[20].mxu0 %v8742_v23  ;;  %v5853_v20 = vcombine.low %v8859_v3, %v8871_v33  ;;  %v4205_v23 = vor.u32 %v4204_v44, %v8850_v28  ;;  %v4679_v13 = vrot.slane %v8563_v25, 5  ;;  %v7093_v41 = vld [vmem:[%s7350_s6 + $0x48] sm:$0xff]   ;;  %v5800_v2 = vcombine.low %v4153_v11, %v4163_v40  ;;  %v7151_v8 = vld [vmem:[%s7350_s6 + $0x20] sm:$0x1] }
 0x13d   : > { %6414 = vmatprep.mubr.bf16.mxu1 %v7092_v53  ;;  %6622 = vmatprep.mubr.bf16.mxu0 %v8805_v19  ;;  %v4599_v19 = vrot.slane %v7150_v48, 5  ;;  %v5827_v46 = vrot.slane %v5811_v61, 9  ;;  %v8898_v58 = vsel %vm7628_vm5, %v5838_v30, %v4676_v37  ;;  %v4678_v53 = vrot.slane %v4676_v37, 4  ;;  %v7152_v25 = vld [vmem:[%s9193_s1 + $0x120] sm:$0xff]   ;;  %v7153_v40 = vld [vmem:[%s7350_s6 + $0x28] sm:$0xf] }
 0x13e   : > { %6688 = vmatpush3.bf16.msra.mxu1 %v7148_v52  ;;  %v5801_v21 = vcombine.low %v4177_v16, %v4187_v43  ;;  %v4196_v31 = vrot.slane %v4195_v47, 4  ;;  %v4206_v52 = vrot.slane %v4205_v23, 4  ;;  %v4210_v44 = vrot.slane %v4208_v15, 5  ;;  %v5812_v43 = vld [vmem:[%s7350_s6 + $0x24] sm:$0xe] }
 0x13f   : > { %6681 = vmatprep.subr.bf16.mxu1 %v7149_v9  ;;  %v4601_v12 = vrot.slane %v4599_v19, 4  ;;  %v4602_v50 = vrot.slane %v7151_v8, 5  ;;  %v8907_v34 = vsel %vm7628_vm5, %v4678_v53, %v4679_v13  ;;  %v4606_v16 = vrot.slane %v7153_v40, 5  ;;  %v7154_v48 = vld [vmem:[%s7350_s6 + $0x34] sm:$0xf] }
 0x140   : > { %v5854_v11 = vcombine.low %v8898_v58, %v8907_v34  ;;  %v5839_v47 = vrot.slane %v5823_v24, 9  ;;  %v4683_v23 = vrot.slane %v8579_v22, 5  ;;  %v4201_v15 = vsel %vm7381_vm2, %v4196_v31, %v8850_v28  ;;  %v7155_v28 = vld [vmem:[%s9193_s1 + $0x128] sm:$0xff]   ;;  %v5824_v13 = vld [vmem:[%s7350_s6 + $0xb4] sm:$0xe] }
 0x141   : > { %v4211_v61 = vsel %vm7381_vm2, %v4206_v52, %v4210_v44  ;;  %v4600_v30 = vsel %vm7628_vm5, %v5827_v46, %v4599_v19  ;;  %v4603_v22 = vsel %vm7628_vm5, %v4601_v12, %v4602_v50  ;;  %v4613_v49 = vrot.slane %v7154_v48, 5  ;;  %v7156_v52 = vld [vmem:[%s7350_s6 + $0x2c] sm:$0x1]  ;;  %v5825_v48 = vld [vmem:[%s7350_s6 + $0xc0] sm:$0xe] }
 0x142   : > { %6689 = vmatpush3.bf16.msra.mxu1 %v7149_v9  ;;  %v4686_v9 = vrot.slane %v8614_v14, 5  ;;  %v8930_v37 = vsel %vm7628_vm5, %v5839_v47, %v4683_v23  ;;  %v4685_v19 = vrot.slane %v4683_v23, 4  ;;  %v5813_v14 = vld [vmem:[%s7350_s6 + $0x30] sm:$0xe]  ;;  %v5828_v46 = vrot.slane %v5812_v43, 9 }
 0x143   : > { %6682 = vmatprep.subr.bf16.mxu1 %v7152_v25  ;;  %v4608_v53 = vrot.slane %v4606_v16, 4  ;;  %v5843_v31 = vcombine.low %v4600_v30, %v4603_v22  ;;  %v4609_v44 = vrot.slane %v7156_v52, 5  ;;  %v5840_v12 = vrot.slane %v5824_v13, 9  ;;  %v7158_v47 = vld [vmem:[%s9193_s1 + $0x130] sm:$0xff]   ;;  %v7159_v22 = vld [vmem:[%s7350_s6 + $0x40] sm:$0xf] }
 0x144   : > { %6415 = vmatmul.mubr.bf16.gmra.mrb[8].mxu1 %v7093_v41  ;;  %6623 = vmatmul.mubr.bf16.gmra.mrb[24].mxu0 %v5800_v2  ;;  %v7096_v41 = vld [vmem:[%s7350_s6 + $0x60] sm:$0xff]   ;;  %v5802_v2 = vcombine.low %v4201_v15, %v4211_v61  ;;  %v5829_v8 = vrot.slane %v5813_v14, 9  ;;  %v4615_v50 = vrot.slane %v4613_v49, 4  ;;  %v4690_v23 = vrot.slane %v8630_v56, 5  ;;  %v5579_v14 = vld [vmem:[%s7350_s6 + $0x6c] sm:$0xf] }
 0x145   : > { %6418 = vmatprep.mubr.bf16.mxu1 %v7095_v32  ;;  %6626 = vmatprep.mubr.bf16.mxu0 %v5801_v21  ;;  %v7098_v32 = vld [vmem:[%s7350_s6 + $0x6c] sm:$0xff]   ;;  %v8938_v21 = vsel %vm7628_vm5, %v4685_v19, %v4686_v9  ;;  %v4693_v15 = vrot.slane %v8685_v0, 5  ;;  %v4607_v43 = vsel %vm7628_vm5, %v5828_v46, %v4606_v16  ;;  %v4610_v56 = vsel %vm7628_vm5, %v4608_v53, %v4609_v44  ;;  %v5814_v9 = vld [vmem:[%s7350_s6 + $0x3c] sm:$0xe] }
 0x146   : > { %6690 = vmatpush3.bf16.msra.mxu1 %v7152_v25  ;;  %v5855_v24 = vcombine.low %v8930_v37, %v8938_v21  ;;  %v7157_v25 = vld [vmem:[%s7350_s6 + $0x38] sm:$0x1]  ;;  %v8951_v61 = vsel %vm7628_vm5, %v5840_v12, %v4690_v23  ;;  %v4692_v30 = vrot.slane %v4690_v23, 4  ;;  %v4620_v0 = vrot.slane %v7159_v22, 5  ;;  %v7161_v12 = vld [vmem:[%s7350_s6 + $0x44] sm:$0x1] }
 0x147   : > { %6683 = vmatprep.subr.bf16.mxu1 %v7155_v28  ;;  %v4616_v40 = vrot.slane %v7157_v25, 5  ;;  %v7160_v16 = vld [vmem:[%s9193_s1 + $0x138] sm:$0xff]   ;;  %v5830_v46 = vrot.slane %v5814_v9, 9  ;;  %v5841_v53 = vrot.slane %v5825_v48, 9  ;;  %v2385_v25 = vshrl.u32 %v5579_v14, 16 }
 0x148   : > { %v8969_v13 = vsel %vm7628_vm5, %v4692_v30, %v4693_v15  ;;  %v4622_v44 = vrot.slane %v4620_v0, 4  ;;  %v5826_v15 = vld [vmem:[%s7350_s6 + $0xcc] sm:$0xe]  ;;  %v7162_v30 = vld [vmem:[%s7350_s6 + $0x70] sm:$0xf]  ;;  %v2476_v5 = vshll.u32 %v7168_v54, 16 }
 0x149   : > { %v4617_v19 = vsel %vm7628_vm5, %v4615_v50, %v4616_v40  ;;  %v4700_v50 = vrot.slane %v8813_v57, 5  ;;  %v2388_v40 = vshll.u32 %v5579_v14, 16  ;;  %v5842_v48 = vrot.slane %v5826_v15, 9 }
 0x14a   : > { %6691 = vmatpush3.bf16.msra.mxu1 %v7155_v28  ;;  %v4614_v28 = vsel %vm7628_vm5, %v5829_v8, %v4613_v49  ;;  %v7100_v49 = vld [vmem:[%s7350_s6 + $0x84] sm:$0xff]   ;;  %v4623_v8 = vrot.slane %v7161_v12, 5  ;;  %v7163_v12 = vld [vmem:[%s7350_s6 + $0x74] sm:$0x1] }
 0x14b   : > { %6684 = vmatprep.subr.bf16.mxu1 %v7158_v47  ;;  %v5845_v52 = vcombine.low %v4614_v28, %v4617_v19  ;;  %v2387_v28 = vrot.slane %v2385_v25, 4  ;;  %v2390_v19 = vrot.slane %v2388_v40, 5 }
 0x14c   : > { %6419 = vmatmul.mubr.bf16.gmra.mrb[12].mxu1 %v7096_v41  ;;  %6627 = vmatmul.mubr.bf16.gmra.mrb[28].mxu0 %v5802_v2  ;;  %v7099_v41 = vld [vmem:[%s7350_s6 + $0x78] sm:$0xff]   ;;  %v5856_v2 = vcombine.low %v8951_v61, %v8969_v13  ;;  %v4624_v9 = vsel %vm7628_vm5, %v4622_v44, %v4623_v8 }
 0x14d   : > { %6422 = vmatprep.mubr.bf16.mxu1 %v7098_v32  ;;  %6646 = vmatprep.mubr.bf16.mxu0 %v5843_v31  ;;  %v5844_v32 = vcombine.low %v4607_v43, %v4610_v56  ;;  %v4697_v31 = vrot.slane %v8745_v36, 5  ;;  %v2394_v43 = vshll.u32 %v7162_v30, 16  ;;  %v2398_v36 = vshrl.u32 %v7162_v30, 16 }
 0x14e   : > { %6692 = vmatpush3.bf16.msra.mxu1 %v7158_v47  ;;  %v4621_v56 = vsel %vm7628_vm5, %v5830_v46, %v4620_v0  ;;  %v7102_v0 = vld [vmem:[%s7350_s6 + $0x9c] sm:$0xff]   ;;  %v5585_v46 = vld [vmem:[%s7350_s6 + $0x84] sm:$0xf]  ;;  %v2391_v44 = vor.u32 %v2390_v19, %v2387_v28 }
 0x14f   : > { %6685 = vmatprep.subr.bf16.mxu1 %v7160_v16  ;;  %v8981_v47 = vsel %vm7628_vm5, %v5841_v53, %v4697_v31  ;;  %v4699_v23 = vrot.slane %v4697_v31, 4  ;;  %v8997_v14 = vrot.slane %v2394_v43, 5  ;;  %v5846_v53 = vcombine.low %v4621_v56, %v4624_v9  ;;  %v7103_v43 = vld [vmem:[%s7350_s6 + $0xa8] sm:$0xff]   ;;  %v5591_v19 = vld [vmem:[%s7350_s6 + $0x9c] sm:$0xf] }
 0x150   : > { %v2436_v25 = vshll.u32 %v5585_v46, 16  ;;  %v2392_v56 = vrot.slane %v2391_v44, 4  ;;  %v2481_v1 = vshrl.u32 %v5591_v19, 16 }
 0x151   : > { %v8987_v57 = vsel %vm7628_vm5, %v4699_v23, %v4700_v50  ;;  %v2433_v50 = vshrl.u32 %v5585_v46, 16  ;;  %v7164_v23 = vld [vmem:[%s7350_s6 + $0x88] sm:$0xf] }
 0x152   : > { %6693 = vmatpush3.bf16.msra.mxu1 %v7160_v16  ;;  %v5857_v22 = vcombine.low %v8981_v47, %v8987_v57  ;;  %v4704_v16 = vrot.slane %v8810_v18, 5  ;;  %v2404_v18 = vshll.u32 %v7163_v12, 16  ;;  %v2442_v15 = vshll.u32 %v7164_v23, 16 }
 0x153   : > { %v2446_v30 = vshrl.u32 %v7164_v23, 16  ;;  %v2438_v28 = vrot.slane %v2436_v25, 5  ;;  %v2397_v44 = vsel %vm7381_vm2, %v2392_v56, %v8997_v14 }
 0x154   : > { %6423 = vmatmul.mubr.bf16.gmra.mrb[16].mxu1 %v7099_v41  ;;  %6647 = vmatmul.mubr.bf16.vlgmr.msra.gmra.mrb[0].mxu0 %v5844_v32  ;;  %v7101_v41 = vld [vmem:[%s7350_s6 + $0x90] sm:$0xff]   ;;  %v2400_v32 = vrot.slane %v2398_v36, 4  ;;  %v9004_v31 = vsel %vm7628_vm5, %v5842_v48, %v4704_v16  ;;  %v2406_v36 = vrot.slane %v2404_v18, 5  ;;  %v2435_v48 = vrot.slane %v2433_v50, 4  ;;  %v7167_v50 = vld [vmem:[%s7350_s6 + $0x8c] sm:$0x1] }
 0x155   : > { %6426 = vmatprep.mubr.bf16.mxu1 %v7100_v49  ;;  %6650 = vmatprep.mubr.bf16.mxu0 %v5845_v52  ;;  %v4707_v49 = vrot.slane %v8863_v38, 5  ;;  %v4706_v52 = vrot.slane %v4704_v16, 4  ;;  %v7104_v16 = vld [vmem:[%s7350_s6 + $0xb4] sm:$0xff]   ;;  %v2452_v25 = vshll.u32 %v7167_v50, 16 }
 0x156   : > { %v2401_v38 = vor.u32 %v2400_v32, %v8997_v14  ;;  %v2448_v32 = vrot.slane %v2446_v30, 4  ;;  %v2439_v23 = vor.u32 %v2438_v28, %v2435_v48 }
 0x157   : > { %v9009_v8 = vsel %vm7628_vm5, %v4706_v52, %v4707_v49  ;;  %v2457_v49 = vshrl.u32 %v5588_v10, 16  ;;  %v7166_v52 = vld [vmem:[%s7350_s6 + $0xa0] sm:$0xf]  ;;  %v2454_v48 = vrot.slane %v2452_v25, 5  ;;  %v2478_v25 = vrot.slane %v2476_v5, 5 }
 0x158   : > { %v5858_v40 = vcombine.low %v9004_v31, %v9009_v8  ;;  %v2402_v9 = vrot.slane %v2401_v38, 4  ;;  %v2490_v12 = vshll.u32 %v7166_v52, 16  ;;  %v2494_v18 = vshrl.u32 %v7166_v52, 16  ;;  %v7170_v52 = vld [vmem:[%s7350_s6 + $0xac] sm:$0xf] }
 0x159   : > { %v2459_v30 = vrot.slane %v2457_v49, 4  ;;  %v2440_v28 = vrot.slane %v2439_v23, 4 }
 0x15a   : > { %v2407_v38 = vsel %vm7381_vm2, %v2402_v9, %v2406_v36  ;;  %v2483_v36 = vrot.slane %v2481_v1, 4  ;;  %v9041_v59 = vrot.slane %v2490_v12, 5  ;;  %v2496_v51 = vrot.slane %v2494_v18, 4 }
 0x15b   : > { %v5611_v9 = vcombine.low %v2397_v44, %v2407_v38  ;;  %v2514_v12 = vshll.u32 %v7170_v52, 16  ;;  %v2518_v18 = vshrl.u32 %v7170_v52, 16 }
 0x15c   : > { %6427 = vmatmul.mubr.bf16.gmra.mrb[20].mxu1 %v7101_v41  ;;  %6651 = vmatmul.mubr.bf16.gmra.mrb[4].mxu0 %v5846_v53  ;;  %v9022_v41 = vrot.slane %v2442_v15, 5  ;;  %v2460_v53 = vshll.u32 %v5588_v10, 16 }
 0x15d   : > { %6430 = vmatprep.mubr.bf16.mxu1 %v7102_v0  ;;  %6654 = vmatprep.mubr.bf16.mxu0 %v5847_v6  ;;  %v7165_v0 = vld [vmem:[%s7350_s6 + $0x94] sm:$0xf]  ;;  %v2484_v6 = vshll.u32 %v5591_v19, 16 }
 0x15e   : > { %v2466_v46 = vshll.u32 %v7165_v0, 16  ;;  %v2470_v7 = vshrl.u32 %v7165_v0, 16  ;;  %v2449_v15 = vor.u32 %v2448_v32, %v9022_v41  ;;  %v2462_v10 = vrot.slane %v2460_v53, 5  ;;  %v7169_v0 = vld [vmem:[%s7350_s6 + $0xa4] sm:$0x1] }
 0x15f   : > { %v2486_v56 = vrot.slane %v2484_v6, 5  ;;  %v2497_v53 = vor.u32 %v2496_v51, %v9041_v59  ;;  %v2445_v44 = vsel %vm7381_vm2, %v2440_v28, %v9022_v41  ;;  %v2516_v51 = vrot.slane %v2514_v12, 5 }
 0x160   : > { %v9039_v14 = vrot.slane %v2466_v46, 5  ;;  %v2450_v19 = vrot.slane %v2449_v15, 4  ;;  %v2500_v46 = vshll.u32 %v7169_v0, 16 }
 0x161   : > { %v2487_v49 = vor.u32 %v2486_v56, %v2483_v36 }
 0x162   : > { %v2455_v38 = vsel %vm7381_vm2, %v2450_v19, %v2454_v48  ;;  %v2502_v36 = vrot.slane %v2500_v46, 5  ;;  %v7173_v46 = vld [vmem:[%s7350_s6 + $0xc4] sm:$0xf] }
 0x164   : > { %6431 = vmatmul.mubr.bf16.gmra.mrb[24].mxu1 %v7103_v43  ;;  %6655 = vmatmul.mubr.bf16.gmra.mrb[8].mxu0 %v5848_v60  ;;  %v2472_v43 = vrot.slane %v2470_v7, 4  ;;  %v7105_v60 = vld [vmem:[%s7350_s6 + $0xc0] sm:$0xff]   ;;  %v5597_v7 = vld [vmem:[%s7350_s6 + $0xb4] sm:$0xf] }
 0x165   : > { %6434 = vmatprep.mubr.bf16.mxu1 %v7104_v16  ;;  %6658 = vmatprep.mubr.bf16.mxu0 %v5849_v4  ;;  %v2463_v16 = vor.u32 %v2462_v10, %v2459_v30  ;;  %v5594_v4 = vld [vmem:[%s7350_s6 + $0xa8] sm:$0xf]  ;;  %v2529_v23 = vshrl.u32 %v5597_v7, 16  ;;  %v2532_v15 = vshll.u32 %v5597_v7, 16  ;;  %v7171_v30 = vld [vmem:[%s7350_s6 + $0xb8] sm:$0xf] }
 0x166   : > { %v2473_v32 = vor.u32 %v2472_v43, %v9039_v14  ;;  %v2505_v1 = vshrl.u32 %v5594_v4, 16  ;;  %v2508_v6 = vshll.u32 %v5594_v4, 16  ;;  %v2538_v27 = vshll.u32 %v7171_v30, 16 }
 0x167   : > { %v2464_v50 = vrot.slane %v2463_v16, 4  ;;  %v2542_v35 = vshrl.u32 %v7171_v30, 16  ;;  %v2488_v10 = vrot.slane %v2487_v49, 4  ;;  %v2498_v43 = vrot.slane %v2497_v53, 4  ;;  %v7172_v49 = vld [vmem:[%s7350_s6 + $0xb0] sm:$0x1] }
 0x168   : > { %v2507_v41 = vrot.slane %v2505_v1, 4  ;;  %v2510_v56 = vrot.slane %v2508_v6, 5  ;;  %v2531_v48 = vrot.slane %v2529_v23, 4  ;;  %v2534_v28 = vrot.slane %v2532_v15, 5  ;;  %v7174_v6 = vld [vmem:[%s7350_s6 + $0xbc] sm:$0x1] }
 0x169   : > { %v2540_v45 = vrot.slane %v2538_v27, 5  ;;  %v2544_v62 = vrot.slane %v2542_v35, 4  ;;  %v2469_v19 = vsel %vm7381_vm2, %v2464_v50, %v9039_v14  ;;  %v2493_v54 = vsel %vm7381_vm2, %v2488_v10, %v9041_v59  ;;  %v7175_v35 = vld [vmem:[%s7350_s6 + $0xc8] sm:$0x1] }
 0x16a   : > { %v2503_v5 = vsel %vm7381_vm2, %v2498_v43, %v2502_v36  ;;  %v2511_v4 = vor.u32 %v2510_v56, %v2507_v41  ;;  %v2524_v53 = vshll.u32 %v7172_v49, 16  ;;  %v2562_v7 = vshll.u32 %v7173_v46, 16 }
 0x16b   : > { %v2566_v59 = vshrl.u32 %v7173_v46, 16  ;;  %v2545_v1 = vor.u32 %v2544_v62, %v2540_v45  ;;  %v2548_v52 = vshll.u32 %v7174_v6, 16 }
 0x16c   : > { %6435 = vmatmul.mubr.bf16.gmra.mrb[28].mxu1 %v7105_v60  ;;  %6659 = vmatmul.mubr.bf16.gmra.mrb[12].mxu0 %v5850_v55  ;;  %v2474_v55 = vrot.slane %v2473_v32, 4  ;;  %v2520_v60 = vrot.slane %v2518_v18, 4  ;;  %v5615_v18 = vcombine.low %v2493_v54, %v2503_v5  ;;  %v2526_v26 = vrot.slane %v2524_v53, 5 }
 0x16d   : > { %6470 = vmatprep.mubr.bf16.mxu1 %v5611_v9  ;;  %6662 = vmatprep.mubr.bf16.mxu0 %v5851_v63  ;;  %v5613_v9 = vcombine.low %v2445_v44, %v2455_v38  ;;  %v5600_v63 = vld [vmem:[%s7350_s6 + $0xc0] sm:$0xf]  ;;  %v2512_v44 = vrot.slane %v2511_v4, 4  ;;  %v2564_v50 = vrot.slane %v2562_v7, 5  ;;  %v2546_v15 = vrot.slane %v2545_v1, 4  ;;  %s5902_s6 = sshll.u32 %s9267_s12, 7 }
 0x16e   : > { %v2479_v16 = vsel %vm7381_vm2, %v2474_v55, %v2478_v25  ;;  %v2521_v32 = vor.u32 %v2520_v60, %v2516_v51  ;;  %v2553_v14 = vshrl.u32 %v5600_v63, 16  ;;  %v2556_v0 = vshll.u32 %v5600_v63, 16  ;;  %s9132_s21 = scalar_lea.vmem %s9195_s3, %s5902_s6 }
 0x16f   : > { %v5614_v12 = vcombine.low %v2469_v19, %v2479_v16  ;;  %v2568_v25 = vrot.slane %v2566_v59, 4  ;;  %v2550_v30 = vrot.slane %v2548_v52, 5  ;;  %v2517_v3 = vsel %vm7381_vm2, %v2512_v44, %v2516_v51 }
 0x170   : > { %v2522_v38 = vrot.slane %v2521_v32, 4  ;;  %v2555_v42 = vrot.slane %v2553_v14, 4  ;;  %v2572_v55 = vshll.u32 %v7175_v35, 16 }
 0x171   : > { %v2569_v27 = vor.u32 %v2568_v25, %v2564_v50  ;;  %v2551_v43 = vsel %vm7381_vm2, %v2546_v15, %v2550_v30 }
 0x172   : > { %v2527_v33 = vsel %vm7381_vm2, %v2522_v38, %v2526_v26  ;;  %v2574_v41 = vrot.slane %v2572_v55, 5 }
 0x173   : > { %v5616_v58 = vcombine.low %v2517_v3, %v2527_v33  ;;  %v2570_v36 = vrot.slane %v2569_v27, 4 }
 0x174   : > { %6471 = vmatmul.mubr.bf16.vlgmr.msra.gmra.mrb[16].mxu1 %v8852_v17  ;;  %6663 = vmatmul.mubr.bf16.gmra.mrb[16].mxu0 %v5852_v29  ;;  %v2535_v17 = vor.u32 %v2534_v28, %v2531_v48  ;;  %v2558_v29 = vrot.slane %v2556_v0, 5 }
 0x175   : > { %6474 = vmatprep.mubr.bf16.mxu1 %v5613_v9  ;;  %6666 = vmatprep.mubr.bf16.mxu0 %v5853_v20  ;;  %v2575_v21 = vsel %vm7381_vm2, %v2570_v36, %v2574_v41 }
 0x176   : > { %v2536_v23 = vrot.slane %v2535_v17, 4  ;;  %v2559_v20 = vor.u32 %v2558_v29, %v2555_v42 }
 0x178   : > { %v2541_v10 = vsel %vm7381_vm2, %v2536_v23, %v2540_v45 }
 0x179   : > { %v5617_v34 = vcombine.low %v2541_v10, %v2551_v43 }
 0x17c   : > { %6475 = vmatmul.mubr.bf16.gmra.mrb[20].mxu1 %v5614_v12  ;;  %6667 = vmatmul.mubr.bf16.gmra.mrb[20].mxu0 %v5854_v11  ;;  %v2560_v11 = vrot.slane %v2559_v20, 4 }
 0x17d   : > { %6478 = vmatprep.mubr.bf16.mxu1 %v5615_v18  ;;  %6670 = vmatprep.mubr.bf16.mxu0 %v5855_v24 }
 0x17e   : > { %v2565_v37 = vsel %vm7381_vm2, %v2560_v11, %v2564_v50 }
 0x17f   : > { %v5618_v24 = vcombine.low %v2565_v37, %v2575_v21 }
 0x184   : > { %6479 = vmatmul.mubr.bf16.gmra.mrb[24].mxu1 %v5616_v58  ;;  %6671 = vmatmul.mubr.bf16.gmra.mrb[24].mxu0 %v5856_v2 }
 0x185   : > { %6482 = vmatprep.mubr.bf16.mxu1 %v5617_v34  ;;  %6674 = vmatprep.mubr.bf16.mxu0 %v5857_v22 }
 0x18c   : > { %6483 = vmatmul.mubr.bf16.gmra.mrb[28].mxu1 %v5618_v24  ;;  %6675 = vmatmul.mubr.bf16.gmra.mrb[28].mxu0 %v5858_v40  ;;  %v9122_v40 = vld [vmem:[#allocation2] ss:$0 sm:$0xff] }
 0x207   : > { %v6408_v56 = vpop.f32.mrb[0].mxu1 }
 0x208   : > { %v1985_v61 = vpop.f32.mrb[1].mxu1 }
 0x209   : > { %v6409_v13 = vpop.f32.mrb[2].mxu1 }
 0x20a   : > { %v1988_v2 = vpop.f32.mrb[3].mxu1 }
 0x20f   : > { %v6412_v51 = vpop.f32.mrb[4].mxu1 }
 0x210   : > { %v2001_v60 = vpop.f32.mrb[5].mxu1 }
 0x211   : > { %v6413_v9 = vpop.f32.mrb[6].mxu1 }
 0x212   : > { %v2004_v48 = vpop.f32.mrb[7].mxu1 }
 0x217   : > { %v6416_v39 = vpop.f32.mrb[8].mxu1 }
 0x218   : > { %v2017_v28 = vpop.f32.mrb[9].mxu1 }
 0x219   : > { %v6417_v45 = vpop.f32.mrb[10].mxu1 }
 0x21a   : > { %v9112_v62 = vpop.f32.mrb[11].mxu1 }
 0x21f   : > { %v9114_v47 = vpop.f32.mrb[12].mxu1 }
 0x220   : > { %v9116_v57 = vpop.f32.mrb[13].mxu1 }
 0x221   : > { %v9118_v22 = vpop.f32.mrb[14].mxu1 }
 0x222   : > { %v9120_v31 = vpop.f32.mrb[15].mxu1 }
 0x227   : > { %v6648_v8 = vpop.f32.mrb[0].mxu0 }
 0x228   : > { %v6694_v63 = vadd.f32 %v6648_v8, %v6408_v56  ;;  %v4871_v19 = vpop.f32.mrb[1].mxu0 }
 0x229   : > { %v6695_v16 = vadd.f32 %v4871_v19, %v1985_v61  ;;  %v6649_v54 = vpop.f32.mrb[2].mxu0 }
 0x22a   : > { %v5039_v5 = vadd.f32 %v6694_v63, %v9122_v40  ;;  %v6696_v4 = vadd.f32 %v6649_v54, %v6409_v13  ;;  %v4874_v32 = vpop.f32.mrb[3].mxu0 }
 0x22b   : > { %v5037_v49 = vadd.f32 %v6695_v16, %v9122_v40  ;;  %v6697_v53 = vadd.f32 %v4874_v32, %v1988_v2 }
 0x22c   : > { %v5071_v14 = vmul.f32 0.1, %v5039_v5  ;;  %v5040_v0 = vadd.f32 %v6696_v4, %v9122_v40 }
 0x22d   : > { %v5069_v46 = vmul.f32 0.1, %v5037_v49  ;;  %v5038_v7 = vadd.f32 %v6697_v53, %v9122_v40 }
 0x22e   : > { %v5072_v59 = vmul.f32 0.1, %v5040_v0  ;;  %v5103_v6 = vmax.f32 %v5039_v5, %v5071_v14 }
 0x22f   : > { %v5070_v17 = vmul.f32 0.1, %v5038_v7  ;;  %v6652_v1 = vpop.f32.mrb[4].mxu0  ;;  %v5101_v44 = vmax.f32 %v5037_v49, %v5069_v46 }
 0x230   : > { %v5104_v52 = vmax.f32 %v5040_v0, %v5072_v59  ;;  %v6698_v12 = vadd.f32 %v6652_v1, %v6412_v51  ;;  %v4887_v18 = vpop.f32.mrb[5].mxu0 }
 0x231   : > { %v5102_v38 = vmax.f32 %v5038_v7, %v5070_v17  ;;  %v6699_v26 = vadd.f32 %v4887_v18, %v2001_v60  ;;  %v6653_v42 = vpop.f32.mrb[6].mxu0 }
 0x232   : > { %v5943_v29 = vpack.c.bf16 %v5104_v52, %v5103_v6  ;;  %v5043_v50 = vadd.f32 %v6698_v12, %v9122_v40  ;;  %v6700_v25 = vadd.f32 %v6653_v42, %v6413_v9  ;;  %v4890_v23 = vpop.f32.mrb[7].mxu0 }
 0x233   : > { %v5938_v15 = vpack.c.bf16 %v5102_v38, %v5101_v44  ;;  %v5041_v30 = vadd.f32 %v6699_v26, %v9122_v40  ;;  %v6701_v3 = vadd.f32 %v4890_v23, %v2004_v48 }
 0x234   : > { %6015 = vst [vmem:[%s9132_s21 + $0x8] sm:$0xff] %v5943_v29   ;;  %v5075_v33 = vmul.f32 0.1, %v5043_v50  ;;  %v5044_v20 = vadd.f32 %v6700_v25, %v9122_v40 }
 0x235   : > { %5939 = vst [vmem:[%s9132_s21] sm:$0xff] %v5938_v15   ;;  %v5073_v27 = vmul.f32 0.1, %v5041_v30  ;;  %v5042_v35 = vadd.f32 %v6701_v3, %v9122_v40 }
 0x236   : > { %v5076_v55 = vmul.f32 0.1, %v5044_v20  ;;  %v5107_v58 = vmax.f32 %v5043_v50, %v5075_v33 }
 0x237   : > { %v5074_v10 = vmul.f32 0.1, %v5042_v35  ;;  %v6656_v43 = vpop.f32.mrb[8].mxu0  ;;  %v5105_v41 = vmax.f32 %v5041_v30, %v5073_v27 }
 0x238   : > { %v5108_v34 = vmax.f32 %v5044_v20, %v5076_v55  ;;  %v6702_v11 = vadd.f32 %v6656_v43, %v6416_v39  ;;  %v4903_v36 = vpop.f32.mrb[9].mxu0 }
 0x239   : > { %v5106_v37 = vmax.f32 %v5042_v35, %v5074_v10  ;;  %v6703_v21 = vadd.f32 %v4903_v36, %v2017_v28  ;;  %v6657_v24 = vpop.f32.mrb[10].mxu0 }
 0x23a   : > { %v5953_v56 = vpack.c.bf16 %v5108_v34, %v5107_v58  ;;  %v5047_v61 = vadd.f32 %v6702_v11, %v9122_v40  ;;  %v6704_v13 = vadd.f32 %v6657_v24, %v6417_v45  ;;  %v4906_v2 = vpop.f32.mrb[11].mxu0 }
 0x23b   : > { %v5948_v51 = vpack.c.bf16 %v5106_v37, %v5105_v41  ;;  %v5045_v60 = vadd.f32 %v6703_v21, %v9122_v40  ;;  %v6705_v9 = vadd.f32 %v4906_v2, %v9112_v62 }
 0x23c   : > { %6017 = vst [vmem:[%s9132_s21 + $0x18] sm:$0xff] %v5953_v56   ;;  %v5079_v48 = vmul.f32 0.1, %v5047_v61  ;;  %v5048_v39 = vadd.f32 %v6704_v13, %v9122_v40 }
 0x23d   : > { %6016 = vst [vmem:[%s9132_s21 + $0x10] sm:$0xff] %v5948_v51   ;;  %v5077_v8 = vmul.f32 0.1, %v5045_v60  ;;  %v5046_v63 = vadd.f32 %v6705_v9, %v9122_v40 }
 0x23e   : > { %v5080_v28 = vmul.f32 0.1, %v5048_v39  ;;  %v5111_v54 = vmax.f32 %v5047_v61, %v5079_v48 }
 0x23f   : > { %v5078_v19 = vmul.f32 0.1, %v5046_v63  ;;  %v6660_v16 = vpop.f32.mrb[12].mxu0  ;;  %v5109_v32 = vmax.f32 %v5045_v60, %v5077_v8 }
 0x240   : > { %v5112_v45 = vmax.f32 %v5048_v39, %v5080_v28  ;;  %v6706_v5 = vadd.f32 %v6660_v16, %v9114_v47  ;;  %v4919_v4 = vpop.f32.mrb[13].mxu0 }
 0x241   : > { %v5110_v62 = vmax.f32 %v5046_v63, %v5078_v19  ;;  %v6707_v49 = vadd.f32 %v4919_v4, %v9116_v57  ;;  %v6661_v53 = vpop.f32.mrb[14].mxu0 }
 0x242   : > { %v5963_v14 = vpack.c.bf16 %v5112_v45, %v5111_v54  ;;  %v5051_v0 = vadd.f32 %v6706_v5, %v9122_v40  ;;  %v6708_v46 = vadd.f32 %v6661_v53, %v9118_v22  ;;  %v4922_v7 = vpop.f32.mrb[15].mxu0 }
 0x243   : > { %v5958_v59 = vpack.c.bf16 %v5110_v62, %v5109_v32  ;;  %v5049_v17 = vadd.f32 %v6707_v49, %v9122_v40  ;;  %v6709_v1 = vadd.f32 %v4922_v7, %v9120_v31 }
 0x244   : > { %6019 = vst [vmem:[%s9132_s21 + $0x28] sm:$0xff] %v5963_v14   ;;  %v5083_v47 = vmul.f32 0.1, %v5051_v0  ;;  %v5052_v6 = vadd.f32 %v6708_v46, %v9122_v40 }
 0x245   : > { %6018 = vst [vmem:[%s9132_s21 + $0x20] sm:$0xff] %v5958_v59   ;;  %v5081_v52 = vmul.f32 0.1, %v5049_v17  ;;  %v5050_v57 = vadd.f32 %v6709_v1, %v9122_v40 }
 0x246   : > { %v5084_v12 = vmul.f32 0.1, %v5052_v6  ;;  %v5115_v22 = vmax.f32 %v5051_v0, %v5083_v47 }
 0x247   : > { %v6472_v18 = vpop.f32.mrb[16].mxu1  ;;  %v5082_v44 = vmul.f32 0.1, %v5050_v57  ;;  %v6664_v38 = vpop.f32.mrb[16].mxu0  ;;  %v5113_v31 = vmax.f32 %v5049_v17, %v5081_v52 }
 0x248   : > { %v2802_v26 = vpop.f32.mrb[17].mxu1  ;;  %v5116_v42 = vmax.f32 %v5052_v6, %v5084_v12  ;;  %v6710_v29 = vadd.f32 %v6664_v38, %v6472_v18  ;;  %v4935_v50 = vpop.f32.mrb[17].mxu0 }
 0x249   : > { %v6473_v25 = vpop.f32.mrb[18].mxu1  ;;  %v5114_v23 = vmax.f32 %v5050_v57, %v5082_v44  ;;  %v6711_v15 = vadd.f32 %v4935_v50, %v2802_v26  ;;  %v6665_v30 = vpop.f32.mrb[18].mxu0 }
 0x24a   : > { %v2805_v3 = vpop.f32.mrb[19].mxu1  ;;  %v5973_v33 = vpack.c.bf16 %v5116_v42, %v5115_v22  ;;  %v5055_v20 = vadd.f32 %v6710_v29, %v9122_v40  ;;  %v6712_v27 = vadd.f32 %v6665_v30, %v6473_v25  ;;  %v4938_v35 = vpop.f32.mrb[19].mxu0 }
 0x24b   : > { %v5968_v55 = vpack.c.bf16 %v5114_v23, %v5113_v31  ;;  %v5053_v10 = vadd.f32 %v6711_v15, %v9122_v40  ;;  %v6713_v43 = vadd.f32 %v4938_v35, %v2805_v3 }
 0x24c   : > { %6021 = vst [vmem:[%s9132_s21 + $0x38] sm:$0xff] %v5973_v33   ;;  %v5087_v58 = vmul.f32 0.1, %v5055_v20  ;;  %v5056_v34 = vadd.f32 %v6712_v27, %v9122_v40 }
 0x24d   : > { %6020 = vst [vmem:[%s9132_s21 + $0x30] sm:$0xff] %v5968_v55   ;;  %v5085_v11 = vmul.f32 0.1, %v5053_v10  ;;  %v5054_v36 = vadd.f32 %v6713_v43, %v9122_v40 }
 0x24e   : > { %v5088_v41 = vmul.f32 0.1, %v5056_v34  ;;  %v5119_v61 = vmax.f32 %v5055_v20, %v5087_v58 }
 0x24f   : > { %v6476_v37 = vpop.f32.mrb[20].mxu1  ;;  %v5086_v21 = vmul.f32 0.1, %v5054_v36  ;;  %v6668_v24 = vpop.f32.mrb[20].mxu0  ;;  %v5117_v9 = vmax.f32 %v5053_v10, %v5085_v11 }
 0x250   : > { %v2818_v56 = vpop.f32.mrb[21].mxu1  ;;  %v5120_v13 = vmax.f32 %v5056_v34, %v5088_v41  ;;  %v6714_v2 = vadd.f32 %v6668_v24, %v6476_v37  ;;  %v4951_v51 = vpop.f32.mrb[21].mxu0 }
 0x251   : > { %v6477_v60 = vpop.f32.mrb[22].mxu1  ;;  %v5118_v48 = vmax.f32 %v5054_v36, %v5086_v21  ;;  %v6715_v39 = vadd.f32 %v4951_v51, %v2818_v56  ;;  %v6669_v8 = vpop.f32.mrb[22].mxu0 }
 0x252   : > { %v2821_v63 = vpop.f32.mrb[23].mxu1  ;;  %v5983_v28 = vpack.c.bf16 %v5120_v13, %v5119_v61  ;;  %v5059_v19 = vadd.f32 %v6714_v2, %v9122_v40  ;;  %v6716_v16 = vadd.f32 %v6669_v8, %v6477_v60  ;;  %v4954_v54 = vpop.f32.mrb[23].mxu0 }
 0x253   : > { %v5978_v45 = vpack.c.bf16 %v5118_v48, %v5117_v9  ;;  %v5057_v5 = vadd.f32 %v6715_v39, %v9122_v40  ;;  %v6717_v4 = vadd.f32 %v4954_v54, %v2821_v63 }
 0x254   : > { %6023 = vst [vmem:[%s9132_s21 + $0x48] sm:$0xff] %v5983_v28   ;;  %v5091_v32 = vmul.f32 0.1, %v5059_v19  ;;  %v5060_v62 = vadd.f32 %v6716_v16, %v9122_v40 }
 0x255   : > { %6022 = vst [vmem:[%s9132_s21 + $0x40] sm:$0xff] %v5978_v45   ;;  %v5089_v49 = vmul.f32 0.1, %v5057_v5  ;;  %v5058_v53 = vadd.f32 %v6717_v4, %v9122_v40 }
 0x256   : > { %v5092_v14 = vmul.f32 0.1, %v5060_v62  ;;  %v5123_v17 = vmax.f32 %v5059_v19, %v5091_v32 }
 0x257   : > { %v6480_v0 = vpop.f32.mrb[24].mxu1  ;;  %v5090_v46 = vmul.f32 0.1, %v5058_v53  ;;  %v6672_v7 = vpop.f32.mrb[24].mxu0  ;;  %v5121_v57 = vmax.f32 %v5057_v5, %v5089_v49 }
 0x258   : > { %v2834_v59 = vpop.f32.mrb[25].mxu1  ;;  %v5124_v1 = vmax.f32 %v5060_v62, %v5092_v14  ;;  %v6718_v47 = vadd.f32 %v6672_v7, %v6480_v0  ;;  %v4967_v6 = vpop.f32.mrb[25].mxu0 }
 0x259   : > { %v6481_v52 = vpop.f32.mrb[26].mxu1  ;;  %v5122_v12 = vmax.f32 %v5058_v53, %v5090_v46  ;;  %v6719_v18 = vadd.f32 %v4967_v6, %v2834_v59  ;;  %v6673_v44 = vpop.f32.mrb[26].mxu0 }
 0x25a   : > { %v2837_v38 = vpop.f32.mrb[27].mxu1  ;;  %v5993_v26 = vpack.c.bf16 %v5124_v1, %v5123_v17  ;;  %v5063_v22 = vadd.f32 %v6718_v47, %v9122_v40  ;;  %v6720_v42 = vadd.f32 %v6673_v44, %v6481_v52  ;;  %v4970_v29 = vpop.f32.mrb[27].mxu0 }
 0x25b   : > { %v5988_v50 = vpack.c.bf16 %v5122_v12, %v5121_v57  ;;  %v5061_v25 = vadd.f32 %v6719_v18, %v9122_v40  ;;  %v6721_v31 = vadd.f32 %v4970_v29, %v2837_v38 }
 0x25c   : > { %6025 = vst [vmem:[%s9132_s21 + $0x58] sm:$0xff] %v5993_v26   ;;  %v5095_v23 = vmul.f32 0.1, %v5063_v22  ;;  %v5064_v15 = vadd.f32 %v6720_v42, %v9122_v40 }
 0x25d   : > { %6024 = vst [vmem:[%s9132_s21 + $0x50] sm:$0xff] %v5988_v50   ;;  %v5093_v30 = vmul.f32 0.1, %v5061_v25  ;;  %v5062_v3 = vadd.f32 %v6721_v31, %v9122_v40 }
 0x25e   : > { %v5096_v33 = vmul.f32 0.1, %v5064_v15  ;;  %v5127_v10 = vmax.f32 %v5063_v22, %v5095_v23 }
 0x25f   : > { %v6484_v20 = vpop.f32.mrb[28].mxu1  ;;  %v5094_v27 = vmul.f32 0.1, %v5062_v3  ;;  %v6676_v35 = vpop.f32.mrb[28].mxu0  ;;  %v5125_v36 = vmax.f32 %v5061_v25, %v5093_v30 }
 0x260   : > { %v2850_v55 = vpop.f32.mrb[29].mxu1  ;;  %v5128_v43 = vmax.f32 %v5064_v15, %v5096_v33  ;;  %v6722_v58 = vadd.f32 %v6676_v35, %v6484_v20  ;;  %v4983_v34 = vpop.f32.mrb[29].mxu0 }
 0x261   : > { %v6485_v11 = vpop.f32.mrb[30].mxu1  ;;  %v5126_v41 = vmax.f32 %v5062_v3, %v5094_v27  ;;  %v6723_v37 = vadd.f32 %v4983_v34, %v2850_v55  ;;  %v6677_v21 = vpop.f32.mrb[30].mxu0 }
 0x262   : > { %v2853_v24 = vpop.f32.mrb[31].mxu1  ;;  %v6003_v56 = vpack.c.bf16 %v5128_v43, %v5127_v10  ;;  %v5067_v61 = vadd.f32 %v6722_v58, %v9122_v40  ;;  %v6724_v13 = vadd.f32 %v6677_v21, %v6485_v11  ;;  %v4986_v2 = vpop.f32.mrb[31].mxu0 }
 0x263   : > { %v5998_v51 = vpack.c.bf16 %v5126_v41, %v5125_v36  ;;  %v5065_v60 = vadd.f32 %v6723_v37, %v9122_v40  ;;  %v6725_v9 = vadd.f32 %v4986_v2, %v2853_v24 }
 0x264   : > { %6027 = vst [vmem:[%s9132_s21 + $0x68] sm:$0xff] %v6003_v56   ;;  %v5099_v48 = vmul.f32 0.1, %v5067_v61  ;;  %v5068_v39 = vadd.f32 %v6724_v13, %v9122_v40 }
 0x265   : > { %6026 = vst [vmem:[%s9132_s21 + $0x60] sm:$0xff] %v5998_v51   ;;  %v5097_v8 = vmul.f32 0.1, %v5065_v60  ;;  %v5066_v63 = vadd.f32 %v6725_v9, %v9122_v40 }
 0x266   : > { %v5100_v28 = vmul.f32 0.1, %v5068_v39  ;;  %v5131_v16 = vmax.f32 %v5067_v61, %v5099_v48 }
 0x267   : > { %v5098_v19 = vmul.f32 0.1, %v5066_v63  ;;  %v5129_v45 = vmax.f32 %v5065_v60, %v5097_v8 }
 0x268   : > { %v5132_v54 = vmax.f32 %v5068_v39, %v5100_v28 }
 0x269   : > { %v5130_v5 = vmax.f32 %v5066_v63, %v5098_v19 }
 0x26a   : > { %v6013_v4 = vpack.c.bf16 %v5132_v54, %v5131_v16 }
 0x26b   : > { %v6008_v32 = vpack.c.bf16 %v5130_v5, %v5129_v45 }
 0x26c   : > { %6029 = vst [vmem:[%s9132_s21 + $0x78] sm:$0xff] %v6013_v4  }
 0x26d   : > { %6028 = vst [vmem:[%s9132_s21 + $0x70] sm:$0xff] %v6008_v32  }
 0x26e PF: > { %s14_s14 = sadd.s32 1, %s7230_s14   ;;  %s9262_s12 = smov %s7226_s13 }
 0x26f   : > { %p11_p4 = scmp.ge.s32.totalorder %s14_s14, 4   ;;  %s9263_s13 = smov %s9265_s16 }
 0x271   :  { %13 = sbr.rel (!%p11_p4) target bundleno = 2 (0x2), region = 73 }
 0x278   :  { %5320 = vsyncpa [#allocation3], 1 }
 0x279   :  { %5322 = vsyncpa [#allocation3 + $0x1], 1 }

// kernel: yolo_forward.10
= control target key start
LH: loop header
LB: loop body
LE: loop exit
PB: predicated region body
PF: predicated region fallthrough
CT: control target
= control target key end

     0   :  { %s3144_s12 = smov 0   ;;  %s3146_s13 = smov 0   ;;  %s3507_s0 = inlined_call_operand.vmem [shape: bf16[2,8192], index: 0, kind: input, shape index: {}]   ;;  %s3508_s1 = inlined_call_operand.vmem [shape: bf16[8192,256], index: 1, kind: input, shape index: {}]   ;;  %s3509_s2 = inlined_call_operand.vmem [shape: f32[1,256], index: 2, kind: input, shape index: {}]   ;;  %s3510_s3 = inlined_call_operand.vmem [shape: bf16[2,256], index: 3, kind: output, shape index: {}]  }
   0x1   :  { %s3148_s14 = smov 0  }
   0x2 LB: > { %s22_s15 = sadd.s32 1, %s3115_s13  ;;  %p2388_p0 = scmp.ge.s32.totalorder %s3119_s14, 1  ;;  %s3119_s14 = sphi %s3148_s14, %s13_s14   ;;  %s3115_s13 = sphi %s3146_s13, %s3512_s13   ;;  %s3111_s12 = sphi %s3144_s12, %s3511_s12  }
   0x3   : > { %p23_p1 = scmp.ge.s32.totalorder %s22_s15, 4  ;;  %p178_p2 = scmp.lt.s32.totalorder %s3119_s14, 5 }
   0x5   : > { %s3514_s15 = smov (%p23_p1, %s22_s15), 0  ;;  %p179_p3 = pnand %p2388_p0, %p178_p2 }
   0x6   : > { %s2389_s16 = sshll.u32 (!%p179_p3), %s3111_s12, 4  ;;  %s2390_s17 = sshll.u32 (!%p179_p3), %s3111_s12, 8 }
   0x7   : > { %182 = sbr.rel (%p179_p3) target bundleno = 525 (0x20d), region = 32  ;;  %p215_p4 = scmp.lt.s32.totalorder (!%p179_p3), %s2389_s16, 63 }
   0x8   : > { %p221_p5 = scmp.lt.s32.totalorder (!%p179_p3), %s2390_s17, 1023  ;;  %p2393_p6 = scmp.ne.s32.totalorder (!%p179_p3), %s3111_s12, 0 }
   0xe   : > { %s3516_s16 = smov (!%p215_p4, %s2389_s16), 63  ;;  %s3518_s17 = smov (!%p221_p5, %s2390_s17), 1023 }
   0xf   : > { %s3169_s20 = scalar_lea.vmem %s3507_s0, %s3516_s16  ;;  %s2657_s21 = sshll.u32 %s3518_s17, 3  ;;  %v3121_v0 = vmov (!%p2393_p6), 0.0  }
  0x10   : > { %s3174_s24 = scalar_lea.vmem %s3508_s1, %s2657_s21  ;;  %244 = sbr.rel (%p2393_p6) target bundleno = 23 (0x17), region = 36  ;;  %245 = vst [vmem:[#allocation2] sm:$0xf] (!%p2393_p6), %v3121_v0 }
  0x17 PF: > { %v2711_v1 = vld [vmem:[%s3174_s24 + $0x4] ss:$8 sps:$4 sm:$0xff]   ;;  %v2715_v3 = vld [vmem:[%s3174_s24] ss:$8 sps:$4 sm:$0xff]   ;;  %v2717_v5 = vld [vmem:[%s3174_s24 + $0x14] ss:$8 sps:$4 sm:$0xff]   ;;  %v511_v39 = vlaneseq }
  0x18   : > { %v2713_v2 = vld [vmem:[%s3174_s24 + $0x404] ss:$8 sps:$4 sm:$0xff]   ;;  %1901 = vmatprep.subr.bf16.mxu1 %v2711_v1  ;;  %v2716_v4 = vld [vmem:[%s3174_s24 + $0x400] ss:$8 sps:$4 sm:$0xff]   ;;  %v2719_v6 = vld [vmem:[%s3174_s24 + $0x414] ss:$8 sps:$4 sm:$0xff]  }
  0x19   : > { %2065 = vmatprep.subr.bf16.mxu0 %v2713_v2  ;;  %1902 = vmatpush1.bf16.msra.mxu1 %v2715_v3  ;;  %v2721_v7 = vld [vmem:[%s3174_s24 + $0x10] ss:$8 sps:$4 sm:$0xff]   ;;  %v2723_v9 = vld [vmem:[%s3174_s24 + $0x24] ss:$8 sps:$4 sm:$0xff]   ;;  %v2727_v11 = vld [vmem:[%s3174_s24 + $0x20] ss:$8 sps:$4 sm:$0xff]  }
  0x1a   : > { %2066 = vmatpush1.bf16.msra.mxu0 %v2716_v4  ;;  %1903 = vmatprep.subr.bf16.mxu1 %v2717_v5  ;;  %v2722_v8 = vld [vmem:[%s3174_s24 + $0x410] ss:$8 sps:$4 sm:$0xff]   ;;  %v2725_v10 = vld [vmem:[%s3174_s24 + $0x424] ss:$8 sps:$4 sm:$0xff]   ;;  %v2728_v12 = vld [vmem:[%s3174_s24 + $0x420] ss:$8 sps:$4 sm:$0xff]  }
  0x1b   : > { %2067 = vmatprep.subr.bf16.mxu0 %v2719_v6  ;;  %v2729_v13 = vld [vmem:[%s3174_s24 + $0x34] ss:$8 sps:$4 sm:$0xff]   ;;  %v2733_v15 = vld [vmem:[%s3174_s24 + $0x30] ss:$8 sps:$4 sm:$0xff]   ;;  %v2735_v17 = vld [vmem:[%s3174_s24 + $0x44] ss:$8 sps:$4 sm:$0xff]  }
  0x1c   : > { %v2731_v14 = vld [vmem:[%s3174_s24 + $0x434] ss:$8 sps:$4 sm:$0xff]   ;;  %v2734_v16 = vld [vmem:[%s3174_s24 + $0x430] ss:$8 sps:$4 sm:$0xff]   ;;  %v2737_v18 = vld [vmem:[%s3174_s24 + $0x444] ss:$8 sps:$4 sm:$0xff]  }
  0x1d   : > { %1904 = vmatpush1.bf16.msra.mxu1 %v2721_v7  ;;  %v2739_v19 = vld [vmem:[%s3174_s24 + $0x40] ss:$8 sps:$4 sm:$0xff]   ;;  %v2741_v21 = vld [vmem:[%s3174_s24 + $0x54] ss:$8 sps:$4 sm:$0xff]   ;;  %v2745_v23 = vld [vmem:[%s3174_s24 + $0x50] ss:$8 sps:$4 sm:$0xff]  }
  0x1e   : > { %2068 = vmatpush1.bf16.msra.mxu0 %v2722_v8  ;;  %1905 = vmatprep.subr.bf16.mxu1 %v2723_v9  ;;  %v2740_v20 = vld [vmem:[%s3174_s24 + $0x440] ss:$8 sps:$4 sm:$0xff]   ;;  %v2743_v22 = vld [vmem:[%s3174_s24 + $0x454] ss:$8 sps:$4 sm:$0xff]   ;;  %v2746_v24 = vld [vmem:[%s3174_s24 + $0x450] ss:$8 sps:$4 sm:$0xff]  }
  0x1f   : > { %2069 = vmatprep.subr.bf16.mxu0 %v2725_v10  ;;  %v2747_v25 = vld [vmem:[%s3174_s24 + $0x64] ss:$8 sps:$4 sm:$0xff]   ;;  %v2751_v27 = vld [vmem:[%s3174_s24 + $0x60] ss:$8 sps:$4 sm:$0xff]   ;;  %v2753_v29 = vld [vmem:[%s3174_s24 + $0x74] ss:$8 sps:$4 sm:$0xff]  }
  0x20   : > { %v2749_v26 = vld [vmem:[%s3174_s24 + $0x464] ss:$8 sps:$4 sm:$0xff]   ;;  %v2752_v28 = vld [vmem:[%s3174_s24 + $0x460] ss:$8 sps:$4 sm:$0xff]   ;;  %v2755_v30 = vld [vmem:[%s3174_s24 + $0x474] ss:$8 sps:$4 sm:$0xff]  }
  0x21   : > { %1906 = vmatpush1.bf16.msra.mxu1 %v2727_v11  ;;  %v2757_v31 = vld [vmem:[%s3174_s24 + $0x70] ss:$8 sps:$4 sm:$0xff]   ;;  %v2759_v33 = vld [vmem:[%s3174_s24 + $0x84] ss:$8 sps:$4 sm:$0xff]   ;;  %v2763_v35 = vld [vmem:[%s3174_s24 + $0x80] ss:$8 sps:$4 sm:$0xff]  }
  0x22   : > { %2070 = vmatpush1.bf16.msra.mxu0 %v2728_v12  ;;  %1907 = vmatprep.subr.bf16.mxu1 %v2729_v13  ;;  %v2758_v32 = vld [vmem:[%s3174_s24 + $0x470] ss:$8 sps:$4 sm:$0xff]   ;;  %v2761_v34 = vld [vmem:[%s3174_s24 + $0x484] ss:$8 sps:$4 sm:$0xff]   ;;  %v2764_v36 = vld [vmem:[%s3174_s24 + $0x480] ss:$8 sps:$4 sm:$0xff]  }
  0x23   : > { %2071 = vmatprep.subr.bf16.mxu0 %v2731_v14  ;;  %v3122_v37 = vmov 1966171168   ;;  %v2765_v40 = vld [vmem:[%s3174_s24 + $0x94] ss:$8 sps:$4 sm:$0xff]   ;;  %v2769_v42 = vld [vmem:[%s3174_s24 + $0x90] ss:$8 sps:$4 sm:$0xff]  }
  0x24   : > { %v509_v38 = vunpack.c.l.s4 %v3122_v37  ;;  %v2767_v41 = vld [vmem:[%s3174_s24 + $0x494] ss:$8 sps:$4 sm:$0xff]   ;;  %v3216_v44 = vshrl.u32 %v511_v39, 7  ;;  %v2770_v45 = vld [vmem:[%s3174_s24 + $0x490] ss:$8 sps:$4 sm:$0xff]   ;;  %v247_v53 = vld [vmem:[%s3169_s20] sm:$0xff] }
  0x25   : > { %1908 = vmatpush1.bf16.msra.mxu1 %v2733_v15  ;;  %v2771_v46 = vld [vmem:[%s3174_s24 + $0xa4] ss:$8 sps:$4 sm:$0xff]   ;;  %v2775_v48 = vld [vmem:[%s3174_s24 + $0xa0] ss:$8 sps:$4 sm:$0xff]   ;;  %v2777_v51 = vld [vmem:[%s3174_s24 + $0xb4] ss:$8 sps:$4 sm:$0xff]   ;;  %v507_v13 = vcombine.high %v247_v53, %v247_v53 }
  0x26   : > { %2072 = vmatpush1.bf16.msra.mxu0 %v2734_v16  ;;  %1909 = vmatprep.subr.bf16.mxu1 %v2735_v17  ;;  %v510_v43 = vunpack.c.0.s8 %v509_v38  ;;  %v2773_v47 = vld [vmem:[%s3174_s24 + $0x4a4] ss:$8 sps:$4 sm:$0xff]   ;;  %v2776_v49 = vld [vmem:[%s3174_s24 + $0x4a0] ss:$8 sps:$4 sm:$0xff]   ;;  %v2779_v52 = vld [vmem:[%s3174_s24 + $0x4b4] ss:$8 sps:$4 sm:$0xff]  }
  0x27   : > { %2073 = vmatprep.subr.bf16.mxu0 %v2737_v18  ;;  %v2781_v54 = vld [vmem:[%s3174_s24 + $0xb0] ss:$8 sps:$4 sm:$0xff]   ;;  %v248_v57 = vld [vmem:[%s3169_s20 + $0x8] sm:$0xff]  ;;  %v2789_v2 = vld [vmem:[%s3174_s24 + $0xd4] ss:$8 sps:$4 sm:$0xff]   ;;  %p2650_p7 = scmp.ne.s32.totalorder %s3111_s12, 3 }
  0x28   : > { %v3224_v50 = vsub.s32 %v510_v43, %v3216_v44  ;;  %v2782_v56 = vld [vmem:[%s3174_s24 + $0x4b0] ss:$8 sps:$4 sm:$0xff]   ;;  %v2783_v58 = vld [vmem:[%s3174_s24 + $0xc4] ss:$8 sps:$4 sm:$0xff]   ;;  %v2787_v0 = vld [vmem:[%s3174_s24 + $0xc0] ss:$8 sps:$4 sm:$0xff]   ;;  %v556_v14 = vcombine.high %v248_v57, %v248_v57 }
  0x29   : > { %1910 = vmatpush1.bf16.msra.mxu1 %v2739_v19  ;;  %v2785_v59 = vld [vmem:[%s3174_s24 + $0x4c4] ss:$8 sps:$4 sm:$0xff]   ;;  %v2788_v1 = vld [vmem:[%s3174_s24 + $0x4c0] ss:$8 sps:$4 sm:$0xff]   ;;  %v2791_v3 = vld [vmem:[%s3174_s24 + $0x4d4] ss:$8 sps:$4 sm:$0xff]  }
  0x2a   : > { %2074 = vmatpush1.bf16.msra.mxu0 %v2740_v20  ;;  %1911 = vmatprep.subr.bf16.mxu1 %v2741_v21  ;;  %v514_v55 = vrot.slane %v247_v53, %v3224_v50  ;;  %v563_v61 = vrot.slane %v248_v57, %v3224_v50  ;;  %v2793_v5 = vld [vmem:[%s3174_s24 + $0xd0] ss:$8 sps:$4 sm:$0xff]   ;;  %v2795_v7 = vld [vmem:[%s3174_s24 + $0xe4] ss:$8 sps:$4 sm:$0xff]   ;;  %v2799_v9 = vld [vmem:[%s3174_s24 + $0xe0] ss:$8 sps:$4 sm:$0xff]   ;;  %v521_v19 = vrot.slane %v507_v13, %v3224_v50 }
  0x2b   : > { %2075 = vmatprep.subr.bf16.mxu0 %v2743_v22  ;;  %v2794_v6 = vld [vmem:[%s3174_s24 + $0x4d0] ss:$8 sps:$4 sm:$0xff]   ;;  %v2797_v8 = vld [vmem:[%s3174_s24 + $0x4e4] ss:$8 sps:$4 sm:$0xff]   ;;  %v2800_v10 = vld [vmem:[%s3174_s24 + $0x4e0] ss:$8 sps:$4 sm:$0xff]   ;;  %v570_v20 = vrot.slane %v556_v14, %v3224_v50 }
  0x2c   : > { %v522_v60 = vcombine.high %v514_v55, %v514_v55  ;;  %v571_v63 = vcombine.high %v563_v61, %v563_v61  ;;  %v2801_v11 = vld [vmem:[%s3174_s24 + $0xf4] ss:$8 sps:$4 sm:$0xff]   ;;  %v2805_v15 = vld [vmem:[%s3174_s24 + $0xf0] ss:$8 sps:$4 sm:$0xff]   ;;  %v2810_v17 = vld [vmem:[%s3174_s24 + $0x104] ss:$8 sps:$4 sm:$0xff]   ;;  %v3260_v21 = vrot.slane %v514_v55, %v3224_v50  ;;  %v3263_v22 = vrot.slane %v563_v61, %v3224_v50 }
  0x2d   : > { %1912 = vmatpush1.bf16.msra.mxu1 %v2745_v23  ;;  %v2803_v12 = vld [vmem:[%s3174_s24 + $0x4f4] ss:$8 sps:$4 sm:$0xff]   ;;  %v2806_v16 = vld [vmem:[%s3174_s24 + $0x4f0] ss:$8 sps:$4 sm:$0xff]   ;;  %v2814_v18 = vld [vmem:[%s3174_s24 + $0x504] ss:$8 sps:$4 sm:$0xff]   ;;  %v523_v23 = vcombine.high %v521_v19, %v521_v19 }
  0x2e   : > { %2076 = vmatpush1.bf16.msra.mxu0 %v2746_v24  ;;  %1913 = vmatprep.subr.bf16.mxu1 %v2747_v25  ;;  %v3237_v62 = vrot.slane %v522_v60, %v3224_v50  ;;  %v593_v4 = vrot.slane %v571_v63, %v3224_v50  ;;  %v572_v24 = vcombine.high %v570_v20, %v570_v20  ;;  %v2808_v25 = vld [vmem:[%s3174_s24 + $0x100] ss:$8 sps:$4 sm:$0xff]   ;;  %v2823_v37 = vld [vmem:[%s3174_s24 + $0x124] ss:$8 sps:$4 sm:$0xff]   ;;  %v2827_v43 = vld [vmem:[%s3174_s24 + $0x130] ss:$8 sps:$4 sm:$0xff]  }
  0x2f   : > { %2077 = vmatprep.subr.bf16.mxu0 %v2749_v26  ;;  %v2812_v26 = vld [vmem:[%s3174_s24 + $0x500] ss:$8 sps:$4 sm:$0xff]   ;;  %v2826_v38 = vld [vmem:[%s3174_s24 + $0x524] ss:$8 sps:$4 sm:$0xff]   ;;  %v2839_v53 = vld [vmem:[%s3174_s24 + $0x150] ss:$8 sps:$4 sm:$0xff]  }
  0x30   : > { %1933 = vmatprep.mubr.bf16.mxu1 %v3237_v62  ;;  %2097 = vmatprep.mubr.bf16.mxu0 %v593_v4  ;;  %v2821_v39 = vld [vmem:[%s3174_s24 + $0x120] ss:$8 sps:$4 sm:$0xff]   ;;  %v2847_v55 = vld [vmem:[%s3174_s24 + $0x164] ss:$8 sps:$4 sm:$0xff]   ;;  %v2856_v60 = vld [vmem:[%s3174_s24 + $0x574] ss:$8 sps:$4 sm:$0xff]  }
  0x31   : > { %1914 = vmatpush1.bf16.msra.mxu1 %v2751_v27  ;;  %v2817_v27 = vld [vmem:[%s3174_s24 + $0x114] ss:$8 sps:$4 sm:$0xff]   ;;  %v2845_v57 = vld [vmem:[%s3174_s24 + $0x160] ss:$8 sps:$4 sm:$0xff]   ;;  %v2851_v61 = vld [vmem:[%s3174_s24 + $0x170] ss:$8 sps:$4 sm:$0xff]  }
  0x32   : > { %2078 = vmatpush1.bf16.msra.mxu0 %v2752_v28  ;;  %1915 = vmatprep.subr.bf16.mxu1 %v2753_v29  ;;  %v2820_v28 = vld [vmem:[%s3174_s24 + $0x514] ss:$8 sps:$4 sm:$0xff]   ;;  %v3270_v29 = vrot.slane %v523_v23, %v3224_v50  ;;  %v2859_v63 = vld [vmem:[%s3174_s24 + $0x184] ss:$8 sps:$4 sm:$0xff]   ;;  %v2875_v13 = vld [vmem:[%s3174_s24 + $0x1b0] ss:$8 sps:$4 sm:$0xff]  }
  0x33   : > { %2079 = vmatprep.subr.bf16.mxu0 %v2755_v30  ;;  %v3273_v30 = vrot.slane %v572_v24, %v3224_v50  ;;  %v2878_v14 = vld [vmem:[%s3174_s24 + $0x5b0] ss:$8 sps:$4 sm:$0xff]  }
  0x34   : > { %v2887_v23 = vld [vmem:[%s3174_s24 + $0x1d0] ss:$8 sps:$4 sm:$0xff]  }
  0x35   : > { %1916 = vmatpush1.bf16.msra.mxu1 %v2757_v31  ;;  %v3276_v31 = vrot.slane %v521_v19, %v3224_v50  ;;  %v2889_v19 = vld [vmem:[%s3174_s24 + $0x1d4] ss:$8 sps:$4 sm:$0xff]   ;;  %v2890_v24 = vld [vmem:[%s3174_s24 + $0x5d0] ss:$8 sps:$4 sm:$0xff]  }
  0x36   : > { %2080 = vmatpush1.bf16.msra.mxu0 %v2758_v32  ;;  %1917 = vmatprep.subr.bf16.mxu1 %v2759_v33  ;;  %v554_v32 = vcombine.high %v3237_v62, %v3237_v62  ;;  %v603_v33 = vcombine.high %v593_v4, %v593_v4  ;;  %v2854_v62 = vld [vmem:[%s3174_s24 + $0x570] ss:$8 sps:$4 sm:$0xff]   ;;  %v2868_v4 = vld [vmem:[%s3174_s24 + $0x594] ss:$8 sps:$4 sm:$0xff]  }
  0x37   : > { %2081 = vmatprep.subr.bf16.mxu0 %v2761_v34  ;;  %v3281_v34 = vrot.slane %v570_v20, %v3224_v50  ;;  %v2892_v20 = vld [vmem:[%s3174_s24 + $0x5d4] ss:$8 sps:$4 sm:$0xff]  }
  0x39   : > { %1918 = vmatpush1.bf16.msra.mxu1 %v2763_v35  ;;  %v2815_v35 = vld [vmem:[%s3174_s24 + $0x110] ss:$8 sps:$4 sm:$0xff]  }
  0x3a   : > { %2082 = vmatpush1.bf16.msra.mxu0 %v2764_v36  ;;  %1919 = vmatprep.subr.bf16.mxu1 %v2765_v40  ;;  %v2818_v36 = vld [vmem:[%s3174_s24 + $0x510] ss:$8 sps:$4 sm:$0xff]   ;;  %v2824_v40 = vld [vmem:[%s3174_s24 + $0x520] ss:$8 sps:$4 sm:$0xff]  }
  0x3b   : > { %2083 = vmatprep.subr.bf16.mxu0 %v2767_v41  ;;  %v2829_v41 = vld [vmem:[%s3174_s24 + $0x134] ss:$8 sps:$4 sm:$0xff]  }
  0x3d   : > { %1920 = vmatpush1.bf16.msra.mxu1 %v2769_v42  ;;  %v2832_v42 = vld [vmem:[%s3174_s24 + $0x534] ss:$8 sps:$4 sm:$0xff]  }
  0x3e   : > { %2084 = vmatpush1.bf16.msra.mxu0 %v2770_v45  ;;  %1921 = vmatprep.subr.bf16.mxu1 %v2771_v46  ;;  %v2830_v45 = vld [vmem:[%s3174_s24 + $0x530] ss:$8 sps:$4 sm:$0xff]   ;;  %v2835_v46 = vld [vmem:[%s3174_s24 + $0x144] ss:$8 sps:$4 sm:$0xff]  }
  0x3f   : > { %2085 = vmatprep.subr.bf16.mxu0 %v2773_v47  ;;  %v2838_v47 = vld [vmem:[%s3174_s24 + $0x544] ss:$8 sps:$4 sm:$0xff]  }
  0x41   : > { %1922 = vmatpush1.bf16.msra.mxu1 %v2775_v48  ;;  %v2833_v48 = vld [vmem:[%s3174_s24 + $0x140] ss:$8 sps:$4 sm:$0xff]  }
  0x42   : > { %2086 = vmatpush1.bf16.msra.mxu0 %v2776_v49  ;;  %1923 = vmatprep.subr.bf16.mxu1 %v2777_v51  ;;  %v2836_v49 = vld [vmem:[%s3174_s24 + $0x540] ss:$8 sps:$4 sm:$0xff]   ;;  %v2841_v51 = vld [vmem:[%s3174_s24 + $0x154] ss:$8 sps:$4 sm:$0xff]  }
  0x43   : > { %2087 = vmatprep.subr.bf16.mxu0 %v2779_v52  ;;  %v2844_v52 = vld [vmem:[%s3174_s24 + $0x554] ss:$8 sps:$4 sm:$0xff]  }
  0x45   : > { %1924 = vmatpush1.bf16.msra.mxu1 %v2781_v54  ;;  %v2842_v54 = vld [vmem:[%s3174_s24 + $0x550] ss:$8 sps:$4 sm:$0xff]  }
  0x46   : > { %2088 = vmatpush1.bf16.msra.mxu0 %v2782_v56  ;;  %1925 = vmatprep.subr.bf16.mxu1 %v2783_v58  ;;  %v2850_v56 = vld [vmem:[%s3174_s24 + $0x564] ss:$8 sps:$4 sm:$0xff]   ;;  %v2848_v58 = vld [vmem:[%s3174_s24 + $0x560] ss:$8 sps:$4 sm:$0xff]  }
  0x47   : > { %2089 = vmatprep.subr.bf16.mxu0 %v2785_v59  ;;  %v2853_v59 = vld [vmem:[%s3174_s24 + $0x174] ss:$8 sps:$4 sm:$0xff]  }
  0x49   : > { %1926 = vmatpush1.bf16.msra.mxu1 %v2787_v0  ;;  %v2862_v0 = vld [vmem:[%s3174_s24 + $0x584] ss:$8 sps:$4 sm:$0xff]  }
  0x4a   : > { %2090 = vmatpush1.bf16.msra.mxu0 %v2788_v1  ;;  %1927 = vmatprep.subr.bf16.mxu1 %v2789_v2  ;;  %v2857_v1 = vld [vmem:[%s3174_s24 + $0x180] ss:$8 sps:$4 sm:$0xff]  }
  0x4b   : > { %2091 = vmatprep.subr.bf16.mxu0 %v2791_v3  ;;  %v2860_v2 = vld [vmem:[%s3174_s24 + $0x580] ss:$8 sps:$4 sm:$0xff]   ;;  %v2865_v3 = vld [vmem:[%s3174_s24 + $0x194] ss:$8 sps:$4 sm:$0xff]  }
  0x4d   : > { %1928 = vmatpush1.bf16.msra.mxu1 %v2793_v5  ;;  %v2863_v5 = vld [vmem:[%s3174_s24 + $0x190] ss:$8 sps:$4 sm:$0xff]  }
  0x4e   : > { %2092 = vmatpush1.bf16.msra.mxu0 %v2794_v6  ;;  %1929 = vmatprep.subr.bf16.mxu1 %v2795_v7  ;;  %v2866_v6 = vld [vmem:[%s3174_s24 + $0x590] ss:$8 sps:$4 sm:$0xff]   ;;  %v2871_v7 = vld [vmem:[%s3174_s24 + $0x1a4] ss:$8 sps:$4 sm:$0xff]  }
  0x4f   : > { %2093 = vmatprep.subr.bf16.mxu0 %v2797_v8  ;;  %v2874_v8 = vld [vmem:[%s3174_s24 + $0x5a4] ss:$8 sps:$4 sm:$0xff]  }
  0x51   : > { %1930 = vmatpush1.bf16.msra.mxu1 %v2799_v9  ;;  %v2869_v9 = vld [vmem:[%s3174_s24 + $0x1a0] ss:$8 sps:$4 sm:$0xff]  }
  0x52   : > { %2094 = vmatpush1.bf16.msra.mxu0 %v2800_v10  ;;  %1931 = vmatprep.subr.bf16.mxu1 %v2801_v11  ;;  %v2872_v10 = vld [vmem:[%s3174_s24 + $0x5a0] ss:$8 sps:$4 sm:$0xff]   ;;  %v2877_v11 = vld [vmem:[%s3174_s24 + $0x1b4] ss:$8 sps:$4 sm:$0xff]  }
  0x53   : > { %2095 = vmatprep.subr.bf16.mxu0 %v2803_v12  ;;  %v2880_v12 = vld [vmem:[%s3174_s24 + $0x5b4] ss:$8 sps:$4 sm:$0xff]  }
  0x55   : > { %1932 = vmatpush1.bf16.msra.mxu1 %v2805_v15  ;;  %v2883_v15 = vld [vmem:[%s3174_s24 + $0x1c4] ss:$8 sps:$4 sm:$0xff]  }
  0x56   : > { %2096 = vmatpush1.bf16.msra.mxu0 %v2806_v16  ;;  %1942 = vmatprep.subr.bf16.mxu1 %v2810_v17  ;;  %v2886_v16 = vld [vmem:[%s3174_s24 + $0x5c4] ss:$8 sps:$4 sm:$0xff]   ;;  %v2881_v17 = vld [vmem:[%s3174_s24 + $0x1c0] ss:$8 sps:$4 sm:$0xff]  }
  0x57   : > { %2106 = vmatprep.subr.bf16.mxu0 %v2814_v18  ;;  %v2884_v18 = vld [vmem:[%s3174_s24 + $0x5c0] ss:$8 sps:$4 sm:$0xff]  }
  0x58   : > { %1934 = vmatmul.mubr.bf16.vlgmr.msra.gmra.mrb[0].mxu1 %v3260_v21 }
  0x59   : > { %2098 = vmatmul.mubr.bf16.vlgmr.msra.gmra.mrb[0].mxu0 %v3263_v22  ;;  %1943 = vmatpush1.bf16.msra.mxu1 %v2808_v25  ;;  %v2895_v25 = vld [vmem:[%s3174_s24 + $0x1e4] ss:$8 sps:$4 sm:$0xff]  }
  0x5a   : > { %2107 = vmatpush1.bf16.msra.mxu0 %v2812_v26  ;;  %1944 = vmatprep.subr.bf16.mxu1 %v2817_v27  ;;  %v2898_v26 = vld [vmem:[%s3174_s24 + $0x5e4] ss:$8 sps:$4 sm:$0xff]   ;;  %v2893_v27 = vld [vmem:[%s3174_s24 + $0x1e0] ss:$8 sps:$4 sm:$0xff]  }
  0x5b   : > { %2108 = vmatprep.subr.bf16.mxu0 %v2820_v28  ;;  %1974 = vmatprep.mubr.bf16.mxu1 %v554_v32  ;;  %v2896_v28 = vld [vmem:[%s3174_s24 + $0x5e0] ss:$8 sps:$4 sm:$0xff]   ;;  %v2901_v32 = vld [vmem:[%s3174_s24 + $0x1f4] ss:$8 sps:$4 sm:$0xff]  }
  0x5c   : > { %2138 = vmatprep.mubr.bf16.mxu0 %v603_v33  ;;  %v2904_v33 = vld [vmem:[%s3174_s24 + $0x5f4] ss:$8 sps:$4 sm:$0xff]  }
  0x5d   : > { %1945 = vmatpush1.bf16.msra.mxu1 %v2815_v35  ;;  %v2899_v35 = vld [vmem:[%s3174_s24 + $0x1f0] ss:$8 sps:$4 sm:$0xff]  }
  0x5e   : > { %2109 = vmatpush1.bf16.msra.mxu0 %v2818_v36  ;;  %1946 = vmatprep.subr.bf16.mxu1 %v2823_v37  ;;  %v2902_v36 = vld [vmem:[%s3174_s24 + $0x5f0] ss:$8 sps:$4 sm:$0xff]   ;;  %v2907_v37 = vld [vmem:[%s3174_s24 + $0x204] ss:$8 sps:$4 sm:$0xff]  }
  0x5f   : > { %2110 = vmatprep.subr.bf16.mxu0 %v2826_v38  ;;  %v2910_v38 = vld [vmem:[%s3174_s24 + $0x604] ss:$8 sps:$4 sm:$0xff]  }
  0x61   : > { %1947 = vmatpush1.bf16.msra.mxu1 %v2821_v39  ;;  %v552_v39 = vcombine.high %v3260_v21, %v3260_v21  ;;  %v2911_v21 = vld [vmem:[%s3174_s24 + $0x210] ss:$8 sps:$4 sm:$0xff]  }
  0x62   : > { %2111 = vmatpush1.bf16.msra.mxu0 %v2824_v40  ;;  %1948 = vmatprep.subr.bf16.mxu1 %v2829_v41  ;;  %v601_v40 = vcombine.high %v3263_v22, %v3263_v22  ;;  %v2905_v41 = vld [vmem:[%s3174_s24 + $0x200] ss:$8 sps:$4 sm:$0xff]   ;;  %v2914_v22 = vld [vmem:[%s3174_s24 + $0x610] ss:$8 sps:$4 sm:$0xff]  }
  0x63   : > { %2112 = vmatprep.subr.bf16.mxu0 %v2832_v42  ;;  %v2908_v42 = vld [vmem:[%s3174_s24 + $0x600] ss:$8 sps:$4 sm:$0xff]  }
  0x65   : > { %1949 = vmatpush1.bf16.msra.mxu1 %v2827_v43  ;;  %v2913_v43 = vld [vmem:[%s3174_s24 + $0x214] ss:$8 sps:$4 sm:$0xff]  }
  0x66   : > { %2113 = vmatpush1.bf16.msra.mxu0 %v2830_v45  ;;  %1950 = vmatprep.subr.bf16.mxu1 %v2835_v46  ;;  %v2916_v45 = vld [vmem:[%s3174_s24 + $0x614] ss:$8 sps:$4 sm:$0xff]   ;;  %v2919_v46 = vld [vmem:[%s3174_s24 + $0x224] ss:$8 sps:$4 sm:$0xff]  }
  0x67   : > { %2114 = vmatprep.subr.bf16.mxu0 %v2838_v47  ;;  %v2922_v47 = vld [vmem:[%s3174_s24 + $0x624] ss:$8 sps:$4 sm:$0xff]  }
  0x69   : > { %1951 = vmatpush1.bf16.msra.mxu1 %v2833_v48  ;;  %v2917_v48 = vld [vmem:[%s3174_s24 + $0x220] ss:$8 sps:$4 sm:$0xff]  }
  0x6a   : > { %2115 = vmatpush1.bf16.msra.mxu0 %v2836_v49  ;;  %1952 = vmatprep.subr.bf16.mxu1 %v2841_v51  ;;  %v2920_v49 = vld [vmem:[%s3174_s24 + $0x620] ss:$8 sps:$4 sm:$0xff]   ;;  %v2925_v51 = vld [vmem:[%s3174_s24 + $0x234] ss:$8 sps:$4 sm:$0xff]  }
  0x6b   : > { %2116 = vmatprep.subr.bf16.mxu0 %v2844_v52  ;;  %v2928_v52 = vld [vmem:[%s3174_s24 + $0x634] ss:$8 sps:$4 sm:$0xff]  }
  0x6d   : > { %1953 = vmatpush1.bf16.msra.mxu1 %v2839_v53  ;;  %v2923_v53 = vld [vmem:[%s3174_s24 + $0x230] ss:$8 sps:$4 sm:$0xff]  }
  0x6e   : > { %2117 = vmatpush1.bf16.msra.mxu0 %v2842_v54  ;;  %1954 = vmatprep.subr.bf16.mxu1 %v2847_v55  ;;  %v2926_v54 = vld [vmem:[%s3174_s24 + $0x630] ss:$8 sps:$4 sm:$0xff]   ;;  %v2931_v55 = vld [vmem:[%s3174_s24 + $0x244] ss:$8 sps:$4 sm:$0xff]  }
  0x6f   : > { %2118 = vmatprep.subr.bf16.mxu0 %v2850_v56  ;;  %v2934_v56 = vld [vmem:[%s3174_s24 + $0x644] ss:$8 sps:$4 sm:$0xff]  }
  0x71   : > { %1955 = vmatpush1.bf16.msra.mxu1 %v2845_v57  ;;  %v2929_v57 = vld [vmem:[%s3174_s24 + $0x240] ss:$8 sps:$4 sm:$0xff]  }
  0x72   : > { %2119 = vmatpush1.bf16.msra.mxu0 %v2848_v58  ;;  %1956 = vmatprep.subr.bf16.mxu1 %v2853_v59  ;;  %v2932_v58 = vld [vmem:[%s3174_s24 + $0x640] ss:$8 sps:$4 sm:$0xff]   ;;  %v2937_v59 = vld [vmem:[%s3174_s24 + $0x254] ss:$8 sps:$4 sm:$0xff]  }
  0x73   : > { %2120 = vmatprep.subr.bf16.mxu0 %v2856_v60  ;;  %v2940_v60 = vld [vmem:[%s3174_s24 + $0x654] ss:$8 sps:$4 sm:$0xff]  }
  0x75   : > { %1957 = vmatpush1.bf16.msra.mxu1 %v2851_v61  ;;  %v2935_v61 = vld [vmem:[%s3174_s24 + $0x250] ss:$8 sps:$4 sm:$0xff]  }
  0x76   : > { %2121 = vmatpush1.bf16.msra.mxu0 %v2854_v62  ;;  %1958 = vmatprep.subr.bf16.mxu1 %v2859_v63  ;;  %v2938_v62 = vld [vmem:[%s3174_s24 + $0x650] ss:$8 sps:$4 sm:$0xff]   ;;  %v2943_v63 = vld [vmem:[%s3174_s24 + $0x264] ss:$8 sps:$4 sm:$0xff]  }
  0x77   : > { %2122 = vmatprep.subr.bf16.mxu0 %v2862_v0  ;;  %v2946_v0 = vld [vmem:[%s3174_s24 + $0x664] ss:$8 sps:$4 sm:$0xff]  }
  0x79   : > { %1959 = vmatpush1.bf16.msra.mxu1 %v2857_v1  ;;  %v2941_v1 = vld [vmem:[%s3174_s24 + $0x260] ss:$8 sps:$4 sm:$0xff]  }
  0x7a   : > { %2123 = vmatpush1.bf16.msra.mxu0 %v2860_v2  ;;  %1960 = vmatprep.subr.bf16.mxu1 %v2865_v3  ;;  %v2944_v2 = vld [vmem:[%s3174_s24 + $0x660] ss:$8 sps:$4 sm:$0xff]   ;;  %v2949_v3 = vld [vmem:[%s3174_s24 + $0x274] ss:$8 sps:$4 sm:$0xff]  }
  0x7b   : > { %2124 = vmatprep.subr.bf16.mxu0 %v2868_v4  ;;  %v2952_v4 = vld [vmem:[%s3174_s24 + $0x674] ss:$8 sps:$4 sm:$0xff]  }
  0x7d   : > { %1961 = vmatpush1.bf16.msra.mxu1 %v2863_v5  ;;  %v2947_v5 = vld [vmem:[%s3174_s24 + $0x270] ss:$8 sps:$4 sm:$0xff]  }
  0x7e   : > { %2125 = vmatpush1.bf16.msra.mxu0 %v2866_v6  ;;  %1962 = vmatprep.subr.bf16.mxu1 %v2871_v7  ;;  %v2950_v6 = vld [vmem:[%s3174_s24 + $0x670] ss:$8 sps:$4 sm:$0xff]   ;;  %v2955_v7 = vld [vmem:[%s3174_s24 + $0x284] ss:$8 sps:$4 sm:$0xff]  }
  0x7f   : > { %2126 = vmatprep.subr.bf16.mxu0 %v2874_v8  ;;  %v2958_v8 = vld [vmem:[%s3174_s24 + $0x684] ss:$8 sps:$4 sm:$0xff]  }
  0x81   : > { %1963 = vmatpush1.bf16.msra.mxu1 %v2869_v9  ;;  %v2953_v9 = vld [vmem:[%s3174_s24 + $0x280] ss:$8 sps:$4 sm:$0xff]  }
  0x82   : > { %2127 = vmatpush1.bf16.msra.mxu0 %v2872_v10  ;;  %1964 = vmatprep.subr.bf16.mxu1 %v2877_v11  ;;  %v2956_v10 = vld [vmem:[%s3174_s24 + $0x680] ss:$8 sps:$4 sm:$0xff]   ;;  %v2961_v11 = vld [vmem:[%s3174_s24 + $0x294] ss:$8 sps:$4 sm:$0xff]  }
  0x83   : > { %2128 = vmatprep.subr.bf16.mxu0 %v2880_v12  ;;  %v2964_v12 = vld [vmem:[%s3174_s24 + $0x694] ss:$8 sps:$4 sm:$0xff]  }
  0x85   : > { %1965 = vmatpush1.bf16.msra.mxu1 %v2875_v13  ;;  %v2959_v13 = vld [vmem:[%s3174_s24 + $0x290] ss:$8 sps:$4 sm:$0xff]  }
  0x86   : > { %2129 = vmatpush1.bf16.msra.mxu0 %v2878_v14  ;;  %1966 = vmatprep.subr.bf16.mxu1 %v2883_v15  ;;  %v2962_v14 = vld [vmem:[%s3174_s24 + $0x690] ss:$8 sps:$4 sm:$0xff]   ;;  %v2967_v15 = vld [vmem:[%s3174_s24 + $0x2a4] ss:$8 sps:$4 sm:$0xff]  }
  0x87   : > { %2130 = vmatprep.subr.bf16.mxu0 %v2886_v16  ;;  %v2970_v16 = vld [vmem:[%s3174_s24 + $0x6a4] ss:$8 sps:$4 sm:$0xff]  }
  0x89   : > { %1967 = vmatpush1.bf16.msra.mxu1 %v2881_v17  ;;  %v2965_v17 = vld [vmem:[%s3174_s24 + $0x2a0] ss:$8 sps:$4 sm:$0xff]  }
  0x8a   : > { %2131 = vmatpush1.bf16.msra.mxu0 %v2884_v18  ;;  %1968 = vmatprep.subr.bf16.mxu1 %v2889_v19  ;;  %v2968_v18 = vld [vmem:[%s3174_s24 + $0x6a0] ss:$8 sps:$4 sm:$0xff]   ;;  %v2973_v19 = vld [vmem:[%s3174_s24 + $0x2b4] ss:$8 sps:$4 sm:$0xff]  }
  0x8b   : > { %2132 = vmatprep.subr.bf16.mxu0 %v2892_v20  ;;  %v2976_v20 = vld [vmem:[%s3174_s24 + $0x6b4] ss:$8 sps:$4 sm:$0xff]  }
  0x8d   : > { %1969 = vmatpush1.bf16.msra.mxu1 %v2887_v23  ;;  %v2971_v23 = vld [vmem:[%s3174_s24 + $0x2b0] ss:$8 sps:$4 sm:$0xff]  }
  0x8e   : > { %2133 = vmatpush1.bf16.msra.mxu0 %v2890_v24  ;;  %1970 = vmatprep.subr.bf16.mxu1 %v2895_v25  ;;  %v2974_v24 = vld [vmem:[%s3174_s24 + $0x6b0] ss:$8 sps:$4 sm:$0xff]   ;;  %v2979_v25 = vld [vmem:[%s3174_s24 + $0x2c4] ss:$8 sps:$4 sm:$0xff]  }
  0x8f   : > { %2134 = vmatprep.subr.bf16.mxu0 %v2898_v26  ;;  %v2982_v26 = vld [vmem:[%s3174_s24 + $0x6c4] ss:$8 sps:$4 sm:$0xff]  }
  0x91   : > { %1971 = vmatpush1.bf16.msra.mxu1 %v2893_v27  ;;  %v2977_v27 = vld [vmem:[%s3174_s24 + $0x2c0] ss:$8 sps:$4 sm:$0xff]  }
  0x92   : > { %2135 = vmatpush1.bf16.msra.mxu0 %v2896_v28  ;;  %1972 = vmatprep.subr.bf16.mxu1 %v2901_v32  ;;  %v2980_v28 = vld [vmem:[%s3174_s24 + $0x6c0] ss:$8 sps:$4 sm:$0xff]   ;;  %v2985_v32 = vld [vmem:[%s3174_s24 + $0x2d4] ss:$8 sps:$4 sm:$0xff]  }
  0x93   : > { %2136 = vmatprep.subr.bf16.mxu0 %v2904_v33  ;;  %v2988_v33 = vld [vmem:[%s3174_s24 + $0x6d4] ss:$8 sps:$4 sm:$0xff]  }
  0x95   : > { %1973 = vmatpush1.bf16.msra.mxu1 %v2899_v35  ;;  %v2983_v35 = vld [vmem:[%s3174_s24 + $0x2d0] ss:$8 sps:$4 sm:$0xff]  }
  0x96   : > { %2137 = vmatpush1.bf16.msra.mxu0 %v2902_v36  ;;  %1983 = vmatprep.subr.bf16.mxu1 %v2907_v37  ;;  %v2986_v36 = vld [vmem:[%s3174_s24 + $0x6d0] ss:$8 sps:$4 sm:$0xff]   ;;  %v2991_v37 = vld [vmem:[%s3174_s24 + $0x2e4] ss:$8 sps:$4 sm:$0xff]  }
  0x97   : > { %2147 = vmatprep.subr.bf16.mxu0 %v2910_v38  ;;  %v2994_v38 = vld [vmem:[%s3174_s24 + $0x6e4] ss:$8 sps:$4 sm:$0xff]  }
  0x98   : > { %1975 = vmatmul.mubr.bf16.vlgmr.msra.gmra.mrb[0].mxu1 %v552_v39  ;;  %v2989_v39 = vld [vmem:[%s3174_s24 + $0x2e0] ss:$8 sps:$4 sm:$0xff]  }
  0x99   : > { %2139 = vmatmul.mubr.bf16.vlgmr.msra.gmra.mrb[0].mxu0 %v601_v40  ;;  %1984 = vmatpush1.bf16.msra.mxu1 %v2905_v41  ;;  %v2992_v40 = vld [vmem:[%s3174_s24 + $0x6e0] ss:$8 sps:$4 sm:$0xff]   ;;  %v2997_v41 = vld [vmem:[%s3174_s24 + $0x2f4] ss:$8 sps:$4 sm:$0xff]  }
  0x9a   : > { %2148 = vmatpush1.bf16.msra.mxu0 %v2908_v42  ;;  %1985 = vmatprep.subr.bf16.mxu1 %v2913_v43  ;;  %v3000_v42 = vld [vmem:[%s3174_s24 + $0x6f4] ss:$8 sps:$4 sm:$0xff]   ;;  %v2995_v43 = vld [vmem:[%s3174_s24 + $0x2f0] ss:$8 sps:$4 sm:$0xff]  }
  0x9b   : > { %2149 = vmatprep.subr.bf16.mxu0 %v2916_v45  ;;  %2015 = vmatprep.mubr.bf16.mxu1 %v3270_v29  ;;  %v2998_v45 = vld [vmem:[%s3174_s24 + $0x6f0] ss:$8 sps:$4 sm:$0xff]  }
  0x9c   : > { %2179 = vmatprep.mubr.bf16.mxu0 %v3273_v30 }
  0x9d   : > { %1986 = vmatpush1.bf16.msra.mxu1 %v2911_v21  ;;  %v3003_v21 = vld [vmem:[%s3174_s24 + $0x304] ss:$8 sps:$4 sm:$0xff]  }
  0x9e   : > { %2150 = vmatpush1.bf16.msra.mxu0 %v2914_v22  ;;  %1987 = vmatprep.subr.bf16.mxu1 %v2919_v46  ;;  %v3006_v22 = vld [vmem:[%s3174_s24 + $0x704] ss:$8 sps:$4 sm:$0xff]   ;;  %v3001_v46 = vld [vmem:[%s3174_s24 + $0x300] ss:$8 sps:$4 sm:$0xff]  }
  0x9f   : > { %2151 = vmatprep.subr.bf16.mxu0 %v2922_v47  ;;  %v3004_v47 = vld [vmem:[%s3174_s24 + $0x700] ss:$8 sps:$4 sm:$0xff]  }
  0xa1   : > { %1988 = vmatpush1.bf16.msra.mxu1 %v2917_v48  ;;  %v3009_v48 = vld [vmem:[%s3174_s24 + $0x314] ss:$8 sps:$4 sm:$0xff]  }
  0xa2   : > { %2152 = vmatpush1.bf16.msra.mxu0 %v2920_v49  ;;  %1989 = vmatprep.subr.bf16.mxu1 %v2925_v51  ;;  %v3012_v49 = vld [vmem:[%s3174_s24 + $0x714] ss:$8 sps:$4 sm:$0xff]   ;;  %v555_v51 = vcombine.high %v3270_v29, %v3270_v29  ;;  %v3015_v29 = vld [vmem:[%s3174_s24 + $0x324] ss:$8 sps:$4 sm:$0xff]  }
  0xa3   : > { %2153 = vmatprep.subr.bf16.mxu0 %v2928_v52  ;;  %v604_v52 = vcombine.high %v3273_v30, %v3273_v30  ;;  %v3013_v30 = vld [vmem:[%s3174_s24 + $0x320] ss:$8 sps:$4 sm:$0xff]  }
  0xa5   : > { %1990 = vmatpush1.bf16.msra.mxu1 %v2923_v53  ;;  %v3007_v53 = vld [vmem:[%s3174_s24 + $0x310] ss:$8 sps:$4 sm:$0xff]  }
  0xa6   : > { %2154 = vmatpush1.bf16.msra.mxu0 %v2926_v54  ;;  %1991 = vmatprep.subr.bf16.mxu1 %v2931_v55  ;;  %v3010_v54 = vld [vmem:[%s3174_s24 + $0x710] ss:$8 sps:$4 sm:$0xff]   ;;  %v3018_v55 = vld [vmem:[%s3174_s24 + $0x724] ss:$8 sps:$4 sm:$0xff]  }
  0xa7   : > { %2155 = vmatprep.subr.bf16.mxu0 %v2934_v56  ;;  %v3016_v56 = vld [vmem:[%s3174_s24 + $0x720] ss:$8 sps:$4 sm:$0xff]  }
  0xa9   : > { %1992 = vmatpush1.bf16.msra.mxu1 %v2929_v57  ;;  %v3021_v57 = vld [vmem:[%s3174_s24 + $0x334] ss:$8 sps:$4 sm:$0xff]  }
  0xaa   : > { %2156 = vmatpush1.bf16.msra.mxu0 %v2932_v58  ;;  %1993 = vmatprep.subr.bf16.mxu1 %v2937_v59  ;;  %v3024_v58 = vld [vmem:[%s3174_s24 + $0x734] ss:$8 sps:$4 sm:$0xff]   ;;  %v3019_v59 = vld [vmem:[%s3174_s24 + $0x330] ss:$8 sps:$4 sm:$0xff]  }
  0xab   : > { %2157 = vmatprep.subr.bf16.mxu0 %v2940_v60  ;;  %v3022_v60 = vld [vmem:[%s3174_s24 + $0x730] ss:$8 sps:$4 sm:$0xff]  }
  0xad   : > { %1994 = vmatpush1.bf16.msra.mxu1 %v2935_v61  ;;  %v3027_v61 = vld [vmem:[%s3174_s24 + $0x344] ss:$8 sps:$4 sm:$0xff]  }
  0xae   : > { %2158 = vmatpush1.bf16.msra.mxu0 %v2938_v62  ;;  %1995 = vmatprep.subr.bf16.mxu1 %v2943_v63  ;;  %v3030_v62 = vld [vmem:[%s3174_s24 + $0x744] ss:$8 sps:$4 sm:$0xff]   ;;  %v3025_v63 = vld [vmem:[%s3174_s24 + $0x340] ss:$8 sps:$4 sm:$0xff]  }
  0xaf   : > { %2159 = vmatprep.subr.bf16.mxu0 %v2946_v0  ;;  %v3028_v0 = vld [vmem:[%s3174_s24 + $0x740] ss:$8 sps:$4 sm:$0xff]  }
  0xb1   : > { %1996 = vmatpush1.bf16.msra.mxu1 %v2941_v1  ;;  %v3033_v1 = vld [vmem:[%s3174_s24 + $0x354] ss:$8 sps:$4 sm:$0xff]  }
  0xb2   : > { %2160 = vmatpush1.bf16.msra.mxu0 %v2944_v2  ;;  %1997 = vmatprep.subr.bf16.mxu1 %v2949_v3  ;;  %v3036_v2 = vld [vmem:[%s3174_s24 + $0x754] ss:$8 sps:$4 sm:$0xff]   ;;  %v3031_v3 = vld [vmem:[%s3174_s24 + $0x350] ss:$8 sps:$4 sm:$0xff]  }
  0xb3   : > { %2161 = vmatprep.subr.bf16.mxu0 %v2952_v4  ;;  %v3034_v4 = vld [vmem:[%s3174_s24 + $0x750] ss:$8 sps:$4 sm:$0xff]  }
  0xb5   : > { %1998 = vmatpush1.bf16.msra.mxu1 %v2947_v5  ;;  %v3039_v5 = vld [vmem:[%s3174_s24 + $0x364] ss:$8 sps:$4 sm:$0xff]  }
  0xb6   : > { %2162 = vmatpush1.bf16.msra.mxu0 %v2950_v6  ;;  %1999 = vmatprep.subr.bf16.mxu1 %v2955_v7  ;;  %v3042_v6 = vld [vmem:[%s3174_s24 + $0x764] ss:$8 sps:$4 sm:$0xff]   ;;  %v3037_v7 = vld [vmem:[%s3174_s24 + $0x360] ss:$8 sps:$4 sm:$0xff]  }
  0xb7   : > { %2163 = vmatprep.subr.bf16.mxu0 %v2958_v8  ;;  %v3040_v8 = vld [vmem:[%s3174_s24 + $0x760] ss:$8 sps:$4 sm:$0xff]  }
  0xb9   : > { %2000 = vmatpush1.bf16.msra.mxu1 %v2953_v9  ;;  %v3045_v9 = vld [vmem:[%s3174_s24 + $0x374] ss:$8 sps:$4 sm:$0xff]  }
  0xba   : > { %2164 = vmatpush1.bf16.msra.mxu0 %v2956_v10  ;;  %2001 = vmatprep.subr.bf16.mxu1 %v2961_v11  ;;  %v3048_v10 = vld [vmem:[%s3174_s24 + $0x774] ss:$8 sps:$4 sm:$0xff]   ;;  %v3043_v11 = vld [vmem:[%s3174_s24 + $0x370] ss:$8 sps:$4 sm:$0xff]  }
  0xbb   : > { %2165 = vmatprep.subr.bf16.mxu0 %v2964_v12  ;;  %v3046_v12 = vld [vmem:[%s3174_s24 + $0x770] ss:$8 sps:$4 sm:$0xff]  }
  0xbd   : > { %2002 = vmatpush1.bf16.msra.mxu1 %v2959_v13  ;;  %v3051_v13 = vld [vmem:[%s3174_s24 + $0x384] ss:$8 sps:$4 sm:$0xff]  }
  0xbe   : > { %2166 = vmatpush1.bf16.msra.mxu0 %v2962_v14  ;;  %2003 = vmatprep.subr.bf16.mxu1 %v2967_v15  ;;  %v3054_v14 = vld [vmem:[%s3174_s24 + $0x784] ss:$8 sps:$4 sm:$0xff]   ;;  %v3049_v15 = vld [vmem:[%s3174_s24 + $0x380] ss:$8 sps:$4 sm:$0xff]  }
  0xbf   : > { %2167 = vmatprep.subr.bf16.mxu0 %v2970_v16  ;;  %v3052_v16 = vld [vmem:[%s3174_s24 + $0x780] ss:$8 sps:$4 sm:$0xff]  }
  0xc1   : > { %2004 = vmatpush1.bf16.msra.mxu1 %v2965_v17  ;;  %v3057_v17 = vld [vmem:[%s3174_s24 + $0x394] ss:$8 sps:$4 sm:$0xff]  }
  0xc2   : > { %2168 = vmatpush1.bf16.msra.mxu0 %v2968_v18  ;;  %2005 = vmatprep.subr.bf16.mxu1 %v2973_v19  ;;  %v3060_v18 = vld [vmem:[%s3174_s24 + $0x794] ss:$8 sps:$4 sm:$0xff]   ;;  %v3055_v19 = vld [vmem:[%s3174_s24 + $0x390] ss:$8 sps:$4 sm:$0xff]  }
  0xc3   : > { %2169 = vmatprep.subr.bf16.mxu0 %v2976_v20  ;;  %v3058_v20 = vld [vmem:[%s3174_s24 + $0x790] ss:$8 sps:$4 sm:$0xff]  }
  0xc5   : > { %2006 = vmatpush1.bf16.msra.mxu1 %v2971_v23  ;;  %v3063_v23 = vld [vmem:[%s3174_s24 + $0x3a4] ss:$8 sps:$4 sm:$0xff]  }
  0xc6   : > { %2170 = vmatpush1.bf16.msra.mxu0 %v2974_v24  ;;  %2007 = vmatprep.subr.bf16.mxu1 %v2979_v25  ;;  %v3066_v24 = vld [vmem:[%s3174_s24 + $0x7a4] ss:$8 sps:$4 sm:$0xff]   ;;  %v3061_v25 = vld [vmem:[%s3174_s24 + $0x3a0] ss:$8 sps:$4 sm:$0xff]  }
  0xc7   : > { %2171 = vmatprep.subr.bf16.mxu0 %v2982_v26  ;;  %v3064_v26 = vld [vmem:[%s3174_s24 + $0x7a0] ss:$8 sps:$4 sm:$0xff]  }
  0xc9   : > { %2008 = vmatpush1.bf16.msra.mxu1 %v2977_v27  ;;  %v3069_v27 = vld [vmem:[%s3174_s24 + $0x3b4] ss:$8 sps:$4 sm:$0xff]  }
  0xca   : > { %2172 = vmatpush1.bf16.msra.mxu0 %v2980_v28  ;;  %2009 = vmatprep.subr.bf16.mxu1 %v2985_v32  ;;  %v3072_v28 = vld [vmem:[%s3174_s24 + $0x7b4] ss:$8 sps:$4 sm:$0xff]   ;;  %v3067_v32 = vld [vmem:[%s3174_s24 + $0x3b0] ss:$8 sps:$4 sm:$0xff]  }
  0xcb   : > { %2173 = vmatprep.subr.bf16.mxu0 %v2988_v33  ;;  %v3070_v33 = vld [vmem:[%s3174_s24 + $0x7b0] ss:$8 sps:$4 sm:$0xff]  }
  0xcd   : > { %2010 = vmatpush1.bf16.msra.mxu1 %v2983_v35  ;;  %v3075_v35 = vld [vmem:[%s3174_s24 + $0x3c4] ss:$8 sps:$4 sm:$0xff]  }
  0xce   : > { %2174 = vmatpush1.bf16.msra.mxu0 %v2986_v36  ;;  %2011 = vmatprep.subr.bf16.mxu1 %v2991_v37  ;;  %v3078_v36 = vld [vmem:[%s3174_s24 + $0x7c4] ss:$8 sps:$4 sm:$0xff]   ;;  %v3073_v37 = vld [vmem:[%s3174_s24 + $0x3c0] ss:$8 sps:$4 sm:$0xff]  }
  0xcf   : > { %2175 = vmatprep.subr.bf16.mxu0 %v2994_v38  ;;  %v3076_v38 = vld [vmem:[%s3174_s24 + $0x7c0] ss:$8 sps:$4 sm:$0xff]  }
  0xd1   : > { %2012 = vmatpush1.bf16.msra.mxu1 %v2989_v39  ;;  %v3081_v39 = vld [vmem:[%s3174_s24 + $0x3d4] ss:$8 sps:$4 sm:$0xff]  }
  0xd2   : > { %2176 = vmatpush1.bf16.msra.mxu0 %v2992_v40  ;;  %2013 = vmatprep.subr.bf16.mxu1 %v2997_v41  ;;  %v3084_v40 = vld [vmem:[%s3174_s24 + $0x7d4] ss:$8 sps:$4 sm:$0xff]   ;;  %v3079_v41 = vld [vmem:[%s3174_s24 + $0x3d0] ss:$8 sps:$4 sm:$0xff]  }
  0xd3   : > { %2177 = vmatprep.subr.bf16.mxu0 %v3000_v42  ;;  %v3082_v42 = vld [vmem:[%s3174_s24 + $0x7d0] ss:$8 sps:$4 sm:$0xff]  }
  0xd5   : > { %2014 = vmatpush1.bf16.msra.mxu1 %v2995_v43  ;;  %v3087_v43 = vld [vmem:[%s3174_s24 + $0x3e4] ss:$8 sps:$4 sm:$0xff]  }
  0xd6   : > { %2178 = vmatpush1.bf16.msra.mxu0 %v2998_v45  ;;  %2024 = vmatprep.subr.bf16.mxu1 %v3003_v21  ;;  %v3090_v45 = vld [vmem:[%s3174_s24 + $0x7e4] ss:$8 sps:$4 sm:$0xff]   ;;  %v3085_v21 = vld [vmem:[%s3174_s24 + $0x3e0] ss:$8 sps:$4 sm:$0xff]  }
  0xd7   : > { %2188 = vmatprep.subr.bf16.mxu0 %v3006_v22  ;;  %v3088_v22 = vld [vmem:[%s3174_s24 + $0x7e0] ss:$8 sps:$4 sm:$0xff]  }
  0xd8   : > { %2016 = vmatmul.mubr.bf16.vlgmr.msra.gmra.mrb[0].mxu1 %v3276_v31 }
  0xd9   : > { %2180 = vmatmul.mubr.bf16.vlgmr.msra.gmra.mrb[0].mxu0 %v3281_v34  ;;  %2025 = vmatpush1.bf16.msra.mxu1 %v3001_v46  ;;  %v3093_v46 = vld [vmem:[%s3174_s24 + $0x3f4] ss:$8 sps:$4 sm:$0xff]  }
  0xda   : > { %2189 = vmatpush1.bf16.msra.mxu0 %v3004_v47  ;;  %2026 = vmatprep.subr.bf16.mxu1 %v3009_v48  ;;  %v3096_v47 = vld [vmem:[%s3174_s24 + $0x7f4] ss:$8 sps:$4 sm:$0xff]   ;;  %v3091_v48 = vld [vmem:[%s3174_s24 + $0x3f0] ss:$8 sps:$4 sm:$0xff]  }
  0xdb   : > { %2190 = vmatprep.subr.bf16.mxu0 %v3012_v49  ;;  %2056 = vmatprep.mubr.bf16.mxu1 %v555_v51  ;;  %v3094_v49 = vld [vmem:[%s3174_s24 + $0x7f0] ss:$8 sps:$4 sm:$0xff]   ;;  %v553_v51 = vcombine.high %v3276_v31, %v3276_v31 }
  0xdc   : > { %2220 = vmatprep.mubr.bf16.mxu0 %v604_v52  ;;  %v602_v52 = vcombine.high %v3281_v34, %v3281_v34 }
  0xdd   : > { %2027 = vmatpush1.bf16.msra.mxu1 %v3007_v53  ;;  %v3123_v53 = vmov 1983009808  }
  0xde   : > { %2191 = vmatpush1.bf16.msra.mxu0 %v3010_v54  ;;  %2028 = vmatprep.subr.bf16.mxu1 %v3015_v29  ;;  %v2233_v54 = vunpack.c.l.s4 %v3123_v53 }
  0xdf   : > { %2192 = vmatprep.subr.bf16.mxu0 %v3018_v55 }
  0xe0   : > { %v2234_v29 = vunpack.c.0.s8 %v2233_v54 }
  0xe1   : > { %2029 = vmatpush1.bf16.msra.mxu1 %v3013_v30 }
  0xe2   : > { %2193 = vmatpush1.bf16.msra.mxu0 %v3016_v56  ;;  %2030 = vmatprep.subr.bf16.mxu1 %v3021_v57 }
  0xe3   : > { %2194 = vmatprep.subr.bf16.mxu0 %v3024_v58 }
  0xe5   : > { %2031 = vmatpush1.bf16.msra.mxu1 %v3019_v59 }
  0xe6   : > { %2195 = vmatpush1.bf16.msra.mxu0 %v3022_v60  ;;  %2032 = vmatprep.subr.bf16.mxu1 %v3027_v61  ;;  %v2237_v60 = vsub.s32 %v2234_v29, %v3216_v44 }
  0xe7   : > { %2196 = vmatprep.subr.bf16.mxu0 %v3030_v62 }
  0xe9   : > { %2033 = vmatpush1.bf16.msra.mxu1 %v3025_v63 }
  0xea   : > { %2197 = vmatpush1.bf16.msra.mxu0 %v3028_v0  ;;  %2034 = vmatprep.subr.bf16.mxu1 %v3033_v1  ;;  %v246_v0 = vld [vmem:[#allocation2] sm:$0xf] }
  0xeb   : > { %2198 = vmatprep.subr.bf16.mxu0 %v3036_v2 }
  0xed   : > { %2035 = vmatpush1.bf16.msra.mxu1 %v3031_v3  ;;  %v2247_v3 = vld [vmem:[%s3509_s2] sm:$0x3] (!%p2650_p7) }
  0xee   : > { %2199 = vmatpush1.bf16.msra.mxu0 %v3034_v4  ;;  %2036 = vmatprep.subr.bf16.mxu1 %v3039_v5  ;;  %v2251_v4 = vsub.s32 (!%p2650_p7), 0, %v3216_v44  ;;  %v2255_v5 = vsub.s32 (!%p2650_p7), 1, %v3216_v44 }
  0xef   : > { %2200 = vmatprep.subr.bf16.mxu0 %v3042_v6 }
  0xf0   : > { %v2252_v6 = vrot.slane (!%p2650_p7), %v2247_v3, %v2251_v4 }
  0xf1   : > { %2037 = vmatpush1.bf16.msra.mxu1 %v3037_v7  ;;  %v2256_v7 = vrot.slane (!%p2650_p7), %v2247_v3, %v2255_v5 }
  0xf2   : > { %2201 = vmatpush1.bf16.msra.mxu0 %v3040_v8  ;;  %2038 = vmatprep.subr.bf16.mxu1 %v3045_v9 }
  0xf3   : > { %2202 = vmatprep.subr.bf16.mxu0 %v3048_v10  ;;  %v2257_v8 = vcombine.low (!%p2650_p7), %v2252_v6, %v2256_v7 }
  0xf5   : > { %2039 = vmatpush1.bf16.msra.mxu1 %v3043_v11  ;;  %v2264_v10 = vrot.slane (!%p2650_p7), %v2257_v8, %v2237_v60 }
  0xf6   : > { %2203 = vmatpush1.bf16.msra.mxu0 %v3046_v12  ;;  %2040 = vmatprep.subr.bf16.mxu1 %v3051_v13 }
  0xf7   : > { %2204 = vmatprep.subr.bf16.mxu0 %v3054_v14 }
  0xf9   : > { %2041 = vmatpush1.bf16.msra.mxu1 %v3049_v15 }
  0xfa   : > { %2205 = vmatpush1.bf16.msra.mxu0 %v3052_v16  ;;  %2042 = vmatprep.subr.bf16.mxu1 %v3057_v17 }
  0xfb   : > { %2206 = vmatprep.subr.bf16.mxu0 %v3060_v18 }
  0xfd   : > { %2043 = vmatpush1.bf16.msra.mxu1 %v3055_v19 }
  0xfe   : > { %2207 = vmatpush1.bf16.msra.mxu0 %v3058_v20  ;;  %2044 = vmatprep.subr.bf16.mxu1 %v3063_v23 }
  0xff   : > { %2208 = vmatprep.subr.bf16.mxu0 %v3066_v24 }
 0x101   : > { %2045 = vmatpush1.bf16.msra.mxu1 %v3061_v25 }
 0x102   : > { %2209 = vmatpush1.bf16.msra.mxu0 %v3064_v26  ;;  %2046 = vmatprep.subr.bf16.mxu1 %v3069_v27 }
 0x103   : > { %2210 = vmatprep.subr.bf16.mxu0 %v3072_v28 }
 0x105   : > { %2047 = vmatpush1.bf16.msra.mxu1 %v3067_v32 }
 0x106   : > { %2211 = vmatpush1.bf16.msra.mxu0 %v3070_v33  ;;  %2048 = vmatprep.subr.bf16.mxu1 %v3075_v35 }
 0x107   : > { %2212 = vmatprep.subr.bf16.mxu0 %v3078_v36 }
 0x109   : > { %2049 = vmatpush1.bf16.msra.mxu1 %v3073_v37 }
 0x10a   : > { %2213 = vmatpush1.bf16.msra.mxu0 %v3076_v38  ;;  %2050 = vmatprep.subr.bf16.mxu1 %v3081_v39 }
 0x10b   : > { %2214 = vmatprep.subr.bf16.mxu0 %v3084_v40 }
 0x10d   : > { %2051 = vmatpush1.bf16.msra.mxu1 %v3079_v41 }
 0x10e   : > { %2215 = vmatpush1.bf16.msra.mxu0 %v3082_v42  ;;  %2052 = vmatprep.subr.bf16.mxu1 %v3087_v43 }
 0x10f   : > { %2216 = vmatprep.subr.bf16.mxu0 %v3090_v45 }
 0x111   : > { %2053 = vmatpush1.bf16.msra.mxu1 %v3085_v21 }
 0x112   : > { %2217 = vmatpush1.bf16.msra.mxu0 %v3088_v22  ;;  %2054 = vmatprep.subr.bf16.mxu1 %v3093_v46 }
 0x113   : > { %2218 = vmatprep.subr.bf16.mxu0 %v3096_v47 }
 0x115   : > { %2055 = vmatpush1.bf16.msra.mxu1 %v3091_v48 }
 0x116   : > { %2219 = vmatpush1.bf16.msra.mxu0 %v3094_v49 }
 0x118   : > { %2057 = vmatmul.mubr.bf16.vlgmr.msra.gmra.mrb[0].mxu1 %v553_v51 }
 0x119   : > { %2221 = vmatmul.mubr.bf16.vlgmr.msra.gmra.mrb[0].mxu0 %v602_v52 }
 0x1eb   : > { %v2058_v55 = vpop.f32.mrb[0].mxu1 }
 0x1ec   : > { %v2222_v30 = vpop.f32.mrb[0].mxu0  ;;  %v2060_v57 = vpop.f32.mrb[1].mxu1 }
 0x1ed   : > { %v2658_v56 = vadd.f32 %v2222_v30, %v2058_v55  ;;  %v2224_v58 = vpop.f32.mrb[1].mxu0  ;;  %v2062_v61 = vpop.f32.mrb[2].mxu1 }
 0x1ee   : > { %v2659_v59 = vadd.f32 %v2224_v58, %v2060_v57  ;;  %v2226_v31 = vpop.f32.mrb[2].mxu0  ;;  %v2063_v62 = vpop.f32.mrb[3].mxu1 }
 0x1ef   : > { %v2227_v63 = vpop.f32.mrb[3].mxu0 }
 0x1f0   : > { %v2231_v34 = vcombine.low %v2658_v56, %v2659_v59  ;;  %2245 = sbr.rel (%p2650_p7) target bundleno = 525 (0x20d), region = 40 }
 0x1f2   : > { %v2238_v1 = vrot.slane %v2231_v34, %v2237_v60 }
 0x1f4   : > { %v2240_v2 = vadd.f32 %v2238_v1, %v246_v0 }
 0x1f6   : > { %2241 = vst [vmem:[#allocation2] sm:$0xf] %v2240_v2 }
 0x1fd   : > { %v2246_v9 = vld [vmem:[#allocation2] sm:$0xf] }
 0x1fe   : > { %v2266_v11 = vadd.f32 %v2264_v10, %v2246_v9 }
 0x200   : > { %v2267_v12 = vmul.f32 0.1, %v2266_v11 }
 0x202   : > { %v2268_v13 = vmax.f32 %v2266_v11, %v2267_v12 }
 0x204   : > { %v2276_v14 = vrot.slane %v2268_v13, %v2237_v60 }
 0x206   : > { %v2277_v15 = vcombine.high %v2276_v14, %v2276_v14 }
 0x208   : > { %v2651_v16 = vpack.c.bf16 %v2277_v15, %v2276_v14 }
 0x20a   : > { %v2291_v17 = vrot.slane %v2651_v16, %v3224_v50 }
 0x20c   : > { %2652 = vst.sshfl [vmem:[%s3510_s3] sm:$0x5 pattern:$0x73625140] %v2291_v17 }
 0x20d PF: > { %s13_s14 = sadd.s32 1, %s3119_s14   ;;  %s3511_s12 = smov %s3115_s13 }
 0x20e   : > { %p10_p8 = scmp.ge.s32.totalorder %s13_s14, 6   ;;  %s3512_s13 = smov %s3514_s15 }
 0x210   :  { %12 = sbr.rel (!%p10_p8) target bundleno = 2 (0x2), region = 76 }

// kernel: yolo_forward.11
= control target key start
LH: loop header
LB: loop body
LE: loop exit
PB: predicated region body
PF: predicated region fallthrough
CT: control target
= control target key end

     0   :  { %8 = vsyncpa [#allocation5], 0  ;;  %s1730_s0 = inlined_call_operand.vmem [shape: bf16[2,256], index: 0, kind: input, shape index: {}]   ;;  %s1731_s1 = inlined_call_operand.vmem [shape: bf16[256,1536], index: 1, kind: input, shape index: {}]   ;;  %s1732_s2 = inlined_call_operand.vmem [shape: f32[1,1536], index: 2, kind: input, shape index: {}]   ;;  %s1733_s3 = inlined_call_operand.hbm [shape: f32[2,1536], index: 3, kind: output, shape index: {}]  }
   0x1   :  { %10 = vsyncpa [#allocation5 + $0x1], 0  ;;  %s1389_s12 = smov 0   ;;  %s1391_s13 = smov 0  }
   0x2   :  { %s1393_s14 = smov 0   ;;  %s1395_s15 = smov 0  }
   0x3   :  { %s1397_s16 = smov 0   ;;  %s1399_s17 = smov 0  }
   0x4 LB: > { %s1049_s18 = sadd.s32 4294967295, %s1364_s17   ;;  %s1050_s19 = sadd.s32 4294967294, %s1364_s17   ;;  %s1364_s17 = sphi %s1399_s17, %s16_s17   ;;  %s1360_s16 = sphi %s1397_s16, %s1740_s16   ;;  %s1356_s15 = sphi %s1395_s15, %s1739_s15   ;;  %s1352_s14 = sphi %s1393_s14, %s1738_s14   ;;  %s1348_s13 = sphi %s1391_s13, %s1737_s13   ;;  %s1344_s12 = sphi %s1389_s12, %s1736_s12  }
   0x5   : > { %s28_s20 = sadd.s32 1, %s1360_s16  ;;  %s63_s21 = sadd.s32 1, %s1352_s14 }
   0x6   : > { %p30_p0 = scmp.ge.s32.totalorder %s28_s20, 3  ;;  %p70_p1 = scmp.ne.s32.totalorder %s1352_s14, %s1348_s13 }
   0x7   : > { %p71_p2 = scmp.eq.s32.totalorder %s1364_s17, 0  ;;  %p126_p3 = scmp.eq.s32.totalorder %s1049_s18, 2 }
   0x8   : > { %s1742_s20 = smov (%p30_p0, %s28_s20), 0  ;;  %p131_p6 = scmp.ne.s32.totalorder %s1348_s13, %s1344_s12 }
   0x9   : > { %p72_p4 = por %p71_p2, %p70_p1  ;;  %p1428_p5 = por %p126_p3, %p70_p1 }
   0xa   : > { %s59_s23 = ssub.s32 %s1360_s16, %s1742_s20  ;;  %p132_p8 = scmp.eq.s32.totalorder %s1050_s19, 2 }
   0xb   : > { %p61_p7 = scmp.eq.s32.totalorder %s59_s23, 0  ;;  %p1053_p10 = scmp.ge.s32.totalorder %s1364_s17, 3 }
   0xc   : > { %p1439_p9 = por %p132_p8, %p131_p6 }
   0xd   : > { %s1437_s24 = scalar_select %p61_p7, %s1352_s14, %s63_s21  }
   0xe   : > { %156 = sbr.rel (%p1053_p10) target bundleno = 57 (0x39), region = 20 }
  0x15   : > { %159 = sbr.rel (!%p72_p4) target bundleno = 57 (0x39), region = 24  ;;  %s161_s26 = sand.u32 (%p72_p4), 1, %s1352_s14  }
  0x16   : > { %s1131_s27 = sshll.u32 (%p72_p4), %s1360_s16, 4  ;;  %s1054_s28 = sshll.u32 (%p72_p4), %s161_s26, 9 }
  0x17   : > { %s1449_s4 = scalar_lea.vmem (%p72_p4), %s1731_s1, %s1131_s27  ;;  %s1454_s5 = scalar_lea.vmem (%p72_p4), [#allocation3], %s1054_s28 }
  0x18   : > { %v182_v0 = vld [vmem:[%s1449_s4] sm:$0xff] (%p72_p4)  ;;  %v184_v1 = vld [vmem:[%s1449_s4 + $0x8] sm:$0xff] (%p72_p4)  ;;  %v186_v2 = vld [vmem:[%s1449_s4 + $0x30] sm:$0xff] (%p72_p4) }
  0x19   : > { %183 = vst [vmem:[%s1454_s5] sm:$0xff] (%p72_p4), %v182_v0  ;;  %185 = vst [vmem:[%s1454_s5 + $0x8] sm:$0xff] (%p72_p4), %v184_v1  ;;  %v188_v3 = vld [vmem:[%s1449_s4 + $0x38] sm:$0xff] (%p72_p4)  ;;  %v190_v4 = vld [vmem:[%s1449_s4 + $0x60] sm:$0xff] (%p72_p4) }
  0x1a   : > { %187 = vst [vmem:[%s1454_s5 + $0x10] sm:$0xff] (%p72_p4), %v186_v2  ;;  %v192_v5 = vld [vmem:[%s1449_s4 + $0x68] sm:$0xff] (%p72_p4)  ;;  %189 = vst [vmem:[%s1454_s5 + $0x18] sm:$0xff] (%p72_p4), %v188_v3  ;;  %v194_v6 = vld [vmem:[%s1449_s4 + $0x90] sm:$0xff] (%p72_p4) }
  0x1b   : > { %191 = vst [vmem:[%s1454_s5 + $0x20] sm:$0xff] (%p72_p4), %v190_v4  ;;  %193 = vst [vmem:[%s1454_s5 + $0x28] sm:$0xff] (%p72_p4), %v192_v5  ;;  %v196_v7 = vld [vmem:[%s1449_s4 + $0x98] sm:$0xff] (%p72_p4)  ;;  %v198_v8 = vld [vmem:[%s1449_s4 + $0xc0] sm:$0xff] (%p72_p4) }
  0x1c   : > { %195 = vst [vmem:[%s1454_s5 + $0x30] sm:$0xff] %v194_v6  ;;  %197 = vst [vmem:[%s1454_s5 + $0x38] sm:$0xff] %v196_v7  ;;  %v200_v9 = vld [vmem:[%s1449_s4 + $0xc8] sm:$0xff]  ;;  %v202_v10 = vld [vmem:[%s1449_s4 + $0xf0] sm:$0xff] }
  0x1d   : > { %199 = vst [vmem:[%s1454_s5 + $0x40] sm:$0xff] %v198_v8  ;;  %v204_v11 = vld [vmem:[%s1449_s4 + $0xf8] sm:$0xff]  ;;  %201 = vst [vmem:[%s1454_s5 + $0x48] sm:$0xff] %v200_v9  ;;  %v206_v12 = vld [vmem:[%s1449_s4 + $0x120] sm:$0xff] }
  0x1e   : > { %203 = vst [vmem:[%s1454_s5 + $0x50] sm:$0xff] %v202_v10  ;;  %205 = vst [vmem:[%s1454_s5 + $0x58] sm:$0xff] %v204_v11  ;;  %v208_v13 = vld [vmem:[%s1449_s4 + $0x128] sm:$0xff]  ;;  %v210_v14 = vld [vmem:[%s1449_s4 + $0x150] sm:$0xff] }
  0x1f   : > { %207 = vst [vmem:[%s1454_s5 + $0x60] sm:$0xff] %v206_v12  ;;  %209 = vst [vmem:[%s1454_s5 + $0x68] sm:$0xff] %v208_v13  ;;  %v212_v15 = vld [vmem:[%s1449_s4 + $0x158] sm:$0xff]  ;;  %v214_v16 = vld [vmem:[%s1449_s4 + $0x180] sm:$0xff] }
  0x20   : > { %211 = vst [vmem:[%s1454_s5 + $0x70] sm:$0xff] %v210_v14  ;;  %v216_v17 = vld [vmem:[%s1449_s4 + $0x188] sm:$0xff]  ;;  %213 = vst [vmem:[%s1454_s5 + $0x78] sm:$0xff] %v212_v15  ;;  %v218_v18 = vld [vmem:[%s1449_s4 + $0x1b0] sm:$0xff] }
  0x21   : > { %215 = vst [vmem:[%s1454_s5 + $0x80] sm:$0xff] %v214_v16  ;;  %217 = vst [vmem:[%s1454_s5 + $0x88] sm:$0xff] %v216_v17  ;;  %v220_v19 = vld [vmem:[%s1449_s4 + $0x1b8] sm:$0xff]  ;;  %v222_v20 = vld [vmem:[%s1449_s4 + $0x1e0] sm:$0xff] }
  0x22   : > { %219 = vst [vmem:[%s1454_s5 + $0x90] sm:$0xff] %v218_v18  ;;  %221 = vst [vmem:[%s1454_s5 + $0x98] sm:$0xff] %v220_v19  ;;  %v224_v21 = vld [vmem:[%s1449_s4 + $0x1e8] sm:$0xff]  ;;  %v226_v22 = vld [vmem:[%s1449_s4 + $0x210] sm:$0xff] }
  0x23   : > { %223 = vst [vmem:[%s1454_s5 + $0xa0] sm:$0xff] %v222_v20  ;;  %v228_v23 = vld [vmem:[%s1449_s4 + $0x218] sm:$0xff]  ;;  %225 = vst [vmem:[%s1454_s5 + $0xa8] sm:$0xff] %v224_v21  ;;  %v230_v24 = vld [vmem:[%s1449_s4 + $0x240] sm:$0xff] }
  0x24   : > { %227 = vst [vmem:[%s1454_s5 + $0xb0] sm:$0xff] %v226_v22  ;;  %229 = vst [vmem:[%s1454_s5 + $0xb8] sm:$0xff] %v228_v23  ;;  %v232_v25 = vld [vmem:[%s1449_s4 + $0x248] sm:$0xff]  ;;  %v234_v26 = vld [vmem:[%s1449_s4 + $0x270] sm:$0xff] }
  0x25   : > { %231 = vst [vmem:[%s1454_s5 + $0xc0] sm:$0xff] %v230_v24  ;;  %233 = vst [vmem:[%s1454_s5 + $0xc8] sm:$0xff] %v232_v25  ;;  %v236_v27 = vld [vmem:[%s1449_s4 + $0x278] sm:$0xff]  ;;  %v238_v28 = vld [vmem:[%s1449_s4 + $0x2a0] sm:$0xff] }
  0x26   : > { %235 = vst [vmem:[%s1454_s5 + $0xd0] sm:$0xff] %v234_v26  ;;  %v240_v29 = vld [vmem:[%s1449_s4 + $0x2a8] sm:$0xff]  ;;  %237 = vst [vmem:[%s1454_s5 + $0xd8] sm:$0xff] %v236_v27  ;;  %v242_v30 = vld [vmem:[%s1449_s4 + $0x2d0] sm:$0xff] }
  0x27   : > { %239 = vst [vmem:[%s1454_s5 + $0xe0] sm:$0xff] %v238_v28  ;;  %241 = vst [vmem:[%s1454_s5 + $0xe8] sm:$0xff] %v240_v29  ;;  %v244_v31 = vld [vmem:[%s1449_s4 + $0x2d8] sm:$0xff]  ;;  %v246_v32 = vld [vmem:[%s1449_s4 + $0x300] sm:$0xff] }
  0x28   : > { %243 = vst [vmem:[%s1454_s5 + $0xf0] sm:$0xff] %v242_v30  ;;  %245 = vst [vmem:[%s1454_s5 + $0xf8] sm:$0xff] %v244_v31  ;;  %v248_v33 = vld [vmem:[%s1449_s4 + $0x308] sm:$0xff]  ;;  %v250_v34 = vld [vmem:[%s1449_s4 + $0x330] sm:$0xff] }
  0x29   : > { %247 = vst [vmem:[%s1454_s5 + $0x100] sm:$0xff] %v246_v32  ;;  %v252_v35 = vld [vmem:[%s1449_s4 + $0x338] sm:$0xff]  ;;  %249 = vst [vmem:[%s1454_s5 + $0x108] sm:$0xff] %v248_v33  ;;  %v254_v36 = vld [vmem:[%s1449_s4 + $0x360] sm:$0xff] }
  0x2a   : > { %251 = vst [vmem:[%s1454_s5 + $0x110] sm:$0xff] %v250_v34  ;;  %253 = vst [vmem:[%s1454_s5 + $0x118] sm:$0xff] %v252_v35  ;;  %v256_v37 = vld [vmem:[%s1449_s4 + $0x368] sm:$0xff]  ;;  %v258_v38 = vld [vmem:[%s1449_s4 + $0x390] sm:$0xff] }
  0x2b   : > { %255 = vst [vmem:[%s1454_s5 + $0x120] sm:$0xff] %v254_v36  ;;  %257 = vst [vmem:[%s1454_s5 + $0x128] sm:$0xff] %v256_v37  ;;  %v260_v39 = vld [vmem:[%s1449_s4 + $0x398] sm:$0xff]  ;;  %v262_v40 = vld [vmem:[%s1449_s4 + $0x3c0] sm:$0xff] }
  0x2c   : > { %259 = vst [vmem:[%s1454_s5 + $0x130] sm:$0xff] %v258_v38  ;;  %v264_v41 = vld [vmem:[%s1449_s4 + $0x3c8] sm:$0xff]  ;;  %261 = vst [vmem:[%s1454_s5 + $0x138] sm:$0xff] %v260_v39  ;;  %v266_v42 = vld [vmem:[%s1449_s4 + $0x3f0] sm:$0xff] }
  0x2d   : > { %263 = vst [vmem:[%s1454_s5 + $0x140] sm:$0xff] %v262_v40  ;;  %265 = vst [vmem:[%s1454_s5 + $0x148] sm:$0xff] %v264_v41  ;;  %v268_v43 = vld [vmem:[%s1449_s4 + $0x3f8] sm:$0xff]  ;;  %v270_v44 = vld [vmem:[%s1449_s4 + $0x420] sm:$0xff] }
  0x2e   : > { %267 = vst [vmem:[%s1454_s5 + $0x150] sm:$0xff] %v266_v42  ;;  %269 = vst [vmem:[%s1454_s5 + $0x158] sm:$0xff] %v268_v43  ;;  %v272_v45 = vld [vmem:[%s1449_s4 + $0x428] sm:$0xff]  ;;  %v274_v46 = vld [vmem:[%s1449_s4 + $0x450] sm:$0xff] }
  0x2f   : > { %271 = vst [vmem:[%s1454_s5 + $0x160] sm:$0xff] %v270_v44  ;;  %v276_v47 = vld [vmem:[%s1449_s4 + $0x458] sm:$0xff]  ;;  %273 = vst [vmem:[%s1454_s5 + $0x168] sm:$0xff] %v272_v45  ;;  %v278_v48 = vld [vmem:[%s1449_s4 + $0x480] sm:$0xff] }
  0x30   : > { %275 = vst [vmem:[%s1454_s5 + $0x170] sm:$0xff] %v274_v46  ;;  %277 = vst [vmem:[%s1454_s5 + $0x178] sm:$0xff] %v276_v47  ;;  %v280_v49 = vld [vmem:[%s1449_s4 + $0x488] sm:$0xff]  ;;  %v282_v50 = vld [vmem:[%s1449_s4 + $0x4b0] sm:$0xff] }
  0x31   : > { %279 = vst [vmem:[%s1454_s5 + $0x180] sm:$0xff] %v278_v48  ;;  %281 = vst [vmem:[%s1454_s5 + $0x188] sm:$0xff] %v280_v49  ;;  %v284_v51 = vld [vmem:[%s1449_s4 + $0x4b8] sm:$0xff]  ;;  %v286_v52 = vld [vmem:[%s1449_s4 + $0x4e0] sm:$0xff] }
  0x32   : > { %283 = vst [vmem:[%s1454_s5 + $0x190] sm:$0xff] %v282_v50  ;;  %v288_v53 = vld [vmem:[%s1449_s4 + $0x4e8] sm:$0xff]  ;;  %285 = vst [vmem:[%s1454_s5 + $0x198] sm:$0xff] %v284_v51  ;;  %v290_v54 = vld [vmem:[%s1449_s4 + $0x510] sm:$0xff] }
  0x33   : > { %287 = vst [vmem:[%s1454_s5 + $0x1a0] sm:$0xff] %v286_v52  ;;  %289 = vst [vmem:[%s1454_s5 + $0x1a8] sm:$0xff] %v288_v53  ;;  %v292_v55 = vld [vmem:[%s1449_s4 + $0x518] sm:$0xff]  ;;  %v294_v56 = vld [vmem:[%s1449_s4 + $0x540] sm:$0xff] }
  0x34   : > { %291 = vst [vmem:[%s1454_s5 + $0x1b0] sm:$0xff] %v290_v54  ;;  %293 = vst [vmem:[%s1454_s5 + $0x1b8] sm:$0xff] %v292_v55  ;;  %v296_v57 = vld [vmem:[%s1449_s4 + $0x548] sm:$0xff]  ;;  %v298_v58 = vld [vmem:[%s1449_s4 + $0x570] sm:$0xff] }
  0x35   : > { %295 = vst [vmem:[%s1454_s5 + $0x1c0] sm:$0xff] %v294_v56  ;;  %v300_v59 = vld [vmem:[%s1449_s4 + $0x578] sm:$0xff]  ;;  %297 = vst [vmem:[%s1454_s5 + $0x1c8] sm:$0xff] %v296_v57  ;;  %v302_v60 = vld [vmem:[%s1449_s4 + $0x5a0] sm:$0xff] }
  0x36   : > { %299 = vst [vmem:[%s1454_s5 + $0x1d0] sm:$0xff] %v298_v58  ;;  %301 = vst [vmem:[%s1454_s5 + $0x1d8] sm:$0xff] %v300_v59  ;;  %v304_v61 = vld [vmem:[%s1449_s4 + $0x5a8] sm:$0xff]  ;;  %v306_v62 = vld [vmem:[%s1449_s4 + $0x5d0] sm:$0xff] }
  0x37   : > { %303 = vst [vmem:[%s1454_s5 + $0x1e0] sm:$0xff] %v302_v60  ;;  %305 = vst [vmem:[%s1454_s5 + $0x1e8] sm:$0xff] %v304_v61  ;;  %v308_v63 = vld [vmem:[%s1449_s4 + $0x5d8] sm:$0xff] }
  0x38   : > { %307 = vst [vmem:[%s1454_s5 + $0x1f0] sm:$0xff] %v306_v62  ;;  %309 = vst [vmem:[%s1454_s5 + $0x1f8] sm:$0xff] %v308_v63 }
  0x39 PF: > { %p1057_p11 = scmp.ge.s32.totalorder %s1364_s17, 1  ;;  %p322_p12 = scmp.lt.s32.totalorder %s1364_s17, 4 }
  0x3b   : > { %p323_p13 = pnand %p1057_p11, %p322_p12 }
  0x3c   : > { %s1584_s6 = sand.u32 (!%p323_p13), 1, %s1348_s13   ;;  %v1589_v0 = vld.sshfl [vmem:[%s1730_s0] sm:$0x11 pattern:$0x75316420] (!%p323_p13)  ;;  %v456_v1 = vlaneseq (!%p323_p13)  ;;  %s1060_s11 = sshll.u32 (!%p323_p13), %s1356_s15, 2 }
  0x3d   : > { %326 = sbr.rel (%p323_p13) target bundleno = 363 (0x16b), region = 51  ;;  %s1058_s9 = sshll.u32 (!%p323_p13), %s1584_s6, 9  ;;  %v1366_v2 = vmov (!%p323_p13), 1966171168   ;;  %v452_v7 = vcombine.high (!%p323_p13), %v1589_v0, %v1589_v0 }
  0x3e   : > { %v454_v3 = vunpack.c.l.s4 (!%p323_p13), %v1366_v2  ;;  %v1592_v4 = vshrl.u32 (!%p323_p13), %v456_v1, 7  ;;  %s1594_s10 = scalar_lea.vmem (!%p323_p13), [#allocation3], %s1058_s9  ;;  %p368_p0 = scmp.lt.s32.totalorder (!%p323_p13), %s1060_s11, 11 }
  0x3f   : > { %v1190_v5 = vld [vmem:[%s1594_s10 + $0x4] ss:$16 sps:$4 sm:$0xff] (!%p323_p13)   ;;  %v1192_v6 = vld [vmem:[%s1594_s10 + $0xc] ss:$16 sps:$4 sm:$0xff] (!%p323_p13)   ;;  %v1194_v9 = vld [vmem:[%s1594_s10] ss:$16 sps:$4 sm:$0xff] (!%p323_p13)  }
  0x40   : > { %v455_v8 = vunpack.c.0.s8 (!%p323_p13), %v454_v3  ;;  %789 = vmatprep.subr.bf16.mxu0 (!%p323_p13), %v1190_v5  ;;  %v1195_v10 = vld [vmem:[%s1594_s10 + $0x8] ss:$16 sps:$4 sm:$0xff] (!%p323_p13)   ;;  %830 = vmatprep.subr.bf16.mxu1 (!%p323_p13), %v1192_v6  ;;  %v1196_v11 = vld [vmem:[%s1594_s10 + $0x24] ss:$16 sps:$4 sm:$0xff] (!%p323_p13)   ;;  %v1198_v13 = vld [vmem:[%s1594_s10 + $0x2c] ss:$16 sps:$4 sm:$0xff] (!%p323_p13)  }
  0x41   : > { %790 = vmatpush1.bf16.msra.mxu0 (!%p323_p13), %v1194_v9  ;;  %831 = vmatpush1.bf16.msra.mxu1 (!%p323_p13), %v1195_v10  ;;  %v1200_v14 = vld [vmem:[%s1594_s10 + $0x20] ss:$16 sps:$4 sm:$0xff] (!%p323_p13)   ;;  %v1201_v15 = vld [vmem:[%s1594_s10 + $0x28] ss:$16 sps:$4 sm:$0xff] (!%p323_p13)   ;;  %v1202_v17 = vld [vmem:[%s1594_s10 + $0x44] ss:$16 sps:$4 sm:$0xff] (!%p323_p13)  }
  0x42   : > { %v1604_v12 = vsub.s32 (!%p323_p13), %v455_v8, %v1592_v4  ;;  %791 = vmatprep.subr.bf16.mxu0 (!%p323_p13), %v1196_v11  ;;  %832 = vmatprep.subr.bf16.mxu1 (!%p323_p13), %v1198_v13  ;;  %v1204_v18 = vld [vmem:[%s1594_s10 + $0x4c] ss:$16 sps:$4 sm:$0xff] (!%p323_p13)   ;;  %v1206_v19 = vld [vmem:[%s1594_s10 + $0x40] ss:$16 sps:$4 sm:$0xff] (!%p323_p13)   ;;  %v1207_v20 = vld [vmem:[%s1594_s10 + $0x48] ss:$16 sps:$4 sm:$0xff] (!%p323_p13)  }
  0x43   : > { %v1208_v21 = vld [vmem:[%s1594_s10 + $0x64] ss:$16 sps:$4 sm:$0xff] (!%p323_p13)   ;;  %v1210_v22 = vld [vmem:[%s1594_s10 + $0x6c] ss:$16 sps:$4 sm:$0xff] (!%p323_p13)   ;;  %v1212_v23 = vld [vmem:[%s1594_s10 + $0x60] ss:$16 sps:$4 sm:$0xff] (!%p323_p13)  }
  0x44   : > { %v466_v16 = vrot.slane %v452_v7, %v1604_v12  ;;  %v1213_v24 = vld [vmem:[%s1594_s10 + $0x68] ss:$16 sps:$4 sm:$0xff]   ;;  %v1214_v25 = vld [vmem:[%s1594_s10 + $0x84] ss:$16 sps:$4 sm:$0xff]   ;;  %v1216_v26 = vld [vmem:[%s1594_s10 + $0x8c] ss:$16 sps:$4 sm:$0xff]   ;;  %v459_v11 = vrot.slane %v1589_v0, %v1604_v12 }
  0x45   : > { %792 = vmatpush1.bf16.msra.mxu0 %v1200_v14  ;;  %833 = vmatpush1.bf16.msra.mxu1 %v1201_v15  ;;  %v1218_v27 = vld [vmem:[%s1594_s10 + $0x80] ss:$16 sps:$4 sm:$0xff]   ;;  %v1219_v28 = vld [vmem:[%s1594_s10 + $0x88] ss:$16 sps:$4 sm:$0xff]   ;;  %v1220_v29 = vld [vmem:[%s1594_s10 + $0xa4] ss:$16 sps:$4 sm:$0xff]  }
  0x46   : > { %821 = vmatprep.mubr.bf16.mxu0 %v466_v16  ;;  %862 = vmatprep.mubr.bf16.mxu1 %v466_v16  ;;  %v1222_v30 = vld [vmem:[%s1594_s10 + $0xac] ss:$16 sps:$4 sm:$0xff]   ;;  %v1224_v31 = vld [vmem:[%s1594_s10 + $0xa0] ss:$16 sps:$4 sm:$0xff]   ;;  %v1225_v32 = vld [vmem:[%s1594_s10 + $0xa8] ss:$16 sps:$4 sm:$0xff]  }
  0x47   : > { %793 = vmatprep.subr.bf16.mxu0 %v1202_v17  ;;  %834 = vmatprep.subr.bf16.mxu1 %v1204_v18  ;;  %v1226_v33 = vld [vmem:[%s1594_s10 + $0xc4] ss:$16 sps:$4 sm:$0xff]   ;;  %v1228_v34 = vld [vmem:[%s1594_s10 + $0xcc] ss:$16 sps:$4 sm:$0xff]   ;;  %v1230_v35 = vld [vmem:[%s1594_s10 + $0xc0] ss:$16 sps:$4 sm:$0xff]  }
  0x48   : > { %v1231_v36 = vld [vmem:[%s1594_s10 + $0xc8] ss:$16 sps:$4 sm:$0xff]   ;;  %v1232_v37 = vld [vmem:[%s1594_s10 + $0xe4] ss:$16 sps:$4 sm:$0xff]   ;;  %v1234_v38 = vld [vmem:[%s1594_s10 + $0xec] ss:$16 sps:$4 sm:$0xff]  }
  0x49   : > { %794 = vmatpush1.bf16.msra.mxu0 %v1206_v19  ;;  %835 = vmatpush1.bf16.msra.mxu1 %v1207_v20  ;;  %v1236_v39 = vld [vmem:[%s1594_s10 + $0xe0] ss:$16 sps:$4 sm:$0xff]   ;;  %v1237_v40 = vld [vmem:[%s1594_s10 + $0xe8] ss:$16 sps:$4 sm:$0xff]   ;;  %v1238_v41 = vld [vmem:[%s1594_s10 + $0x104] ss:$16 sps:$4 sm:$0xff]  }
  0x4a   : > { %795 = vmatprep.subr.bf16.mxu0 %v1208_v21  ;;  %836 = vmatprep.subr.bf16.mxu1 %v1210_v22  ;;  %v1240_v42 = vld [vmem:[%s1594_s10 + $0x10c] ss:$16 sps:$4 sm:$0xff]   ;;  %v1242_v43 = vld [vmem:[%s1594_s10 + $0x100] ss:$16 sps:$4 sm:$0xff]   ;;  %v1243_v44 = vld [vmem:[%s1594_s10 + $0x108] ss:$16 sps:$4 sm:$0xff]  }
  0x4b   : > { %v1244_v45 = vld [vmem:[%s1594_s10 + $0x124] ss:$16 sps:$4 sm:$0xff]   ;;  %v1246_v46 = vld [vmem:[%s1594_s10 + $0x12c] ss:$16 sps:$4 sm:$0xff]   ;;  %v1248_v47 = vld [vmem:[%s1594_s10 + $0x120] ss:$16 sps:$4 sm:$0xff]  }
  0x4c   : > { %v1249_v48 = vld [vmem:[%s1594_s10 + $0x128] ss:$16 sps:$4 sm:$0xff]   ;;  %v1250_v49 = vld [vmem:[%s1594_s10 + $0x144] ss:$16 sps:$4 sm:$0xff]   ;;  %v1252_v50 = vld [vmem:[%s1594_s10 + $0x14c] ss:$16 sps:$4 sm:$0xff]  }
  0x4d   : > { %796 = vmatpush1.bf16.msra.mxu0 %v1212_v23  ;;  %837 = vmatpush1.bf16.msra.mxu1 %v1213_v24  ;;  %v1254_v51 = vld [vmem:[%s1594_s10 + $0x140] ss:$16 sps:$4 sm:$0xff]   ;;  %v1255_v52 = vld [vmem:[%s1594_s10 + $0x148] ss:$16 sps:$4 sm:$0xff]   ;;  %v1256_v53 = vld [vmem:[%s1594_s10 + $0x164] ss:$16 sps:$4 sm:$0xff]  }
  0x4e   : > { %797 = vmatprep.subr.bf16.mxu0 %v1214_v25  ;;  %838 = vmatprep.subr.bf16.mxu1 %v1216_v26  ;;  %v1258_v54 = vld [vmem:[%s1594_s10 + $0x16c] ss:$16 sps:$4 sm:$0xff]   ;;  %v1260_v55 = vld [vmem:[%s1594_s10 + $0x160] ss:$16 sps:$4 sm:$0xff]   ;;  %v1261_v56 = vld [vmem:[%s1594_s10 + $0x168] ss:$16 sps:$4 sm:$0xff]  }
  0x4f   : > { %v1262_v57 = vld [vmem:[%s1594_s10 + $0x184] ss:$16 sps:$4 sm:$0xff]   ;;  %v1264_v58 = vld [vmem:[%s1594_s10 + $0x18c] ss:$16 sps:$4 sm:$0xff]   ;;  %v1266_v59 = vld [vmem:[%s1594_s10 + $0x180] ss:$16 sps:$4 sm:$0xff]  }
  0x50   : > { %v1267_v60 = vld [vmem:[%s1594_s10 + $0x188] ss:$16 sps:$4 sm:$0xff]   ;;  %v1268_v61 = vld [vmem:[%s1594_s10 + $0x1a4] ss:$16 sps:$4 sm:$0xff]   ;;  %v1270_v62 = vld [vmem:[%s1594_s10 + $0x1ac] ss:$16 sps:$4 sm:$0xff]  }
  0x51   : > { %798 = vmatpush1.bf16.msra.mxu0 %v1218_v27  ;;  %839 = vmatpush1.bf16.msra.mxu1 %v1219_v28  ;;  %v1272_v63 = vld [vmem:[%s1594_s10 + $0x1a0] ss:$16 sps:$4 sm:$0xff]   ;;  %v1273_v1 = vld [vmem:[%s1594_s10 + $0x1a8] ss:$16 sps:$4 sm:$0xff]   ;;  %v1274_v2 = vld [vmem:[%s1594_s10 + $0x1c4] ss:$16 sps:$4 sm:$0xff]  }
  0x52   : > { %799 = vmatprep.subr.bf16.mxu0 %v1220_v29  ;;  %840 = vmatprep.subr.bf16.mxu1 %v1222_v30  ;;  %v1276_v3 = vld [vmem:[%s1594_s10 + $0x1cc] ss:$16 sps:$4 sm:$0xff]   ;;  %v1278_v5 = vld [vmem:[%s1594_s10 + $0x1c0] ss:$16 sps:$4 sm:$0xff]   ;;  %v1279_v6 = vld [vmem:[%s1594_s10 + $0x1c8] ss:$16 sps:$4 sm:$0xff]  }
  0x53   : > { %v1280_v7 = vld [vmem:[%s1594_s10 + $0x1e4] ss:$16 sps:$4 sm:$0xff]   ;;  %v1282_v8 = vld [vmem:[%s1594_s10 + $0x1ec] ss:$16 sps:$4 sm:$0xff]   ;;  %v1284_v9 = vld [vmem:[%s1594_s10 + $0x1e0] ss:$16 sps:$4 sm:$0xff]  }
  0x54   : > { %v1285_v10 = vld [vmem:[%s1594_s10 + $0x1e8] ss:$16 sps:$4 sm:$0xff]   ;;  %s1744_s11 = smov (!%p368_p0, %s1060_s11), 11  ;;  %v1367_v13 = vmov 1983009808   ;;  %v903_v15 = vsub.s32 0, %v1592_v4 }
  0x55   : > { %800 = vmatpush1.bf16.msra.mxu0 %v1224_v31  ;;  %841 = vmatpush1.bf16.msra.mxu1 %v1225_v32  ;;  %s370_s21 = scalar_lea.vmem %s1732_s2, %s1744_s11  ;;  %v878_v14 = vunpack.c.l.s4 %v1367_v13  ;;  %v907_v16 = vsub.s32 1, %v1592_v4  ;;  %v911_v0 = vsub.s32 2, %v1592_v4  ;;  %v915_v12 = vsub.s32 3, %v1592_v4  ;;  %s1059_s23 = sshll.u32 %s1584_s6, 3 }
  0x56   : > { %801 = vmatprep.subr.bf16.mxu0 %v1226_v33  ;;  %842 = vmatprep.subr.bf16.mxu1 %v1228_v34  ;;  %v899_v17 = vld [vmem:[%s370_s21] sm:$0xf]  ;;  %s1132_s26 = sshll.u32 %s1356_s15, 7  ;;  %s359_s27 = scalar_lea.vmem [#allocation4], %s1059_s23 }
  0x57   : > { %v879_v18 = vunpack.c.0.s8 %v878_v14  ;;  %v904_v19 = vrot.slane %v899_v17, %v903_v15  ;;  %v908_v20 = vrot.slane %v899_v17, %v907_v16  ;;  %v912_v21 = vrot.slane %v899_v17, %v911_v0  ;;  %s952_s28 = sshll.u32 %s359_s27, 4  ;;  %s1682_s4 = scalar_lea.hbm %s1733_s3, %s1132_s26  ;;  %s1684_s28 = int_to_ptr.vmem [resolvable:$true] %s952_s28 }
  0x58   : > { %v916_v22 = vrot.slane %v899_v17, %v915_v12  ;;  %s938_s5 = scalar_lea.sflag [#allocation5], %s1584_s6  ;;  %s1286_s7 = scalar_lea.vmem %s1684_s28, 128 }
  0x59   : > { %802 = vmatpush1.bf16.msra.mxu0 %v1230_v35  ;;  %843 = vmatpush1.bf16.msra.mxu1 %v1231_v36  ;;  %v882_v23 = vsub.s32 %v879_v18, %v1592_v4  ;;  %v917_v24 = vcombine.low %v904_v19, %v908_v20  ;;  %p1287_p1 = scmp.ne.s32.totalorder %s1684_s28, %s1286_s7  ;;  %s1368_s15 = smov [#allocation4]  }
  0x5a   : > { %803 = vmatprep.subr.bf16.mxu0 %v1232_v37  ;;  %844 = vmatprep.subr.bf16.mxu1 %v1234_v38  ;;  %v918_v25 = vcombine.low %v912_v21, %v916_v22  ;;  %s1290_s8 = sshll.u32 %s1368_s15, 4  ;;  %s1291_s8 = int_to_ptr.vmem [resolvable:$false] %s1290_s8 }
  0x5b   : > { %v925_v28 = vrot.slane %v917_v24, %v882_v23  ;;  %p1288_p2 = pnand %p1287_p1, %p1428_p5  ;;  %s1292_s9 = scalar_lea.vmem %s1291_s8, 256 }
  0x5c   : > { %v932_v29 = vrot.slane %v918_v25, %v882_v23  ;;  %p1293_p4 = scmp.lt.s32.totalorder %s1684_s28, %s1291_s8  ;;  %p1294_p6 = scmp.lt.s32.totalorder %s1292_s9, %s1286_s7 }
  0x5d   : > { %804 = vmatpush1.bf16.msra.mxu0 %v1236_v39  ;;  %845 = vmatpush1.bf16.msra.mxu1 %v1237_v40  ;;  %p1289_p3 = pneg %p1288_p2 }
  0x5e   : > { %805 = vmatprep.subr.bf16.mxu0 %v1238_v41  ;;  %846 = vmatprep.subr.bf16.mxu1 %v1240_v42  ;;  %v933_v39 = vcombine.low %v925_v28, %v932_v29  ;;  %p1295_p7 = por %p1294_p6, %p1293_p4 }
  0x60   : > { %p1296_p8 = pnand %p1295_p7, %p1289_p3 }
  0x61   : > { %806 = vmatpush1.bf16.msra.mxu0 %v1242_v43  ;;  %847 = vmatpush1.bf16.msra.mxu1 %v1243_v44 }
  0x62   : > { %807 = vmatprep.subr.bf16.mxu0 %v1244_v45  ;;  %848 = vmatprep.subr.bf16.mxu1 %v1246_v46 }
  0x65   : > { %808 = vmatpush1.bf16.msra.mxu0 %v1248_v47  ;;  %849 = vmatpush1.bf16.msra.mxu1 %v1249_v48 }
  0x66   : > { %809 = vmatprep.subr.bf16.mxu0 %v1250_v49  ;;  %850 = vmatprep.subr.bf16.mxu1 %v1252_v50 }
  0x69   : > { %810 = vmatpush1.bf16.msra.mxu0 %v1254_v51  ;;  %851 = vmatpush1.bf16.msra.mxu1 %v1255_v52 }
  0x6a   : > { %811 = vmatprep.subr.bf16.mxu0 %v1256_v53  ;;  %852 = vmatprep.subr.bf16.mxu1 %v1258_v54 }
  0x6d   : > { %812 = vmatpush1.bf16.msra.mxu0 %v1260_v55  ;;  %853 = vmatpush1.bf16.msra.mxu1 %v1261_v56 }
  0x6e   : > { %813 = vmatprep.subr.bf16.mxu0 %v1262_v57  ;;  %854 = vmatprep.subr.bf16.mxu1 %v1264_v58 }
  0x71   : > { %814 = vmatpush1.bf16.msra.mxu0 %v1266_v59  ;;  %855 = vmatpush1.bf16.msra.mxu1 %v1267_v60 }
  0x72   : > { %815 = vmatprep.subr.bf16.mxu0 %v1268_v61  ;;  %856 = vmatprep.subr.bf16.mxu1 %v1270_v62 }
  0x75   : > { %816 = vmatpush1.bf16.msra.mxu0 %v1272_v63  ;;  %857 = vmatpush1.bf16.msra.mxu1 %v1273_v1 }
  0x76   : > { %817 = vmatprep.subr.bf16.mxu0 %v1274_v2  ;;  %858 = vmatprep.subr.bf16.mxu1 %v1276_v3 }
  0x79   : > { %818 = vmatpush1.bf16.msra.mxu0 %v1278_v5  ;;  %859 = vmatpush1.bf16.msra.mxu1 %v1279_v6 }
  0x7a   : > { %819 = vmatprep.subr.bf16.mxu0 %v1280_v7  ;;  %860 = vmatprep.subr.bf16.mxu1 %v1282_v8 }
  0x7d   : > { %820 = vmatpush1.bf16.msra.mxu0 %v1284_v9  ;;  %861 = vmatpush1.bf16.msra.mxu1 %v1285_v10 }
  0x80   : > { %822 = vmatmul.mubr.bf16.vlgmr.msra.gmra.mrb[0].mxu0 %v459_v11  ;;  %863 = vmatmul.mubr.bf16.vlgmr.msra.gmra.mrb[0].mxu1 %v459_v11 }
 0x153   : > { %v823_v26 = vpop.f32.mrb[0].mxu0  ;;  %v864_v27 = vpop.f32.mrb[0].mxu1 }
 0x154   : > { %v825_v30 = vpop.f32.mrb[1].mxu0  ;;  %v866_v31 = vpop.f32.mrb[1].mxu1 }
 0x155   : > { %v875_v32 = vcombine.low %v823_v26, %v825_v30  ;;  %v876_v33 = vcombine.low %v864_v27, %v866_v31  ;;  %v827_v34 = vpop.f32.mrb[2].mxu0  ;;  %v868_v35 = vpop.f32.mrb[2].mxu1 }
 0x156   : > { %v828_v36 = vpop.f32.mrb[3].mxu0  ;;  %v869_v37 = vpop.f32.mrb[3].mxu1 }
 0x157   : > { %v883_v38 = vrot.slane %v875_v32, %v882_v23  ;;  %v890_v4 = vrot.slane %v876_v33, %v882_v23 }
 0x159   : > { %v891_v40 = vcombine.low %v883_v38, %v890_v4 }
 0x15b   : > { %v935_v41 = vadd.f32 %v933_v39, %v891_v40 }
 0x15d   : > { %936 = vst [vmem:[%s359_s27] sm:$0xff] %v935_v41 }
 0x15e   : > { %1299 = shalt.err (!%p1296_p8)
}
 0x15f   : > { %s1300_s6 = scalar_lea.hbm %s1682_s4, 128  ;;  %s1304_s18 = scalar_lea.hbm %s1733_s3, 384 }
 0x160   : > { %p1301_p10 = scmp.ne.s32.totalorder %s1682_s4, %s1300_s6  ;;  %p1305_p13 = scmp.lt.u32.totalorder %s1682_s4, %s1733_s3 }
 0x161   : > { %p1306_p0 = scmp.lt.u32.totalorder %s1304_s18, %s1300_s6  ;;  %p1308_p2 = scmp.lt.u32.totalorder %s1300_s6, %s1682_s4 }
 0x162   : > { %p1302_p11 = pnand %p1301_p10, %p1428_p5 }
 0x163   : > { %p1307_p1 = por %p1306_p0, %p1305_p13 }
 0x164   : > { %p1303_p12 = pneg %p1302_p11 }
 0x165   : > { %p1309_p3 = por %p1308_p2, %p1307_p1 }
 0x167   : > { %p1310_p4 = pnand %p1309_p3, %p1303_p12 }
 0x169   : > { %1313 = shalt.err (!%p1310_p4)
}
 0x16a   : > { %1133 = dma.vmem_to_hbm [thread:$0]  (%p1428_p5), %s1684_s28, 128, %s1682_s4, %s938_s5  }
 0x16b PF: > { %p1139_p6 = scmp.ge.s32.totalorder %s1364_s17, 2  ;;  %s964_s23 = sand.u32 1, %s1344_s12  }
 0x16c   : > { %s965_s26 = scalar_lea.sflag [#allocation5], %s964_s23 }
 0x16d   : > { %p1136_p7 = pnand %p1139_p6, %p1439_p9 }
 0x16f   : > { %1339 = dma.done.wait (!%p1136_p7), %s965_s26, 128  }
 0x170   : > { %1341 = vsyncadd (!%p1136_p7), %s965_s26, 4294967168  ;;  %s16_s17 = sadd.s32 1, %s1364_s17   ;;  %s1736_s12 = smov %s1348_s13 }
 0x171   : > { %p13_p8 = scmp.ge.s32.totalorder %s16_s17, 5   ;;  %s1737_s13 = smov %s1352_s14 }
 0x172   : > { %s1738_s14 = smov %s1437_s24  ;;  %s1739_s15 = smov %s1360_s16 }
 0x173   : > { %s1740_s16 = smov %s1742_s20  ;;  %15 = sbr.rel (!%p13_p8) target bundleno = 4 (0x4), region = 109 }
 0x17a   :  { %970 = vsyncpa [#allocation5], 1 }
 0x17b   :  { %972 = vsyncpa [#allocation5 + $0x1], 1 }

</bundles_post_ra>
